<compile_context>
chip_gen: v7x
topology: tpu7x:2x2x1
jax: 0.10.0
libtpu: 0.0.40
codegen_flags: <defaults>
</compile_context>

<pallas_src>
import jax
import jax.numpy as jnp
from jax.experimental import pallas as pl
from jax.experimental.pallas import tpu as pltpu

LN_EPS = 1e-5


# ------------------------------ fused Pallas kernel ------------------------------

def _make_bottleneck_kernel(H, W, C, P):
    M = H * W
    inv_w = 1.0 / float(W)

    def kernel(x_ref, w1_ref, ws_ref, w2_ref, w3_ref,
               g_ref, gt_ref, sc_ref, bi_ref, msk_ref, o_ref):

        def ln_relu(x, stage):
            # Group sum over the W axis (= 16 consecutive rows of the channels-last
            # layout) via (H, M) @ (M, Cx), broadcast back with (M, H) @ (H, Cx):
            # two tiny MXU matmuls instead of a sublane-segment reduction.
            gsum = jnp.dot(gt_ref[...], x, preferred_element_type=jnp.float32)        # (H, Cx)
            mean = jnp.dot(g_ref[...], gsum, preferred_element_type=jnp.float32) * inv_w
            d = x - mean
            vsum = jnp.dot(gt_ref[...], d * d, preferred_element_type=jnp.float32)
            var = jnp.dot(g_ref[...], vsum, preferred_element_type=jnp.float32) * inv_w
            y = d * jax.lax.rsqrt(var + LN_EPS)
            y = y * sc_ref[stage] + bi_ref[stage]   # per-row affine: gamma[w], beta[w]
            return jnp.maximum(y, 0.0)

        x = x_ref[...]                              # (M, C) channels-last, rows = (h, w)
        a1 = ln_relu(x, 0)

        # conv1 (1x1) and the 1x1 shortcut share the same VMEM-resident LHS.
        out1 = jnp.dot(a1, w1_ref[...], preferred_element_type=jnp.float32)       # (M, P)
        shortcut = jnp.dot(a1, ws_ref[...], preferred_element_type=jnp.float32)   # (M, 4P)

        a2 = ln_relu(out1, 1)

        # conv2: 3x3, stride 1, pad 1  ==  9 shifted, masked, accumulated matmuls.
        acc = None
        t = 0
        for dy in (-1, 0, 1):
            for dx in (-1, 0, 1):
                s = dy * W + dx                     # flat row shift for this tap
                if s == 0:
                    shifted = a2
                else:
                    # shifted[r] = a2[(r + s) % M]; wrapped rows are zeroed by the mask
                    shifted = pltpu.roll(a2, shift=(-s) % M, axis=0)
                tap = shifted * msk_ref[t]          # zero out-of-image taps (VPU)
                contrib = jnp.dot(tap, w2_ref[t * P:(t + 1) * P, :],
                                  preferred_element_type=jnp.float32)
                acc = contrib if acc is None else acc + contrib
                t += 1

        a3 = ln_relu(acc, 2)

        # conv3 (1x1) fused with the residual add
        o_ref[...] = (jnp.dot(a3, w3_ref[...], preferred_element_type=jnp.float32)
                      + shortcut)

    return kernel


# ------------------------------ wrapper ------------------------------

def preact_bottleneck_forward(x, p):
    """x: (N, C_in, H, W) NCHW float32.  Returns (N, 4*planes, H, W)."""
    N, C, H, W = x.shape
    P = p["w1"].shape[1]          # planes
    E = p["w3"].shape[1]          # 4 * planes
    M = H * W

    # single boundary transpose: NCHW -> channels-last rows (n, h, w) x lanes (c)
    x_flat = jnp.transpose(x, (0, 2, 3, 1)).reshape(N * M, C)

    h_idx = jnp.arange(M, dtype=jnp.int32) // W
    w_idx = jnp.arange(M, dtype=jnp.int32) % W

    # 0/1 group matrix for the LayerNorm reduction over the W axis
    G = (h_idx[:, None] == jnp.arange(H, dtype=jnp.int32)[None, :]).astype(jnp.float32)  # (M, H)
    GT = G.T                                                                             # (H, M)

    # per-row LayerNorm affine (gamma/beta indexed by w, broadcast over channels)
    ln_scale = jnp.stack([p["g1"][w_idx], p["g2"][w_idx], p["g3"][w_idx]])[..., None]    # (3, M, 1)
    ln_bias = jnp.stack([p["b1"][w_idx], p["b2"][w_idx], p["b3"][w_idx]])[..., None]     # (3, M, 1)

    # boundary-validity masks for the nine 3x3-conv taps
    masks = []
    for dy in (-1, 0, 1):
        for dx in (-1, 0, 1):
            valid = ((h_idx + dy >= 0) & (h_idx + dy < H) &
                     (w_idx + dx >= 0) & (w_idx + dx < W))
            masks.append(valid.astype(jnp.float32))
    masks = jnp.stack(masks)[..., None]                                                  # (9, M, 1)

    kernel = _make_bottleneck_kernel(H, W, C, P)
    out_flat = pl.pallas_call(
        kernel,
        out_shape=jax.ShapeDtypeStruct((N * M, E), jnp.float32),
        grid=(N,),
        in_specs=[
            pl.BlockSpec((M, C), lambda i: (i, 0)),          # x: one image per step
            pl.BlockSpec((C, P), lambda i: (0, 0)),          # w1
            pl.BlockSpec((C, E), lambda i: (0, 0)),          # ws (shortcut)
            pl.BlockSpec((9 * P, P), lambda i: (0, 0)),      # w2 (tap-major rows)
            pl.BlockSpec((P, E), lambda i: (0, 0)),          # w3
            pl.BlockSpec((M, H), lambda i: (0, 0)),          # G
            pl.BlockSpec((H, M), lambda i: (0, 0)),          # G^T
            pl.BlockSpec((3, M, 1), lambda i: (0, 0, 0)),    # per-row gammas
            pl.BlockSpec((3, M, 1), lambda i: (0, 0, 0)),    # per-row betas
            pl.BlockSpec((9, M, 1), lambda i: (0, 0, 0)),    # conv2 tap masks
        ],
        out_specs=pl.BlockSpec((M, E), lambda i: (i, 0)),
        compiler_params=pltpu.CompilerParams(
            dimension_semantics=("parallel",)),              # v7x: one image per TensorCore
    )(x_flat, p["w1"], p["ws"], p["w2"], p["w3"], G, GT, ln_scale, ln_bias, masks)

    return jnp.transpose(out_flat.reshape(N, H, W, E), (0, 3, 1, 2))


# ------------------------- pure-JAX reference check -------------------------

def reference_forward(x, p):
    dn = ("NCHW", "OIHW", "NCHW")

    def conv2d(t, w, padding=0):
        return jax.lax.conv_general_dilated(
            t, w, (1, 1), [(padding, padding)] * 2,
            dimension_numbers=dn, precision=jax.lax.Precision.HIGHEST)

    def ln(t, g, b):  # LayerNorm over trailing axis, as nn.LayerNorm((C,)) on NCHW
        m = t.mean(-1, keepdims=True)
        v = jnp.mean((t - m) ** 2, axis=-1, keepdims=True)
        return (t - m) / jnp.sqrt(v + LN_EPS) * g + b

    out = jax.nn.relu(ln(x, p["g1"], p["b1"]))
    shortcut = conv2d(out, p["Ws_oihw"])
    out = conv2d(out, p["W1_oihw"])
    out = conv2d(jax.nn.relu(ln(out, p["g2"], p["b2"])), p["W2_oihw"], padding=1)
    out = conv2d(jax.nn.relu(ln(out, p["g3"], p["b3"])), p["W3_oihw"])
    return out + shortcut


# ---------------------------------- params / main -------------------------------------

def init_params(key, in_planes, planes):
    expansion = 4
    ks = jax.random.split(key, 10)
    f32 = jnp.float32

    W1 = jax.random.normal(ks[0], (planes, in_planes, 1, 1), f32) / jnp.sqrt(in_planes)
    W2 = jax.random.normal(ks[1], (planes, planes, 3, 3), f32) / jnp.sqrt(9 * planes)
    W3 = jax.random.normal(ks[2], (expansion * planes, planes, 1, 1), f32) / jnp.sqrt(planes)
    Ws = jax.random.normal(ks[3], (expansion * planes, in_planes, 1, 1), f32) / jnp.sqrt(in_planes)

    return {
        "g1": 1.0 + 0.1 * jax.random.normal(ks[4], (in_planes,), f32),
        "b1": 0.1 * jax.random.normal(ks[5], (in_planes,), f32),
        "g2": 1.0 + 0.1 * jax.random.normal(ks[6], (planes,), f32),
        "b2": 0.1 * jax.random.normal(ks[7], (planes,), f32),
        "g3": 1.0 + 0.1 * jax.random.normal(ks[8], (planes,), f32),
        "b3": 0.1 * jax.random.normal(ks[9], (planes,), f32),
        # OIHW copies for the reference conv implementation
        "W1_oihw": W1, "W2_oihw": W2, "W3_oihw": W3, "Ws_oihw": Ws,
        # matmul-form weights for the fused Pallas kernel
        "w1": W1[:, :, 0, 0].T,                                             # (C_in, P)
        "w3": W3[:, :, 0, 0].T,                                             # (P, 4P)
        "ws": Ws[:, :, 0, 0].T,                                             # (C_in, 4P)
        "w2": jnp.transpose(W2, (2, 3, 1, 0)).reshape(9 * planes, planes),  # (9P, P), (ky,kx,c) rows
    }


if __name__ == "__main__":
    key = jax.random.PRNGKey(0)
    kx, kp = jax.random.split(key)

    # The PyTorch code's LayerNorm((channels,)) on NCHW requires channels == W.
    N, C, H, W = 2, 16, 16, 16
    planes = 16           # stride = 1; shortcut conv present since in_planes != 4*planes
    assert C == W and planes == W, "LayerNorm-over-W semantics requires channels == W"

    x = jax.random.normal(kx, (N, C, H, W), jnp.float32)
    params = init_params(kp, C, planes)

    fwd = jax.jit(preact_bottleneck_forward)
    y = jax.block_until_ready(fwd(x, params))
    assert y.shape == (N, 4 * planes, H, W), y.shape

    y_ref = jax.block_until_ready(reference_forward(x, params))
    err = float(jnp.max(jnp.abs(y - y_ref)))
    scale = float(jnp.max(jnp.abs(y_ref)))
    assert err <= 5e-2 * max(1.0, scale), f"max abs error {err} (reference scale {scale})"

    print("KERNEL_OK")
</pallas_src>

<mosaic_0001>
module attributes {stable_mosaic.version = 11 : i64} {
  func.func @kernel(%arg0: i32, %arg1: memref<256x16xf32, #tpu.memory_space<vmem>>, %arg2: memref<16x16xf32, #tpu.memory_space<vmem>>, %arg3: memref<16x64xf32, #tpu.memory_space<vmem>>, %arg4: memref<144x16xf32, #tpu.memory_space<vmem>>, %arg5: memref<16x64xf32, #tpu.memory_space<vmem>>, %arg6: memref<256x16xf32, #tpu.memory_space<vmem>>, %arg7: memref<16x256xf32, #tpu.memory_space<vmem>>, %arg8: memref<3x256x1xf32, #tpu.memory_space<vmem>>, %arg9: memref<3x256x1xf32, #tpu.memory_space<vmem>>, %arg10: memref<9x256x1xf32, #tpu.memory_space<vmem>>, %arg11: memref<256x64xf32, #tpu.memory_space<vmem>>) attributes {dimension_semantics = [#tpu.dimension_semantics<parallel>], iteration_bounds = array<i64: 2>, scalar_prefetch = 0 : i64, scratch_operands = 0 : i64, tpu.core_type = #tpu.core_type<tc>, window_params = [{transform_indices = @transform_0, window_bounds = array<i64: 256, 16>}, {pipeline_mode = #tpu.pipeline_mode<synchronous>, transform_indices = @transform_1, window_bounds = array<i64: 16, 16>}, {pipeline_mode = #tpu.pipeline_mode<synchronous>, transform_indices = @transform_2, window_bounds = array<i64: 16, 64>}, {pipeline_mode = #tpu.pipeline_mode<synchronous>, transform_indices = @transform_3, window_bounds = array<i64: 144, 16>}, {pipeline_mode = #tpu.pipeline_mode<synchronous>, transform_indices = @transform_4, window_bounds = array<i64: 16, 64>}, {pipeline_mode = #tpu.pipeline_mode<synchronous>, transform_indices = @transform_5, window_bounds = array<i64: 256, 16>}, {pipeline_mode = #tpu.pipeline_mode<synchronous>, transform_indices = @transform_6, window_bounds = array<i64: 16, 256>}, {pipeline_mode = #tpu.pipeline_mode<synchronous>, transform_indices = @transform_7, window_bounds = array<i64: 3, 256, 1>}, {pipeline_mode = #tpu.pipeline_mode<synchronous>, transform_indices = @transform_8, window_bounds = array<i64: 3, 256, 1>}, {pipeline_mode = #tpu.pipeline_mode<synchronous>, transform_indices = @transform_9, window_bounds = array<i64: 9, 256, 1>}, {transform_indices = @transform_10, window_bounds = array<i64: 256, 64>}]} {
    %c0 = arith.constant 0 : index
    %c0_0 = arith.constant 0 : index
    %0 = vector.load %arg1[%c0, %c0_0] : memref<256x16xf32, #tpu.memory_space<vmem>>, vector<256x16xf32>
    %c0_1 = arith.constant 0 : index
    %c0_2 = arith.constant 0 : index
    %1 = vector.load %arg7[%c0_1, %c0_2] : memref<16x256xf32, #tpu.memory_space<vmem>>, vector<16x256xf32>
    %cst = arith.constant dense<0.000000e+00> : vector<16x16xf32>
    %2 = tpu.matmul %1, %0, %cst {dimension_numbers = #tpu.dot_dimension_numbers<[1], [0], [0], [1], [0, 0, 1, 1], [], []>} : vector<16x256xf32>, vector<256x16xf32>, vector<16x16xf32> -> vector<16x16xf32>
    %c0_3 = arith.constant 0 : index
    %c0_4 = arith.constant 0 : index
    %3 = vector.load %arg6[%c0_3, %c0_4] : memref<256x16xf32, #tpu.memory_space<vmem>>, vector<256x16xf32>
    %cst_5 = arith.constant dense<0.000000e+00> : vector<256x16xf32>
    %4 = tpu.matmul %3, %2, %cst_5 {dimension_numbers = #tpu.dot_dimension_numbers<[1], [0], [0], [1], [0, 0, 1, 1], [], []>} : vector<256x16xf32>, vector<16x16xf32>, vector<256x16xf32> -> vector<256x16xf32>
    %cst_6 = arith.constant 6.250000e-02 : f32
    %5 = vector.broadcast %cst_6 : f32 to vector<256x16xf32>
    %6 = arith.mulf %4, %5 : vector<256x16xf32>
    %7 = arith.subf %0, %6 : vector<256x16xf32>
    %c0_7 = arith.constant 0 : index
    %c0_8 = arith.constant 0 : index
    %8 = vector.load %arg7[%c0_7, %c0_8] : memref<16x256xf32, #tpu.memory_space<vmem>>, vector<16x256xf32>
    %9 = arith.mulf %7, %7 : vector<256x16xf32>
    %cst_9 = arith.constant dense<0.000000e+00> : vector<16x16xf32>
    %10 = tpu.matmul %8, %9, %cst_9 {dimension_numbers = #tpu.dot_dimension_numbers<[1], [0], [0], [1], [0, 0, 1, 1], [], []>} : vector<16x256xf32>, vector<256x16xf32>, vector<16x16xf32> -> vector<16x16xf32>
    %c0_10 = arith.constant 0 : index
    %c0_11 = arith.constant 0 : index
    %11 = vector.load %arg6[%c0_10, %c0_11] : memref<256x16xf32, #tpu.memory_space<vmem>>, vector<256x16xf32>
    %cst_12 = arith.constant dense<0.000000e+00> : vector<256x16xf32>
    %12 = tpu.matmul %11, %10, %cst_12 {dimension_numbers = #tpu.dot_dimension_numbers<[1], [0], [0], [1], [0, 0, 1, 1], [], []>} : vector<256x16xf32>, vector<16x16xf32>, vector<256x16xf32> -> vector<256x16xf32>
    %cst_13 = arith.constant 6.250000e-02 : f32
    %13 = vector.broadcast %cst_13 : f32 to vector<256x16xf32>
    %14 = arith.mulf %12, %13 : vector<256x16xf32>
    %cst_14 = arith.constant 9.99999974E-6 : f32
    %15 = vector.broadcast %cst_14 : f32 to vector<256x16xf32>
    %16 = arith.addf %14, %15 : vector<256x16xf32>
    %17 = math.rsqrt %16 : vector<256x16xf32>
    %18 = arith.mulf %7, %17 : vector<256x16xf32>
    %c0_15 = arith.constant 0 : index
    %c0_16 = arith.constant 0 : index
    %c0_17 = arith.constant 0 : index
    %19 = vector.load %arg8[%c0_15, %c0_16, %c0_17] : memref<3x256x1xf32, #tpu.memory_space<vmem>>, vector<1x256x1xf32>
    %20 = vector.shape_cast %19 : vector<1x256x1xf32> to vector<256x1xf32>
    %21 = vector.broadcast %20 : vector<256x1xf32> to vector<256x16xf32>
    %22 = arith.mulf %18, %21 : vector<256x16xf32>
    %c0_18 = arith.constant 0 : index
    %c0_19 = arith.constant 0 : index
    %c0_20 = arith.constant 0 : index
    %23 = vector.load %arg9[%c0_18, %c0_19, %c0_20] : memref<3x256x1xf32, #tpu.memory_space<vmem>>, vector<1x256x1xf32>
    %24 = vector.shape_cast %23 : vector<1x256x1xf32> to vector<256x1xf32>
    %25 = vector.broadcast %24 : vector<256x1xf32> to vector<256x16xf32>
    %26 = arith.addf %22, %25 : vector<256x16xf32>
    %cst_21 = arith.constant 0.000000e+00 : f32
    %27 = vector.broadcast %cst_21 : f32 to vector<256x16xf32>
    %28 = arith.maximumf %26, %27 : vector<256x16xf32>
    %c0_22 = arith.constant 0 : index
    %c0_23 = arith.constant 0 : index
    %29 = vector.load %arg2[%c0_22, %c0_23] : memref<16x16xf32, #tpu.memory_space<vmem>>, vector<16x16xf32>
    %cst_24 = arith.constant dense<0.000000e+00> : vector<256x16xf32>
    %30 = tpu.matmul %28, %29, %cst_24 {dimension_numbers = #tpu.dot_dimension_numbers<[1], [0], [0], [1], [0, 0, 1, 1], [], []>} : vector<256x16xf32>, vector<16x16xf32>, vector<256x16xf32> -> vector<256x16xf32>
    %c0_25 = arith.constant 0 : index
    %c0_26 = arith.constant 0 : index
    %31 = vector.load %arg3[%c0_25, %c0_26] : memref<16x64xf32, #tpu.memory_space<vmem>>, vector<16x64xf32>
    %cst_27 = arith.constant dense<0.000000e+00> : vector<256x64xf32>
    %32 = tpu.matmul %28, %31, %cst_27 {dimension_numbers = #tpu.dot_dimension_numbers<[1], [0], [0], [1], [0, 0, 1, 1], [], []>} : vector<256x16xf32>, vector<16x64xf32>, vector<256x64xf32> -> vector<256x64xf32>
    %c0_28 = arith.constant 0 : index
    %c0_29 = arith.constant 0 : index
    %33 = vector.load %arg7[%c0_28, %c0_29] : memref<16x256xf32, #tpu.memory_space<vmem>>, vector<16x256xf32>
    %cst_30 = arith.constant dense<0.000000e+00> : vector<16x16xf32>
    %34 = tpu.matmul %33, %30, %cst_30 {dimension_numbers = #tpu.dot_dimension_numbers<[1], [0], [0], [1], [0, 0, 1, 1], [], []>} : vector<16x256xf32>, vector<256x16xf32>, vector<16x16xf32> -> vector<16x16xf32>
    %c0_31 = arith.constant 0 : index
    %c0_32 = arith.constant 0 : index
    %35 = vector.load %arg6[%c0_31, %c0_32] : memref<256x16xf32, #tpu.memory_space<vmem>>, vector<256x16xf32>
    %cst_33 = arith.constant dense<0.000000e+00> : vector<256x16xf32>
    %36 = tpu.matmul %35, %34, %cst_33 {dimension_numbers = #tpu.dot_dimension_numbers<[1], [0], [0], [1], [0, 0, 1, 1], [], []>} : vector<256x16xf32>, vector<16x16xf32>, vector<256x16xf32> -> vector<256x16xf32>
    %cst_34 = arith.constant 6.250000e-02 : f32
    %37 = vector.broadcast %cst_34 : f32 to vector<256x16xf32>
    %38 = arith.mulf %36, %37 : vector<256x16xf32>
    %39 = arith.subf %30, %38 : vector<256x16xf32>
    %c0_35 = arith.constant 0 : index
    %c0_36 = arith.constant 0 : index
    %40 = vector.load %arg7[%c0_35, %c0_36] : memref<16x256xf32, #tpu.memory_space<vmem>>, vector<16x256xf32>
    %41 = arith.mulf %39, %39 : vector<256x16xf32>
    %cst_37 = arith.constant dense<0.000000e+00> : vector<16x16xf32>
    %42 = tpu.matmul %40, %41, %cst_37 {dimension_numbers = #tpu.dot_dimension_numbers<[1], [0], [0], [1], [0, 0, 1, 1], [], []>} : vector<16x256xf32>, vector<256x16xf32>, vector<16x16xf32> -> vector<16x16xf32>
    %c0_38 = arith.constant 0 : index
    %c0_39 = arith.constant 0 : index
    %43 = vector.load %arg6[%c0_38, %c0_39] : memref<256x16xf32, #tpu.memory_space<vmem>>, vector<256x16xf32>
    %cst_40 = arith.constant dense<0.000000e+00> : vector<256x16xf32>
    %44 = tpu.matmul %43, %42, %cst_40 {dimension_numbers = #tpu.dot_dimension_numbers<[1], [0], [0], [1], [0, 0, 1, 1], [], []>} : vector<256x16xf32>, vector<16x16xf32>, vector<256x16xf32> -> vector<256x16xf32>
    %cst_41 = arith.constant 6.250000e-02 : f32
    %45 = vector.broadcast %cst_41 : f32 to vector<256x16xf32>
    %46 = arith.mulf %44, %45 : vector<256x16xf32>
    %cst_42 = arith.constant 9.99999974E-6 : f32
    %47 = vector.broadcast %cst_42 : f32 to vector<256x16xf32>
    %48 = arith.addf %46, %47 : vector<256x16xf32>
    %49 = math.rsqrt %48 : vector<256x16xf32>
    %50 = arith.mulf %39, %49 : vector<256x16xf32>
    %c1 = arith.constant 1 : index
    %c0_43 = arith.constant 0 : index
    %c0_44 = arith.constant 0 : index
    %51 = vector.load %arg8[%c1, %c0_43, %c0_44] : memref<3x256x1xf32, #tpu.memory_space<vmem>>, vector<1x256x1xf32>
    %52 = vector.shape_cast %51 : vector<1x256x1xf32> to vector<256x1xf32>
    %53 = vector.broadcast %52 : vector<256x1xf32> to vector<256x16xf32>
    %54 = arith.mulf %50, %53 : vector<256x16xf32>
    %c1_45 = arith.constant 1 : index
    %c0_46 = arith.constant 0 : index
    %c0_47 = arith.constant 0 : index
    %55 = vector.load %arg9[%c1_45, %c0_46, %c0_47] : memref<3x256x1xf32, #tpu.memory_space<vmem>>, vector<1x256x1xf32>
    %56 = vector.shape_cast %55 : vector<1x256x1xf32> to vector<256x1xf32>
    %57 = vector.broadcast %56 : vector<256x1xf32> to vector<256x16xf32>
    %58 = arith.addf %54, %57 : vector<256x16xf32>
    %cst_48 = arith.constant 0.000000e+00 : f32
    %59 = vector.broadcast %cst_48 : f32 to vector<256x16xf32>
    %60 = arith.maximumf %58, %59 : vector<256x16xf32>
    %c17_i32 = arith.constant 17 : i32
    %61 = tpu.dynamic_rotate %60 by %c17_i32 dim 0 : vector<256x16xf32>, i32 -> vector<256x16xf32>
    %c0_49 = arith.constant 0 : index
    %c0_50 = arith.constant 0 : index
    %c0_51 = arith.constant 0 : index
    %62 = vector.load %arg10[%c0_49, %c0_50, %c0_51] : memref<9x256x1xf32, #tpu.memory_space<vmem>>, vector<1x256x1xf32>
    %63 = vector.shape_cast %62 : vector<1x256x1xf32> to vector<256x1xf32>
    %64 = vector.broadcast %63 : vector<256x1xf32> to vector<256x16xf32>
    %65 = arith.mulf %61, %64 : vector<256x16xf32>
    %c0_52 = arith.constant 0 : index
    %c0_53 = arith.constant 0 : index
    %66 = vector.load %arg4[%c0_52, %c0_53] : memref<144x16xf32, #tpu.memory_space<vmem>>, vector<16x16xf32>
    %cst_54 = arith.constant dense<0.000000e+00> : vector<256x16xf32>
    %67 = tpu.matmul %65, %66, %cst_54 {dimension_numbers = #tpu.dot_dimension_numbers<[1], [0], [0], [1], [0, 0, 1, 1], [], []>} : vector<256x16xf32>, vector<16x16xf32>, vector<256x16xf32> -> vector<256x16xf32>
    %c16_i32 = arith.constant 16 : i32
    %68 = tpu.dynamic_rotate %60 by %c16_i32 dim 0 : vector<256x16xf32>, i32 -> vector<256x16xf32>
    %c1_55 = arith.constant 1 : index
    %c0_56 = arith.constant 0 : index
    %c0_57 = arith.constant 0 : index
    %69 = vector.load %arg10[%c1_55, %c0_56, %c0_57] : memref<9x256x1xf32, #tpu.memory_space<vmem>>, vector<1x256x1xf32>
    %70 = vector.shape_cast %69 : vector<1x256x1xf32> to vector<256x1xf32>
    %71 = vector.broadcast %70 : vector<256x1xf32> to vector<256x16xf32>
    %72 = arith.mulf %68, %71 : vector<256x16xf32>
    %c16 = arith.constant 16 : index
    %c0_58 = arith.constant 0 : index
    %73 = vector.load %arg4[%c16, %c0_58] : memref<144x16xf32, #tpu.memory_space<vmem>>, vector<16x16xf32>
    %cst_59 = arith.constant dense<0.000000e+00> : vector<256x16xf32>
    %74 = tpu.matmul %72, %73, %cst_59 {dimension_numbers = #tpu.dot_dimension_numbers<[1], [0], [0], [1], [0, 0, 1, 1], [], []>} : vector<256x16xf32>, vector<16x16xf32>, vector<256x16xf32> -> vector<256x16xf32>
    %75 = arith.addf %67, %74 : vector<256x16xf32>
    %c15_i32 = arith.constant 15 : i32
    %76 = tpu.dynamic_rotate %60 by %c15_i32 dim 0 : vector<256x16xf32>, i32 -> vector<256x16xf32>
    %c2 = arith.constant 2 : index
    %c0_60 = arith.constant 0 : index
    %c0_61 = arith.constant 0 : index
    %77 = vector.load %arg10[%c2, %c0_60, %c0_61] : memref<9x256x1xf32, #tpu.memory_space<vmem>>, vector<1x256x1xf32>
    %78 = vector.shape_cast %77 : vector<1x256x1xf32> to vector<256x1xf32>
    %79 = vector.broadcast %78 : vector<256x1xf32> to vector<256x16xf32>
    %80 = arith.mulf %76, %79 : vector<256x16xf32>
    %c32 = arith.constant 32 : index
    %c0_62 = arith.constant 0 : index
    %81 = vector.load %arg4[%c32, %c0_62] : memref<144x16xf32, #tpu.memory_space<vmem>>, vector<16x16xf32>
    %cst_63 = arith.constant dense<0.000000e+00> : vector<256x16xf32>
    %82 = tpu.matmul %80, %81, %cst_63 {dimension_numbers = #tpu.dot_dimension_numbers<[1], [0], [0], [1], [0, 0, 1, 1], [], []>} : vector<256x16xf32>, vector<16x16xf32>, vector<256x16xf32> -> vector<256x16xf32>
    %83 = arith.addf %75, %82 : vector<256x16xf32>
    %c1_i32 = arith.constant 1 : i32
    %84 = tpu.dynamic_rotate %60 by %c1_i32 dim 0 : vector<256x16xf32>, i32 -> vector<256x16xf32>
    %c3 = arith.constant 3 : index
    %c0_64 = arith.constant 0 : index
    %c0_65 = arith.constant 0 : index
    %85 = vector.load %arg10[%c3, %c0_64, %c0_65] : memref<9x256x1xf32, #tpu.memory_space<vmem>>, vector<1x256x1xf32>
    %86 = vector.shape_cast %85 : vector<1x256x1xf32> to vector<256x1xf32>
    %87 = vector.broadcast %86 : vector<256x1xf32> to vector<256x16xf32>
    %88 = arith.mulf %84, %87 : vector<256x16xf32>
    %c48 = arith.constant 48 : index
    %c0_66 = arith.constant 0 : index
    %89 = vector.load %arg4[%c48, %c0_66] : memref<144x16xf32, #tpu.memory_space<vmem>>, vector<16x16xf32>
    %cst_67 = arith.constant dense<0.000000e+00> : vector<256x16xf32>
    %90 = tpu.matmul %88, %89, %cst_67 {dimension_numbers = #tpu.dot_dimension_numbers<[1], [0], [0], [1], [0, 0, 1, 1], [], []>} : vector<256x16xf32>, vector<16x16xf32>, vector<256x16xf32> -> vector<256x16xf32>
    %91 = arith.addf %83, %90 : vector<256x16xf32>
    %c4 = arith.constant 4 : index
    %c0_68 = arith.constant 0 : index
    %c0_69 = arith.constant 0 : index
    %92 = vector.load %arg10[%c4, %c0_68, %c0_69] : memref<9x256x1xf32, #tpu.memory_space<vmem>>, vector<1x256x1xf32>
    %93 = vector.shape_cast %92 : vector<1x256x1xf32> to vector<256x1xf32>
    %94 = vector.broadcast %93 : vector<256x1xf32> to vector<256x16xf32>
    %95 = arith.mulf %60, %94 : vector<256x16xf32>
    %c64 = arith.constant 64 : index
    %c0_70 = arith.constant 0 : index
    %96 = vector.load %arg4[%c64, %c0_70] : memref<144x16xf32, #tpu.memory_space<vmem>>, vector<16x16xf32>
    %cst_71 = arith.constant dense<0.000000e+00> : vector<256x16xf32>
    %97 = tpu.matmul %95, %96, %cst_71 {dimension_numbers = #tpu.dot_dimension_numbers<[1], [0], [0], [1], [0, 0, 1, 1], [], []>} : vector<256x16xf32>, vector<16x16xf32>, vector<256x16xf32> -> vector<256x16xf32>
    %98 = arith.addf %91, %97 : vector<256x16xf32>
    %c255_i32 = arith.constant 255 : i32
    %99 = tpu.dynamic_rotate %60 by %c255_i32 dim 0 : vector<256x16xf32>, i32 -> vector<256x16xf32>
    %c5 = arith.constant 5 : index
    %c0_72 = arith.constant 0 : index
    %c0_73 = arith.constant 0 : index
    %100 = vector.load %arg10[%c5, %c0_72, %c0_73] : memref<9x256x1xf32, #tpu.memory_space<vmem>>, vector<1x256x1xf32>
    %101 = vector.shape_cast %100 : vector<1x256x1xf32> to vector<256x1xf32>
    %102 = vector.broadcast %101 : vector<256x1xf32> to vector<256x16xf32>
    %103 = arith.mulf %99, %102 : vector<256x16xf32>
    %c80 = arith.constant 80 : index
    %c0_74 = arith.constant 0 : index
    %104 = vector.load %arg4[%c80, %c0_74] : memref<144x16xf32, #tpu.memory_space<vmem>>, vector<16x16xf32>
    %cst_75 = arith.constant dense<0.000000e+00> : vector<256x16xf32>
    %105 = tpu.matmul %103, %104, %cst_75 {dimension_numbers = #tpu.dot_dimension_numbers<[1], [0], [0], [1], [0, 0, 1, 1], [], []>} : vector<256x16xf32>, vector<16x16xf32>, vector<256x16xf32> -> vector<256x16xf32>
    %106 = arith.addf %98, %105 : vector<256x16xf32>
    %c241_i32 = arith.constant 241 : i32
    %107 = tpu.dynamic_rotate %60 by %c241_i32 dim 0 : vector<256x16xf32>, i32 -> vector<256x16xf32>
    %c6 = arith.constant 6 : index
    %c0_76 = arith.constant 0 : index
    %c0_77 = arith.constant 0 : index
    %108 = vector.load %arg10[%c6, %c0_76, %c0_77] : memref<9x256x1xf32, #tpu.memory_space<vmem>>, vector<1x256x1xf32>
    %109 = vector.shape_cast %108 : vector<1x256x1xf32> to vector<256x1xf32>
    %110 = vector.broadcast %109 : vector<256x1xf32> to vector<256x16xf32>
    %111 = arith.mulf %107, %110 : vector<256x16xf32>
    %c96 = arith.constant 96 : index
    %c0_78 = arith.constant 0 : index
    %112 = vector.load %arg4[%c96, %c0_78] : memref<144x16xf32, #tpu.memory_space<vmem>>, vector<16x16xf32>
    %cst_79 = arith.constant dense<0.000000e+00> : vector<256x16xf32>
    %113 = tpu.matmul %111, %112, %cst_79 {dimension_numbers = #tpu.dot_dimension_numbers<[1], [0], [0], [1], [0, 0, 1, 1], [], []>} : vector<256x16xf32>, vector<16x16xf32>, vector<256x16xf32> -> vector<256x16xf32>
    %114 = arith.addf %106, %113 : vector<256x16xf32>
    %c240_i32 = arith.constant 240 : i32
    %115 = tpu.dynamic_rotate %60 by %c240_i32 dim 0 : vector<256x16xf32>, i32 -> vector<256x16xf32>
    %c7 = arith.constant 7 : index
    %c0_80 = arith.constant 0 : index
    %c0_81 = arith.constant 0 : index
    %116 = vector.load %arg10[%c7, %c0_80, %c0_81] : memref<9x256x1xf32, #tpu.memory_space<vmem>>, vector<1x256x1xf32>
    %117 = vector.shape_cast %116 : vector<1x256x1xf32> to vector<256x1xf32>
    %118 = vector.broadcast %117 : vector<256x1xf32> to vector<256x16xf32>
    %119 = arith.mulf %115, %118 : vector<256x16xf32>
    %c112 = arith.constant 112 : index
    %c0_82 = arith.constant 0 : index
    %120 = vector.load %arg4[%c112, %c0_82] : memref<144x16xf32, #tpu.memory_space<vmem>>, vector<16x16xf32>
    %cst_83 = arith.constant dense<0.000000e+00> : vector<256x16xf32>
    %121 = tpu.matmul %119, %120, %cst_83 {dimension_numbers = #tpu.dot_dimension_numbers<[1], [0], [0], [1], [0, 0, 1, 1], [], []>} : vector<256x16xf32>, vector<16x16xf32>, vector<256x16xf32> -> vector<256x16xf32>
    %122 = arith.addf %114, %121 : vector<256x16xf32>
    %c239_i32 = arith.constant 239 : i32
    %123 = tpu.dynamic_rotate %60 by %c239_i32 dim 0 : vector<256x16xf32>, i32 -> vector<256x16xf32>
    %c8 = arith.constant 8 : index
    %c0_84 = arith.constant 0 : index
    %c0_85 = arith.constant 0 : index
    %124 = vector.load %arg10[%c8, %c0_84, %c0_85] : memref<9x256x1xf32, #tpu.memory_space<vmem>>, vector<1x256x1xf32>
    %125 = vector.shape_cast %124 : vector<1x256x1xf32> to vector<256x1xf32>
    %126 = vector.broadcast %125 : vector<256x1xf32> to vector<256x16xf32>
    %127 = arith.mulf %123, %126 : vector<256x16xf32>
    %c128 = arith.constant 128 : index
    %c0_86 = arith.constant 0 : index
    %128 = vector.load %arg4[%c128, %c0_86] : memref<144x16xf32, #tpu.memory_space<vmem>>, vector<16x16xf32>
    %cst_87 = arith.constant dense<0.000000e+00> : vector<256x16xf32>
    %129 = tpu.matmul %127, %128, %cst_87 {dimension_numbers = #tpu.dot_dimension_numbers<[1], [0], [0], [1], [0, 0, 1, 1], [], []>} : vector<256x16xf32>, vector<16x16xf32>, vector<256x16xf32> -> vector<256x16xf32>
    %130 = arith.addf %122, %129 : vector<256x16xf32>
    %c0_88 = arith.constant 0 : index
    %c0_89 = arith.constant 0 : index
    %131 = vector.load %arg7[%c0_88, %c0_89] : memref<16x256xf32, #tpu.memory_space<vmem>>, vector<16x256xf32>
    %cst_90 = arith.constant dense<0.000000e+00> : vector<16x16xf32>
    %132 = tpu.matmul %131, %130, %cst_90 {dimension_numbers = #tpu.dot_dimension_numbers<[1], [0], [0], [1], [0, 0, 1, 1], [], []>} : vector<16x256xf32>, vector<256x16xf32>, vector<16x16xf32> -> vector<16x16xf32>
    %c0_91 = arith.constant 0 : index
    %c0_92 = arith.constant 0 : index
    %133 = vector.load %arg6[%c0_91, %c0_92] : memref<256x16xf32, #tpu.memory_space<vmem>>, vector<256x16xf32>
    %cst_93 = arith.constant dense<0.000000e+00> : vector<256x16xf32>
    %134 = tpu.matmul %133, %132, %cst_93 {dimension_numbers = #tpu.dot_dimension_numbers<[1], [0], [0], [1], [0, 0, 1, 1], [], []>} : vector<256x16xf32>, vector<16x16xf32>, vector<256x16xf32> -> vector<256x16xf32>
    %cst_94 = arith.constant 6.250000e-02 : f32
    %135 = vector.broadcast %cst_94 : f32 to vector<256x16xf32>
    %136 = arith.mulf %134, %135 : vector<256x16xf32>
    %137 = arith.subf %130, %136 : vector<256x16xf32>
    %c0_95 = arith.constant 0 : index
    %c0_96 = arith.constant 0 : index
    %138 = vector.load %arg7[%c0_95, %c0_96] : memref<16x256xf32, #tpu.memory_space<vmem>>, vector<16x256xf32>
    %139 = arith.mulf %137, %137 : vector<256x16xf32>
    %cst_97 = arith.constant dense<0.000000e+00> : vector<16x16xf32>
    %140 = tpu.matmul %138, %139, %cst_97 {dimension_numbers = #tpu.dot_dimension_numbers<[1], [0], [0], [1], [0, 0, 1, 1], [], []>} : vector<16x256xf32>, vector<256x16xf32>, vector<16x16xf32> -> vector<16x16xf32>
    %c0_98 = arith.constant 0 : index
    %c0_99 = arith.constant 0 : index
    %141 = vector.load %arg6[%c0_98, %c0_99] : memref<256x16xf32, #tpu.memory_space<vmem>>, vector<256x16xf32>
    %cst_100 = arith.constant dense<0.000000e+00> : vector<256x16xf32>
    %142 = tpu.matmul %141, %140, %cst_100 {dimension_numbers = #tpu.dot_dimension_numbers<[1], [0], [0], [1], [0, 0, 1, 1], [], []>} : vector<256x16xf32>, vector<16x16xf32>, vector<256x16xf32> -> vector<256x16xf32>
    %cst_101 = arith.constant 6.250000e-02 : f32
    %143 = vector.broadcast %cst_101 : f32 to vector<256x16xf32>
    %144 = arith.mulf %142, %143 : vector<256x16xf32>
    %cst_102 = arith.constant 9.99999974E-6 : f32
    %145 = vector.broadcast %cst_102 : f32 to vector<256x16xf32>
    %146 = arith.addf %144, %145 : vector<256x16xf32>
    %147 = math.rsqrt %146 : vector<256x16xf32>
    %148 = arith.mulf %137, %147 : vector<256x16xf32>
    %c2_103 = arith.constant 2 : index
    %c0_104 = arith.constant 0 : index
    %c0_105 = arith.constant 0 : index
    %149 = vector.load %arg8[%c2_103, %c0_104, %c0_105] : memref<3x256x1xf32, #tpu.memory_space<vmem>>, vector<1x256x1xf32>
    %150 = vector.shape_cast %149 : vector<1x256x1xf32> to vector<256x1xf32>
    %151 = vector.broadcast %150 : vector<256x1xf32> to vector<256x16xf32>
    %152 = arith.mulf %148, %151 : vector<256x16xf32>
    %c2_106 = arith.constant 2 : index
    %c0_107 = arith.constant 0 : index
    %c0_108 = arith.constant 0 : index
    %153 = vector.load %arg9[%c2_106, %c0_107, %c0_108] : memref<3x256x1xf32, #tpu.memory_space<vmem>>, vector<1x256x1xf32>
    %154 = vector.shape_cast %153 : vector<1x256x1xf32> to vector<256x1xf32>
    %155 = vector.broadcast %154 : vector<256x1xf32> to vector<256x16xf32>
    %156 = arith.addf %152, %155 : vector<256x16xf32>
    %cst_109 = arith.constant 0.000000e+00 : f32
    %157 = vector.broadcast %cst_109 : f32 to vector<256x16xf32>
    %158 = arith.maximumf %156, %157 : vector<256x16xf32>
    %c0_110 = arith.constant 0 : index
    %c0_111 = arith.constant 0 : index
    %159 = vector.load %arg5[%c0_110, %c0_111] : memref<16x64xf32, #tpu.memory_space<vmem>>, vector<16x64xf32>
    %cst_112 = arith.constant dense<0.000000e+00> : vector<256x64xf32>
    %160 = tpu.matmul %158, %159, %cst_112 {dimension_numbers = #tpu.dot_dimension_numbers<[1], [0], [0], [1], [0, 0, 1, 1], [], []>} : vector<256x16xf32>, vector<16x64xf32>, vector<256x64xf32> -> vector<256x64xf32>
    %161 = arith.addf %160, %32 : vector<256x64xf32>
    %c0_113 = arith.constant 0 : index
    %c0_114 = arith.constant 0 : index
    %162 = vector.load %arg11[%c0_113, %c0_114] : memref<256x64xf32, #tpu.memory_space<vmem>>, vector<256x64xf32>
    tpu.vector_store %arg11[%c0_113, %c0_114], %161 {strides = array<i32>} : memref<256x64xf32, #tpu.memory_space<vmem>>, vector<256x64xf32>,
    return
  }
  func.func @transform_0(%arg0: i32) -> (i32, i32) {
    %c0_i32 = arith.constant 0 : i32
    %c0_i32_0 = arith.constant 0 : i32
    return %arg0, %c0_i32 : i32, i32
  }
  func.func @transform_1(%arg0: i32) -> (i32, i32) {
    %c0_i32 = arith.constant 0 : i32
    %c0_i32_0 = arith.constant 0 : i32
    %c0_i32_1 = arith.constant 0 : i32
    return %c0_i32, %c0_i32_0 : i32, i32
  }
  func.func @transform_2(%arg0: i32) -> (i32, i32) {
    %c0_i32 = arith.constant 0 : i32
    %c0_i32_0 = arith.constant 0 : i32
    %c0_i32_1 = arith.constant 0 : i32
    return %c0_i32, %c0_i32_0 : i32, i32
  }
  func.func @transform_3(%arg0: i32) -> (i32, i32) {
    %c0_i32 = arith.constant 0 : i32
    %c0_i32_0 = arith.constant 0 : i32
    %c0_i32_1 = arith.constant 0 : i32
    return %c0_i32, %c0_i32_0 : i32, i32
  }
  func.func @transform_4(%arg0: i32) -> (i32, i32) {
    %c0_i32 = arith.constant 0 : i32
    %c0_i32_0 = arith.constant 0 : i32
    %c0_i32_1 = arith.constant 0 : i32
    return %c0_i32, %c0_i32_0 : i32, i32
  }
  func.func @transform_5(%arg0: i32) -> (i32, i32) {
    %c0_i32 = arith.constant 0 : i32
    %c0_i32_0 = arith.constant 0 : i32
    %c0_i32_1 = arith.constant 0 : i32
    return %c0_i32, %c0_i32_0 : i32, i32
  }
  func.func @transform_6(%arg0: i32) -> (i32, i32) {
    %c0_i32 = arith.constant 0 : i32
    %c0_i32_0 = arith.constant 0 : i32
    %c0_i32_1 = arith.constant 0 : i32
    return %c0_i32, %c0_i32_0 : i32, i32
  }
  func.func @transform_7(%arg0: i32) -> (i32, i32, i32) {
    %c0_i32 = arith.constant 0 : i32
    %c0_i32_0 = arith.constant 0 : i32
    %c0_i32_1 = arith.constant 0 : i32
    %c0_i32_2 = arith.constant 0 : i32
    return %c0_i32, %c0_i32_0, %c0_i32_1 : i32, i32, i32
  }
  func.func @transform_8(%arg0: i32) -> (i32, i32, i32) {
    %c0_i32 = arith.constant 0 : i32
    %c0_i32_0 = arith.constant 0 : i32
    %c0_i32_1 = arith.constant 0 : i32
    %c0_i32_2 = arith.constant 0 : i32
    return %c0_i32, %c0_i32_0, %c0_i32_1 : i32, i32, i32
  }
  func.func @transform_9(%arg0: i32) -> (i32, i32, i32) {
    %c0_i32 = arith.constant 0 : i32
    %c0_i32_0 = arith.constant 0 : i32
    %c0_i32_1 = arith.constant 0 : i32
    %c0_i32_2 = arith.constant 0 : i32
    return %c0_i32, %c0_i32_0, %c0_i32_1 : i32, i32, i32
  }
  func.func @transform_10(%arg0: i32) -> (i32, i32) {
    %c0_i32 = arith.constant 0 : i32
    %c0_i32_0 = arith.constant 0 : i32
    return %arg0, %c0_i32 : i32, i32
  }
}

</mosaic_0001>

<bundles_post_ra>
// kernel: preact_bottleneck_forward.1
= control target key start
LH: loop header
LB: loop body
LE: loop exit
PB: predicated region body
PF: predicated region fallthrough
CT: control target
= control target key end

     0   :  { %15 = vsyncpa [#allocation3], 0  ;;  %s20771_s0 = inlined_call_operand.vmem [shape: f32[512,16], index: 0, kind: input, shape index: {}]   ;;  %s20772_s1 = inlined_call_operand.vmem [shape: f32[16,16], index: 1, kind: input, shape index: {}]   ;;  %s20773_s2 = inlined_call_operand.vmem [shape: f32[16,64], index: 2, kind: input, shape index: {}]   ;;  %s20774_s3 = inlined_call_operand.vmem [shape: f32[144,16], index: 3, kind: input, shape index: {}]   ;;  %s20775_s4 = inlined_call_operand.vmem [shape: f32[16,64], index: 4, kind: input, shape index: {}]   ;;  %s20776_s5 = inlined_call_operand.vmem [shape: f32[256,16], index: 5, kind: input, shape index: {}]   ;;  %s20777_s6 = inlined_call_operand.vmem [shape: f32[16,256], index: 6, kind: input, shape index: {}]   ;;  %s20778_s7 = inlined_call_operand.vmem [shape: f32[3,256,1], index: 7, kind: input, shape index: {}]   ;;  %s20779_s8 = inlined_call_operand.vmem [shape: f32[3,256,1], index: 8, kind: input, shape index: {}]   ;;  %s20780_s9 = inlined_call_operand.vmem [shape: f32[9,256,1], index: 9, kind: input, shape index: {}]   ;;  %s20781_s10 = inlined_call_operand.hbm [shape: f32[512,64], index: 10, kind: output, shape index: {}]  }
   0x1   :  { %17 = vsyncpa [#allocation3 + $0x1], 0  ;;  %s14514_s13 = smov 0   ;;  %s14516_s14 = smov 0  }
   0x2   :  { %s14518_s15 = smov 0   ;;  %s14520_s16 = smov 0  }
   0x3 LB: > { %s14535_s17 = sadd.s32 4294967295, %s14453_s16   ;;  %s10711_s18 = sadd.s32 4294967294, %s14453_s16   ;;  %s14453_s16 = sphi %s14520_s16, %s22133_s16   ;;  %s14449_s15 = sphi %s14518_s15, %s22132_s15   ;;  %s14445_s14 = sphi %s14516_s14, %s22131_s14   ;;  %s14441_s13 = sphi %s14514_s13, %s22130_s13  }
   0x4   : > { %s14539_s19 = sadd.s32 1, %s14453_s16   ;;  %s245_s20 = sadd.s32 1, %s14449_s15 }
   0x5   : > { %s242_s21 = ssub.s32 %s14453_s16, %s14539_s19  ;;  %p255_p0 = scmp.ne.s32.totalorder %s14449_s15, %s14445_s14 }
   0x6   : > { %p243_p1 = scmp.eq.s32.totalorder %s242_s21, 0  ;;  %p256_p2 = scmp.eq.s32.totalorder %s14535_s17, 1 }
   0x7   : > { %p261_p3 = scmp.ne.s32.totalorder %s14445_s14, %s14441_s13  ;;  %p262_p4 = scmp.eq.s32.totalorder %s10711_s18, 1 }
   0x8   : > { %s14550_s22 = scalar_select %p243_p1, %s14449_s15, %s245_s20  }
   0x9   : > { %p14552_p5 = por %p256_p2, %p255_p0  ;;  %p14556_p6 = por %p262_p4, %p261_p3 }
   0xa   : > { %20983 = sst [smem:[#allocation5_spill]] %s14550_s22  ;;  %p10714_p7 = scmp.ge.s32.totalorder %s14453_s16, 1 }
   0xb   : > { %p316_p8 = scmp.lt.s32.totalorder %s14453_s16, 3 }
   0xd   : > { %p317_p9 = pnand %p10714_p7, %p316_p8 }
   0xf   : > { %320 = sbr.rel (%p317_p9) target bundleno = 4342 (0x10f6), region = 60 }
  0x16   : > { %v1574_v0 = vld [vmem:[%s20779_s8] sm:$0xff]  ;;  %s10716_s29 = sshll.u32 %s14535_s17, 5  ;;  %v14455_v2 = vmov 0   ;;  %v1575_v3 = vld [vmem:[%s20779_s8 + $0x8] sm:$0xff]  ;;  %v1353_v5 = vld [vmem:[%s20778_s7 + $0x18] sm:$0xff]  ;;  %vm504_vm0 = vcmask 130048  }
  0x17   : > { %v1350_v1 = vld [vmem:[%s20778_s7] sm:$0xff]  ;;  %14057 = vset.pattern.permute.xlu1 %v14455_v2  ;;  %14056 = vset.pattern.permute.xlu0 %v14455_v2  ;;  %p355_p10 = scmp.lt.s32.totalorder %s10716_s29, 63  ;;  %v1351_v4 = vld [vmem:[%s20778_s7 + $0x8] sm:$0xff]  ;;  %v1352_v6 = vld [vmem:[%s20778_s7 + $0x10] sm:$0xff]  ;;  %s351_s26 = sand.u32 1, %s14445_s14   ;;  %vm10602_vm3 = vcmask 523264  }
  0x18   : > { %1608 = vperm.xlu1 %14057, %v1574_v0   ;;  %1384 = vperm.xlu0 %14056, %v1350_v1   ;;  %v394_v7 = vld [vmem:[%s20777_s6 + $0x8] sm:$0xff]  ;;  %v1577_v21 = vld [vmem:[%s20779_s8 + $0x18] sm:$0xff]  ;;  %v1576_v22 = vld [vmem:[%s20779_s8 + $0x10] sm:$0xff]  ;;  %s10715_s27 = sshll.u32 %s351_s26, 8  ;;  %s11683_s11 = sshll.u32 %s14535_s17, 12 }
  0x19   : > { %s22135_s29 = smov (!%p355_p10, %s10716_s29), 63  ;;  %461 = vmatprep.mubr.f32.mxu0 %v394_v7  ;;  %v1355_v29 = vld [vmem:[%s20778_s7 + $0x28] sm:$0xff]  ;;  %v1354_v30 = vld [vmem:[%s20778_s7 + $0x20] sm:$0xff]  ;;  %v1357_v45 = vld [vmem:[%s20778_s7 + $0x38] sm:$0xff]  ;;  %s20653_s28 = scalar_lea.vmem [#allocation2], %s10715_s27 }
  0x1a   : > { %s10717_s20 = sshll.u32 %s22135_s29, 3  ;;  %v1579_v37 = vld [vmem:[%s20779_s8 + $0x28] sm:$0xff]  ;;  %v1578_v38 = vld [vmem:[%s20779_s8 + $0x20] sm:$0xff]  ;;  %v1356_v46 = vld [vmem:[%s20778_s7 + $0x30] sm:$0xff]  ;;  %s10649_s12 = sshll.u32 %s20653_s28, 4  ;;  %s20722_s12 = int_to_ptr.vmem [resolvable:$true] %s10649_s12 }
  0x1b   : > { %s14584_s30 = scalar_lea.vmem %s20771_s0, %s10717_s20  ;;  %v1581_v53 = vld [vmem:[%s20779_s8 + $0x38] sm:$0xff]  ;;  %v1580_v54 = vld [vmem:[%s20779_s8 + $0x30] sm:$0xff]  ;;  %v1359_v61 = vld [vmem:[%s20778_s7 + $0x48] sm:$0xff]  ;;  %s20730_s17 = scalar_lea.sflag [#allocation3], %s351_s26 }
  0x1c   : > { %1613 = vperm.xlu1 %14057, %v1575_v3   ;;  %1389 = vperm.xlu0 %14056, %v1351_v4   ;;  %v377_v8 = vld [vmem:[%s14584_s30 + $0x80] sm:$0xff]  ;;  %v378_v9 = vld [vmem:[%s14584_s30 + $0x88] sm:$0xff]  ;;  %v379_v13 = vld [vmem:[%s14584_s30 + $0x90] sm:$0xff]  ;;  %s14391_s18 = scalar_lea.vmem %s20722_s12, 4096  ;;  %s14456_s20 = smov [#allocation2]  }
  0x1d   : > { %v361_v10 = vld [vmem:[%s14584_s30] sm:$0xff]  ;;  %v13460_v11 = vpack.c.bf16 %v378_v9, %v377_v8  ;;  %v362_v12 = vld [vmem:[%s14584_s30 + $0x8] sm:$0xff]  ;;  %v380_v14 = vld [vmem:[%s14584_s30 + $0x98] sm:$0xff]  ;;  %p14392_p11 = scmp.ne.s32.totalorder %s20722_s12, %s14391_s18  ;;  %s14395_s21 = sshll.u32 %s14456_s20, 4  ;;  %s14396_s21 = int_to_ptr.vmem [resolvable:$false] %s14395_s21 }
  0x1e   : > { %v13462_v15 = vpack.c.bf16 %v362_v12, %v361_v10  ;;  %v13464_v16 = vpack.c.bf16 %v380_v14, %v379_v13  ;;  %v363_v17 = vld [vmem:[%s14584_s30 + $0x10] sm:$0xff]  ;;  %v364_v18 = vld [vmem:[%s14584_s30 + $0x18] sm:$0xff]  ;;  %v381_v19 = vld [vmem:[%s14584_s30 + $0xa0] sm:$0xff]  ;;  %s14397_s25 = scalar_lea.vmem %s14396_s21, 8192  ;;  %p14398_p0 = scmp.lt.s32.totalorder %s20722_s12, %s14396_s21 }
  0x1f   : > { %v382_v20 = vld [vmem:[%s14584_s30 + $0xa8] sm:$0xff]  ;;  %13461 = vmatprep.subr.bf16.mxu0 %v13460_v11  ;;  %v13466_v23 = vpack.c.bf16 %v364_v18, %v363_v17  ;;  %v365_v25 = vld [vmem:[%s14584_s30 + $0x20] sm:$0xff]  ;;  %v383_v27 = vld [vmem:[%s14584_s30 + $0xb0] sm:$0xff]  ;;  %p14393_p12 = pnand %p14392_p11, %p14552_p5  ;;  %p14399_p1 = scmp.lt.s32.totalorder %s14397_s25, %s14391_s18 }
  0x20   : > { %1399 = vperm.xlu1 %14057, %v1353_v5   ;;  %1394 = vperm.xlu0 %14056, %v1352_v6   ;;  %v13468_v24 = vpack.c.bf16 %v382_v20, %v381_v19  ;;  %v366_v26 = vld [vmem:[%s14584_s30 + $0x28] sm:$0xff]  ;;  %v384_v28 = vld [vmem:[%s14584_s30 + $0xb8] sm:$0xff]  ;;  %v367_v33 = vld [vmem:[%s14584_s30 + $0x30] sm:$0xff] }
  0x21   : > { %13463 = vmatpush3.bf16.msra.mxu0 %v13462_v15  ;;  %v13470_v31 = vpack.c.bf16 %v366_v26, %v365_v25  ;;  %v13472_v32 = vpack.c.bf16 %v384_v28, %v383_v27  ;;  %v368_v34 = vld [vmem:[%s14584_s30 + $0x38] sm:$0xff]  ;;  %v385_v35 = vld [vmem:[%s14584_s30 + $0xc0] sm:$0xff]  ;;  %v386_v36 = vld [vmem:[%s14584_s30 + $0xc8] sm:$0xff]  ;;  %p14394_p13 = pneg %p14393_p12  ;;  %p14400_p2 = por %p14399_p1, %p14398_p0 }
  0x22   : > { %13465 = vmatprep.subr.bf16.mxu0 %v13464_v16  ;;  %v13474_v39 = vpack.c.bf16 %v368_v34, %v367_v33  ;;  %v13476_v40 = vpack.c.bf16 %v386_v36, %v385_v35  ;;  %v369_v41 = vld [vmem:[%s14584_s30 + $0x40] sm:$0xff]  ;;  %v370_v42 = vld [vmem:[%s14584_s30 + $0x48] sm:$0xff]  ;;  %v387_v43 = vld [vmem:[%s14584_s30 + $0xd0] sm:$0xff] }
  0x23   : > { %v388_v44 = vld [vmem:[%s14584_s30 + $0xd8] sm:$0xff]  ;;  %v13478_v47 = vpack.c.bf16 %v370_v42, %v369_v41  ;;  %v371_v49 = vld [vmem:[%s14584_s30 + $0x50] sm:$0xff]  ;;  %v389_v51 = vld [vmem:[%s14584_s30 + $0xe0] sm:$0xff]  ;;  %p14401_p3 = pnand %p14400_p2, %p14394_p13 }
  0x24   : > { %1623 = vperm.xlu1 %14057, %v1577_v21   ;;  %1618 = vperm.xlu0 %14056, %v1576_v22   ;;  %v13480_v48 = vpack.c.bf16 %v388_v44, %v387_v43  ;;  %v372_v50 = vld [vmem:[%s14584_s30 + $0x58] sm:$0xff]  ;;  %v390_v52 = vld [vmem:[%s14584_s30 + $0xe8] sm:$0xff]  ;;  %v373_v57 = vld [vmem:[%s14584_s30 + $0x60] sm:$0xff] }
  0x25   : > { %13467 = vmatpush3.bf16.msra.mxu0 %v13466_v23  ;;  %v13482_v55 = vpack.c.bf16 %v372_v50, %v371_v49  ;;  %v13484_v56 = vpack.c.bf16 %v390_v52, %v389_v51  ;;  %v374_v58 = vld [vmem:[%s14584_s30 + $0x68] sm:$0xff]  ;;  %v391_v59 = vld [vmem:[%s14584_s30 + $0xf0] sm:$0xff]  ;;  %v392_v60 = vld [vmem:[%s14584_s30 + $0xf8] sm:$0xff] }
  0x26   : > { %13469 = vmatprep.subr.bf16.mxu0 %v13468_v24  ;;  %v1358_v62 = vld [vmem:[%s20778_s7 + $0x40] sm:$0xff]  ;;  %v13486_v63 = vpack.c.bf16 %v374_v58, %v373_v57  ;;  %v13488_v0 = vpack.c.bf16 %v392_v60, %v391_v59  ;;  %v375_v1 = vld [vmem:[%s14584_s30 + $0x70] sm:$0xff]  ;;  %v376_v2 = vld [vmem:[%s14584_s30 + $0x78] sm:$0xff] }
  0x27   : > { %v1583_v3 = vld [vmem:[%s20779_s8 + $0x48] sm:$0xff]  ;;  %v1582_v4 = vld [vmem:[%s20779_s8 + $0x40] sm:$0xff]  ;;  %v13490_v5 = vpack.c.bf16 %v376_v2, %v375_v1  ;;  %v1361_v6 = vld [vmem:[%s20778_s7 + $0x58] sm:$0xff] }
  0x28   : > { %1409 = vperm.xlu1 %14057, %v1355_v29   ;;  %1404 = vperm.xlu0 %14056, %v1354_v30   ;;  %v1360_v7 = vld [vmem:[%s20778_s7 + $0x50] sm:$0xff]  ;;  %v393_v8 = vld [vmem:[%s20777_s6] sm:$0xff]  ;;  %v396_v9 = vld [vmem:[%s20777_s6 + $0x18] sm:$0xff] }
  0x29   : > { %13471 = vmatpush3.bf16.msra.mxu0 %v13470_v31  ;;  %v1585_v10 = vld [vmem:[%s20779_s8 + $0x58] sm:$0xff]  ;;  %v1584_v11 = vld [vmem:[%s20779_s8 + $0x50] sm:$0xff]  ;;  %v1363_v13 = vld [vmem:[%s20778_s7 + $0x68] sm:$0xff] }
  0x2a   : > { %13473 = vmatprep.subr.bf16.mxu0 %v13472_v32  ;;  %v395_v12 = vld [vmem:[%s20777_s6 + $0x10] sm:$0xff]  ;;  %v1362_v14 = vld [vmem:[%s20778_s7 + $0x60] sm:$0xff]  ;;  %v1587_v15 = vld [vmem:[%s20779_s8 + $0x68] sm:$0xff] }
  0x2b   : > { %v1586_v16 = vld [vmem:[%s20779_s8 + $0x60] sm:$0xff]  ;;  %v1365_v17 = vld [vmem:[%s20778_s7 + $0x78] sm:$0xff]  ;;  %v1364_v18 = vld [vmem:[%s20778_s7 + $0x70] sm:$0xff] }
  0x2c   : > { %1633 = vperm.xlu1 %14057, %v1579_v37   ;;  %1628 = vperm.xlu0 %14056, %v1578_v38   ;;  %v1589_v19 = vld [vmem:[%s20779_s8 + $0x78] sm:$0xff]  ;;  %v1588_v20 = vld [vmem:[%s20779_s8 + $0x70] sm:$0xff]  ;;  %v1367_v21 = vld [vmem:[%s20778_s7 + $0x88] sm:$0xff] }
  0x2d   : > { %13475 = vmatpush3.bf16.msra.mxu0 %v13474_v39  ;;  %v1366_v22 = vld [vmem:[%s20778_s7 + $0x80] sm:$0xff]  ;;  %v1591_v23 = vld [vmem:[%s20779_s8 + $0x88] sm:$0xff]  ;;  %v1369_v25 = vld [vmem:[%s20778_s7 + $0x98] sm:$0xff] }
  0x2e   : > { %13477 = vmatprep.subr.bf16.mxu0 %v13476_v40  ;;  %v1590_v24 = vld [vmem:[%s20779_s8 + $0x80] sm:$0xff]  ;;  %v1368_v26 = vld [vmem:[%s20778_s7 + $0x90] sm:$0xff]  ;;  %v1593_v27 = vld [vmem:[%s20779_s8 + $0x98] sm:$0xff] }
  0x2f   : > { %v1592_v28 = vld [vmem:[%s20779_s8 + $0x90] sm:$0xff]  ;;  %v1371_v29 = vld [vmem:[%s20778_s7 + $0xa8] sm:$0xff]  ;;  %v1370_v30 = vld [vmem:[%s20778_s7 + $0xa0] sm:$0xff] }
  0x30   : > { %1419 = vperm.xlu1 %14057, %v1357_v45   ;;  %1414 = vperm.xlu0 %14056, %v1356_v46   ;;  %v1595_v31 = vld [vmem:[%s20779_s8 + $0xa8] sm:$0xff]  ;;  %v1594_v32 = vld [vmem:[%s20779_s8 + $0xa0] sm:$0xff]  ;;  %v1373_v33 = vld [vmem:[%s20778_s7 + $0xb8] sm:$0xff] }
  0x31   : > { %13479 = vmatpush3.bf16.msra.mxu0 %v13478_v47  ;;  %v1372_v34 = vld [vmem:[%s20778_s7 + $0xb0] sm:$0xff]  ;;  %v1597_v35 = vld [vmem:[%s20779_s8 + $0xb8] sm:$0xff]  ;;  %v1375_v37 = vld [vmem:[%s20778_s7 + $0xc8] sm:$0xff] }
  0x32   : > { %13481 = vmatprep.subr.bf16.mxu0 %v13480_v48  ;;  %v1596_v36 = vld [vmem:[%s20779_s8 + $0xb0] sm:$0xff]  ;;  %v1374_v38 = vld [vmem:[%s20778_s7 + $0xc0] sm:$0xff]  ;;  %v1599_v39 = vld [vmem:[%s20779_s8 + $0xc8] sm:$0xff] }
  0x33   : > { %v1598_v40 = vld [vmem:[%s20779_s8 + $0xc0] sm:$0xff]  ;;  %v1377_v41 = vld [vmem:[%s20778_s7 + $0xd8] sm:$0xff]  ;;  %v1376_v42 = vld [vmem:[%s20778_s7 + $0xd0] sm:$0xff] }
  0x34   : > { %1643 = vperm.xlu1 %14057, %v1581_v53   ;;  %1638 = vperm.xlu0 %14056, %v1580_v54   ;;  %v1601_v43 = vld [vmem:[%s20779_s8 + $0xd8] sm:$0xff]  ;;  %v1600_v44 = vld [vmem:[%s20779_s8 + $0xd0] sm:$0xff]  ;;  %v1379_v45 = vld [vmem:[%s20778_s7 + $0xe8] sm:$0xff] }
  0x35   : > { %13483 = vmatpush3.bf16.msra.mxu0 %v13482_v55  ;;  %v1378_v46 = vld [vmem:[%s20778_s7 + $0xe0] sm:$0xff]  ;;  %v1603_v47 = vld [vmem:[%s20779_s8 + $0xe8] sm:$0xff]  ;;  %v1381_v49 = vld [vmem:[%s20778_s7 + $0xf8] sm:$0xff] }
  0x36   : > { %13485 = vmatprep.subr.bf16.mxu0 %v13484_v56  ;;  %v1602_v48 = vld [vmem:[%s20779_s8 + $0xe0] sm:$0xff]  ;;  %v1380_v50 = vld [vmem:[%s20778_s7 + $0xf0] sm:$0xff]  ;;  %v1605_v51 = vld [vmem:[%s20779_s8 + $0xf8] sm:$0xff] }
  0x37   : > { %v1604_v52 = vld [vmem:[%s20779_s8 + $0xf0] sm:$0xff]  ;;  %v10939_v54 = vld [vmem:[%s20778_s7 + $0x1e8] sm:$0xff]  ;;  %v10941_v58 = vld [vmem:[%s20778_s7 + $0x1f8] sm:$0xff] }
  0x38   : > { %1429 = vperm.xlu1 %14057, %v1359_v61   ;;  %1424 = vperm.xlu0 %14056, %v1358_v62   ;;  %v10940_v53 = vld [vmem:[%s20778_s7 + $0x1f0] sm:$0xff]  ;;  %v10971_v57 = vld [vmem:[%s20779_s8 + $0x1e8] sm:$0xff]  ;;  %v10973_v61 = vld [vmem:[%s20779_s8 + $0x1f8] sm:$0xff] }
  0x39   : > { %13487 = vmatpush3.bf16.msra.mxu0 %v13486_v63  ;;  %v10972_v62 = vld [vmem:[%s20779_s8 + $0x1f0] sm:$0xff]  ;;  %v472_v1 = vld [vmem:[%s20776_s5] sm:$0xff]  ;;  %v10911_v2 = vld [vmem:[%s20778_s7 + $0x108] sm:$0xff] }
  0x3a   : > { %13489 = vmatprep.subr.bf16.mxu0 %v13488_v0  ;;  %12528 = vmatprep.mubr.msk.f32.mxu1 %vm504_vm0, %v472_v1  ;;  %v10920_v1 = vld [vmem:[%s20778_s7 + $0x150] sm:$0xff] }
  0x3c   : > { %1653 = vperm.xlu1 %14057, %v1583_v3   ;;  %1648 = vperm.xlu0 %14056, %v1582_v4   ;;  %v10910_v3 = vld [vmem:[%s20778_s7 + $0x100] sm:$0xff] }
  0x3d   : > { %13491 = vmatpush3.bf16.msra.mxu0 %v13490_v5 }
  0x40   : > { %1439 = vperm.xlu1 %14057, %v1361_v6   ;;  %1434 = vperm.xlu0 %14056, %v1360_v7   ;;  %v10943_v6 = vld [vmem:[%s20779_s8 + $0x108] sm:$0xff]  ;;  %v10942_v7 = vld [vmem:[%s20779_s8 + $0x100] sm:$0xff] }
  0x41   : > { %462 = vmatmul.mubr.f32.vlgmr.msra.gmra.mrb[0].mxu0 %v393_v8 }
  0x42   : > { %466 = vmatprep.mubr.f32.mxu0 %v396_v9 }
  0x44   : > { %1663 = vperm.xlu1 %14057, %v1585_v10   ;;  %1658 = vperm.xlu0 %14056, %v1584_v11   ;;  %v10913_v10 = vld [vmem:[%s20778_s7 + $0x118] sm:$0xff]  ;;  %v10912_v11 = vld [vmem:[%s20778_s7 + $0x110] sm:$0xff] }
  0x45   : > { %467 = vmatmul.mubr.f32.gmra.mrb[2].mxu0 %v395_v12 }
  0x48   : > { %1449 = vperm.xlu1 %14057, %v1363_v13   ;;  %1444 = vperm.xlu0 %14056, %v1362_v14   ;;  %v10944_v14 = vld [vmem:[%s20779_s8 + $0x110] sm:$0xff] }
  0x4c   : > { %1673 = vperm.xlu1 %14057, %v1587_v15   ;;  %1668 = vperm.xlu0 %14056, %v1586_v16   ;;  %v3753_v15 = vld [vmem:[%s20780_s9] sm:$0xff] }
  0x50   : > { %1459 = vperm.xlu1 %14057, %v1365_v17   ;;  %1454 = vperm.xlu0 %14056, %v1364_v18   ;;  %v10945_v18 = vld [vmem:[%s20779_s8 + $0x118] sm:$0xff] }
  0x54   : > { %1683 = vperm.xlu1 %14057, %v1589_v19   ;;  %1678 = vperm.xlu0 %14056, %v1588_v20   ;;  %v3754_v19 = vld [vmem:[%s20780_s9 + $0x8] sm:$0xff] }
  0x58   : > { %1469 = vperm.xlu1 %14057, %v1367_v21   ;;  %1464 = vperm.xlu0 %14056, %v1366_v22   ;;  %v10915_v22 = vld [vmem:[%s20778_s7 + $0x128] sm:$0xff] }
  0x5c   : > { %1693 = vperm.xlu1 %14057, %v1591_v23   ;;  %1688 = vperm.xlu0 %14056, %v1590_v24   ;;  %v10914_v23 = vld [vmem:[%s20778_s7 + $0x120] sm:$0xff] }
  0x60   : > { %1479 = vperm.xlu1 %14057, %v1369_v25   ;;  %1474 = vperm.xlu0 %14056, %v1368_v26   ;;  %v10946_v26 = vld [vmem:[%s20779_s8 + $0x120] sm:$0xff] }
  0x64   : > { %1703 = vperm.xlu1 %14057, %v1593_v27   ;;  %1698 = vperm.xlu0 %14056, %v1592_v28   ;;  %v3755_v27 = vld [vmem:[%s20780_s9 + $0x10] sm:$0xff] }
  0x68   : > { %1489 = vperm.xlu1 %14057, %v1371_v29   ;;  %1484 = vperm.xlu0 %14056, %v1370_v30   ;;  %v10947_v30 = vld [vmem:[%s20779_s8 + $0x128] sm:$0xff] }
  0x6c   : > { %1713 = vperm.xlu1 %14057, %v1595_v31   ;;  %1708 = vperm.xlu0 %14056, %v1594_v32   ;;  %v3756_v31 = vld [vmem:[%s20780_s9 + $0x18] sm:$0xff] }
  0x70   : > { %1499 = vperm.xlu1 %14057, %v1373_v33   ;;  %1494 = vperm.xlu0 %14056, %v1372_v34   ;;  %v10917_v34 = vld [vmem:[%s20778_s7 + $0x138] sm:$0xff] }
  0x74   : > { %1723 = vperm.xlu1 %14057, %v1597_v35   ;;  %1718 = vperm.xlu0 %14056, %v1596_v36   ;;  %v10916_v35 = vld [vmem:[%s20778_s7 + $0x130] sm:$0xff] }
  0x78   : > { %1509 = vperm.xlu1 %14057, %v1375_v37   ;;  %1504 = vperm.xlu0 %14056, %v1374_v38   ;;  %v10948_v38 = vld [vmem:[%s20779_s8 + $0x130] sm:$0xff] }
  0x7c   : > { %1733 = vperm.xlu1 %14057, %v1599_v39   ;;  %1728 = vperm.xlu0 %14056, %v1598_v40   ;;  %v3757_v39 = vld [vmem:[%s20780_s9 + $0x20] sm:$0xff] }
  0x80   : > { %1519 = vperm.xlu1 %14057, %v1377_v41   ;;  %1514 = vperm.xlu0 %14056, %v1376_v42   ;;  %v10949_v42 = vld [vmem:[%s20779_s8 + $0x138] sm:$0xff] }
  0x84   : > { %1743 = vperm.xlu1 %14057, %v1601_v43   ;;  %1738 = vperm.xlu0 %14056, %v1600_v44   ;;  %v3758_v43 = vld [vmem:[%s20780_s9 + $0x28] sm:$0xff] }
  0x88   : > { %1529 = vperm.xlu1 %14057, %v1379_v45   ;;  %1524 = vperm.xlu0 %14056, %v1378_v46   ;;  %v10919_v46 = vld [vmem:[%s20778_s7 + $0x148] sm:$0xff] }
  0x8c   : > { %1753 = vperm.xlu1 %14057, %v1603_v47   ;;  %1748 = vperm.xlu0 %14056, %v1602_v48   ;;  %v10918_v47 = vld [vmem:[%s20778_s7 + $0x140] sm:$0xff] }
  0x90   : > { %1539 = vperm.xlu1 %14057, %v1381_v49   ;;  %1534 = vperm.xlu0 %14056, %v1380_v50   ;;  %v10950_v50 = vld [vmem:[%s20779_s8 + $0x140] sm:$0xff] }
  0x94   : > { %1763 = vperm.xlu1 %14057, %v1605_v51   ;;  %1758 = vperm.xlu0 %14056, %v1604_v52   ;;  %v3759_v51 = vld [vmem:[%s20780_s9 + $0x30] sm:$0xff] }
  0x97   : > { %v14810_v55 = vpop.permute.xlu1 %1608  ;;  %v14812_v56 = vpop.permute.xlu0 %1384 }
  0x98   : > { %3389 = vperm.xlu1 %14057, %v10940_v53   ;;  %3384 = vperm.xlu0 %14056, %v10939_v54   ;;  %v10951_v54 = vld [vmem:[%s20779_s8 + $0x148] sm:$0xff] }
  0x9b   : > { %v14820_v59 = vpop.permute.xlu1 %1613  ;;  %v14822_v60 = vpop.permute.xlu0 %1389 }
  0x9c   : > { %3609 = vperm.xlu1 %14057, %v10971_v57   ;;  %3394 = vperm.xlu0 %14056, %v10941_v58   ;;  %v3760_v57 = vld [vmem:[%s20780_s9 + $0x38] sm:$0xff] }
  0x9f   : > { %v14830_v63 = vpop.permute.xlu1 %1399  ;;  %v14832_v0 = vpop.permute.xlu0 %1394 }
  0xa0   : > { %3619 = vperm.xlu1 %14057, %v10973_v61   ;;  %3614 = vperm.xlu0 %14056, %v10972_v62   ;;  %v10921_v62 = vld [vmem:[%s20778_s7 + $0x158] sm:$0xff] }
  0xa3   : > { %v14844_v4 = vpop.permute.xlu1 %1623  ;;  %v14846_v5 = vpop.permute.xlu0 %1618 }
  0xa4   : > { %3244 = vperm.xlu1 %14057, %v10911_v2   ;;  %3239 = vperm.xlu0 %14056, %v10910_v3  }
  0xa7   : > { %v14854_v8 = vpop.permute.xlu1 %1409  ;;  %v14856_v9 = vpop.permute.xlu0 %1404 }
  0xa8   : > { %3469 = vperm.xlu1 %14057, %v10943_v6   ;;  %3464 = vperm.xlu0 %14056, %v10942_v7   ;;  %v10952_v6 = vld [vmem:[%s20779_s8 + $0x150] sm:$0xff]  ;;  %v3761_v7 = vld [vmem:[%s20780_s9 + $0x40] sm:$0xff] }
  0xab   : > { %v14864_v12 = vpop.permute.xlu1 %1633  ;;  %v14866_v13 = vpop.permute.xlu0 %1628 }
  0xac   : > { %3254 = vperm.xlu1 %14057, %v10913_v10   ;;  %3249 = vperm.xlu0 %14056, %v10912_v11  }
  0xaf   : > { %v14874_v16 = vpop.permute.xlu1 %1419  ;;  %v14876_v17 = vpop.permute.xlu0 %1414 }
  0xb0   : > { %3474 = vperm.xlu1 %14057, %v10944_v14   ;;  %3787 = vperm.xlu0 %14056, %v3753_v15   ;;  %v10953_v14 = vld [vmem:[%s20779_s8 + $0x158] sm:$0xff]  ;;  %v3762_v15 = vld [vmem:[%s20780_s9 + $0x48] sm:$0xff] }
  0xb3   : > { %v14884_v20 = vpop.permute.xlu1 %1643  ;;  %v14886_v21 = vpop.permute.xlu0 %1638 }
  0xb4   : > { %3479 = vperm.xlu1 %14057, %v10945_v18   ;;  %3792 = vperm.xlu0 %14056, %v3754_v19  }
  0xb7   : > { %v14894_v24 = vpop.permute.xlu1 %1429  ;;  %v14896_v25 = vpop.permute.xlu0 %1424 }
  0xb8   : > { %3264 = vperm.xlu1 %14057, %v10915_v22   ;;  %3259 = vperm.xlu0 %14056, %v10914_v23   ;;  %v10923_v22 = vld [vmem:[%s20778_s7 + $0x168] sm:$0xff]  ;;  %v10922_v23 = vld [vmem:[%s20778_s7 + $0x160] sm:$0xff] }
  0xbb   : > { %v14904_v28 = vpop.permute.xlu1 %1653  ;;  %v14906_v29 = vpop.permute.xlu0 %1648 }
  0xbc   : > { %3484 = vperm.xlu1 %14057, %v10946_v26   ;;  %3797 = vperm.xlu0 %14056, %v3755_v27  }
  0xbf   : > { %v14914_v32 = vpop.permute.xlu1 %1439  ;;  %v14916_v33 = vpop.permute.xlu0 %1434 }
  0xc0   : > { %3489 = vperm.xlu1 %14057, %v10947_v30   ;;  %3802 = vperm.xlu0 %14056, %v3756_v31   ;;  %v10954_v30 = vld [vmem:[%s20779_s8 + $0x160] sm:$0xff]  ;;  %v3763_v31 = vld [vmem:[%s20780_s9 + $0x50] sm:$0xff] }
  0xc3   : > { %v14924_v36 = vpop.permute.xlu1 %1663  ;;  %v14926_v37 = vpop.permute.xlu0 %1658 }
  0xc4   : > { %3274 = vperm.xlu1 %14057, %v10917_v34   ;;  %3269 = vperm.xlu0 %14056, %v10916_v35  }
  0xc7   : > { %v14934_v40 = vpop.permute.xlu1 %1449  ;;  %v14936_v41 = vpop.permute.xlu0 %1444 }
  0xc8   : > { %20986 = vst [vmem:[#allocation6_spill] sm:$0xff] %v14936_v41  ;;  %3494 = vperm.xlu1 %14057, %v10948_v38   ;;  %3807 = vperm.xlu0 %14056, %v3757_v39   ;;  %v10955_v38 = vld [vmem:[%s20779_s8 + $0x168] sm:$0xff]  ;;  %v3764_v39 = vld [vmem:[%s20780_s9 + $0x58] sm:$0xff] }
  0xcb   : > { %v14944_v44 = vpop.permute.xlu1 %1673  ;;  %v14946_v45 = vpop.permute.xlu0 %1668 }
  0xcc   : > { %20987 = vst [vmem:[#allocation7_spill] sm:$0xff] %v14944_v44  ;;  %20988 = vst [vmem:[#allocation8_spill] sm:$0xff] %v14946_v45  ;;  %3499 = vperm.xlu1 %14057, %v10949_v42   ;;  %3812 = vperm.xlu0 %14056, %v3758_v43   ;;  %v14267_v45 = vld [vmem:[%s14584_s30 + $0xb8] sm:$0xff] }
  0xcf   : > { %v14954_v48 = vpop.permute.xlu1 %1459  ;;  %v14956_v49 = vpop.permute.xlu0 %1454 }
  0xd0   : > { %20989 = vst [vmem:[#allocation9_spill] sm:$0xff] %v14954_v48  ;;  %20990 = vst [vmem:[#allocation10_spill] sm:$0xff] %v14956_v49  ;;  %3284 = vperm.xlu1 %14057, %v10919_v46   ;;  %3279 = vperm.xlu0 %14056, %v10918_v47   ;;  %v10925_v46 = vld [vmem:[%s20778_s7 + $0x178] sm:$0xff]  ;;  %v10924_v47 = vld [vmem:[%s20778_s7 + $0x170] sm:$0xff] }
  0xd1   : > { %v14260_v49 = vld [vmem:[%s14584_s30 + $0x90] sm:$0xff]  ;;  %v11267_v48 = vld [vmem:[%s20780_s9 + $0x528] sm:$0xff] }
  0xd3   : > { %v14964_v52 = vpop.permute.xlu1 %1683  ;;  %v14966_v53 = vpop.permute.xlu0 %1678 }
  0xd4   : > { %20991 = vst [vmem:[#allocation11_spill] sm:$0xff] %v14964_v52  ;;  %20992 = vst [vmem:[#allocation12_spill] sm:$0xff] %v14966_v53  ;;  %3504 = vperm.xlu1 %14057, %v10950_v50   ;;  %3817 = vperm.xlu0 %14056, %v3759_v51  }
  0xd7   : > { %v14974_v58 = vpop.permute.xlu1 %1469  ;;  %v14976_v61 = vpop.permute.xlu0 %1464 }
  0xd8   : > { %20993 = vst [vmem:[#allocation13_spill] sm:$0xff] %v14974_v58  ;;  %20994 = vst [vmem:[#allocation14_spill] sm:$0xff] %v14976_v61  ;;  %3509 = vperm.xlu1 %14057, %v10951_v54   ;;  %3822 = vperm.xlu0 %14056, %v3760_v57   ;;  %v10956_v54 = vld [vmem:[%s20779_s8 + $0x170] sm:$0xff]  ;;  %v3765_v57 = vld [vmem:[%s20780_s9 + $0x60] sm:$0xff] }
  0xdb   : > { %v14984_v2 = vpop.permute.xlu1 %1693  ;;  %v14986_v3 = vpop.permute.xlu0 %1688 }
  0xdc   : > { %20995 = vst [vmem:[#allocation15_spill] sm:$0xff] %v14984_v2  ;;  %20996 = vst [vmem:[#allocation16_spill] sm:$0xff] %v14986_v3  ;;  %3294 = vperm.xlu1 %14057, %v10921_v62   ;;  %3289 = vperm.xlu0 %14056, %v10920_v1   ;;  %v14254_v3 = vld [vmem:[%s14584_s30 + $0x10] sm:$0xff] }
  0xdf   : > { %v14994_v10 = vpop.permute.xlu1 %1479  ;;  %v14996_v11 = vpop.permute.xlu0 %1474 }
  0xe0   : > { %20997 = vst [vmem:[#allocation17_spill] sm:$0xff] %v14994_v10  ;;  %20998 = vst [vmem:[#allocation18_spill] sm:$0xff] %v14996_v11  ;;  %3514 = vperm.xlu1 %14057, %v10952_v6   ;;  %3827 = vperm.xlu0 %14056, %v3761_v7   ;;  %v10957_v6 = vld [vmem:[%s20779_s8 + $0x178] sm:$0xff]  ;;  %v3766_v7 = vld [vmem:[%s20780_s9 + $0x68] sm:$0xff] }
  0xe3   : > { %v15004_v18 = vpop.permute.xlu1 %1703  ;;  %v15006_v19 = vpop.permute.xlu0 %1698 }
  0xe4   : > { %20999 = vst [vmem:[#allocation19_spill] sm:$0xff] %v15004_v18  ;;  %21000 = vst [vmem:[#allocation20_spill] sm:$0xff] %v15006_v19  ;;  %3519 = vperm.xlu1 %14057, %v10953_v14   ;;  %3832 = vperm.xlu0 %14056, %v3762_v15  }
  0xe7   : > { %v15014_v26 = vpop.permute.xlu1 %1489  ;;  %v15016_v27 = vpop.permute.xlu0 %1484 }
  0xe8   : > { %21001 = vst [vmem:[#allocation21_spill] sm:$0xff] %v15014_v26  ;;  %21002 = vst [vmem:[#allocation22_spill] sm:$0xff] %v15016_v27  ;;  %3304 = vperm.xlu1 %14057, %v10923_v22   ;;  %3299 = vperm.xlu0 %14056, %v10922_v23   ;;  %v10927_v22 = vld [vmem:[%s20778_s7 + $0x188] sm:$0xff]  ;;  %v10926_v23 = vld [vmem:[%s20778_s7 + $0x180] sm:$0xff] }
  0xe9   : > { %v11228_v27 = vld [vmem:[%s20780_s9 + $0x4f0] sm:$0xff] }
  0xeb   : > { %v15024_v34 = vpop.permute.xlu1 %1713  ;;  %v15026_v35 = vpop.permute.xlu0 %1708 }
  0xec   : > { %21003 = vst [vmem:[#allocation23_spill] sm:$0xff] %v15024_v34  ;;  %21004 = vst [vmem:[#allocation24_spill] sm:$0xff] %v15026_v35  ;;  %3524 = vperm.xlu1 %14057, %v10954_v30   ;;  %3837 = vperm.xlu0 %14056, %v3763_v31  }
  0xef   : > { %v15034_v42 = vpop.permute.xlu1 %1499  ;;  %v15036_v43 = vpop.permute.xlu0 %1494 }
  0xf0   : > { %21005 = vst [vmem:[#allocation25_spill] sm:$0xff] %v15034_v42  ;;  %21006 = vst [vmem:[#allocation26_spill] sm:$0xff] %v15036_v43  ;;  %3529 = vperm.xlu1 %14057, %v10955_v38   ;;  %3842 = vperm.xlu0 %14056, %v3764_v39   ;;  %v10958_v38 = vld [vmem:[%s20779_s8 + $0x180] sm:$0xff]  ;;  %v3767_v39 = vld [vmem:[%s20780_s9 + $0x70] sm:$0xff] }
  0xf3   : > { %v15044_v50 = vpop.permute.xlu1 %1723  ;;  %v15046_v51 = vpop.permute.xlu0 %1718 }
  0xf4   : > { %21007 = vst [vmem:[#allocation27_spill] sm:$0xff] %v15044_v50  ;;  %21008 = vst [vmem:[#allocation28_spill] sm:$0xff] %v15046_v51  ;;  %3314 = vperm.xlu1 %14057, %v10925_v46   ;;  %3309 = vperm.xlu0 %14056, %v10924_v47  }
  0xf7   : > { %v15054_v62 = vpop.permute.xlu1 %1509  ;;  %v15056_v1 = vpop.permute.xlu0 %1504 }
  0xf8   : > { %21009 = vst [vmem:[#allocation29_spill] sm:$0xff] %v15054_v62  ;;  %21010 = vst [vmem:[#allocation30_spill] sm:$0xff] %v15056_v1  ;;  %3534 = vperm.xlu1 %14057, %v10956_v54   ;;  %3847 = vperm.xlu0 %14056, %v3765_v57   ;;  %v10959_v54 = vld [vmem:[%s20779_s8 + $0x188] sm:$0xff]  ;;  %v3768_v57 = vld [vmem:[%s20780_s9 + $0x78] sm:$0xff] }
  0xfb   : > { %v15064_v14 = vpop.permute.xlu1 %1733  ;;  %v15066_v15 = vpop.permute.xlu0 %1728 }
  0xfc   : > { %21011 = vst [vmem:[#allocation31_spill] sm:$0xff] %v15064_v14  ;;  %21012 = vst [vmem:[#allocation32_spill] sm:$0xff] %v15066_v15  ;;  %3539 = vperm.xlu1 %14057, %v10957_v6   ;;  %3852 = vperm.xlu0 %14056, %v3766_v7  }
  0xff   : > { %v15074_v30 = vpop.permute.xlu1 %1519  ;;  %v15076_v31 = vpop.permute.xlu0 %1514 }
 0x100   : > { %21013 = vst [vmem:[#allocation33_spill] sm:$0xff] %v15074_v30  ;;  %21014 = vst [vmem:[#allocation34_spill] sm:$0xff] %v15076_v31  ;;  %3324 = vperm.xlu1 %14057, %v10927_v22   ;;  %3319 = vperm.xlu0 %14056, %v10926_v23   ;;  %v10929_v22 = vld [vmem:[%s20778_s7 + $0x198] sm:$0xff]  ;;  %v10928_v23 = vld [vmem:[%s20778_s7 + $0x190] sm:$0xff] }
 0x103   : > { %v15084_v46 = vpop.permute.xlu1 %1743  ;;  %v15086_v47 = vpop.permute.xlu0 %1738 }
 0x104   : > { %21015 = vst [vmem:[#allocation35_spill] sm:$0xff] %v15084_v46  ;;  %21016 = vst [vmem:[#allocation36_spill] sm:$0xff] %v15086_v47  ;;  %3544 = vperm.xlu1 %14057, %v10958_v38   ;;  %3857 = vperm.xlu0 %14056, %v3767_v39  }
 0x107   : > { %v15094_v6 = vpop.permute.xlu1 %1529  ;;  %v15096_v7 = vpop.permute.xlu0 %1524 }
 0x108   : > { %21017 = vst [vmem:[#allocation37_spill] sm:$0xff] %v15094_v6  ;;  %21018 = vst [vmem:[#allocation38_spill] sm:$0xff] %v15096_v7  ;;  %3549 = vperm.xlu1 %14057, %v10959_v54   ;;  %3862 = vperm.xlu0 %14056, %v3768_v57   ;;  %v10960_v7 = vld [vmem:[%s20779_s8 + $0x190] sm:$0xff]  ;;  %v3769_v54 = vld [vmem:[%s20780_s9 + $0x80] sm:$0xff] }
 0x10b   : > { %v15104_v38 = vpop.permute.xlu1 %1753  ;;  %v15106_v39 = vpop.permute.xlu0 %1748 }
 0x10c   : > { %21019 = vst [vmem:[#allocation39_spill] sm:$0xff] %v15104_v38  ;;  %21020 = vst [vmem:[#allocation40_spill] sm:$0xff] %v15106_v39  ;;  %3334 = vperm.xlu1 %14057, %v10929_v22   ;;  %3329 = vperm.xlu0 %14056, %v10928_v23   ;;  %v10961_v39 = vld [vmem:[%s20779_s8 + $0x198] sm:$0xff]  ;;  %v3770_v22 = vld [vmem:[%s20780_s9 + $0x88] sm:$0xff] }
 0x10f   : > { %v15114_v57 = vpop.permute.xlu1 %1539  ;;  %v15116_v6 = vpop.permute.xlu0 %1534 }
 0x110   : > { %21021 = vst [vmem:[#allocation41_spill] sm:$0xff] %v15114_v57  ;;  %21022 = vst [vmem:[#allocation42_spill] sm:$0xff] %v15116_v6  ;;  %3554 = vperm.xlu1 %14057, %v10960_v7   ;;  %3867 = vperm.xlu0 %14056, %v3769_v54   ;;  %v10931_v7 = vld [vmem:[%s20778_s7 + $0x1a8] sm:$0xff]  ;;  %v10930_v54 = vld [vmem:[%s20778_s7 + $0x1a0] sm:$0xff] }
 0x113   : > { %v15124_v23 = vpop.permute.xlu1 %1763  ;;  %v15126_v38 = vpop.permute.xlu0 %1758 }
 0x114   : > { %21023 = vst [vmem:[#allocation43_spill] sm:$0xff] %v15124_v23  ;;  %21024 = vst [vmem:[#allocation44_spill] sm:$0xff] %v15126_v38  ;;  %v11716_v47 = vpop.f32.mrb[0].mxu0  ;;  %3559 = vperm.xlu1 %14057, %v10961_v39   ;;  %3872 = vperm.xlu0 %14056, %v3770_v22   ;;  %v10962_v39 = vld [vmem:[%s20779_s8 + $0x1a0] sm:$0xff]  ;;  %v3771_v22 = vld [vmem:[%s20780_s9 + $0x90] sm:$0xff] }
 0x115   : > { %v11717_v57 = vpop.f32.mrb[1].mxu0 }
 0x116   : > { %v11718_v6 = vadd.f32 %v11717_v57, %v11716_v47 }
 0x117   : > { %v15134_v46 = vpop.permute.xlu1 %3389  ;;  %v15136_v31 = vpop.permute.xlu0 %3384 }
 0x118   : > { %21025 = vst [vmem:[#allocation45_spill] sm:$0xff] %v15134_v46  ;;  %21026 = vst [vmem:[#allocation46_spill] sm:$0xff] %v15136_v31  ;;  %v11719_v23 = vpop.f32.mrb[2].mxu0  ;;  %3344 = vperm.xlu1 %14057, %v10931_v7   ;;  %3339 = vperm.xlu0 %14056, %v10930_v54   ;;  %v10963_v7 = vld [vmem:[%s20779_s8 + $0x1a8] sm:$0xff]  ;;  %v3772_v54 = vld [vmem:[%s20780_s9 + $0x98] sm:$0xff] }
 0x119   : > { %v11720_v38 = vpop.f32.mrb[3].mxu0  ;;  %v10934_v31 = vld [vmem:[%s20778_s7 + $0x1c0] sm:$0xff] }
 0x11a   : > { %v11721_v30 = vadd.f32 %v11720_v38, %v11719_v23  ;;  %v473_v23 = vld [vmem:[%s20776_s5 + $0x8] sm:$0xff] }
 0x11b   : > { %v15144_v15 = vpop.permute.xlu1 %3609  ;;  %v15146_v47 = vpop.permute.xlu0 %3394 }
 0x11c   : > { %21027 = vst [vmem:[#allocation47_spill] sm:$0xff] %v15144_v15  ;;  %21028 = vst [vmem:[#allocation48_spill] sm:$0xff] %v15146_v47  ;;  %3564 = vperm.xlu1 %14057, %v10962_v39   ;;  %3877 = vperm.xlu0 %14056, %v3771_v22   ;;  %v13492_v57 = vpack.c.bf16 %v11721_v30, %v11718_v6  ;;  %v474_v30 = vld [vmem:[%s20776_s5 + $0x10] sm:$0xff]  ;;  %v10933_v6 = vld [vmem:[%s20778_s7 + $0x1b8] sm:$0xff] }
 0x11d   : > { %v10932_v39 = vld [vmem:[%s20778_s7 + $0x1b0] sm:$0xff]  ;;  %v3774_v47 = vld [vmem:[%s20780_s9 + $0xa8] sm:$0xff] }
 0x11e   : > { %13493 = vmatprep.subr.bf16.mxu1 %v13492_v57 }
 0x11f   : > { %13495 = vmatpush3.bf16.msra.mxu1 %v13492_v57  ;;  %v15154_v46 = vpop.permute.xlu1 %3619  ;;  %v15156_v38 = vpop.permute.xlu0 %3614 }
 0x120   : > { %21029 = vst [vmem:[#allocation49_spill] sm:$0xff] %v15154_v46  ;;  %21030 = vst [vmem:[#allocation50_spill] sm:$0xff] %v15156_v38  ;;  %3569 = vperm.xlu1 %14057, %v10963_v7   ;;  %3882 = vperm.xlu0 %14056, %v3772_v54   ;;  %v475_v7 = vld [vmem:[%s20776_s5 + $0x18] sm:$0xff]  ;;  %v476_v54 = vld [vmem:[%s20776_s5 + $0x20] sm:$0xff] }
 0x121   : > { %v3773_v38 = vld [vmem:[%s20780_s9 + $0xa0] sm:$0xff] }
 0x122   : > { %12529 = vmatmul.mubr.msk.f32.vlgmr.msra.gmra.mrb[0].mxu1 %vm504_vm0, %v473_v23  ;;  %v10964_v23 = vld [vmem:[%s20779_s8 + $0x1b0] sm:$0xff] }
 0x123   : > { %v15171_v22 = vpop.permute.xlu1 %3244  ;;  %v15173_v57 = vpop.permute.xlu0 %3239  ;;  %12531 = vmatprep.mubr.msk.f32.mxu1 %vm504_vm0, %v474_v30 }
 0x124   : > { %21031 = vst [vmem:[#allocation51_spill] sm:$0xff] %v15171_v22  ;;  %21032 = vst [vmem:[#allocation52_spill] sm:$0xff] %v15173_v57  ;;  %3354 = vperm.xlu1 %14057, %v10933_v6   ;;  %3349 = vperm.xlu0 %14056, %v10932_v39   ;;  %v477_v6 = vld [vmem:[%s20776_s5 + $0x28] sm:$0xff]  ;;  %v478_v39 = vld [vmem:[%s20776_s5 + $0x30] sm:$0xff] }
 0x126   : > { %12532 = vmatmul.mubr.msk.f32.gmra.mrb[2].mxu1 %vm504_vm0, %v475_v7  ;;  %v10965_v7 = vld [vmem:[%s20779_s8 + $0x1b8] sm:$0xff] }
 0x127   : > { %v15189_v30 = vpop.permute.xlu1 %3469  ;;  %v15191_v46 = vpop.permute.xlu0 %3464  ;;  %12534 = vmatprep.mubr.msk.f32.mxu1 %vm504_vm0, %v476_v54 }
 0x128   : > { %21033 = vst [vmem:[#allocation53_spill] sm:$0xff] %v15189_v30  ;;  %21034 = vst [vmem:[#allocation54_spill] sm:$0xff] %v15191_v46  ;;  %3574 = vperm.xlu1 %14057, %v10964_v23   ;;  %3887 = vperm.xlu0 %14056, %v3773_v38   ;;  %v479_v38 = vld [vmem:[%s20776_s5 + $0x38] sm:$0xff]  ;;  %v480_v23 = vld [vmem:[%s20776_s5 + $0x40] sm:$0xff] }
 0x12a   : > { %12535 = vmatmul.mubr.msk.f32.gmra.mrb[4].mxu1 %vm504_vm0, %v477_v6  ;;  %v10935_v6 = vld [vmem:[%s20778_s7 + $0x1c8] sm:$0xff] }
 0x12b   : > { %v15207_v54 = vpop.permute.xlu1 %3254  ;;  %v15209_v15 = vpop.permute.xlu0 %3249  ;;  %12537 = vmatprep.mubr.msk.f32.mxu1 %vm504_vm0, %v478_v39 }
 0x12c   : > { %21035 = vst [vmem:[#allocation55_spill] sm:$0xff] %v15207_v54  ;;  %21036 = vst [vmem:[#allocation56_spill] sm:$0xff] %v15209_v15  ;;  %3579 = vperm.xlu1 %14057, %v10965_v7   ;;  %3892 = vperm.xlu0 %14056, %v3774_v47   ;;  %v481_v47 = vld [vmem:[%s20776_s5 + $0x48] sm:$0xff]  ;;  %v482_v7 = vld [vmem:[%s20776_s5 + $0x50] sm:$0xff] }
 0x12e   : > { %12538 = vmatmul.mubr.msk.f32.gmra.mrb[6].mxu1 %vm504_vm0, %v479_v38  ;;  %v10966_v38 = vld [vmem:[%s20779_s8 + $0x1c0] sm:$0xff] }
 0x12f   : > { %v15225_v39 = vpop.permute.xlu1 %3474  ;;  %v15227_v15 = vpop.permute.xlu0 %3787  ;;  %12540 = vmatprep.mubr.msk.f32.mxu1 %vm504_vm0, %v480_v23 }
 0x130   : > { %21037 = vst [vmem:[#allocation57_spill] sm:$0xff] %v15225_v39  ;;  %21038 = vst [vmem:[#allocation58_spill] sm:$0xff] %v15227_v15  ;;  %3364 = vperm.xlu1 %14057, %v10935_v6   ;;  %3359 = vperm.xlu0 %14056, %v10934_v31   ;;  %v3775_v15 = vld [vmem:[%s20780_s9 + $0xb0] sm:$0xff]  ;;  %v483_v31 = vld [vmem:[%s20776_s5 + $0x58] sm:$0xff] }
 0x131   : > { %v484_v6 = vld [vmem:[%s20776_s5 + $0x60] sm:$0xff] }
 0x132   : > { %12541 = vmatmul.mubr.msk.f32.gmra.mrb[8].mxu1 %vm504_vm0, %v481_v47  ;;  %v10967_v47 = vld [vmem:[%s20779_s8 + $0x1c8] sm:$0xff] }
 0x133   : > { %v15243_v23 = vpop.permute.xlu1 %3479  ;;  %v15245_v39 = vpop.permute.xlu0 %3792  ;;  %12543 = vmatprep.mubr.msk.f32.mxu1 %vm504_vm0, %v482_v7 }
 0x134   : > { %21039 = vst [vmem:[#allocation59_spill] sm:$0xff] %v15243_v23  ;;  %21040 = vst [vmem:[#allocation60_spill] sm:$0xff] %v15245_v39  ;;  %3584 = vperm.xlu1 %14057, %v10966_v38   ;;  %3897 = vperm.xlu0 %14056, %v3775_v15   ;;  %v3776_v39 = vld [vmem:[%s20780_s9 + $0xb8] sm:$0xff]  ;;  %v485_v15 = vld [vmem:[%s20776_s5 + $0x68] sm:$0xff] }
 0x135   : > { %v486_v38 = vld [vmem:[%s20776_s5 + $0x70] sm:$0xff] }
 0x136   : > { %12544 = vmatmul.mubr.msk.f32.gmra.mrb[10].mxu1 %vm504_vm0, %v483_v31  ;;  %v10937_v31 = vld [vmem:[%s20778_s7 + $0x1d8] sm:$0xff] }
 0x137   : > { %v15261_v7 = vpop.permute.xlu1 %3264  ;;  %v15263_v23 = vpop.permute.xlu0 %3259  ;;  %12546 = vmatprep.mubr.msk.f32.mxu1 %vm504_vm0, %v484_v6 }
 0x138   : > { %21041 = vst [vmem:[#allocation61_spill] sm:$0xff] %v15261_v7  ;;  %21042 = vst [vmem:[#allocation62_spill] sm:$0xff] %v15263_v23  ;;  %3589 = vperm.xlu1 %14057, %v10967_v47   ;;  %3902 = vperm.xlu0 %14056, %v3776_v39   ;;  %v10936_v23 = vld [vmem:[%s20778_s7 + $0x1d0] sm:$0xff]  ;;  %v487_v39 = vld [vmem:[%s20776_s5 + $0x78] sm:$0xff] }
 0x139   : > { %v488_v47 = vld [vmem:[%s20776_s5 + $0x80] sm:$0xff] }
 0x13a   : > { %12547 = vmatmul.mubr.msk.f32.gmra.mrb[12].mxu1 %vm504_vm0, %v485_v15  ;;  %v10968_v15 = vld [vmem:[%s20779_s8 + $0x1d0] sm:$0xff] }
 0x13b   : > { %v15279_v6 = vpop.permute.xlu1 %3484  ;;  %v15281_v7 = vpop.permute.xlu0 %3797  ;;  %12549 = vmatprep.mubr.msk.f32.mxu1 %vm504_vm0, %v486_v38 }
 0x13c   : > { %21043 = vst [vmem:[#allocation63_spill] sm:$0xff] %v15279_v6  ;;  %21044 = vst [vmem:[#allocation64_spill] sm:$0xff] %v15281_v7  ;;  %3374 = vperm.xlu1 %14057, %v10937_v31   ;;  %3369 = vperm.xlu0 %14056, %v10936_v23   ;;  %v3777_v7 = vld [vmem:[%s20780_s9 + $0xc0] sm:$0xff]  ;;  %v489_v23 = vld [vmem:[%s20776_s5 + $0x88] sm:$0xff] }
 0x13d   : > { %v490_v31 = vld [vmem:[%s20776_s5 + $0x90] sm:$0xff] }
 0x13e   : > { %12550 = vmatmul.mubr.msk.f32.gmra.mrb[14].mxu1 %vm504_vm0, %v487_v39  ;;  %v10969_v39 = vld [vmem:[%s20779_s8 + $0x1d8] sm:$0xff] }
 0x13f   : > { %v15297_v38 = vpop.permute.xlu1 %3489  ;;  %v15299_v6 = vpop.permute.xlu0 %3802  ;;  %12552 = vmatprep.mubr.msk.f32.mxu1 %vm504_vm0, %v488_v47 }
 0x140   : > { %21045 = vst [vmem:[#allocation65_spill] sm:$0xff] %v15297_v38  ;;  %21046 = vst [vmem:[#allocation66_spill] sm:$0xff] %v15299_v6  ;;  %3594 = vperm.xlu1 %14057, %v10968_v15   ;;  %3907 = vperm.xlu0 %14056, %v3777_v7   ;;  %v3778_v6 = vld [vmem:[%s20780_s9 + $0xc8] sm:$0xff]  ;;  %v491_v7 = vld [vmem:[%s20776_s5 + $0x98] sm:$0xff] }
 0x141   : > { %v492_v15 = vld [vmem:[%s20776_s5 + $0xa0] sm:$0xff] }
 0x142   : > { %12553 = vmatmul.mubr.msk.f32.gmra.mrb[16].mxu1 %vm504_vm0, %v489_v23  ;;  %v3779_v23 = vld [vmem:[%s20780_s9 + $0xd0] sm:$0xff] }
 0x143   : > { %v15315_v47 = vpop.permute.xlu1 %3274  ;;  %v15317_v38 = vpop.permute.xlu0 %3269  ;;  %12555 = vmatprep.mubr.msk.f32.mxu1 %vm504_vm0, %v490_v31 }
 0x144   : > { %21047 = vst [vmem:[#allocation67_spill] sm:$0xff] %v15315_v47  ;;  %21048 = vst [vmem:[#allocation68_spill] sm:$0xff] %v15317_v38  ;;  %3599 = vperm.xlu1 %14057, %v10969_v39   ;;  %3912 = vperm.xlu0 %14056, %v3778_v6   ;;  %v10938_v38 = vld [vmem:[%s20778_s7 + $0x1e0] sm:$0xff]  ;;  %v493_v6 = vld [vmem:[%s20776_s5 + $0xa8] sm:$0xff] }
 0x145   : > { %v494_v39 = vld [vmem:[%s20776_s5 + $0xb0] sm:$0xff] }
 0x146   : > { %12556 = vmatmul.mubr.msk.f32.gmra.mrb[18].mxu1 %vm504_vm0, %v491_v7  ;;  %v3780_v7 = vld [vmem:[%s20780_s9 + $0xd8] sm:$0xff] }
 0x147   : > { %v15333_v31 = vpop.permute.xlu1 %3494  ;;  %v15335_v47 = vpop.permute.xlu0 %3807  ;;  %12558 = vmatprep.mubr.msk.f32.mxu1 %vm504_vm0, %v492_v15 }
 0x148   : > { %21049 = vst [vmem:[#allocation69_spill] sm:$0xff] %v15333_v31  ;;  %21050 = vst [vmem:[#allocation70_spill] sm:$0xff] %v15335_v47  ;;  %3917 = vperm.xlu1 %14057, %v3779_v23   ;;  %3379 = vperm.xlu0 %14056, %v10938_v38   ;;  %v10970_v47 = vld [vmem:[%s20779_s8 + $0x1e0] sm:$0xff]  ;;  %v495_v38 = vld [vmem:[%s20776_s5 + $0xb8] sm:$0xff] }
 0x149   : > { %v496_v23 = vld [vmem:[%s20776_s5 + $0xc0] sm:$0xff] }
 0x14a   : > { %12559 = vmatmul.mubr.msk.f32.gmra.mrb[20].mxu1 %vm504_vm0, %v493_v6  ;;  %v3782_v6 = vld [vmem:[%s20780_s9 + $0xe8] sm:$0xff] }
 0x14b   : > { %v15351_v15 = vpop.permute.xlu1 %3499  ;;  %v15353_v31 = vpop.permute.xlu0 %3812  ;;  %12561 = vmatprep.mubr.msk.f32.mxu1 %vm504_vm0, %v494_v39 }
 0x14c   : > { %21051 = vst [vmem:[#allocation71_spill] sm:$0xff] %v15351_v15  ;;  %21052 = vst [vmem:[#allocation72_spill] sm:$0xff] %v15353_v31  ;;  %3922 = vperm.xlu1 %14057, %v3780_v7   ;;  %3604 = vperm.xlu0 %14056, %v10970_v47   ;;  %v3781_v31 = vld [vmem:[%s20780_s9 + $0xe0] sm:$0xff]  ;;  %v497_v47 = vld [vmem:[%s20776_s5 + $0xc8] sm:$0xff] }
 0x14d   : > { %v498_v7 = vld [vmem:[%s20776_s5 + $0xd0] sm:$0xff] }
 0x14e   : > { %12562 = vmatmul.mubr.msk.f32.gmra.mrb[22].mxu1 %vm504_vm0, %v495_v38  ;;  %v3784_v38 = vld [vmem:[%s20780_s9 + $0xf8] sm:$0xff] }
 0x14f   : > { %v15369_v39 = vpop.permute.xlu1 %3284  ;;  %v15371_v15 = vpop.permute.xlu0 %3279  ;;  %12564 = vmatprep.mubr.msk.f32.mxu1 %vm504_vm0, %v496_v23 }
 0x150   : > { %21053 = vst [vmem:[#allocation73_spill] sm:$0xff] %v15369_v39  ;;  %21054 = vst [vmem:[#allocation74_spill] sm:$0xff] %v15371_v15  ;;  %3932 = vperm.xlu1 %14057, %v3782_v6   ;;  %3927 = vperm.xlu0 %14056, %v3781_v31   ;;  %v3783_v15 = vld [vmem:[%s20780_s9 + $0xf0] sm:$0xff]  ;;  %v499_v31 = vld [vmem:[%s20776_s5 + $0xd8] sm:$0xff] }
 0x151   : > { %v500_v6 = vld [vmem:[%s20776_s5 + $0xe0] sm:$0xff] }
 0x152   : > { %12565 = vmatmul.mubr.msk.f32.gmra.mrb[24].mxu1 %vm504_vm0, %v497_v47  ;;  %v11071_v47 = vld [vmem:[%s20780_s9 + $0x208] sm:$0xff] }
 0x153   : > { %v15387_v23 = vpop.permute.xlu1 %3504  ;;  %v15389_v39 = vpop.permute.xlu0 %3817  ;;  %12567 = vmatprep.mubr.msk.f32.mxu1 %vm504_vm0, %v498_v7 }
 0x154   : > { %21055 = vst [vmem:[#allocation75_spill] sm:$0xff] %v15387_v23  ;;  %21056 = vst [vmem:[#allocation76_spill] sm:$0xff] %v15389_v39  ;;  %3942 = vperm.xlu1 %14057, %v3784_v38   ;;  %3937 = vperm.xlu0 %14056, %v3783_v15   ;;  %v11070_v39 = vld [vmem:[%s20780_s9 + $0x200] sm:$0xff]  ;;  %v501_v15 = vld [vmem:[%s20776_s5 + $0xe8] sm:$0xff] }
 0x155   : > { %v502_v38 = vld [vmem:[%s20776_s5 + $0xf0] sm:$0xff] }
 0x156   : > { %12568 = vmatmul.mubr.msk.f32.gmra.mrb[26].mxu1 %vm504_vm0, %v499_v31  ;;  %v11073_v31 = vld [vmem:[%s20780_s9 + $0x218] sm:$0xff] }
 0x157   : > { %v15405_v7 = vpop.permute.xlu1 %3509  ;;  %v15407_v23 = vpop.permute.xlu0 %3822  ;;  %12570 = vmatprep.mubr.msk.f32.mxu1 %vm504_vm0, %v500_v6 }
 0x158   : > { %21057 = vst [vmem:[#allocation77_spill] sm:$0xff] %v15405_v7  ;;  %21058 = vst [vmem:[#allocation78_spill] sm:$0xff] %v15407_v23  ;;  %4953 = vperm.xlu1 %14057, %v11071_v47   ;;  %4948 = vperm.xlu0 %14056, %v11070_v39   ;;  %v11072_v23 = vld [vmem:[%s20780_s9 + $0x210] sm:$0xff]  ;;  %v503_v39 = vld [vmem:[%s20776_s5 + $0xf8] sm:$0xff] }
 0x159   : > { %v11075_v47 = vld [vmem:[%s20780_s9 + $0x228] sm:$0xff] }
 0x15a   : > { %12571 = vmatmul.mubr.msk.f32.gmra.mrb[28].mxu1 %vm504_vm0, %v501_v15  ;;  %v11074_v15 = vld [vmem:[%s20780_s9 + $0x220] sm:$0xff] }
 0x15b   : > { %v15423_v6 = vpop.permute.xlu1 %3294  ;;  %v15425_v7 = vpop.permute.xlu0 %3289  ;;  %12573 = vmatprep.mubr.msk.f32.mxu1 %vm504_vm0, %v502_v38  ;;  %v14250_v38 = vld [vmem:[%s20777_s6 + $0x8] sm:$0xff] }
 0x15c   : > { %21059 = vst [vmem:[#allocation79_spill] sm:$0xff] %v15423_v6  ;;  %21060 = vst [vmem:[#allocation80_spill] sm:$0xff] %v15425_v7  ;;  %4963 = vperm.xlu1 %14057, %v11073_v31   ;;  %4958 = vperm.xlu0 %14056, %v11072_v23   ;;  %v11077_v23 = vld [vmem:[%s20780_s9 + $0x238] sm:$0xff]  ;;  %v11076_v31 = vld [vmem:[%s20780_s9 + $0x230] sm:$0xff] }
 0x15e   : > { %12574 = vmatmul.mubr.msk.f32.gmra.mrb[30].mxu1 %vm504_vm0, %v503_v39 }
 0x15f   : > { %v15438_v6 = vpop.permute.xlu1 %3514  ;;  %v15440_v7 = vpop.permute.xlu0 %3827  ;;  %986 = vmatprep.mubr.f32.mxu1 %v14250_v38  ;;  %v11079_v38 = vld [vmem:[%s20780_s9 + $0x248] sm:$0xff] }
 0x160   : > { %21061 = vst [vmem:[#allocation81_spill] sm:$0xff] %v15438_v6  ;;  %21062 = vst [vmem:[#allocation82_spill] sm:$0xff] %v15440_v7  ;;  %4973 = vperm.xlu1 %14057, %v11075_v47   ;;  %4968 = vperm.xlu0 %14056, %v11074_v15   ;;  %v11078_v47 = vld [vmem:[%s20780_s9 + $0x240] sm:$0xff] }
 0x163   : > { %v15451_v39 = vpop.permute.xlu1 %3519  ;;  %v15453_v6 = vpop.permute.xlu0 %3832 }
 0x164   : > { %21063 = vst [vmem:[#allocation83_spill] sm:$0xff] %v15451_v39  ;;  %21064 = vst [vmem:[#allocation84_spill] sm:$0xff] %v15453_v6  ;;  %4983 = vperm.xlu1 %14057, %v11077_v23   ;;  %4978 = vperm.xlu0 %14056, %v11076_v31   ;;  %v11081_v6 = vld [vmem:[%s20780_s9 + $0x258] sm:$0xff]  ;;  %v11080_v23 = vld [vmem:[%s20780_s9 + $0x250] sm:$0xff] }
 0x167   : > { %v15461_v15 = vpop.permute.xlu1 %3304  ;;  %v15463_v7 = vpop.permute.xlu0 %3299 }
 0x168   : > { %21065 = vst [vmem:[#allocation85_spill] sm:$0xff] %v15461_v15  ;;  %21066 = vst [vmem:[#allocation86_spill] sm:$0xff] %v15463_v7  ;;  %4993 = vperm.xlu1 %14057, %v11079_v38   ;;  %4988 = vperm.xlu0 %14056, %v11078_v47   ;;  %v11083_v7 = vld [vmem:[%s20780_s9 + $0x268] sm:$0xff]  ;;  %v11082_v38 = vld [vmem:[%s20780_s9 + $0x260] sm:$0xff] }
 0x16b   : > { %v15471_v31 = vpop.permute.xlu1 %3524  ;;  %v15473_v39 = vpop.permute.xlu0 %3837 }
 0x16c   : > { %21067 = vst [vmem:[#allocation87_spill] sm:$0xff] %v15471_v31  ;;  %21068 = vst [vmem:[#allocation88_spill] sm:$0xff] %v15473_v39  ;;  %5003 = vperm.xlu1 %14057, %v11081_v6   ;;  %4998 = vperm.xlu0 %14056, %v11080_v23   ;;  %v11085_v39 = vld [vmem:[%s20780_s9 + $0x278] sm:$0xff]  ;;  %v11084_v6 = vld [vmem:[%s20780_s9 + $0x270] sm:$0xff] }
 0x16f   : > { %v15481_v47 = vpop.permute.xlu1 %3529  ;;  %v15483_v15 = vpop.permute.xlu0 %3842 }
 0x170   : > { %21069 = vst [vmem:[#allocation89_spill] sm:$0xff] %v15481_v47  ;;  %21070 = vst [vmem:[#allocation90_spill] sm:$0xff] %v15483_v15  ;;  %5013 = vperm.xlu1 %14057, %v11083_v7   ;;  %5008 = vperm.xlu0 %14056, %v11082_v38   ;;  %v11087_v15 = vld [vmem:[%s20780_s9 + $0x288] sm:$0xff]  ;;  %v11086_v7 = vld [vmem:[%s20780_s9 + $0x280] sm:$0xff] }
 0x173   : > { %v15491_v23 = vpop.permute.xlu1 %3314  ;;  %v15493_v31 = vpop.permute.xlu0 %3309 }
 0x174   : > { %21071 = vst [vmem:[#allocation91_spill] sm:$0xff] %v15491_v23  ;;  %21072 = vst [vmem:[#allocation92_spill] sm:$0xff] %v15493_v31  ;;  %5023 = vperm.xlu1 %14057, %v11085_v39   ;;  %5018 = vperm.xlu0 %14056, %v11084_v6   ;;  %v11089_v31 = vld [vmem:[%s20780_s9 + $0x298] sm:$0xff]  ;;  %v11088_v39 = vld [vmem:[%s20780_s9 + $0x290] sm:$0xff] }
 0x177   : > { %v15501_v38 = vpop.permute.xlu1 %3534  ;;  %v15503_v47 = vpop.permute.xlu0 %3847 }
 0x178   : > { %21073 = vst [vmem:[#allocation93_spill] sm:$0xff] %v15501_v38  ;;  %21074 = vst [vmem:[#allocation94_spill] sm:$0xff] %v15503_v47  ;;  %5033 = vperm.xlu1 %14057, %v11087_v15   ;;  %5028 = vperm.xlu0 %14056, %v11086_v7   ;;  %v11091_v47 = vld [vmem:[%s20780_s9 + $0x2a8] sm:$0xff]  ;;  %v11090_v15 = vld [vmem:[%s20780_s9 + $0x2a0] sm:$0xff] }
 0x17b   : > { %v15511_v6 = vpop.permute.xlu1 %3539  ;;  %v15513_v23 = vpop.permute.xlu0 %3852 }
 0x17c   : > { %21075 = vst [vmem:[#allocation95_spill] sm:$0xff] %v15511_v6  ;;  %21076 = vst [vmem:[#allocation96_spill] sm:$0xff] %v15513_v23  ;;  %5043 = vperm.xlu1 %14057, %v11089_v31   ;;  %5038 = vperm.xlu0 %14056, %v11088_v39   ;;  %v11093_v23 = vld [vmem:[%s20780_s9 + $0x2b8] sm:$0xff]  ;;  %v11092_v31 = vld [vmem:[%s20780_s9 + $0x2b0] sm:$0xff] }
 0x17f   : > { %v15521_v7 = vpop.permute.xlu1 %3324  ;;  %v15523_v38 = vpop.permute.xlu0 %3319 }
 0x180   : > { %21077 = vst [vmem:[#allocation97_spill] sm:$0xff] %v15521_v7  ;;  %21078 = vst [vmem:[#allocation98_spill] sm:$0xff] %v15523_v38  ;;  %5053 = vperm.xlu1 %14057, %v11091_v47   ;;  %5048 = vperm.xlu0 %14056, %v11090_v15   ;;  %v11095_v38 = vld [vmem:[%s20780_s9 + $0x2c8] sm:$0xff]  ;;  %v11094_v47 = vld [vmem:[%s20780_s9 + $0x2c0] sm:$0xff] }
 0x183   : > { %v15531_v39 = vpop.permute.xlu1 %3544  ;;  %v15533_v6 = vpop.permute.xlu0 %3857 }
 0x184   : > { %21079 = vst [vmem:[#allocation99_spill] sm:$0xff] %v15531_v39  ;;  %21080 = vst [vmem:[#allocation100_spill] sm:$0xff] %v15533_v6  ;;  %5063 = vperm.xlu1 %14057, %v11093_v23   ;;  %5058 = vperm.xlu0 %14056, %v11092_v31   ;;  %v11097_v6 = vld [vmem:[%s20780_s9 + $0x2d8] sm:$0xff]  ;;  %v11096_v23 = vld [vmem:[%s20780_s9 + $0x2d0] sm:$0xff] }
 0x187   : > { %v15541_v15 = vpop.permute.xlu1 %3549  ;;  %v15543_v7 = vpop.permute.xlu0 %3862 }
 0x188   : > { %21081 = vst [vmem:[#allocation101_spill] sm:$0xff] %v15541_v15  ;;  %21082 = vst [vmem:[#allocation102_spill] sm:$0xff] %v15543_v7  ;;  %5073 = vperm.xlu1 %14057, %v11095_v38   ;;  %5068 = vperm.xlu0 %14056, %v11094_v47   ;;  %v11099_v7 = vld [vmem:[%s20780_s9 + $0x2e8] sm:$0xff]  ;;  %v11098_v38 = vld [vmem:[%s20780_s9 + $0x2e0] sm:$0xff] }
 0x18b   : > { %v15551_v31 = vpop.permute.xlu1 %3334  ;;  %v15553_v39 = vpop.permute.xlu0 %3329 }
 0x18c   : > { %21083 = vst [vmem:[#allocation103_spill] sm:$0xff] %v15551_v31  ;;  %21084 = vst [vmem:[#allocation104_spill] sm:$0xff] %v15553_v39  ;;  %5083 = vperm.xlu1 %14057, %v11097_v6   ;;  %5078 = vperm.xlu0 %14056, %v11096_v23   ;;  %v11101_v31 = vld [vmem:[%s20780_s9 + $0x2f8] sm:$0xff]  ;;  %v11100_v6 = vld [vmem:[%s20780_s9 + $0x2f0] sm:$0xff] }
 0x18f   : > { %v15561_v47 = vpop.permute.xlu1 %3554  ;;  %v15563_v15 = vpop.permute.xlu0 %3867 }
 0x190   : > { %21085 = vst [vmem:[#allocation105_spill] sm:$0xff] %v15561_v47  ;;  %21086 = vst [vmem:[#allocation106_spill] sm:$0xff] %v15563_v15  ;;  %5093 = vperm.xlu1 %14057, %v11099_v7   ;;  %5088 = vperm.xlu0 %14056, %v11098_v38   ;;  %v11135_v15 = vld [vmem:[%s20780_s9 + $0x308] sm:$0xff]  ;;  %v11134_v7 = vld [vmem:[%s20780_s9 + $0x300] sm:$0xff] }
 0x193   : > { %v15571_v23 = vpop.permute.xlu1 %3559  ;;  %v15573_v39 = vpop.permute.xlu0 %3872 }
 0x194   : > { %21087 = vst [vmem:[#allocation107_spill] sm:$0xff] %v15571_v23  ;;  %21088 = vst [vmem:[#allocation108_spill] sm:$0xff] %v15573_v39  ;;  %5103 = vperm.xlu1 %14057, %v11101_v31   ;;  %5098 = vperm.xlu0 %14056, %v11100_v6   ;;  %v11137_v39 = vld [vmem:[%s20780_s9 + $0x318] sm:$0xff]  ;;  %v11136_v31 = vld [vmem:[%s20780_s9 + $0x310] sm:$0xff] }
 0x197   : > { %v15581_v38 = vpop.permute.xlu1 %3344  ;;  %v15583_v47 = vpop.permute.xlu0 %3339 }
 0x198   : > { %21089 = vst [vmem:[#allocation109_spill] sm:$0xff] %v15581_v38  ;;  %21090 = vst [vmem:[#allocation110_spill] sm:$0xff] %v15583_v47  ;;  %5533 = vperm.xlu1 %14057, %v11135_v15   ;;  %5528 = vperm.xlu0 %14056, %v11134_v7   ;;  %v11139_v47 = vld [vmem:[%s20780_s9 + $0x328] sm:$0xff]  ;;  %v11138_v15 = vld [vmem:[%s20780_s9 + $0x320] sm:$0xff] }
 0x19b   : > { %v15591_v6 = vpop.permute.xlu1 %3564  ;;  %v15593_v23 = vpop.permute.xlu0 %3877 }
 0x19c   : > { %21091 = vst [vmem:[#allocation111_spill] sm:$0xff] %v15591_v6  ;;  %21092 = vst [vmem:[#allocation112_spill] sm:$0xff] %v15593_v23  ;;  %5543 = vperm.xlu1 %14057, %v11137_v39   ;;  %5538 = vperm.xlu0 %14056, %v11136_v31   ;;  %v11141_v23 = vld [vmem:[%s20780_s9 + $0x338] sm:$0xff]  ;;  %v11140_v39 = vld [vmem:[%s20780_s9 + $0x330] sm:$0xff] }
 0x19f   : > { %v15601_v7 = vpop.permute.xlu1 %3569  ;;  %v15603_v38 = vpop.permute.xlu0 %3882 }
 0x1a0   : > { %21093 = vst [vmem:[#allocation113_spill] sm:$0xff] %v15601_v7  ;;  %21094 = vst [vmem:[#allocation114_spill] sm:$0xff] %v15603_v38  ;;  %5553 = vperm.xlu1 %14057, %v11139_v47   ;;  %5548 = vperm.xlu0 %14056, %v11138_v15   ;;  %v11143_v38 = vld [vmem:[%s20780_s9 + $0x348] sm:$0xff]  ;;  %v11142_v47 = vld [vmem:[%s20780_s9 + $0x340] sm:$0xff] }
 0x1a3   : > { %v15611_v31 = vpop.permute.xlu1 %3354  ;;  %v15613_v6 = vpop.permute.xlu0 %3349 }
 0x1a4   : > { %21095 = vst [vmem:[#allocation115_spill] sm:$0xff] %v15611_v31  ;;  %21096 = vst [vmem:[#allocation116_spill] sm:$0xff] %v15613_v6  ;;  %5563 = vperm.xlu1 %14057, %v11141_v23   ;;  %5558 = vperm.xlu0 %14056, %v11140_v39   ;;  %v11145_v31 = vld [vmem:[%s20780_s9 + $0x358] sm:$0xff]  ;;  %v11144_v23 = vld [vmem:[%s20780_s9 + $0x350] sm:$0xff] }
 0x1a7   : > { %v15621_v15 = vpop.permute.xlu1 %3574  ;;  %v15623_v7 = vpop.permute.xlu0 %3887 }
 0x1a8   : > { %21097 = vst [vmem:[#allocation117_spill] sm:$0xff] %v15621_v15  ;;  %21098 = vst [vmem:[#allocation118_spill] sm:$0xff] %v15623_v7  ;;  %5573 = vperm.xlu1 %14057, %v11143_v38   ;;  %5568 = vperm.xlu0 %14056, %v11142_v47   ;;  %v11147_v7 = vld [vmem:[%s20780_s9 + $0x368] sm:$0xff]  ;;  %v11146_v38 = vld [vmem:[%s20780_s9 + $0x360] sm:$0xff] }
 0x1ab   : > { %v15631_v39 = vpop.permute.xlu1 %3579  ;;  %v15633_v6 = vpop.permute.xlu0 %3892 }
 0x1ac   : > { %21099 = vst [vmem:[#allocation119_spill] sm:$0xff] %v15631_v39  ;;  %21100 = vst [vmem:[#allocation120_spill] sm:$0xff] %v15633_v6  ;;  %5583 = vperm.xlu1 %14057, %v11145_v31   ;;  %5578 = vperm.xlu0 %14056, %v11144_v23   ;;  %v11149_v6 = vld [vmem:[%s20780_s9 + $0x378] sm:$0xff]  ;;  %v11148_v31 = vld [vmem:[%s20780_s9 + $0x370] sm:$0xff] }
 0x1af   : > { %v15641_v47 = vpop.permute.xlu1 %3364  ;;  %v15643_v15 = vpop.permute.xlu0 %3359 }
 0x1b0   : > { %21101 = vst [vmem:[#allocation121_spill] sm:$0xff] %v15641_v47  ;;  %21102 = vst [vmem:[#allocation122_spill] sm:$0xff] %v15643_v15  ;;  %5593 = vperm.xlu1 %14057, %v11147_v7   ;;  %5588 = vperm.xlu0 %14056, %v11146_v38   ;;  %v11151_v47 = vld [vmem:[%s20780_s9 + $0x388] sm:$0xff]  ;;  %v11150_v7 = vld [vmem:[%s20780_s9 + $0x380] sm:$0xff] }
 0x1b3   : > { %v15651_v23 = vpop.permute.xlu1 %3584  ;;  %v15653_v39 = vpop.permute.xlu0 %3897 }
 0x1b4   : > { %21103 = vst [vmem:[#allocation123_spill] sm:$0xff] %v15651_v23  ;;  %21104 = vst [vmem:[#allocation124_spill] sm:$0xff] %v15653_v39  ;;  %5603 = vperm.xlu1 %14057, %v11149_v6   ;;  %5598 = vperm.xlu0 %14056, %v11148_v31   ;;  %v11153_v39 = vld [vmem:[%s20780_s9 + $0x398] sm:$0xff]  ;;  %v11152_v6 = vld [vmem:[%s20780_s9 + $0x390] sm:$0xff] }
 0x1b7   : > { %v15661_v38 = vpop.permute.xlu1 %3589  ;;  %v15663_v15 = vpop.permute.xlu0 %3902 }
 0x1b8   : > { %21105 = vst [vmem:[#allocation125_spill] sm:$0xff] %v15661_v38  ;;  %21106 = vst [vmem:[#allocation126_spill] sm:$0xff] %v15663_v15  ;;  %5613 = vperm.xlu1 %14057, %v11151_v47   ;;  %5608 = vperm.xlu0 %14056, %v11150_v7   ;;  %v11155_v15 = vld [vmem:[%s20780_s9 + $0x3a8] sm:$0xff]  ;;  %v11154_v47 = vld [vmem:[%s20780_s9 + $0x3a0] sm:$0xff] }
 0x1bb   : > { %v15671_v31 = vpop.permute.xlu1 %3374  ;;  %v15673_v23 = vpop.permute.xlu0 %3369 }
 0x1bc   : > { %21107 = vst [vmem:[#allocation127_spill] sm:$0xff] %v15671_v31  ;;  %21108 = vst [vmem:[#allocation128_spill] sm:$0xff] %v15673_v23  ;;  %5623 = vperm.xlu1 %14057, %v11153_v39   ;;  %5618 = vperm.xlu0 %14056, %v11152_v6   ;;  %v11157_v31 = vld [vmem:[%s20780_s9 + $0x3b8] sm:$0xff]  ;;  %v11156_v39 = vld [vmem:[%s20780_s9 + $0x3b0] sm:$0xff] }
 0x1bf   : > { %v15681_v7 = vpop.permute.xlu1 %3594  ;;  %v15683_v38 = vpop.permute.xlu0 %3907 }
 0x1c0   : > { %21109 = vst [vmem:[#allocation129_spill] sm:$0xff] %v15681_v7  ;;  %21110 = vst [vmem:[#allocation130_spill] sm:$0xff] %v15683_v38  ;;  %5633 = vperm.xlu1 %14057, %v11155_v15   ;;  %5628 = vperm.xlu0 %14056, %v11154_v47   ;;  %v11159_v38 = vld [vmem:[%s20780_s9 + $0x3c8] sm:$0xff]  ;;  %v11158_v15 = vld [vmem:[%s20780_s9 + $0x3c0] sm:$0xff] }
 0x1c3   : > { %v15691_v6 = vpop.permute.xlu1 %3599  ;;  %v15693_v23 = vpop.permute.xlu0 %3912 }
 0x1c4   : > { %21111 = vst [vmem:[#allocation131_spill] sm:$0xff] %v15691_v6  ;;  %21112 = vst [vmem:[#allocation132_spill] sm:$0xff] %v15693_v23  ;;  %5643 = vperm.xlu1 %14057, %v11157_v31   ;;  %5638 = vperm.xlu0 %14056, %v11156_v39   ;;  %v11161_v23 = vld [vmem:[%s20780_s9 + $0x3d8] sm:$0xff]  ;;  %v11160_v31 = vld [vmem:[%s20780_s9 + $0x3d0] sm:$0xff] }
 0x1c7   : > { %v15701_v47 = vpop.permute.xlu1 %3917  ;;  %v15703_v7 = vpop.permute.xlu0 %3379 }
 0x1c8   : > { %21113 = vst [vmem:[#allocation133_spill] sm:$0xff] %v15701_v47  ;;  %21114 = vst [vmem:[#allocation134_spill] sm:$0xff] %v15703_v7  ;;  %5653 = vperm.xlu1 %14057, %v11159_v38   ;;  %5648 = vperm.xlu0 %14056, %v11158_v15   ;;  %v11163_v47 = vld [vmem:[%s20780_s9 + $0x3e8] sm:$0xff]  ;;  %v11162_v38 = vld [vmem:[%s20780_s9 + $0x3e0] sm:$0xff] }
 0x1cb   : > { %v15711_v39 = vpop.permute.xlu1 %3922  ;;  %v15713_v6 = vpop.permute.xlu0 %3604 }
 0x1cc   : > { %21115 = vst [vmem:[#allocation135_spill] sm:$0xff] %v15711_v39  ;;  %21116 = vst [vmem:[#allocation136_spill] sm:$0xff] %v15713_v6  ;;  %5663 = vperm.xlu1 %14057, %v11161_v23   ;;  %5658 = vperm.xlu0 %14056, %v11160_v31   ;;  %v11165_v39 = vld [vmem:[%s20780_s9 + $0x3f8] sm:$0xff]  ;;  %v11164_v23 = vld [vmem:[%s20780_s9 + $0x3f0] sm:$0xff] }
 0x1cf   : > { %v15721_v15 = vpop.permute.xlu1 %3932  ;;  %v15723_v7 = vpop.permute.xlu0 %3927 }
 0x1d0   : > { %21117 = vst [vmem:[#allocation137_spill] sm:$0xff] %v15721_v15  ;;  %21118 = vst [vmem:[#allocation138_spill] sm:$0xff] %v15723_v7  ;;  %5673 = vperm.xlu1 %14057, %v11163_v47   ;;  %5668 = vperm.xlu0 %14056, %v11162_v38   ;;  %v11199_v15 = vld [vmem:[%s20780_s9 + $0x408] sm:$0xff]  ;;  %v11198_v47 = vld [vmem:[%s20780_s9 + $0x400] sm:$0xff] }
 0x1d3   : > { %v15731_v31 = vpop.permute.xlu1 %3942  ;;  %v15733_v6 = vpop.permute.xlu0 %3937 }
 0x1d4   : > { %21119 = vst [vmem:[#allocation139_spill] sm:$0xff] %v15731_v31  ;;  %21120 = vst [vmem:[#allocation140_spill] sm:$0xff] %v15733_v6  ;;  %5683 = vperm.xlu1 %14057, %v11165_v39   ;;  %5678 = vperm.xlu0 %14056, %v11164_v23   ;;  %v11201_v31 = vld [vmem:[%s20780_s9 + $0x418] sm:$0xff]  ;;  %v11200_v39 = vld [vmem:[%s20780_s9 + $0x410] sm:$0xff] }
 0x1d7   : > { %v15741_v38 = vpop.permute.xlu1 %4953  ;;  %v15743_v7 = vpop.permute.xlu0 %4948 }
 0x1d8   : > { %21121 = vst [vmem:[#allocation141_spill] sm:$0xff] %v15741_v38  ;;  %21122 = vst [vmem:[#allocation142_spill] sm:$0xff] %v15743_v7  ;;  %6113 = vperm.xlu1 %14057, %v11199_v15   ;;  %6108 = vperm.xlu0 %14056, %v11198_v47   ;;  %v11203_v38 = vld [vmem:[%s20780_s9 + $0x428] sm:$0xff]  ;;  %v11202_v15 = vld [vmem:[%s20780_s9 + $0x420] sm:$0xff] }
 0x1db   : > { %v15751_v23 = vpop.permute.xlu1 %4963  ;;  %v15753_v6 = vpop.permute.xlu0 %4958 }
 0x1dc   : > { %21123 = vst [vmem:[#allocation143_spill] sm:$0xff] %v15751_v23  ;;  %21124 = vst [vmem:[#allocation144_spill] sm:$0xff] %v15753_v6  ;;  %6123 = vperm.xlu1 %14057, %v11201_v31   ;;  %6118 = vperm.xlu0 %14056, %v11200_v39   ;;  %v11205_v23 = vld [vmem:[%s20780_s9 + $0x438] sm:$0xff]  ;;  %v11204_v31 = vld [vmem:[%s20780_s9 + $0x430] sm:$0xff] }
 0x1df   : > { %v15761_v47 = vpop.permute.xlu1 %4973  ;;  %v15763_v7 = vpop.permute.xlu0 %4968 }
 0x1e0   : > { %21125 = vst [vmem:[#allocation145_spill] sm:$0xff] %v15761_v47  ;;  %21126 = vst [vmem:[#allocation146_spill] sm:$0xff] %v15763_v7  ;;  %6133 = vperm.xlu1 %14057, %v11203_v38   ;;  %6128 = vperm.xlu0 %14056, %v11202_v15   ;;  %v11207_v47 = vld [vmem:[%s20780_s9 + $0x448] sm:$0xff]  ;;  %v11206_v38 = vld [vmem:[%s20780_s9 + $0x440] sm:$0xff] }
 0x1e3   : > { %v15771_v39 = vpop.permute.xlu1 %4983  ;;  %v15773_v6 = vpop.permute.xlu0 %4978 }
 0x1e4   : > { %21127 = vst [vmem:[#allocation147_spill] sm:$0xff] %v15771_v39  ;;  %21128 = vst [vmem:[#allocation148_spill] sm:$0xff] %v15773_v6  ;;  %6143 = vperm.xlu1 %14057, %v11205_v23   ;;  %6138 = vperm.xlu0 %14056, %v11204_v31   ;;  %v11209_v39 = vld [vmem:[%s20780_s9 + $0x458] sm:$0xff]  ;;  %v11208_v23 = vld [vmem:[%s20780_s9 + $0x450] sm:$0xff] }
 0x1e7   : > { %v15781_v15 = vpop.permute.xlu1 %4993  ;;  %v15783_v7 = vpop.permute.xlu0 %4988 }
 0x1e8   : > { %21129 = vst [vmem:[#allocation149_spill] sm:$0xff] %v15781_v15  ;;  %21130 = vst [vmem:[#allocation150_spill] sm:$0xff] %v15783_v7  ;;  %6153 = vperm.xlu1 %14057, %v11207_v47   ;;  %6148 = vperm.xlu0 %14056, %v11206_v38   ;;  %v11211_v15 = vld [vmem:[%s20780_s9 + $0x468] sm:$0xff]  ;;  %v11210_v47 = vld [vmem:[%s20780_s9 + $0x460] sm:$0xff] }
 0x1eb   : > { %v15791_v31 = vpop.permute.xlu1 %5003  ;;  %v15793_v6 = vpop.permute.xlu0 %4998 }
 0x1ec   : > { %21131 = vst [vmem:[#allocation151_spill] sm:$0xff] %v15791_v31  ;;  %21132 = vst [vmem:[#allocation152_spill] sm:$0xff] %v15793_v6  ;;  %6163 = vperm.xlu1 %14057, %v11209_v39   ;;  %6158 = vperm.xlu0 %14056, %v11208_v23   ;;  %v11213_v31 = vld [vmem:[%s20780_s9 + $0x478] sm:$0xff]  ;;  %v11212_v39 = vld [vmem:[%s20780_s9 + $0x470] sm:$0xff] }
 0x1ef   : > { %v15801_v38 = vpop.permute.xlu1 %5013  ;;  %v15803_v7 = vpop.permute.xlu0 %5008 }
 0x1f0   : > { %21133 = vst [vmem:[#allocation153_spill] sm:$0xff] %v15801_v38  ;;  %21134 = vst [vmem:[#allocation154_spill] sm:$0xff] %v15803_v7  ;;  %6173 = vperm.xlu1 %14057, %v11211_v15   ;;  %6168 = vperm.xlu0 %14056, %v11210_v47   ;;  %v11215_v15 = vld [vmem:[%s20780_s9 + $0x488] sm:$0xff]  ;;  %v11214_v47 = vld [vmem:[%s20780_s9 + $0x480] sm:$0xff] }
 0x1f3   : > { %v15811_v23 = vpop.permute.xlu1 %5023  ;;  %v15813_v6 = vpop.permute.xlu0 %5018 }
 0x1f4   : > { %21135 = vst [vmem:[#allocation155_spill] sm:$0xff] %v15811_v23  ;;  %21136 = vst [vmem:[#allocation156_spill] sm:$0xff] %v15813_v6  ;;  %6183 = vperm.xlu1 %14057, %v11213_v31   ;;  %6178 = vperm.xlu0 %14056, %v11212_v39   ;;  %v11217_v31 = vld [vmem:[%s20780_s9 + $0x498] sm:$0xff]  ;;  %v11216_v39 = vld [vmem:[%s20780_s9 + $0x490] sm:$0xff] }
 0x1f5   : > { %v12530_v54 = vpop.f32.mrb[0].mxu1 }
 0x1f6   : > { %v667_v38 = vpop.f32.mrb[1].mxu1  ;;  %v827_v35 = vmul.f32 0.0625, %v12530_v54  ;;  %v14251_v54 = vld [vmem:[%s14584_s30 + $0x8] sm:$0xff] }
 0x1f7   : > { %v15821_v7 = vpop.permute.xlu1 %5033  ;;  %v15823_v46 = vpop.permute.xlu0 %5028 }
 0x1f8   : > { %21137 = vst [vmem:[#allocation157_spill] sm:$0xff] %v15821_v7  ;;  %21138 = vst [vmem:[#allocation158_spill] sm:$0xff] %v15823_v46  ;;  %6193 = vperm.xlu1 %14057, %v11215_v15   ;;  %6188 = vperm.xlu0 %14056, %v11214_v47   ;;  %v11219_v15 = vld [vmem:[%s20780_s9 + $0x4a8] sm:$0xff]  ;;  %v11218_v47 = vld [vmem:[%s20780_s9 + $0x4a0] sm:$0xff] }
 0x1f9   : > { %v12533_v23 = vpop.f32.mrb[2].mxu1 }
 0x1fa   : > { %v677_v6 = vpop.f32.mrb[3].mxu1 }
 0x1fb   : > { %v15831_v30 = vpop.permute.xlu1 %5043  ;;  %v15833_v57 = vpop.permute.xlu0 %5038  ;;  %v828_v18 = vmul.f32 0.0625, %v677_v6 }
 0x1fc   : > { %21139 = vst [vmem:[#allocation159_spill] sm:$0xff] %v15831_v30  ;;  %21140 = vst [vmem:[#allocation160_spill] sm:$0xff] %v15833_v57  ;;  %6203 = vperm.xlu1 %14057, %v11217_v31   ;;  %6198 = vperm.xlu0 %14056, %v11216_v39   ;;  %v11221_v39 = vld [vmem:[%s20780_s9 + $0x4b8] sm:$0xff]  ;;  %v11220_v30 = vld [vmem:[%s20780_s9 + $0x4b0] sm:$0xff] }
 0x1fd   : > { %v15835_v7 = vpop.f32.mrb[4].mxu1  ;;  %v15943_v2 = vsub.f32 %v14254_v3, %v828_v18  ;;  %v11264_v3 = vld [vmem:[%s20780_s9 + $0x510] sm:$0xff] }
 0x1fe   : > { %v15843_v46 = vpop.f32.mrb[5].mxu1  ;;  %v831_v58 = vmul.f32 0.0625, %v15835_v7 }
 0x1ff   : > { %v15845_v22 = vpop.permute.xlu1 %5053  ;;  %v15847_v14 = vpop.permute.xlu0 %5048  ;;  %v830_v53 = vmul.f32 0.0625, %v15843_v46 }
 0x200   : > { %21141 = vst [vmem:[#allocation161_spill] sm:$0xff] %v15845_v22  ;;  %21142 = vst [vmem:[#allocation162_spill] sm:$0xff] %v15847_v14  ;;  %6213 = vperm.xlu1 %14057, %v11219_v15   ;;  %6208 = vperm.xlu0 %14056, %v11218_v47   ;;  %v11223_v47 = vld [vmem:[%s20780_s9 + $0x4c8] sm:$0xff]  ;;  %v11222_v22 = vld [vmem:[%s20780_s9 + $0x4c0] sm:$0xff] }
 0x201   : > { %v15849_v31 = vpop.f32.mrb[6].mxu1 }
 0x202   : > { %v15857_v57 = vpop.f32.mrb[7].mxu1 }
 0x203   : > { %v15859_v1 = vpop.permute.xlu1 %5063  ;;  %v15861_v62 = vpop.permute.xlu0 %5058 }
 0x204   : > { %21143 = vst [vmem:[#allocation163_spill] sm:$0xff] %v15859_v1  ;;  %21144 = vst [vmem:[#allocation164_spill] sm:$0xff] %v15861_v62  ;;  %6223 = vperm.xlu1 %14057, %v11221_v39   ;;  %6218 = vperm.xlu0 %14056, %v11220_v30   ;;  %v11225_v30 = vld [vmem:[%s20780_s9 + $0x4d8] sm:$0xff]  ;;  %v11224_v1 = vld [vmem:[%s20780_s9 + $0x4d0] sm:$0xff] }
 0x205   : > { %v15863_v15 = vpop.f32.mrb[8].mxu1 }
 0x206   : > { %v15871_v14 = vpop.f32.mrb[9].mxu1 }
 0x207   : > { %v15873_v51 = vpop.permute.xlu1 %5073  ;;  %v15875_v50 = vpop.permute.xlu0 %5068 }
 0x208   : > { %21145 = vst [vmem:[#allocation165_spill] sm:$0xff] %v15873_v51  ;;  %21146 = vst [vmem:[#allocation166_spill] sm:$0xff] %v15875_v50  ;;  %6233 = vperm.xlu1 %14057, %v11223_v47   ;;  %6228 = vperm.xlu0 %14056, %v11222_v22   ;;  %v11227_v47 = vld [vmem:[%s20780_s9 + $0x4e8] sm:$0xff]  ;;  %v11226_v51 = vld [vmem:[%s20780_s9 + $0x4e0] sm:$0xff] }
 0x209   : > { %v15877_v39 = vpop.f32.mrb[10].mxu1 }
 0x20a   : > { %v15885_v62 = vpop.f32.mrb[11].mxu1 }
 0x20b   : > { %v15887_v43 = vpop.permute.xlu1 %5083  ;;  %v15889_v42 = vpop.permute.xlu0 %5078 }
 0x20c   : > { %21147 = vst [vmem:[#allocation167_spill] sm:$0xff] %v15887_v43  ;;  %21148 = vst [vmem:[#allocation168_spill] sm:$0xff] %v15889_v42  ;;  %6243 = vperm.xlu1 %14057, %v11225_v30   ;;  %6238 = vperm.xlu0 %14056, %v11224_v1   ;;  %v826_v43 = vmul.f32 0.0625, %v667_v38  ;;  %v11229_v42 = vld [vmem:[%s20780_s9 + $0x4f8] sm:$0xff]  ;;  %v15916_v38 = vsub.f32 %v14251_v54, %v827_v35  ;;  %v11263_v35 = vld [vmem:[%s20780_s9 + $0x508] sm:$0xff] }
 0x20d   : > { %v15891_v22 = vpop.f32.mrb[12].mxu1 }
 0x20e   : > { %v15899_v50 = vpop.f32.mrb[13].mxu1  ;;  %v839_v41 = vmul.f32 0.0625, %v15891_v22 }
 0x20f   : > { %v15901_v34 = vpop.permute.xlu1 %5093  ;;  %v15903_v30 = vpop.permute.xlu0 %5088 }
 0x210   : > { %21149 = vst [vmem:[#allocation169_spill] sm:$0xff] %v15901_v34  ;;  %21150 = vst [vmem:[#allocation170_spill] sm:$0xff] %v15903_v30  ;;  %6253 = vperm.xlu1 %14057, %v11227_v47   ;;  %6248 = vperm.xlu0 %14056, %v11226_v51   ;;  %v14252_v34 = vld [vmem:[%s14584_s30] sm:$0xff]  ;;  %v829_v30 = vmul.f32 0.0625, %v12533_v23  ;;  %v891_v23 = vmul.f32 %v15916_v38, %v15916_v38 }
 0x211   : > { %v15905_v1 = vpop.f32.mrb[14].mxu1  ;;  %v15919_v19 = vsub.f32 %v14252_v34, %v826_v43  ;;  %v11262_v34 = vld [vmem:[%s20780_s9 + $0x500] sm:$0xff] }
 0x212   : > { %v15913_v26 = vpop.f32.mrb[15].mxu1 }
 0x213   : > { %v15921_v47 = vpop.permute.xlu1 %5103  ;;  %v15923_v51 = vpop.permute.xlu0 %5098 }
 0x214   : > { %21151 = vst [vmem:[#allocation171_spill] sm:$0xff] %v15921_v47  ;;  %21152 = vst [vmem:[#allocation172_spill] sm:$0xff] %v15923_v51  ;;  %6263 = vperm.xlu1 %14057, %v11229_v42   ;;  %6258 = vperm.xlu0 %14056, %v11228_v27   ;;  %v890_v42 = vmul.f32 %v15919_v19, %v15919_v19  ;;  %v14253_v51 = vld [vmem:[%s14584_s30 + $0x18] sm:$0xff] }
 0x215   : > { %v12554_v11 = vpop.f32.mrb[16].mxu1  ;;  %v15940_v10 = vsub.f32 %v14253_v51, %v829_v30  ;;  %v11265_v30 = vld [vmem:[%s20780_s9 + $0x518] sm:$0xff] }
 0x216   : > { %v843_v43 = vmul.f32 0.0625, %v12554_v11  ;;  %v747_v54 = vpop.f32.mrb[17].mxu1  ;;  %v14255_v11 = vld [vmem:[%s14584_s30 + $0x88] sm:$0xff] }
 0x217   : > { %v842_v6 = vmul.f32 0.0625, %v747_v54  ;;  %v15935_v27 = vpop.permute.xlu1 %5533  ;;  %v15937_v47 = vpop.permute.xlu0 %5528  ;;  %v14256_v54 = vld [vmem:[%s14584_s30 + $0x80] sm:$0xff] }
 0x218   : > { %21153 = vst [vmem:[#allocation173_spill] sm:$0xff] %v15935_v27  ;;  %21154 = vst [vmem:[#allocation174_spill] sm:$0xff] %v15937_v47  ;;  %v15946_v61 = vsub.f32 %v14255_v11, %v843_v43  ;;  %6693 = vperm.xlu1 %14057, %v11263_v35   ;;  %6688 = vperm.xlu0 %14056, %v11262_v34   ;;  %v893_v11 = vmul.f32 %v15940_v10, %v15940_v10 }
 0x219   : > { %v15951_v27 = vsub.f32 %v14256_v54, %v842_v6  ;;  %v12557_v47 = vpop.f32.mrb[18].mxu1  ;;  %v13498_v6 = vpack.c.bf16 %v891_v23, %v890_v42  ;;  %v14257_v54 = vld [vmem:[%s14584_s30 + $0x98] sm:$0xff] }
 0x21a   : > { %21155 = vst [vmem:[#allocation175_spill] sm:$0xff] %v15946_v61  ;;  %v845_v18 = vmul.f32 0.0625, %v12557_v47  ;;  %v757_v51 = vpop.f32.mrb[19].mxu1  ;;  %v907_v46 = vmul.f32 %v15946_v61, %v15946_v61  ;;  %v892_v47 = vmul.f32 %v15943_v2, %v15943_v2 }
 0x21b   : > { %21156 = vst [vmem:[#allocation176_spill] sm:$0xff] %v15951_v27  ;;  %v844_v7 = vmul.f32 0.0625, %v757_v51  ;;  %v15961_v35 = vpop.permute.xlu1 %5543  ;;  %v15963_v34 = vpop.permute.xlu0 %5538  ;;  %v906_v43 = vmul.f32 %v15951_v27, %v15951_v27  ;;  %v14258_v51 = vld [vmem:[%s14584_s30 + $0x28] sm:$0xff] }
 0x21c   : > { %21157 = vst [vmem:[#allocation177_spill] sm:$0xff] %v15961_v35  ;;  %21158 = vst [vmem:[#allocation178_spill] sm:$0xff] %v15963_v34  ;;  %v15972_v52 = vsub.f32 %v14257_v54, %v845_v18  ;;  %6703 = vperm.xlu1 %14057, %v11265_v30   ;;  %6698 = vperm.xlu0 %14056, %v11264_v3   ;;  %v15975_v61 = vsub.f32 %v14258_v51, %v831_v58  ;;  %v14259_v35 = vld [vmem:[%s14584_s30 + $0x20] sm:$0xff]  ;;  %v833_v18 = vmul.f32 0.0625, %v15849_v31  ;;  %v14261_v54 = vld [vmem:[%s14584_s30 + $0xa8] sm:$0xff] }
 0x21d   : > { %v15978_v34 = vsub.f32 %v14259_v35, %v830_v53  ;;  %v15981_v27 = vsub.f32 %v14260_v49, %v844_v7  ;;  %v12560_v23 = vpop.f32.mrb[20].mxu1  ;;  %v13496_v42 = vpack.c.bf16 %v907_v46, %v906_v43  ;;  %v832_v30 = vmul.f32 0.0625, %v15857_v57  ;;  %v11266_v49 = vld [vmem:[%s20780_s9 + $0x520] sm:$0xff] }
 0x21e   : > { %21159 = vst [vmem:[#allocation179_spill] sm:$0xff] %v15972_v52  ;;  %v909_v58 = vmul.f32 %v15972_v52, %v15972_v52  ;;  %v847_v3 = vmul.f32 0.0625, %v12560_v23  ;;  %v767_v53 = vpop.f32.mrb[21].mxu1  ;;  %v835_v46 = vmul.f32 0.0625, %v15863_v15  ;;  %v834_v7 = vmul.f32 0.0625, %v15871_v14 }
 0x21f   : > { %21160 = vst [vmem:[#allocation180_spill] sm:$0xff] %v15981_v27  ;;  %v908_v35 = vmul.f32 %v15981_v27, %v15981_v27  ;;  %v846_v31 = vmul.f32 0.0625, %v767_v53  ;;  %13497 = vmatprep.subr.bf16.mxu1 %v13496_v42  ;;  %v15997_v57 = vpop.permute.xlu1 %5553  ;;  %v15999_v43 = vpop.permute.xlu0 %5548  ;;  %v13502_v23 = vpack.c.bf16 %v893_v11, %v892_v47  ;;  %v895_v14 = vmul.f32 %v15975_v61, %v15975_v61  ;;  %v14262_v42 = vld [vmem:[%s14584_s30 + $0xa0] sm:$0xff]  ;;  %v14264_v47 = vld [vmem:[%s14584_s30 + $0x30] sm:$0xff] }
 0x220   : > { %21161 = vst [vmem:[#allocation181_spill] sm:$0xff] %v15997_v57  ;;  %21162 = vst [vmem:[#allocation182_spill] sm:$0xff] %v15999_v43  ;;  %v16002_v51 = vsub.f32 %v14261_v54, %v847_v3  ;;  %13499 = vmatpush3.bf16.msra.mxu1 %v13498_v6  ;;  %6713 = vperm.xlu1 %14057, %v11267_v48   ;;  %v894_v15 = vmul.f32 %v15978_v34, %v15978_v34  ;;  %v11269_v6 = vld [vmem:[%s20780_s9 + $0x538] sm:$0xff]  ;;  %v836_v52 = vmul.f32 0.0625, %v15885_v62 }
 0x221   : > { %v16009_v53 = vsub.f32 %v14262_v42, %v846_v31  ;;  %6708 = vperm.xlu0 %14056, %v11266_v49   ;;  %v12563_v57 = vpop.f32.mrb[22].mxu1  ;;  %v13500_v43 = vpack.c.bf16 %v909_v58, %v908_v35  ;;  %v14263_v48 = vld [vmem:[%s14584_s30 + $0x38] sm:$0xff]  ;;  %v16018_v3 = vsub.f32 %v14264_v47, %v832_v30  ;;  %v11268_v58 = vld [vmem:[%s20780_s9 + $0x530] sm:$0xff]  ;;  %v14265_v49 = vld [vmem:[%s14584_s30 + $0x48] sm:$0xff] }
 0x222   : > { %21163 = vst [vmem:[#allocation183_spill] sm:$0xff] %v16002_v51  ;;  %v16015_v11 = vsub.f32 %v14263_v48, %v833_v18  ;;  %v911_v54 = vmul.f32 %v16002_v51, %v16002_v51  ;;  %v849_v27 = vmul.f32 0.0625, %v12563_v57  ;;  %v777_v31 = vpop.f32.mrb[23].mxu1  ;;  %v16026_v35 = vsub.f32 %v14265_v49, %v835_v46  ;;  %v14266_v42 = vld [vmem:[%s14584_s30 + $0x40] sm:$0xff]  ;;  %v14268_v46 = vld [vmem:[%s14584_s30 + $0xb0] sm:$0xff] }
 0x223   : > { %21164 = vst [vmem:[#allocation184_spill] sm:$0xff] %v16009_v53  ;;  %v16029_v18 = vsub.f32 %v14266_v42, %v834_v7  ;;  %v910_v30 = vmul.f32 %v16009_v53, %v16009_v53  ;;  %v848_v48 = vmul.f32 0.0625, %v777_v31  ;;  %13501 = vmatprep.subr.bf16.mxu1 %v13500_v43  ;;  %v16033_v47 = vpop.permute.xlu1 %5563  ;;  %v16035_v57 = vpop.permute.xlu0 %5558  ;;  %v837_v51 = vmul.f32 0.0625, %v15877_v39  ;;  %v11271_v42 = vld [vmem:[%s20780_s9 + $0x548] sm:$0xff] }
 0x224   : > { %21165 = vst [vmem:[#allocation185_spill] sm:$0xff] %v16033_v47  ;;  %21166 = vst [vmem:[#allocation186_spill] sm:$0xff] %v16035_v57  ;;  %v16040_v44 = vsub.f32 %v14267_v45, %v849_v27  ;;  %13503 = vmatpush3.bf16.msra.mxu1 %v13502_v23  ;;  %6723 = vperm.xlu1 %14057, %v11269_v6   ;;  %v13506_v43 = vpack.c.bf16 %v895_v14, %v894_v15  ;;  %v11270_v14 = vld [vmem:[%s20780_s9 + $0x540] sm:$0xff]  ;;  %v14270_v47 = vld [vmem:[%s14584_s30 + $0x50] sm:$0xff] }
 0x225   : > { %v16043_v7 = vsub.f32 %v14268_v46, %v848_v48  ;;  %6718 = vperm.xlu0 %14056, %v11268_v58   ;;  %v12566_v49 = vpop.f32.mrb[24].mxu1  ;;  %v13504_v31 = vpack.c.bf16 %v911_v54, %v910_v30  ;;  %v897_v62 = vmul.f32 %v16015_v11, %v16015_v11  ;;  %v896_v45 = vmul.f32 %v16018_v3, %v16018_v3  ;;  %v14269_v46 = vld [vmem:[%s14584_s30 + $0x58] sm:$0xff] }
 0x226   : > { %21167 = vst [vmem:[#allocation187_spill] sm:$0xff] %v16040_v44  ;;  %v913_v39 = vmul.f32 %v16040_v44, %v16040_v44  ;;  %v851_v27 = vmul.f32 0.0625, %v12566_v49  ;;  %v787_v23 = vpop.f32.mrb[25].mxu1  ;;  %v16059_v15 = vmul.f32 %v16026_v35, %v16026_v35  ;;  %v898_v6 = vmul.f32 %v16029_v18, %v16029_v18  ;;  %v14271_v44 = vld [vmem:[%s14584_s30 + $0xc8] sm:$0xff] }
 0x227   : > { %21168 = vst [vmem:[#allocation188_spill] sm:$0xff] %v16043_v7  ;;  %v912_v54 = vmul.f32 %v16043_v7, %v16043_v7  ;;  %v850_v58 = vmul.f32 0.0625, %v787_v23  ;;  %13505 = vmatprep.subr.bf16.mxu1 %v13504_v31  ;;  %v16065_v30 = vpop.permute.xlu1 %5573  ;;  %v16067_v48 = vpop.permute.xlu0 %5568  ;;  %v16070_v49 = vsub.f32 %v14269_v46, %v837_v51  ;;  %v16073_v57 = vsub.f32 %v14270_v47, %v836_v52  ;;  %v14272_v31 = vld [vmem:[%s14584_s30 + $0xc0] sm:$0xff]  ;;  %v11273_v52 = vld [vmem:[%s20780_s9 + $0x558] sm:$0xff]  ;;  %v14274_v46 = vld [vmem:[%s14584_s30 + $0x68] sm:$0xff] }
 0x228   : > { %21169 = vst [vmem:[#allocation189_spill] sm:$0xff] %v16065_v30  ;;  %21170 = vst [vmem:[#allocation190_spill] sm:$0xff] %v16067_v48  ;;  %v16076_v53 = vsub.f32 %v14271_v44, %v851_v27  ;;  %13507 = vmatpush3.bf16.msra.mxu1 %v13506_v43  ;;  %6733 = vperm.xlu1 %14057, %v11271_v42   ;;  %v838_v23 = vmul.f32 0.0625, %v15899_v50  ;;  %v13510_v22 = vpack.c.bf16 %v897_v62, %v896_v45  ;;  %v11272_v50 = vld [vmem:[%s20780_s9 + $0x550] sm:$0xff] }
 0x229   : > { %v16081_v7 = vsub.f32 %v14272_v31, %v850_v58  ;;  %6728 = vperm.xlu0 %14056, %v11270_v14   ;;  %v12569_v30 = vpop.f32.mrb[26].mxu1  ;;  %v13508_v51 = vpack.c.bf16 %v913_v39, %v912_v54  ;;  %v13514_v54 = vpack.c.bf16 %v16059_v15, %v898_v6  ;;  %v901_v62 = vmul.f32 %v16070_v49, %v16070_v49  ;;  %v14273_v58 = vld [vmem:[%s14584_s30 + $0xd8] sm:$0xff] }
 0x22a   : > { %v915_v44 = vmul.f32 %v16076_v53, %v16076_v53  ;;  %v853_v47 = vmul.f32 0.0625, %v12569_v30  ;;  %v797_v43 = vpop.f32.mrb[27].mxu1  ;;  %v900_v45 = vmul.f32 %v16073_v57, %v16073_v57  ;;  %v16106_v31 = vsub.f32 %v14274_v46, %v839_v41 }
 0x22b   : > { %v914_v42 = vmul.f32 %v16081_v7, %v16081_v7  ;;  %v852_v39 = vmul.f32 0.0625, %v797_v43  ;;  %13509 = vmatprep.subr.bf16.mxu1 %v13508_v51  ;;  %v16093_v27 = vpop.permute.xlu1 %5583  ;;  %v16095_v14 = vpop.permute.xlu0 %5578  ;;  %v14275_v51 = vld [vmem:[%s14584_s30 + $0x60] sm:$0xff] }
 0x22c   : > { %21171 = vst [vmem:[#allocation191_spill] sm:$0xff] %v16093_v27  ;;  %21172 = vst [vmem:[#allocation192_spill] sm:$0xff] %v16095_v14  ;;  %v16103_v30 = vsub.f32 %v14273_v58, %v853_v47  ;;  %13511 = vmatpush3.bf16.msra.mxu1 %v13510_v22  ;;  %6743 = vperm.xlu1 %14057, %v11273_v52   ;;  %v16109_v43 = vsub.f32 %v14275_v51, %v838_v23  ;;  %v14276_v27 = vld [vmem:[%s14584_s30 + $0xd0] sm:$0xff]  ;;  %v11275_v47 = vld [vmem:[%s20780_s9 + $0x568] sm:$0xff]  ;;  %v841_v22 = vmul.f32 0.0625, %v15905_v1 }
 0x22d   : > { %v16112_v14 = vsub.f32 %v14276_v27, %v852_v39  ;;  %6738 = vperm.xlu0 %14056, %v11272_v50   ;;  %v12572_v15 = vpop.f32.mrb[28].mxu1  ;;  %v13512_v6 = vpack.c.bf16 %v915_v44, %v914_v42  ;;  %v840_v52 = vmul.f32 0.0625, %v15913_v26  ;;  %v11274_v50 = vld [vmem:[%s20780_s9 + $0x560] sm:$0xff]  ;;  %v14277_v26 = vld [vmem:[%s14584_s30 + $0xe8] sm:$0xff]  ;;  %v13518_v46 = vpack.c.bf16 %v901_v62, %v900_v45  ;;  %v14280_v62 = vld [vmem:[%s14584_s30 + $0x70] sm:$0xff] }
 0x22e   : > { %v917_v41 = vmul.f32 %v16103_v30, %v16103_v30  ;;  %v855_v23 = vmul.f32 0.0625, %v12572_v15  ;;  %v807_v58 = vpop.f32.mrb[29].mxu1  ;;  %v903_v51 = vmul.f32 %v16106_v31, %v16106_v31  ;;  %v902_v15 = vmul.f32 %v16109_v43, %v16109_v43 }
 0x22f   : > { %v916_v44 = vmul.f32 %v16112_v14, %v16112_v14  ;;  %v854_v42 = vmul.f32 0.0625, %v807_v58  ;;  %13513 = vmatprep.subr.bf16.mxu1 %v13512_v6  ;;  %v16126_v39 = vpop.permute.xlu1 %5593  ;;  %v16128_v1 = vpop.permute.xlu0 %5588  ;;  %v14278_v58 = vld [vmem:[%s14584_s30 + $0xe0] sm:$0xff]  ;;  %v16147_v45 = vsub.f32 %v14280_v62, %v840_v52  ;;  %v14281_v52 = vld [vmem:[%s14584_s30 + $0xf8] sm:$0xff] }
 0x230   : > { %21173 = vst [vmem:[#allocation193_spill] sm:$0xff] %v16126_v39  ;;  %21174 = vst [vmem:[#allocation194_spill] sm:$0xff] %v16128_v1  ;;  %v16131_v27 = vsub.f32 %v14277_v26, %v855_v23  ;;  %13515 = vmatpush3.bf16.msra.mxu1 %v13514_v54  ;;  %6753 = vperm.xlu1 %14057, %v11275_v47   ;;  %v11277_v23 = vld [vmem:[%s20780_s9 + $0x578] sm:$0xff] }
 0x231   : > { %v16138_v6 = vsub.f32 %v14278_v58, %v854_v42  ;;  %6748 = vperm.xlu0 %14056, %v11274_v50   ;;  %v12575_v39 = vpop.f32.mrb[30].mxu1  ;;  %v13516_v1 = vpack.c.bf16 %v917_v41, %v916_v44  ;;  %v14279_v54 = vld [vmem:[%s14584_s30 + $0x78] sm:$0xff]  ;;  %v11276_v41 = vld [vmem:[%s20780_s9 + $0x570] sm:$0xff] }
 0x232   : > { %21175 = vst [vmem:[#allocation195_spill] sm:$0xff] %v16131_v27  ;;  %v16144_v47 = vsub.f32 %v14279_v54, %v841_v22  ;;  %v919_v26 = vmul.f32 %v16131_v27, %v16131_v27  ;;  %v857_v42 = vmul.f32 0.0625, %v12575_v39  ;;  %v817_v58 = vpop.f32.mrb[31].mxu1  ;;  %v14282_v39 = vld [vmem:[%s14584_s30 + $0xf0] sm:$0xff]  ;;  %s20720_s30 = scalar_lea.hbm %s20781_s10, %s11683_s11 }
 0x233   : > { %21176 = vst [vmem:[#allocation196_spill] sm:$0xff] %v16138_v6  ;;  %v918_v50 = vmul.f32 %v16138_v6, %v16138_v6  ;;  %v856_v44 = vmul.f32 0.0625, %v817_v58  ;;  %13517 = vmatprep.subr.bf16.mxu1 %v13516_v1  ;;  %v16156_v22 = vpop.permute.xlu1 %5603  ;;  %v16158_v54 = vpop.permute.xlu0 %5598  ;;  %v11279_v6 = vld [vmem:[%s20780_s9 + $0x588] sm:$0xff]  ;;  %v904_v58 = vmul.f32 %v16147_v45, %v16147_v45 }
 0x234   : > { %21177 = vst [vmem:[#allocation197_spill] sm:$0xff] %v16156_v22  ;;  %21178 = vst [vmem:[#allocation198_spill] sm:$0xff] %v16158_v54  ;;  %v16161_v62 = vsub.f32 %v14281_v52, %v857_v42  ;;  %13519 = vmatpush3.bf16.msra.mxu1 %v13518_v46  ;;  %6763 = vperm.xlu1 %14057, %v11277_v23   ;;  %v905_v1 = vmul.f32 %v16144_v47, %v16144_v47  ;;  %v11278_v23 = vld [vmem:[%s20780_s9 + $0x580] sm:$0xff]  ;;  %v11280_v52 = vld [vmem:[%s20780_s9 + $0x590] sm:$0xff] }
 0x235   : > { %v16164_v48 = vsub.f32 %v14282_v39, %v856_v44  ;;  %6758 = vperm.xlu0 %14056, %v11276_v41   ;;  %v13520_v27 = vpack.c.bf16 %v919_v26, %v918_v50  ;;  %v13522_v46 = vpack.c.bf16 %v903_v51, %v902_v15  ;;  %v11281_v51 = vld [vmem:[%s20780_s9 + $0x598] sm:$0xff] }
 0x236   : > { %v921_v42 = vmul.f32 %v16161_v62, %v16161_v62  ;;  %v13526_v15 = vpack.c.bf16 %v905_v1, %v904_v58  ;;  %v11282_v1 = vld [vmem:[%s20780_s9 + $0x5a0] sm:$0xff]  ;;  %v11609_v54 = vld [vmem:[%s20778_s7 + $0x2d8] sm:$0xff] }
 0x237   : > { %21179 = vst [vmem:[#allocation199_spill] sm:$0xff] %v16164_v48  ;;  %v920_v26 = vmul.f32 %v16164_v48, %v16164_v48  ;;  %13521 = vmatprep.subr.bf16.mxu1 %v13520_v27  ;;  %v16180_v41 = vpop.permute.xlu1 %5613  ;;  %v16182_v50 = vpop.permute.xlu0 %5608  ;;  %v14283_v58 = vld [vmem:[%s20777_s6] sm:$0xff] }
 0x238   : > { %21180 = vst [vmem:[#allocation200_spill] sm:$0xff] %v16180_v41  ;;  %21181 = vst [vmem:[#allocation201_spill] sm:$0xff] %v16182_v50  ;;  %13523 = vmatpush3.bf16.msra.mxu1 %v13522_v46  ;;  %6773 = vperm.xlu1 %14057, %v11279_v6   ;;  %v11283_v6 = vld [vmem:[%s20780_s9 + $0x5a8] sm:$0xff]  ;;  %v11637_v50 = vld [vmem:[%s20779_s8 + $0x2b8] sm:$0xff] }
 0x239   : > { %6768 = vperm.xlu0 %14056, %v11278_v23   ;;  %v13524_v44 = vpack.c.bf16 %v921_v42, %v920_v26  ;;  %v14284_v23 = vld [vmem:[%s20777_s6 + $0x18] sm:$0xff] }
 0x23a   : > { %v11285_v26 = vld [vmem:[%s20780_s9 + $0x5b8] sm:$0xff] }
 0x23b   : > { %13525 = vmatprep.subr.bf16.mxu1 %v13524_v44  ;;  %v16190_v39 = vpop.permute.xlu1 %5623  ;;  %v16192_v27 = vpop.permute.xlu0 %5618  ;;  %v11284_v44 = vld [vmem:[%s20780_s9 + $0x5b0] sm:$0xff] }
 0x23c   : > { %21182 = vst [vmem:[#allocation202_spill] sm:$0xff] %v16190_v39  ;;  %21183 = vst [vmem:[#allocation203_spill] sm:$0xff] %v16192_v27  ;;  %13527 = vmatpush3.bf16.msra.mxu1 %v13526_v15  ;;  %6783 = vperm.xlu1 %14057, %v11281_v51   ;;  %v14285_v51 = vld [vmem:[%s20777_s6 + $0x10] sm:$0xff]  ;;  %v11603_v27 = vld [vmem:[%s20778_s7 + $0x2a8] sm:$0xff] }
 0x23d   : > { %6778 = vperm.xlu0 %14056, %v11280_v52  }
 0x23f   : > { %987 = vmatmul.mubr.f32.vlgmr.msra.gmra.mrb[32].mxu1 %v14283_v58  ;;  %v16203_v42 = vpop.permute.xlu1 %5633  ;;  %v16205_v46 = vpop.permute.xlu0 %5628  ;;  %v11286_v58 = vld [vmem:[%s20780_s9 + $0x5c0] sm:$0xff] }
 0x240   : > { %21184 = vst [vmem:[#allocation204_spill] sm:$0xff] %v16203_v42  ;;  %21185 = vst [vmem:[#allocation205_spill] sm:$0xff] %v16205_v46  ;;  %6793 = vperm.xlu1 %14057, %v11283_v6   ;;  %991 = vmatprep.mubr.f32.mxu1 %v14284_v23  ;;  %v14286_v6 = vld [vmem:[%s20776_s5] sm:$0xff] }
 0x241   : > { %6788 = vperm.xlu0 %14056, %v11282_v1   ;;  %v11287_v1 = vld [vmem:[%s20780_s9 + $0x5c8] sm:$0xff] }
 0x243   : > { %992 = vmatmul.mubr.f32.gmra.mrb[34].mxu1 %v14285_v51  ;;  %v16219_v15 = vpop.permute.xlu1 %5643  ;;  %v16221_v52 = vpop.permute.xlu0 %5638 }
 0x244   : > { %21186 = vst [vmem:[#allocation206_spill] sm:$0xff] %v16219_v15  ;;  %21187 = vst [vmem:[#allocation207_spill] sm:$0xff] %v16221_v52  ;;  %6803 = vperm.xlu1 %14057, %v11285_v26   ;;  %12580 = vmatprep.mubr.msk.f32.mxu1 %vm504_vm0, %v14286_v6  ;;  %v11289_v26 = vld [vmem:[%s20780_s9 + $0x5d8] sm:$0xff] }
 0x245   : > { %6798 = vperm.xlu0 %14056, %v11284_v44   ;;  %v11288_v44 = vld [vmem:[%s20780_s9 + $0x5d0] sm:$0xff] }
 0x247   : > { %v16233_v23 = vpop.permute.xlu1 %5653  ;;  %v16235_v51 = vpop.permute.xlu0 %5648 }
 0x248   : > { %21188 = vst [vmem:[#allocation208_spill] sm:$0xff] %v16233_v23  ;;  %21189 = vst [vmem:[#allocation209_spill] sm:$0xff] %v16235_v51  ;;  %6813 = vperm.xlu1 %14057, %v11287_v1   ;;  %v11291_v23 = vld [vmem:[%s20780_s9 + $0x5e8] sm:$0xff]  ;;  %v11290_v1 = vld [vmem:[%s20780_s9 + $0x5e0] sm:$0xff] }
 0x249   : > { %6808 = vperm.xlu0 %14056, %v11286_v58  }
 0x24b   : > { %v16243_v6 = vpop.permute.xlu1 %5663  ;;  %v16245_v15 = vpop.permute.xlu0 %5658 }
 0x24c   : > { %21190 = vst [vmem:[#allocation210_spill] sm:$0xff] %v16243_v6  ;;  %21191 = vst [vmem:[#allocation211_spill] sm:$0xff] %v16245_v15  ;;  %6823 = vperm.xlu1 %14057, %v11289_v26   ;;  %v11293_v6 = vld [vmem:[%s20780_s9 + $0x5f8] sm:$0xff]  ;;  %v11292_v26 = vld [vmem:[%s20780_s9 + $0x5f0] sm:$0xff] }
 0x24d   : > { %6818 = vperm.xlu0 %14056, %v11288_v44  }
 0x24f   : > { %v16253_v58 = vpop.permute.xlu1 %5673  ;;  %v16255_v51 = vpop.permute.xlu0 %5668 }
 0x250   : > { %21192 = vst [vmem:[#allocation212_spill] sm:$0xff] %v16253_v58  ;;  %21193 = vst [vmem:[#allocation213_spill] sm:$0xff] %v16255_v51  ;;  %6833 = vperm.xlu1 %14057, %v11291_v23   ;;  %v11327_v58 = vld [vmem:[%s20780_s9 + $0x608] sm:$0xff]  ;;  %v11326_v23 = vld [vmem:[%s20780_s9 + $0x600] sm:$0xff] }
 0x251   : > { %6828 = vperm.xlu0 %14056, %v11290_v1  }
 0x253   : > { %v16263_v44 = vpop.permute.xlu1 %5683  ;;  %v16265_v15 = vpop.permute.xlu0 %5678 }
 0x254   : > { %21194 = vst [vmem:[#allocation214_spill] sm:$0xff] %v16263_v44  ;;  %21195 = vst [vmem:[#allocation215_spill] sm:$0xff] %v16265_v15  ;;  %6843 = vperm.xlu1 %14057, %v11293_v6   ;;  %v11329_v44 = vld [vmem:[%s20780_s9 + $0x618] sm:$0xff]  ;;  %v11328_v6 = vld [vmem:[%s20780_s9 + $0x610] sm:$0xff] }
 0x255   : > { %6838 = vperm.xlu0 %14056, %v11292_v26  }
 0x257   : > { %v16273_v1 = vpop.permute.xlu1 %6113  ;;  %v16275_v51 = vpop.permute.xlu0 %6108 }
 0x258   : > { %21196 = vst [vmem:[#allocation216_spill] sm:$0xff] %v16273_v1  ;;  %21197 = vst [vmem:[#allocation217_spill] sm:$0xff] %v16275_v51  ;;  %7273 = vperm.xlu1 %14057, %v11327_v58   ;;  %v11331_v1 = vld [vmem:[%s20780_s9 + $0x628] sm:$0xff]  ;;  %v11330_v58 = vld [vmem:[%s20780_s9 + $0x620] sm:$0xff] }
 0x259   : > { %7268 = vperm.xlu0 %14056, %v11326_v23  }
 0x25b   : > { %v16283_v26 = vpop.permute.xlu1 %6123  ;;  %v16285_v15 = vpop.permute.xlu0 %6118 }
 0x25c   : > { %21198 = vst [vmem:[#allocation218_spill] sm:$0xff] %v16283_v26  ;;  %21199 = vst [vmem:[#allocation219_spill] sm:$0xff] %v16285_v15  ;;  %7283 = vperm.xlu1 %14057, %v11329_v44   ;;  %v11333_v26 = vld [vmem:[%s20780_s9 + $0x638] sm:$0xff]  ;;  %v11332_v44 = vld [vmem:[%s20780_s9 + $0x630] sm:$0xff] }
 0x25d   : > { %7278 = vperm.xlu0 %14056, %v11328_v6  }
 0x25f   : > { %v16293_v23 = vpop.permute.xlu1 %6133  ;;  %v16295_v51 = vpop.permute.xlu0 %6128 }
 0x260   : > { %21200 = vst [vmem:[#allocation220_spill] sm:$0xff] %v16293_v23  ;;  %21201 = vst [vmem:[#allocation221_spill] sm:$0xff] %v16295_v51  ;;  %7293 = vperm.xlu1 %14057, %v11331_v1   ;;  %v11335_v23 = vld [vmem:[%s20780_s9 + $0x648] sm:$0xff]  ;;  %v11334_v1 = vld [vmem:[%s20780_s9 + $0x640] sm:$0xff] }
 0x261   : > { %7288 = vperm.xlu0 %14056, %v11330_v58  }
 0x263   : > { %v16303_v6 = vpop.permute.xlu1 %6143  ;;  %v16305_v15 = vpop.permute.xlu0 %6138 }
 0x264   : > { %21202 = vst [vmem:[#allocation222_spill] sm:$0xff] %v16303_v6  ;;  %21203 = vst [vmem:[#allocation223_spill] sm:$0xff] %v16305_v15  ;;  %7303 = vperm.xlu1 %14057, %v11333_v26   ;;  %v11337_v6 = vld [vmem:[%s20780_s9 + $0x658] sm:$0xff]  ;;  %v11336_v26 = vld [vmem:[%s20780_s9 + $0x650] sm:$0xff] }
 0x265   : > { %7298 = vperm.xlu0 %14056, %v11332_v44  }
 0x267   : > { %v16313_v58 = vpop.permute.xlu1 %6153  ;;  %v16315_v51 = vpop.permute.xlu0 %6148 }
 0x268   : > { %21204 = vst [vmem:[#allocation224_spill] sm:$0xff] %v16313_v58  ;;  %21205 = vst [vmem:[#allocation225_spill] sm:$0xff] %v16315_v51  ;;  %7313 = vperm.xlu1 %14057, %v11335_v23   ;;  %v11339_v58 = vld [vmem:[%s20780_s9 + $0x668] sm:$0xff]  ;;  %v11338_v23 = vld [vmem:[%s20780_s9 + $0x660] sm:$0xff] }
 0x269   : > { %7308 = vperm.xlu0 %14056, %v11334_v1  }
 0x26b   : > { %v16323_v44 = vpop.permute.xlu1 %6163  ;;  %v16325_v15 = vpop.permute.xlu0 %6158 }
 0x26c   : > { %21206 = vst [vmem:[#allocation226_spill] sm:$0xff] %v16323_v44  ;;  %21207 = vst [vmem:[#allocation227_spill] sm:$0xff] %v16325_v15  ;;  %7323 = vperm.xlu1 %14057, %v11337_v6   ;;  %v11341_v44 = vld [vmem:[%s20780_s9 + $0x678] sm:$0xff]  ;;  %v11340_v6 = vld [vmem:[%s20780_s9 + $0x670] sm:$0xff] }
 0x26d   : > { %7318 = vperm.xlu0 %14056, %v11336_v26  }
 0x26f   : > { %v16333_v1 = vpop.permute.xlu1 %6173  ;;  %v16335_v51 = vpop.permute.xlu0 %6168 }
 0x270   : > { %21208 = vst [vmem:[#allocation228_spill] sm:$0xff] %v16333_v1  ;;  %21209 = vst [vmem:[#allocation229_spill] sm:$0xff] %v16335_v51  ;;  %7333 = vperm.xlu1 %14057, %v11339_v58   ;;  %v11343_v1 = vld [vmem:[%s20780_s9 + $0x688] sm:$0xff]  ;;  %v11342_v58 = vld [vmem:[%s20780_s9 + $0x680] sm:$0xff] }
 0x271   : > { %7328 = vperm.xlu0 %14056, %v11338_v23  }
 0x273   : > { %v16343_v26 = vpop.permute.xlu1 %6183  ;;  %v16345_v15 = vpop.permute.xlu0 %6178 }
 0x274   : > { %21210 = vst [vmem:[#allocation230_spill] sm:$0xff] %v16343_v26  ;;  %21211 = vst [vmem:[#allocation231_spill] sm:$0xff] %v16345_v15  ;;  %7343 = vperm.xlu1 %14057, %v11341_v44   ;;  %v11345_v26 = vld [vmem:[%s20780_s9 + $0x698] sm:$0xff]  ;;  %v11344_v44 = vld [vmem:[%s20780_s9 + $0x690] sm:$0xff] }
 0x275   : > { %7338 = vperm.xlu0 %14056, %v11340_v6  }
 0x277   : > { %v16353_v23 = vpop.permute.xlu1 %6193  ;;  %v16355_v51 = vpop.permute.xlu0 %6188 }
 0x278   : > { %21212 = vst [vmem:[#allocation232_spill] sm:$0xff] %v16353_v23  ;;  %21213 = vst [vmem:[#allocation233_spill] sm:$0xff] %v16355_v51  ;;  %7353 = vperm.xlu1 %14057, %v11343_v1   ;;  %v11347_v23 = vld [vmem:[%s20780_s9 + $0x6a8] sm:$0xff]  ;;  %v11346_v1 = vld [vmem:[%s20780_s9 + $0x6a0] sm:$0xff] }
 0x279   : > { %7348 = vperm.xlu0 %14056, %v11342_v58  }
 0x27b   : > { %v16363_v6 = vpop.permute.xlu1 %6203  ;;  %v16365_v15 = vpop.permute.xlu0 %6198 }
 0x27c   : > { %21214 = vst [vmem:[#allocation234_spill] sm:$0xff] %v16363_v6  ;;  %21215 = vst [vmem:[#allocation235_spill] sm:$0xff] %v16365_v15  ;;  %7363 = vperm.xlu1 %14057, %v11345_v26   ;;  %v11349_v6 = vld [vmem:[%s20780_s9 + $0x6b8] sm:$0xff]  ;;  %v11348_v26 = vld [vmem:[%s20780_s9 + $0x6b0] sm:$0xff] }
 0x27d   : > { %7358 = vperm.xlu0 %14056, %v11344_v44  }
 0x27f   : > { %v16373_v58 = vpop.permute.xlu1 %6213  ;;  %v16375_v51 = vpop.permute.xlu0 %6208 }
 0x280   : > { %21216 = vst [vmem:[#allocation236_spill] sm:$0xff] %v16373_v58  ;;  %21217 = vst [vmem:[#allocation237_spill] sm:$0xff] %v16375_v51  ;;  %7373 = vperm.xlu1 %14057, %v11347_v23   ;;  %v11351_v58 = vld [vmem:[%s20780_s9 + $0x6c8] sm:$0xff]  ;;  %v11350_v23 = vld [vmem:[%s20780_s9 + $0x6c0] sm:$0xff] }
 0x281   : > { %7368 = vperm.xlu0 %14056, %v11346_v1  }
 0x283   : > { %v16383_v44 = vpop.permute.xlu1 %6223  ;;  %v16385_v15 = vpop.permute.xlu0 %6218 }
 0x284   : > { %21218 = vst [vmem:[#allocation238_spill] sm:$0xff] %v16383_v44  ;;  %21219 = vst [vmem:[#allocation239_spill] sm:$0xff] %v16385_v15  ;;  %7383 = vperm.xlu1 %14057, %v11349_v6   ;;  %v11353_v44 = vld [vmem:[%s20780_s9 + $0x6d8] sm:$0xff]  ;;  %v11352_v6 = vld [vmem:[%s20780_s9 + $0x6d0] sm:$0xff] }
 0x285   : > { %7378 = vperm.xlu0 %14056, %v11348_v26  }
 0x287   : > { %v16393_v1 = vpop.permute.xlu1 %6233  ;;  %v16395_v51 = vpop.permute.xlu0 %6228 }
 0x288   : > { %21220 = vst [vmem:[#allocation240_spill] sm:$0xff] %v16393_v1  ;;  %21221 = vst [vmem:[#allocation241_spill] sm:$0xff] %v16395_v51  ;;  %7393 = vperm.xlu1 %14057, %v11351_v58   ;;  %v11355_v1 = vld [vmem:[%s20780_s9 + $0x6e8] sm:$0xff]  ;;  %v11354_v58 = vld [vmem:[%s20780_s9 + $0x6e0] sm:$0xff] }
 0x289   : > { %7388 = vperm.xlu0 %14056, %v11350_v23  }
 0x28b   : > { %v16403_v26 = vpop.permute.xlu1 %6243  ;;  %v16405_v15 = vpop.permute.xlu0 %6238 }
 0x28c   : > { %21222 = vst [vmem:[#allocation242_spill] sm:$0xff] %v16403_v26  ;;  %21223 = vst [vmem:[#allocation243_spill] sm:$0xff] %v16405_v15  ;;  %7403 = vperm.xlu1 %14057, %v11353_v44   ;;  %v11357_v26 = vld [vmem:[%s20780_s9 + $0x6f8] sm:$0xff]  ;;  %v11356_v44 = vld [vmem:[%s20780_s9 + $0x6f0] sm:$0xff] }
 0x28d   : > { %7398 = vperm.xlu0 %14056, %v11352_v6  }
 0x28f   : > { %v16413_v23 = vpop.permute.xlu1 %6253  ;;  %v16415_v51 = vpop.permute.xlu0 %6248 }
 0x290   : > { %21224 = vst [vmem:[#allocation244_spill] sm:$0xff] %v16413_v23  ;;  %21225 = vst [vmem:[#allocation245_spill] sm:$0xff] %v16415_v51  ;;  %7413 = vperm.xlu1 %14057, %v11355_v1   ;;  %v11391_v23 = vld [vmem:[%s20780_s9 + $0x708] sm:$0xff]  ;;  %v11390_v1 = vld [vmem:[%s20780_s9 + $0x700] sm:$0xff] }
 0x291   : > { %7408 = vperm.xlu0 %14056, %v11354_v58  }
 0x293   : > { %v16423_v6 = vpop.permute.xlu1 %6263  ;;  %v16425_v15 = vpop.permute.xlu0 %6258 }
 0x294   : > { %21226 = vst [vmem:[#allocation246_spill] sm:$0xff] %v16423_v6  ;;  %21227 = vst [vmem:[#allocation247_spill] sm:$0xff] %v16425_v15  ;;  %7423 = vperm.xlu1 %14057, %v11357_v26   ;;  %v11393_v6 = vld [vmem:[%s20780_s9 + $0x718] sm:$0xff]  ;;  %v11392_v26 = vld [vmem:[%s20780_s9 + $0x710] sm:$0xff] }
 0x295   : > { %7418 = vperm.xlu0 %14056, %v11356_v44  }
 0x297   : > { %v16433_v58 = vpop.permute.xlu1 %6693  ;;  %v16435_v51 = vpop.permute.xlu0 %6688 }
 0x298   : > { %21228 = vst [vmem:[#allocation248_spill] sm:$0xff] %v16433_v58  ;;  %21229 = vst [vmem:[#allocation249_spill] sm:$0xff] %v16435_v51  ;;  %7853 = vperm.xlu1 %14057, %v11391_v23   ;;  %v11395_v58 = vld [vmem:[%s20780_s9 + $0x728] sm:$0xff]  ;;  %v11394_v23 = vld [vmem:[%s20780_s9 + $0x720] sm:$0xff] }
 0x299   : > { %7848 = vperm.xlu0 %14056, %v11390_v1  }
 0x29b   : > { %v16443_v44 = vpop.permute.xlu1 %6703  ;;  %v16445_v15 = vpop.permute.xlu0 %6698 }
 0x29c   : > { %21230 = vst [vmem:[#allocation250_spill] sm:$0xff] %v16443_v44  ;;  %21231 = vst [vmem:[#allocation251_spill] sm:$0xff] %v16445_v15  ;;  %7863 = vperm.xlu1 %14057, %v11393_v6   ;;  %v11397_v44 = vld [vmem:[%s20780_s9 + $0x738] sm:$0xff]  ;;  %v11396_v6 = vld [vmem:[%s20780_s9 + $0x730] sm:$0xff] }
 0x29d   : > { %7858 = vperm.xlu0 %14056, %v11392_v26  }
 0x29f   : > { %v16453_v1 = vpop.permute.xlu1 %6713 }
 0x2a0   : > { %21232 = vst [vmem:[#allocation252_spill] sm:$0xff] %v16453_v1  ;;  %v16455_v51 = vpop.permute.xlu0 %6708  ;;  %7873 = vperm.xlu1 %14057, %v11395_v58   ;;  %v11399_v1 = vld [vmem:[%s20780_s9 + $0x748] sm:$0xff]  ;;  %v11398_v58 = vld [vmem:[%s20780_s9 + $0x740] sm:$0xff] }
 0x2a1   : > { %21233 = vst [vmem:[#allocation253_spill] sm:$0xff] %v16455_v51  ;;  %7868 = vperm.xlu0 %14056, %v11394_v23  }
 0x2a3   : > { %v16463_v26 = vpop.permute.xlu1 %6723 }
 0x2a4   : > { %21234 = vst [vmem:[#allocation254_spill] sm:$0xff] %v16463_v26  ;;  %v16465_v15 = vpop.permute.xlu0 %6718  ;;  %7883 = vperm.xlu1 %14057, %v11397_v44   ;;  %v11401_v26 = vld [vmem:[%s20780_s9 + $0x758] sm:$0xff]  ;;  %v11400_v44 = vld [vmem:[%s20780_s9 + $0x750] sm:$0xff] }
 0x2a5   : > { %21235 = vst [vmem:[#allocation255_spill] sm:$0xff] %v16465_v15  ;;  %7878 = vperm.xlu0 %14056, %v11396_v6  }
 0x2a7   : > { %v16473_v23 = vpop.permute.xlu1 %6733 }
 0x2a8   : > { %21236 = vst [vmem:[#allocation256_spill] sm:$0xff] %v16473_v23  ;;  %v16475_v51 = vpop.permute.xlu0 %6728  ;;  %7893 = vperm.xlu1 %14057, %v11399_v1   ;;  %v11403_v23 = vld [vmem:[%s20780_s9 + $0x768] sm:$0xff]  ;;  %v11402_v1 = vld [vmem:[%s20780_s9 + $0x760] sm:$0xff] }
 0x2a9   : > { %21237 = vst [vmem:[#allocation257_spill] sm:$0xff] %v16475_v51  ;;  %7888 = vperm.xlu0 %14056, %v11398_v58  }
 0x2ab   : > { %v16483_v6 = vpop.permute.xlu1 %6743 }
 0x2ac   : > { %21238 = vst [vmem:[#allocation258_spill] sm:$0xff] %v16483_v6  ;;  %v16485_v15 = vpop.permute.xlu0 %6738  ;;  %7903 = vperm.xlu1 %14057, %v11401_v26   ;;  %v11405_v6 = vld [vmem:[%s20780_s9 + $0x778] sm:$0xff]  ;;  %v11404_v26 = vld [vmem:[%s20780_s9 + $0x770] sm:$0xff] }
 0x2ad   : > { %21239 = vst [vmem:[#allocation259_spill] sm:$0xff] %v16485_v15  ;;  %7898 = vperm.xlu0 %14056, %v11400_v44  }
 0x2af   : > { %v16493_v58 = vpop.permute.xlu1 %6753 }
 0x2b0   : > { %21240 = vst [vmem:[#allocation260_spill] sm:$0xff] %v16493_v58  ;;  %v16495_v51 = vpop.permute.xlu0 %6748  ;;  %7913 = vperm.xlu1 %14057, %v11403_v23   ;;  %v11407_v58 = vld [vmem:[%s20780_s9 + $0x788] sm:$0xff]  ;;  %v11406_v23 = vld [vmem:[%s20780_s9 + $0x780] sm:$0xff] }
 0x2b1   : > { %21241 = vst [vmem:[#allocation261_spill] sm:$0xff] %v16495_v51  ;;  %7908 = vperm.xlu0 %14056, %v11402_v1  }
 0x2b3   : > { %v16503_v44 = vpop.permute.xlu1 %6763 }
 0x2b4   : > { %21242 = vst [vmem:[#allocation262_spill] sm:$0xff] %v16503_v44  ;;  %v16505_v15 = vpop.permute.xlu0 %6758  ;;  %7923 = vperm.xlu1 %14057, %v11405_v6   ;;  %v11409_v44 = vld [vmem:[%s20780_s9 + $0x798] sm:$0xff]  ;;  %v11408_v6 = vld [vmem:[%s20780_s9 + $0x790] sm:$0xff] }
 0x2b5   : > { %21243 = vst [vmem:[#allocation263_spill] sm:$0xff] %v16505_v15  ;;  %7918 = vperm.xlu0 %14056, %v11404_v26  }
 0x2b7   : > { %v16513_v1 = vpop.permute.xlu1 %6773 }
 0x2b8   : > { %21244 = vst [vmem:[#allocation264_spill] sm:$0xff] %v16513_v1  ;;  %v16515_v51 = vpop.permute.xlu0 %6768  ;;  %7933 = vperm.xlu1 %14057, %v11407_v58   ;;  %v11411_v1 = vld [vmem:[%s20780_s9 + $0x7a8] sm:$0xff]  ;;  %v11410_v58 = vld [vmem:[%s20780_s9 + $0x7a0] sm:$0xff] }
 0x2b9   : > { %21245 = vst [vmem:[#allocation265_spill] sm:$0xff] %v16515_v51  ;;  %7928 = vperm.xlu0 %14056, %v11406_v23  }
 0x2bb   : > { %v16523_v26 = vpop.permute.xlu1 %6783 }
 0x2bc   : > { %21246 = vst [vmem:[#allocation266_spill] sm:$0xff] %v16523_v26  ;;  %v16525_v15 = vpop.permute.xlu0 %6778  ;;  %7943 = vperm.xlu1 %14057, %v11409_v44   ;;  %v11413_v26 = vld [vmem:[%s20780_s9 + $0x7b8] sm:$0xff]  ;;  %v11412_v44 = vld [vmem:[%s20780_s9 + $0x7b0] sm:$0xff] }
 0x2bd   : > { %21247 = vst [vmem:[#allocation267_spill] sm:$0xff] %v16525_v15  ;;  %7938 = vperm.xlu0 %14056, %v11408_v6  }
 0x2bf   : > { %v16533_v23 = vpop.permute.xlu1 %6793 }
 0x2c0   : > { %21248 = vst [vmem:[#allocation268_spill] sm:$0xff] %v16533_v23  ;;  %v16535_v51 = vpop.permute.xlu0 %6788  ;;  %7953 = vperm.xlu1 %14057, %v11411_v1   ;;  %v11415_v23 = vld [vmem:[%s20780_s9 + $0x7c8] sm:$0xff]  ;;  %v11414_v1 = vld [vmem:[%s20780_s9 + $0x7c0] sm:$0xff] }
 0x2c1   : > { %21249 = vst [vmem:[#allocation269_spill] sm:$0xff] %v16535_v51  ;;  %7948 = vperm.xlu0 %14056, %v11410_v58  }
 0x2c3   : > { %v16543_v6 = vpop.permute.xlu1 %6803 }
 0x2c4   : > { %21250 = vst [vmem:[#allocation270_spill] sm:$0xff] %v16543_v6  ;;  %v16545_v15 = vpop.permute.xlu0 %6798  ;;  %7963 = vperm.xlu1 %14057, %v11413_v26   ;;  %v11417_v6 = vld [vmem:[%s20780_s9 + $0x7d8] sm:$0xff]  ;;  %v11416_v26 = vld [vmem:[%s20780_s9 + $0x7d0] sm:$0xff] }
 0x2c5   : > { %21251 = vst [vmem:[#allocation271_spill] sm:$0xff] %v16545_v15  ;;  %7958 = vperm.xlu0 %14056, %v11412_v44  }
 0x2c7   : > { %v16553_v58 = vpop.permute.xlu1 %6813 }
 0x2c8   : > { %21252 = vst [vmem:[#allocation272_spill] sm:$0xff] %v16553_v58  ;;  %v16555_v51 = vpop.permute.xlu0 %6808  ;;  %7973 = vperm.xlu1 %14057, %v11415_v23   ;;  %v11419_v58 = vld [vmem:[%s20780_s9 + $0x7e8] sm:$0xff]  ;;  %v11418_v23 = vld [vmem:[%s20780_s9 + $0x7e0] sm:$0xff] }
 0x2c9   : > { %21253 = vst [vmem:[#allocation273_spill] sm:$0xff] %v16555_v51  ;;  %7968 = vperm.xlu0 %14056, %v11414_v1  }
 0x2cb   : > { %v16563_v44 = vpop.permute.xlu1 %6823 }
 0x2cc   : > { %21254 = vst [vmem:[#allocation274_spill] sm:$0xff] %v16563_v44  ;;  %v16565_v15 = vpop.permute.xlu0 %6818  ;;  %7983 = vperm.xlu1 %14057, %v11417_v6   ;;  %v11421_v44 = vld [vmem:[%s20780_s9 + $0x7f8] sm:$0xff]  ;;  %v11420_v6 = vld [vmem:[%s20780_s9 + $0x7f0] sm:$0xff] }
 0x2cd   : > { %21255 = vst [vmem:[#allocation275_spill] sm:$0xff] %v16565_v15  ;;  %7978 = vperm.xlu0 %14056, %v11416_v26  }
 0x2cf   : > { %v16573_v1 = vpop.permute.xlu1 %6833 }
 0x2d0   : > { %21256 = vst [vmem:[#allocation276_spill] sm:$0xff] %v16573_v1  ;;  %v16575_v51 = vpop.permute.xlu0 %6828  ;;  %7993 = vperm.xlu1 %14057, %v11419_v58   ;;  %v11454_v1 = vld [vmem:[%s20780_s9 + $0x800] sm:$0xff] }
 0x2d1   : > { %21257 = vst [vmem:[#allocation277_spill] sm:$0xff] %v16575_v51  ;;  %7988 = vperm.xlu0 %14056, %v11418_v23   ;;  %v10974_v58 = vld [vmem:[%s20780_s9 + $0x100] sm:$0xff] }
 0x2d3   : > { %v16583_v26 = vpop.permute.xlu1 %6843 }
 0x2d4   : > { %21258 = vst [vmem:[#allocation278_spill] sm:$0xff] %v16583_v26  ;;  %v16585_v15 = vpop.permute.xlu0 %6838  ;;  %8003 = vperm.xlu1 %14057, %v11421_v44   ;;  %v11455_v26 = vld [vmem:[%s20780_s9 + $0x808] sm:$0xff] }
 0x2d5   : > { %21259 = vst [vmem:[#allocation279_spill] sm:$0xff] %v16585_v15  ;;  %7998 = vperm.xlu0 %14056, %v11420_v6   ;;  %v10975_v44 = vld [vmem:[%s20780_s9 + $0x108] sm:$0xff] }
 0x2d7   : > { %v16593_v23 = vpop.permute.xlu1 %7273 }
 0x2d8   : > { %21260 = vst [vmem:[#allocation280_spill] sm:$0xff] %v16593_v23  ;;  %v16595_v51 = vpop.permute.xlu0 %7268  ;;  %8428 = vperm.xlu1 %14057, %v11454_v1   ;;  %v11456_v23 = vld [vmem:[%s20780_s9 + $0x810] sm:$0xff] }
 0x2d9   : > { %21261 = vst [vmem:[#allocation281_spill] sm:$0xff] %v16595_v51  ;;  %4014 = vperm.xlu0 %14056, %v10974_v58   ;;  %v10976_v1 = vld [vmem:[%s20780_s9 + $0x110] sm:$0xff] }
 0x2db   : > { %v16603_v6 = vpop.permute.xlu1 %7283 }
 0x2dc   : > { %21262 = vst [vmem:[#allocation282_spill] sm:$0xff] %v16603_v6  ;;  %v16605_v15 = vpop.permute.xlu0 %7278  ;;  %8433 = vperm.xlu1 %14057, %v11455_v26   ;;  %v11457_v6 = vld [vmem:[%s20780_s9 + $0x818] sm:$0xff] }
 0x2dd   : > { %21263 = vst [vmem:[#allocation283_spill] sm:$0xff] %v16605_v15  ;;  %4019 = vperm.xlu0 %14056, %v10975_v44   ;;  %v10977_v26 = vld [vmem:[%s20780_s9 + $0x118] sm:$0xff] }
 0x2df   : > { %v16613_v58 = vpop.permute.xlu1 %7293 }
 0x2e0   : > { %21264 = vst [vmem:[#allocation284_spill] sm:$0xff] %v16613_v58  ;;  %v16615_v51 = vpop.permute.xlu0 %7288  ;;  %8438 = vperm.xlu1 %14057, %v11456_v23   ;;  %v11458_v58 = vld [vmem:[%s20780_s9 + $0x820] sm:$0xff] }
 0x2e1   : > { %21265 = vst [vmem:[#allocation285_spill] sm:$0xff] %v16615_v51  ;;  %4024 = vperm.xlu0 %14056, %v10976_v1   ;;  %v10978_v23 = vld [vmem:[%s20780_s9 + $0x120] sm:$0xff] }
 0x2e3   : > { %v16623_v44 = vpop.permute.xlu1 %7303 }
 0x2e4   : > { %21266 = vst [vmem:[#allocation286_spill] sm:$0xff] %v16623_v44  ;;  %v16625_v15 = vpop.permute.xlu0 %7298  ;;  %8443 = vperm.xlu1 %14057, %v11457_v6   ;;  %v11459_v44 = vld [vmem:[%s20780_s9 + $0x828] sm:$0xff] }
 0x2e5   : > { %21267 = vst [vmem:[#allocation287_spill] sm:$0xff] %v16625_v15  ;;  %4029 = vperm.xlu0 %14056, %v10977_v26   ;;  %v10979_v6 = vld [vmem:[%s20780_s9 + $0x128] sm:$0xff] }
 0x2e7   : > { %v16633_v1 = vpop.permute.xlu1 %7313 }
 0x2e8   : > { %21268 = vst [vmem:[#allocation288_spill] sm:$0xff] %v16633_v1  ;;  %v16635_v51 = vpop.permute.xlu0 %7308  ;;  %8448 = vperm.xlu1 %14057, %v11458_v58   ;;  %v11460_v1 = vld [vmem:[%s20780_s9 + $0x830] sm:$0xff] }
 0x2e9   : > { %21269 = vst [vmem:[#allocation289_spill] sm:$0xff] %v16635_v51  ;;  %4034 = vperm.xlu0 %14056, %v10978_v23   ;;  %v10980_v58 = vld [vmem:[%s20780_s9 + $0x130] sm:$0xff] }
 0x2eb   : > { %v16643_v26 = vpop.permute.xlu1 %7323 }
 0x2ec   : > { %21270 = vst [vmem:[#allocation290_spill] sm:$0xff] %v16643_v26  ;;  %v16645_v15 = vpop.permute.xlu0 %7318  ;;  %8453 = vperm.xlu1 %14057, %v11459_v44   ;;  %v11461_v26 = vld [vmem:[%s20780_s9 + $0x838] sm:$0xff] }
 0x2ed   : > { %21271 = vst [vmem:[#allocation291_spill] sm:$0xff] %v16645_v15  ;;  %4039 = vperm.xlu0 %14056, %v10979_v6   ;;  %v10981_v44 = vld [vmem:[%s20780_s9 + $0x138] sm:$0xff] }
 0x2ef   : > { %v16653_v23 = vpop.permute.xlu1 %7333 }
 0x2f0   : > { %21272 = vst [vmem:[#allocation292_spill] sm:$0xff] %v16653_v23  ;;  %v16655_v51 = vpop.permute.xlu0 %7328  ;;  %8458 = vperm.xlu1 %14057, %v11460_v1   ;;  %v11462_v23 = vld [vmem:[%s20780_s9 + $0x840] sm:$0xff] }
 0x2f1   : > { %21273 = vst [vmem:[#allocation293_spill] sm:$0xff] %v16655_v51  ;;  %4044 = vperm.xlu0 %14056, %v10980_v58   ;;  %v10982_v1 = vld [vmem:[%s20780_s9 + $0x140] sm:$0xff] }
 0x2f3   : > { %v16663_v6 = vpop.permute.xlu1 %7343 }
 0x2f4   : > { %21274 = vst [vmem:[#allocation294_spill] sm:$0xff] %v16663_v6  ;;  %v16665_v15 = vpop.permute.xlu0 %7338  ;;  %8463 = vperm.xlu1 %14057, %v11461_v26   ;;  %v11463_v6 = vld [vmem:[%s20780_s9 + $0x848] sm:$0xff] }
 0x2f5   : > { %21275 = vst [vmem:[#allocation295_spill] sm:$0xff] %v16665_v15  ;;  %4049 = vperm.xlu0 %14056, %v10981_v44   ;;  %v10983_v26 = vld [vmem:[%s20780_s9 + $0x148] sm:$0xff] }
 0x2f7   : > { %v16673_v58 = vpop.permute.xlu1 %7353 }
 0x2f8   : > { %21276 = vst [vmem:[#allocation296_spill] sm:$0xff] %v16673_v58  ;;  %v16675_v51 = vpop.permute.xlu0 %7348  ;;  %8468 = vperm.xlu1 %14057, %v11462_v23   ;;  %v11464_v58 = vld [vmem:[%s20780_s9 + $0x850] sm:$0xff] }
 0x2f9   : > { %21277 = vst [vmem:[#allocation297_spill] sm:$0xff] %v16675_v51  ;;  %4054 = vperm.xlu0 %14056, %v10982_v1   ;;  %v10984_v23 = vld [vmem:[%s20780_s9 + $0x150] sm:$0xff] }
 0x2fb   : > { %v16683_v44 = vpop.permute.xlu1 %7363 }
 0x2fc   : > { %21278 = vst [vmem:[#allocation298_spill] sm:$0xff] %v16683_v44  ;;  %v16685_v15 = vpop.permute.xlu0 %7358  ;;  %8473 = vperm.xlu1 %14057, %v11463_v6   ;;  %v11465_v44 = vld [vmem:[%s20780_s9 + $0x858] sm:$0xff] }
 0x2fd   : > { %21279 = vst [vmem:[#allocation299_spill] sm:$0xff] %v16685_v15  ;;  %4059 = vperm.xlu0 %14056, %v10983_v26   ;;  %v10985_v6 = vld [vmem:[%s20780_s9 + $0x158] sm:$0xff] }
 0x2ff   : > { %v16693_v1 = vpop.permute.xlu1 %7373 }
 0x300   : > { %21280 = vst [vmem:[#allocation300_spill] sm:$0xff] %v16693_v1  ;;  %v16695_v51 = vpop.permute.xlu0 %7368  ;;  %8478 = vperm.xlu1 %14057, %v11464_v58   ;;  %v11466_v1 = vld [vmem:[%s20780_s9 + $0x860] sm:$0xff] }
 0x301   : > { %21281 = vst [vmem:[#allocation301_spill] sm:$0xff] %v16695_v51  ;;  %4064 = vperm.xlu0 %14056, %v10984_v23   ;;  %v10986_v58 = vld [vmem:[%s20780_s9 + $0x160] sm:$0xff] }
 0x303   : > { %v16703_v26 = vpop.permute.xlu1 %7383 }
 0x304   : > { %21282 = vst [vmem:[#allocation302_spill] sm:$0xff] %v16703_v26  ;;  %v16705_v15 = vpop.permute.xlu0 %7378  ;;  %8483 = vperm.xlu1 %14057, %v11465_v44   ;;  %v11467_v26 = vld [vmem:[%s20780_s9 + $0x868] sm:$0xff] }
 0x305   : > { %21283 = vst [vmem:[#allocation303_spill] sm:$0xff] %v16705_v15  ;;  %4069 = vperm.xlu0 %14056, %v10985_v6   ;;  %v10987_v44 = vld [vmem:[%s20780_s9 + $0x168] sm:$0xff]  ;;  %v11468_v6 = vld [vmem:[%s20780_s9 + $0x870] sm:$0xff] }
 0x307   : > { %v16713_v23 = vpop.permute.xlu1 %7393 }
 0x308   : > { %21284 = vst [vmem:[#allocation304_spill] sm:$0xff] %v16713_v23  ;;  %8488 = vperm.xlu1 %14057, %v11466_v1   ;;  %v16715_v51 = vpop.permute.xlu0 %7388  ;;  %v10988_v1 = vld [vmem:[%s20780_s9 + $0x170] sm:$0xff]  ;;  %v11469_v23 = vld [vmem:[%s20780_s9 + $0x878] sm:$0xff] }
 0x309   : > { %21285 = vst [vmem:[#allocation305_spill] sm:$0xff] %v16715_v51  ;;  %4074 = vperm.xlu0 %14056, %v10986_v58  }
 0x30b   : > { %v16726_v15 = vpop.permute.xlu1 %7403 }
 0x30c   : > { %8493 = vperm.xlu1 %14057, %v11467_v26   ;;  %21286 = vst [vmem:[#allocation306_spill] sm:$0xff] %v16726_v15  ;;  %v16731_v58 = vpop.permute.xlu0 %7398 }
 0x30d   : > { %4079 = vperm.xlu0 %14056, %v10987_v44   ;;  %21287 = vst [vmem:[#allocation307_spill] sm:$0xff] %v16731_v58  ;;  %v10989_v44 = vld [vmem:[%s20780_s9 + $0x178] sm:$0xff]  ;;  %v10990_v58 = vld [vmem:[%s20780_s9 + $0x180] sm:$0xff] }
 0x30f   : > { %v16739_v52 = vpop.permute.xlu1 %7413 }
 0x310   : > { %8498 = vperm.xlu1 %14057, %v11468_v6   ;;  %21288 = vst [vmem:[#allocation308_spill] sm:$0xff] %v16739_v52  ;;  %v16741_v42 = vpop.permute.xlu0 %7408  ;;  %v11470_v6 = vld [vmem:[%s20780_s9 + $0x880] sm:$0xff] }
 0x311   : > { %4084 = vperm.xlu0 %14056, %v10988_v1   ;;  %21289 = vst [vmem:[#allocation309_spill] sm:$0xff] %v16741_v42 }
 0x312   : > { %v11788_v26 = vpop.f32.mrb[32].mxu1 }
 0x313   : > { %v11789_v51 = vpop.f32.mrb[33].mxu1 }
 0x314   : > { %v11790_v15 = vadd.f32 %v11789_v51, %v11788_v26  ;;  %8503 = vperm.xlu1 %14057, %v11469_v23   ;;  %v11471_v51 = vld [vmem:[%s20780_s9 + $0x888] sm:$0xff]  ;;  %v16752_v23 = vpop.permute.xlu1 %7423  ;;  %v16757_v52 = vpop.permute.xlu0 %7418 }
 0x315   : > { %4089 = vperm.xlu0 %14056, %v10989_v44   ;;  %21290 = vst [vmem:[#allocation310_spill] sm:$0xff] %v16752_v23  ;;  %v10991_v44 = vld [vmem:[%s20780_s9 + $0x188] sm:$0xff]  ;;  %21291 = vst [vmem:[#allocation311_spill] sm:$0xff] %v16757_v52 }
 0x316   : > { %v11791_v1 = vpop.f32.mrb[34].mxu1 }
 0x317   : > { %v11792_v46 = vpop.f32.mrb[35].mxu1 }
 0x318   : > { %v11793_v39 = vadd.f32 %v11792_v46, %v11791_v1  ;;  %8508 = vperm.xlu1 %14057, %v11470_v6   ;;  %v11472_v46 = vld [vmem:[%s20780_s9 + $0x890] sm:$0xff]  ;;  %v16765_v6 = vpop.permute.xlu1 %7853 }
 0x319   : > { %4094 = vperm.xlu0 %14056, %v10990_v58   ;;  %v10992_v58 = vld [vmem:[%s20780_s9 + $0x190] sm:$0xff]  ;;  %21292 = vst [vmem:[#allocation312_spill] sm:$0xff] %v16765_v6 }
 0x31a   : > { %v13528_v26 = vpack.c.bf16 %v11793_v39, %v11790_v15  ;;  %v14287_v39 = vld [vmem:[%s20776_s5 + $0x8] sm:$0xff]  ;;  %v16771_v15 = vpop.permute.xlu0 %7848  ;;  %v14288_v1 = vld [vmem:[%s20776_s5 + $0x10] sm:$0xff] }
 0x31b   : > { %21293 = vst [vmem:[#allocation313_spill] sm:$0xff] %v16771_v15  ;;  %v11626_v15 = vld [vmem:[%s20779_s8 + $0x260] sm:$0xff] }
 0x31c   : > { %13529 = vmatprep.subr.bf16.mxu1 %v13528_v26  ;;  %8513 = vperm.xlu1 %14057, %v11471_v51   ;;  %v11473_v51 = vld [vmem:[%s20780_s9 + $0x898] sm:$0xff] }
 0x31d   : > { %4099 = vperm.xlu0 %14056, %v10991_v44   ;;  %13531 = vmatpush3.bf16.msra.mxu1 %v13528_v26  ;;  %v10993_v26 = vld [vmem:[%s20780_s9 + $0x198] sm:$0xff] }
 0x31e   : > { %v14289_v44 = vld [vmem:[%s20776_s5 + $0x18] sm:$0xff]  ;;  %v16799_v6 = vpop.permute.xlu0 %7858 }
 0x31f   : > { %21295 = vst [vmem:[#allocation315_spill] sm:$0xff] %v16799_v6 }
 0x320   : > { %12581 = vmatmul.mubr.msk.f32.vlgmr.msra.gmra.mrb[36].mxu1 %vm504_vm0, %v14287_v39  ;;  %8518 = vperm.xlu1 %14057, %v11472_v46   ;;  %v14290_v46 = vld [vmem:[%s20776_s5 + $0x20] sm:$0xff]  ;;  %v16794_v39 = vpop.permute.xlu1 %7863 }
 0x321   : > { %4104 = vperm.xlu0 %14056, %v10992_v58   ;;  %12583 = vmatprep.mubr.msk.f32.mxu1 %vm504_vm0, %v14288_v1  ;;  %v11474_v58 = vld [vmem:[%s20780_s9 + $0x8a0] sm:$0xff]  ;;  %21294 = vst [vmem:[#allocation314_spill] sm:$0xff] %v16794_v39 }
 0x322   : > { %v10994_v1 = vld [vmem:[%s20780_s9 + $0x1a0] sm:$0xff] }
 0x324   : > { %12584 = vmatmul.mubr.msk.f32.gmra.mrb[38].mxu1 %vm504_vm0, %v14289_v44  ;;  %8523 = vperm.xlu1 %14057, %v11473_v51   ;;  %v14291_v51 = vld [vmem:[%s20776_s5 + $0x28] sm:$0xff]  ;;  %v16815_v39 = vpop.permute.xlu1 %7873 }
 0x325   : > { %4109 = vperm.xlu0 %14056, %v10993_v26   ;;  %12586 = vmatprep.mubr.msk.f32.mxu1 %vm504_vm0, %v14290_v46  ;;  %v14292_v26 = vld [vmem:[%s20776_s5 + $0x30] sm:$0xff]  ;;  %v11475_v44 = vld [vmem:[%s20780_s9 + $0x8a8] sm:$0xff]  ;;  %21296 = vst [vmem:[#allocation316_spill] sm:$0xff] %v16815_v39 }
 0x326   : > { %v10995_v46 = vld [vmem:[%s20780_s9 + $0x1a8] sm:$0xff]  ;;  %v10996_v39 = vld [vmem:[%s20780_s9 + $0x1b0] sm:$0xff] }
 0x328   : > { %12587 = vmatmul.mubr.msk.f32.gmra.mrb[40].mxu1 %vm504_vm0, %v14291_v51  ;;  %8528 = vperm.xlu1 %14057, %v11474_v58   ;;  %v14293_v58 = vld [vmem:[%s20776_s5 + $0x38] sm:$0xff]  ;;  %v14294_v51 = vld [vmem:[%s20776_s5 + $0x40] sm:$0xff] }
 0x329   : > { %4114 = vperm.xlu0 %14056, %v10994_v1   ;;  %12589 = vmatprep.mubr.msk.f32.mxu1 %vm504_vm0, %v14292_v26  ;;  %v16821_v1 = vpop.permute.xlu0 %7868  ;;  %v11476_v26 = vld [vmem:[%s20780_s9 + $0x8b0] sm:$0xff] }
 0x32a   : > { %21297 = vst [vmem:[#allocation317_spill] sm:$0xff] %v16821_v1  ;;  %v10997_v1 = vld [vmem:[%s20780_s9 + $0x1b8] sm:$0xff] }
 0x32c   : > { %12590 = vmatmul.mubr.msk.f32.gmra.mrb[42].mxu1 %vm504_vm0, %v14293_v58  ;;  %8533 = vperm.xlu1 %14057, %v11475_v44   ;;  %v14295_v44 = vld [vmem:[%s20776_s5 + $0x48] sm:$0xff]  ;;  %v11477_v58 = vld [vmem:[%s20780_s9 + $0x8b8] sm:$0xff] }
 0x32d   : > { %4119 = vperm.xlu0 %14056, %v10995_v46   ;;  %12592 = vmatprep.mubr.msk.f32.mxu1 %vm504_vm0, %v14294_v51  ;;  %v14296_v46 = vld [vmem:[%s20776_s5 + $0x50] sm:$0xff]  ;;  %v16844_v51 = vpop.permute.xlu1 %7883  ;;  %v16849_v6 = vpop.permute.xlu0 %7878 }
 0x32e   : > { %21298 = vst [vmem:[#allocation318_spill] sm:$0xff] %v16844_v51  ;;  %21299 = vst [vmem:[#allocation319_spill] sm:$0xff] %v16849_v6 }
 0x330   : > { %12593 = vmatmul.mubr.msk.f32.gmra.mrb[44].mxu1 %vm504_vm0, %v14295_v44  ;;  %8538 = vperm.xlu1 %14057, %v11476_v26   ;;  %v14298_v26 = vld [vmem:[%s20776_s5 + $0x60] sm:$0xff] }
 0x331   : > { %4124 = vperm.xlu0 %14056, %v10996_v39   ;;  %12595 = vmatprep.mubr.msk.f32.mxu1 %vm504_vm0, %v14296_v46  ;;  %v14297_v39 = vld [vmem:[%s20776_s5 + $0x58] sm:$0xff]  ;;  %v11478_v44 = vld [vmem:[%s20780_s9 + $0x8c0] sm:$0xff]  ;;  %v16865_v51 = vpop.permute.xlu1 %7893 }
 0x332   : > { %v10998_v46 = vld [vmem:[%s20780_s9 + $0x1c0] sm:$0xff]  ;;  %21300 = vst [vmem:[#allocation320_spill] sm:$0xff] %v16865_v51  ;;  %v10999_v51 = vld [vmem:[%s20780_s9 + $0x1c8] sm:$0xff] }
 0x334   : > { %12596 = vmatmul.mubr.msk.f32.gmra.mrb[46].mxu1 %vm504_vm0, %v14297_v39  ;;  %8543 = vperm.xlu1 %14057, %v11477_v58   ;;  %v16871_v58 = vpop.permute.xlu0 %7888  ;;  %v14300_v39 = vld [vmem:[%s20776_s5 + $0x70] sm:$0xff] }
 0x335   : > { %4129 = vperm.xlu0 %14056, %v10997_v1   ;;  %12598 = vmatprep.mubr.msk.f32.mxu1 %vm504_vm0, %v14298_v26  ;;  %v14299_v1 = vld [vmem:[%s20776_s5 + $0x68] sm:$0xff]  ;;  %21301 = vst [vmem:[#allocation321_spill] sm:$0xff] %v16871_v58  ;;  %v11000_v58 = vld [vmem:[%s20780_s9 + $0x1d0] sm:$0xff] }
 0x336   : > { %v11479_v26 = vld [vmem:[%s20780_s9 + $0x8c8] sm:$0xff] }
 0x338   : > { %12599 = vmatmul.mubr.msk.f32.gmra.mrb[48].mxu1 %vm504_vm0, %v14299_v1  ;;  %8548 = vperm.xlu1 %14057, %v11478_v44   ;;  %v14301_v44 = vld [vmem:[%s20776_s5 + $0x78] sm:$0xff]  ;;  %v11480_v1 = vld [vmem:[%s20780_s9 + $0x8d0] sm:$0xff]  ;;  %v16899_v6 = vpop.permute.xlu0 %7898 }
 0x339   : > { %4134 = vperm.xlu0 %14056, %v10998_v46   ;;  %12601 = vmatprep.mubr.msk.f32.mxu1 %vm504_vm0, %v14300_v39  ;;  %v14302_v46 = vld [vmem:[%s20776_s5 + $0x80] sm:$0xff]  ;;  %v16894_v39 = vpop.permute.xlu1 %7903  ;;  %21303 = vst [vmem:[#allocation323_spill] sm:$0xff] %v16899_v6 }
 0x33a   : > { %21302 = vst [vmem:[#allocation322_spill] sm:$0xff] %v16894_v39 }
 0x33c   : > { %12602 = vmatmul.mubr.msk.f32.gmra.mrb[50].mxu1 %vm504_vm0, %v14301_v44  ;;  %8553 = vperm.xlu1 %14057, %v11479_v26   ;;  %v14304_v26 = vld [vmem:[%s20776_s5 + $0x90] sm:$0xff]  ;;  %v11481_v44 = vld [vmem:[%s20780_s9 + $0x8d8] sm:$0xff] }
 0x33d   : > { %4139 = vperm.xlu0 %14056, %v10999_v51   ;;  %12604 = vmatprep.mubr.msk.f32.mxu1 %vm504_vm0, %v14302_v46  ;;  %v14303_v51 = vld [vmem:[%s20776_s5 + $0x88] sm:$0xff]  ;;  %v11001_v46 = vld [vmem:[%s20780_s9 + $0x1d8] sm:$0xff]  ;;  %v16915_v39 = vpop.permute.xlu1 %7913 }
 0x33e   : > { %21304 = vst [vmem:[#allocation324_spill] sm:$0xff] %v16915_v39  ;;  %v11002_v39 = vld [vmem:[%s20780_s9 + $0x1e0] sm:$0xff] }
 0x340   : > { %12605 = vmatmul.mubr.msk.f32.gmra.mrb[52].mxu1 %vm504_vm0, %v14303_v51  ;;  %8558 = vperm.xlu1 %14057, %v11480_v1   ;;  %v16921_v1 = vpop.permute.xlu0 %7908  ;;  %v14306_v51 = vld [vmem:[%s20776_s5 + $0xa0] sm:$0xff] }
 0x341   : > { %4144 = vperm.xlu0 %14056, %v11000_v58   ;;  %12607 = vmatprep.mubr.msk.f32.mxu1 %vm504_vm0, %v14304_v26  ;;  %v14305_v58 = vld [vmem:[%s20776_s5 + $0x98] sm:$0xff]  ;;  %21305 = vst [vmem:[#allocation325_spill] sm:$0xff] %v16921_v1  ;;  %v11482_v26 = vld [vmem:[%s20780_s9 + $0x8e0] sm:$0xff]  ;;  %v11003_v1 = vld [vmem:[%s20780_s9 + $0x1e8] sm:$0xff] }
 0x344   : > { %12608 = vmatmul.mubr.msk.f32.gmra.mrb[54].mxu1 %vm504_vm0, %v14305_v58  ;;  %8563 = vperm.xlu1 %14057, %v11481_v44   ;;  %v14307_v44 = vld [vmem:[%s20776_s5 + $0xa8] sm:$0xff]  ;;  %v16949_v6 = vpop.permute.xlu0 %7918 }
 0x345   : > { %4149 = vperm.xlu0 %14056, %v11001_v46   ;;  %12610 = vmatprep.mubr.msk.f32.mxu1 %vm504_vm0, %v14306_v51  ;;  %v14308_v46 = vld [vmem:[%s20776_s5 + $0xb0] sm:$0xff]  ;;  %v11483_v58 = vld [vmem:[%s20780_s9 + $0x8e8] sm:$0xff]  ;;  %v16944_v51 = vpop.permute.xlu1 %7923  ;;  %21307 = vst [vmem:[#allocation327_spill] sm:$0xff] %v16949_v6 }
 0x346   : > { %21306 = vst [vmem:[#allocation326_spill] sm:$0xff] %v16944_v51 }
 0x348   : > { %12611 = vmatmul.mubr.msk.f32.gmra.mrb[56].mxu1 %vm504_vm0, %v14307_v44  ;;  %8568 = vperm.xlu1 %14057, %v11482_v26   ;;  %v14310_v26 = vld [vmem:[%s20776_s5 + $0xc0] sm:$0xff]  ;;  %v11484_v44 = vld [vmem:[%s20780_s9 + $0x8f0] sm:$0xff] }
 0x349   : > { %4154 = vperm.xlu0 %14056, %v11002_v39   ;;  %12613 = vmatprep.mubr.msk.f32.mxu1 %vm504_vm0, %v14308_v46  ;;  %v14309_v39 = vld [vmem:[%s20776_s5 + $0xb8] sm:$0xff]  ;;  %v11004_v46 = vld [vmem:[%s20780_s9 + $0x1f0] sm:$0xff]  ;;  %v16965_v51 = vpop.permute.xlu1 %7933 }
 0x34a   : > { %21308 = vst [vmem:[#allocation328_spill] sm:$0xff] %v16965_v51  ;;  %v11005_v51 = vld [vmem:[%s20780_s9 + $0x1f8] sm:$0xff] }
 0x34c   : > { %12614 = vmatmul.mubr.msk.f32.gmra.mrb[58].mxu1 %vm504_vm0, %v14309_v39  ;;  %8573 = vperm.xlu1 %14057, %v11483_v58   ;;  %v16971_v58 = vpop.permute.xlu0 %7928  ;;  %v14312_v39 = vld [vmem:[%s20776_s5 + $0xd0] sm:$0xff] }
 0x34d   : > { %4159 = vperm.xlu0 %14056, %v11003_v1   ;;  %12616 = vmatprep.mubr.msk.f32.mxu1 %vm504_vm0, %v14310_v26  ;;  %v14311_v1 = vld [vmem:[%s20776_s5 + $0xc8] sm:$0xff]  ;;  %21309 = vst [vmem:[#allocation329_spill] sm:$0xff] %v16971_v58  ;;  %v11485_v26 = vld [vmem:[%s20780_s9 + $0x8f8] sm:$0xff]  ;;  %v11582_v58 = vld [vmem:[%s20778_s7 + $0x200] sm:$0xff] }
 0x350   : > { %12617 = vmatmul.mubr.msk.f32.gmra.mrb[60].mxu1 %vm504_vm0, %v14311_v1  ;;  %8578 = vperm.xlu1 %14057, %v11484_v44   ;;  %v14313_v44 = vld [vmem:[%s20776_s5 + $0xd8] sm:$0xff]  ;;  %v11583_v1 = vld [vmem:[%s20778_s7 + $0x208] sm:$0xff]  ;;  %v16999_v6 = vpop.permute.xlu0 %7938 }
 0x351   : > { %4164 = vperm.xlu0 %14056, %v11004_v46   ;;  %12619 = vmatprep.mubr.msk.f32.mxu1 %vm504_vm0, %v14312_v39  ;;  %v14314_v46 = vld [vmem:[%s20776_s5 + $0xe0] sm:$0xff]  ;;  %v16994_v39 = vpop.permute.xlu1 %7943  ;;  %21311 = vst [vmem:[#allocation331_spill] sm:$0xff] %v16999_v6 }
 0x352   : > { %21310 = vst [vmem:[#allocation330_spill] sm:$0xff] %v16994_v39 }
 0x354   : > { %12620 = vmatmul.mubr.msk.f32.gmra.mrb[62].mxu1 %vm504_vm0, %v14313_v44  ;;  %8583 = vperm.xlu1 %14057, %v11485_v26   ;;  %v14316_v26 = vld [vmem:[%s20776_s5 + $0xf0] sm:$0xff]  ;;  %v11615_v44 = vld [vmem:[%s20779_s8 + $0x208] sm:$0xff] }
 0x355   : > { %4169 = vperm.xlu0 %14056, %v11005_v51   ;;  %12622 = vmatprep.mubr.msk.f32.mxu1 %vm504_vm0, %v14314_v46  ;;  %v14315_v51 = vld [vmem:[%s20776_s5 + $0xe8] sm:$0xff]  ;;  %v11614_v46 = vld [vmem:[%s20779_s8 + $0x200] sm:$0xff]  ;;  %v17015_v39 = vpop.permute.xlu1 %7953 }
 0x356   : > { %21312 = vst [vmem:[#allocation332_spill] sm:$0xff] %v17015_v39  ;;  %v11617_v39 = vld [vmem:[%s20779_s8 + $0x218] sm:$0xff] }
 0x358   : > { %12623 = vmatmul.mubr.msk.f32.gmra.mrb[64].mxu1 %vm504_vm0, %v14315_v51  ;;  %9837 = vperm.xlu1 %14057, %v11583_v1   ;;  %v17021_v1 = vpop.permute.xlu0 %7948  ;;  %v11585_v51 = vld [vmem:[%s20778_s7 + $0x218] sm:$0xff] }
 0x359   : > { %9832 = vperm.xlu0 %14056, %v11582_v58   ;;  %12625 = vmatprep.mubr.msk.f32.mxu1 %vm504_vm0, %v14316_v26  ;;  %v14317_v58 = vld [vmem:[%s20776_s5 + $0xf8] sm:$0xff]  ;;  %21313 = vst [vmem:[#allocation333_spill] sm:$0xff] %v17021_v1  ;;  %v11584_v26 = vld [vmem:[%s20778_s7 + $0x210] sm:$0xff]  ;;  %v17032_v6 = vpop.permute.xlu1 %7963 }
 0x35a   : > { %21314 = vst [vmem:[#allocation334_spill] sm:$0xff] %v17032_v6 }
 0x35c   : > { %12626 = vmatmul.mubr.msk.f32.gmra.mrb[66].mxu1 %vm504_vm0, %v14317_v58  ;;  %10062 = vperm.xlu1 %14057, %v11615_v44   ;;  %v11616_v44 = vld [vmem:[%s20779_s8 + $0x210] sm:$0xff]  ;;  %v11587_v58 = vld [vmem:[%s20778_s7 + $0x228] sm:$0xff] }
 0x35d   : > { %10057 = vperm.xlu0 %14056, %v11614_v46   ;;  %v17037_v46 = vpop.permute.xlu0 %7958 }
 0x35e   : > { %21315 = vst [vmem:[#allocation335_spill] sm:$0xff] %v17037_v46  ;;  %v11619_v46 = vld [vmem:[%s20779_s8 + $0x228] sm:$0xff] }
 0x360   : > { %9847 = vperm.xlu1 %14057, %v11585_v51   ;;  %v11586_v51 = vld [vmem:[%s20778_s7 + $0x220] sm:$0xff] }
 0x361   : > { %9842 = vperm.xlu0 %14056, %v11584_v26   ;;  %v17045_v26 = vpop.permute.xlu1 %7973  ;;  %v17047_v6 = vpop.permute.xlu0 %7968 }
 0x362   : > { %21316 = vst [vmem:[#allocation336_spill] sm:$0xff] %v17045_v26  ;;  %21317 = vst [vmem:[#allocation337_spill] sm:$0xff] %v17047_v6  ;;  %v11621_v26 = vld [vmem:[%s20779_s8 + $0x238] sm:$0xff] }
 0x364   : > { %10072 = vperm.xlu1 %14057, %v11617_v39   ;;  %v11618_v39 = vld [vmem:[%s20779_s8 + $0x220] sm:$0xff] }
 0x365   : > { %10067 = vperm.xlu0 %14056, %v11616_v44   ;;  %v11589_v44 = vld [vmem:[%s20778_s7 + $0x238] sm:$0xff]  ;;  %v17058_v1 = vpop.permute.xlu1 %7983 }
 0x366   : > { %21318 = vst [vmem:[#allocation338_spill] sm:$0xff] %v17058_v1 }
 0x368   : > { %9857 = vperm.xlu1 %14057, %v11587_v58   ;;  %v11588_v58 = vld [vmem:[%s20778_s7 + $0x230] sm:$0xff] }
 0x369   : > { %9852 = vperm.xlu0 %14056, %v11586_v51   ;;  %v17063_v51 = vpop.permute.xlu0 %7978 }
 0x36a   : > { %21319 = vst [vmem:[#allocation339_spill] sm:$0xff] %v17063_v51  ;;  %v11591_v51 = vld [vmem:[%s20778_s7 + $0x248] sm:$0xff] }
 0x36c   : > { %10082 = vperm.xlu1 %14057, %v11619_v46   ;;  %v11620_v46 = vld [vmem:[%s20779_s8 + $0x230] sm:$0xff] }
 0x36d   : > { %10077 = vperm.xlu0 %14056, %v11618_v39   ;;  %v17071_v39 = vpop.permute.xlu1 %7993  ;;  %v17073_v1 = vpop.permute.xlu0 %7988 }
 0x36e   : > { %21320 = vst [vmem:[#allocation340_spill] sm:$0xff] %v17071_v39  ;;  %21321 = vst [vmem:[#allocation341_spill] sm:$0xff] %v17073_v1  ;;  %v11593_v39 = vld [vmem:[%s20778_s7 + $0x258] sm:$0xff] }
 0x370   : > { %9867 = vperm.xlu1 %14057, %v11589_v44   ;;  %v11590_v44 = vld [vmem:[%s20778_s7 + $0x240] sm:$0xff] }
 0x371   : > { %9862 = vperm.xlu0 %14056, %v11588_v58   ;;  %v11623_v58 = vld [vmem:[%s20779_s8 + $0x248] sm:$0xff]  ;;  %v17084_v6 = vpop.permute.xlu1 %8003 }
 0x372   : > { %21322 = vst [vmem:[#allocation342_spill] sm:$0xff] %v17084_v6 }
 0x374   : > { %10092 = vperm.xlu1 %14057, %v11621_v26   ;;  %v11622_v26 = vld [vmem:[%s20779_s8 + $0x240] sm:$0xff] }
 0x375   : > { %10087 = vperm.xlu0 %14056, %v11620_v46   ;;  %v17089_v46 = vpop.permute.xlu0 %7998 }
 0x376   : > { %21323 = vst [vmem:[#allocation343_spill] sm:$0xff] %v17089_v46  ;;  %v11625_v46 = vld [vmem:[%s20779_s8 + $0x258] sm:$0xff] }
 0x378   : > { %9877 = vperm.xlu1 %14057, %v11591_v51   ;;  %v11592_v51 = vld [vmem:[%s20778_s7 + $0x250] sm:$0xff] }
 0x379   : > { %9872 = vperm.xlu0 %14056, %v11590_v44   ;;  %v17097_v44 = vpop.permute.xlu1 %8428  ;;  %v17099_v6 = vpop.permute.xlu0 %4014 }
 0x37a   : > { %21324 = vst [vmem:[#allocation344_spill] sm:$0xff] %v17097_v44  ;;  %21325 = vst [vmem:[#allocation345_spill] sm:$0xff] %v17099_v6  ;;  %v1831_v44 = vld [vmem:[%s20772_s1 + $0x8] sm:$0xff] }
 0x37c   : > { %10102 = vperm.xlu1 %14057, %v11623_v58   ;;  %v11624_v58 = vld [vmem:[%s20779_s8 + $0x250] sm:$0xff] }
 0x37d   : > { %10097 = vperm.xlu0 %14056, %v11622_v26   ;;  %v11595_v26 = vld [vmem:[%s20778_s7 + $0x268] sm:$0xff]  ;;  %v17110_v1 = vpop.permute.xlu1 %8433 }
 0x37e   : > { %21326 = vst [vmem:[#allocation346_spill] sm:$0xff] %v17110_v1  ;;  %v11627_v1 = vld [vmem:[%s20779_s8 + $0x268] sm:$0xff] }
 0x380   : > { %9887 = vperm.xlu1 %14057, %v11593_v39   ;;  %v11594_v39 = vld [vmem:[%s20778_s7 + $0x260] sm:$0xff] }
 0x381   : > { %9882 = vperm.xlu0 %14056, %v11592_v51   ;;  %v1830_v51 = vld [vmem:[%s20772_s1] sm:$0xff]  ;;  %v17129_v23 = vpop.permute.xlu1 %8438 }
 0x382   : > { %21328 = vst [vmem:[#allocation348_spill] sm:$0xff] %v17129_v23  ;;  %v11631_v23 = vld [vmem:[%s20779_s8 + $0x288] sm:$0xff] }
 0x384   : > { %10112 = vperm.xlu1 %14057, %v11625_v46   ;;  %v17121_v46 = vpop.permute.xlu0 %4019 }
 0x385   : > { %10107 = vperm.xlu0 %14056, %v11624_v58   ;;  %21327 = vst [vmem:[#allocation347_spill] sm:$0xff] %v17121_v46  ;;  %v13532_v58 = vpack.c.bf16 %v1831_v44, %v1830_v51  ;;  %v11597_v44 = vld [vmem:[%s20778_s7 + $0x278] sm:$0xff]  ;;  %v17142_v51 = vpop.permute.xlu1 %8443 }
 0x386   : > { %21330 = vst [vmem:[#allocation350_spill] sm:$0xff] %v17142_v51 }
 0x387   : > { %13533 = vmatprep.subr.bf16.mxu0 %v13532_v58  ;;  %13724 = vmatprep.subr.bf16.mxu1 %v13532_v58 }
 0x388   : > { %9897 = vperm.xlu1 %14057, %v11595_v26   ;;  %13535 = vmatpush3.bf16.msra.mxu0 %v13532_v58  ;;  %v17131_v52 = vpop.permute.xlu0 %4024  ;;  %v11596_v26 = vld [vmem:[%s20778_s7 + $0x270] sm:$0xff] }
 0x389   : > { %9892 = vperm.xlu0 %14056, %v11594_v39   ;;  %13725 = vmatpush3.bf16.msra.mxu1 %v13532_v58  ;;  %21329 = vst [vmem:[#allocation349_spill] sm:$0xff] %v17131_v52  ;;  %v11629_v39 = vld [vmem:[%s20779_s8 + $0x278] sm:$0xff]  ;;  %v11599_v58 = vld [vmem:[%s20778_s7 + $0x288] sm:$0xff] }
 0x38c   : > { %10122 = vperm.xlu1 %14057, %v11627_v1   ;;  %v17147_v1 = vpop.permute.xlu0 %4029 }
 0x38d   : > { %10117 = vperm.xlu0 %14056, %v11626_v15   ;;  %v11628_v15 = vld [vmem:[%s20779_s8 + $0x270] sm:$0xff]  ;;  %21331 = vst [vmem:[#allocation351_spill] sm:$0xff] %v17147_v1 }
 0x390   : > { %9907 = vperm.xlu1 %14057, %v11597_v44   ;;  %v11598_v44 = vld [vmem:[%s20778_s7 + $0x280] sm:$0xff]  ;;  %v17157_v51 = vpop.permute.xlu0 %4034 }
 0x391   : > { %9902 = vperm.xlu0 %14056, %v11596_v26   ;;  %v17155_v26 = vpop.permute.xlu1 %8448  ;;  %21333 = vst [vmem:[#allocation353_spill] sm:$0xff] %v17157_v51 }
 0x392   : > { %21332 = vst [vmem:[#allocation352_spill] sm:$0xff] %v17155_v26  ;;  %v11633_v26 = vld [vmem:[%s20779_s8 + $0x298] sm:$0xff] }
 0x394   : > { %10132 = vperm.xlu1 %14057, %v11629_v39   ;;  %v11630_v39 = vld [vmem:[%s20779_s8 + $0x280] sm:$0xff] }
 0x395   : > { %10127 = vperm.xlu0 %14056, %v11628_v15   ;;  %v11601_v15 = vld [vmem:[%s20778_s7 + $0x298] sm:$0xff]  ;;  %v17168_v42 = vpop.permute.xlu1 %8453 }
 0x396   : > { %21334 = vst [vmem:[#allocation354_spill] sm:$0xff] %v17168_v42 }
 0x398   : > { %9917 = vperm.xlu1 %14057, %v11599_v58   ;;  %v11600_v58 = vld [vmem:[%s20778_s7 + $0x290] sm:$0xff] }
 0x399   : > { %9912 = vperm.xlu0 %14056, %v11598_v44   ;;  %v17173_v44 = vpop.permute.xlu0 %4039 }
 0x39a   : > { %21335 = vst [vmem:[#allocation355_spill] sm:$0xff] %v17173_v44 }
 0x39c   : > { %10142 = vperm.xlu1 %14057, %v11631_v23   ;;  %v11632_v23 = vld [vmem:[%s20779_s8 + $0x290] sm:$0xff] }
 0x39d   : > { %10137 = vperm.xlu0 %14056, %v11630_v39   ;;  %v17181_v39 = vpop.permute.xlu1 %8458  ;;  %v17183_v42 = vpop.permute.xlu0 %4044 }
 0x39e   : > { %21336 = vst [vmem:[#allocation356_spill] sm:$0xff] %v17181_v39  ;;  %21337 = vst [vmem:[#allocation357_spill] sm:$0xff] %v17183_v42  ;;  %v11605_v39 = vld [vmem:[%s20778_s7 + $0x2b8] sm:$0xff] }
 0x3a0   : > { %9927 = vperm.xlu1 %14057, %v11601_v15   ;;  %v11602_v15 = vld [vmem:[%s20778_s7 + $0x2a0] sm:$0xff] }
 0x3a1   : > { %9922 = vperm.xlu0 %14056, %v11600_v58   ;;  %v11635_v58 = vld [vmem:[%s20779_s8 + $0x2a8] sm:$0xff]  ;;  %v17194_v41 = vpop.permute.xlu1 %8463 }
 0x3a2   : > { %21338 = vst [vmem:[#allocation358_spill] sm:$0xff] %v17194_v41 }
 0x3a4   : > { %10152 = vperm.xlu1 %14057, %v11633_v26   ;;  %v11634_v26 = vld [vmem:[%s20779_s8 + $0x2a0] sm:$0xff] }
 0x3a5   : > { %10147 = vperm.xlu0 %14056, %v11632_v23   ;;  %v17199_v23 = vpop.permute.xlu0 %4049 }
 0x3a6   : > { %21339 = vst [vmem:[#allocation359_spill] sm:$0xff] %v17199_v23 }
 0x3a8   : > { %9937 = vperm.xlu1 %14057, %v11603_v27   ;;  %v11604_v27 = vld [vmem:[%s20778_s7 + $0x2b0] sm:$0xff] }
 0x3a9   : > { %9932 = vperm.xlu0 %14056, %v11602_v15   ;;  %v17207_v15 = vpop.permute.xlu1 %8468  ;;  %v17209_v41 = vpop.permute.xlu0 %4054 }
 0x3aa   : > { %21340 = vst [vmem:[#allocation360_spill] sm:$0xff] %v17207_v15  ;;  %21341 = vst [vmem:[#allocation361_spill] sm:$0xff] %v17209_v41  ;;  %v11639_v15 = vld [vmem:[%s20779_s8 + $0x2c8] sm:$0xff]  ;;  %v11642_v41 = vld [vmem:[%s20779_s8 + $0x2e0] sm:$0xff] }
 0x3ac   : > { %10162 = vperm.xlu1 %14057, %v11635_v58   ;;  %v11636_v58 = vld [vmem:[%s20779_s8 + $0x2b0] sm:$0xff] }
 0x3ad   : > { %10157 = vperm.xlu0 %14056, %v11634_v26   ;;  %v11607_v26 = vld [vmem:[%s20778_s7 + $0x2c8] sm:$0xff]  ;;  %v17220_v22 = vpop.permute.xlu1 %8473 }
 0x3ae   : > { %21342 = vst [vmem:[#allocation362_spill] sm:$0xff] %v17220_v22 }
 0x3b0   : > { %9947 = vperm.xlu1 %14057, %v11605_v39   ;;  %v11606_v39 = vld [vmem:[%s20778_s7 + $0x2c0] sm:$0xff] }
 0x3b1   : > { %9942 = vperm.xlu0 %14056, %v11604_v27   ;;  %v17225_v27 = vpop.permute.xlu0 %4059 }
 0x3b2   : > { %21343 = vst [vmem:[#allocation363_spill] sm:$0xff] %v17225_v27 }
 0x3b4   : > { %10172 = vperm.xlu1 %14057, %v11637_v50   ;;  %v11638_v50 = vld [vmem:[%s20779_s8 + $0x2c0] sm:$0xff] }
 0x3b5   : > { %10167 = vperm.xlu0 %14056, %v11636_v58   ;;  %v17233_v58 = vpop.permute.xlu1 %8478  ;;  %v17235_v22 = vpop.permute.xlu0 %4064 }
 0x3b6   : > { %21344 = vst [vmem:[#allocation364_spill] sm:$0xff] %v17233_v58  ;;  %21345 = vst [vmem:[#allocation365_spill] sm:$0xff] %v17235_v22  ;;  %v11611_v58 = vld [vmem:[%s20778_s7 + $0x2e8] sm:$0xff] }
 0x3b8   : > { %9957 = vperm.xlu1 %14057, %v11607_v26   ;;  %v11608_v26 = vld [vmem:[%s20778_s7 + $0x2d0] sm:$0xff] }
 0x3b9   : > { %9952 = vperm.xlu0 %14056, %v11606_v39   ;;  %v11641_v39 = vld [vmem:[%s20779_s8 + $0x2d8] sm:$0xff]  ;;  %v17246_v27 = vpop.permute.xlu1 %8483 }
 0x3ba   : > { %21346 = vst [vmem:[#allocation366_spill] sm:$0xff] %v17246_v27  ;;  %v2154_v27 = vld [vmem:[%s20773_s2 + $0x8] sm:$0xff] }
 0x3bc   : > { %10182 = vperm.xlu1 %14057, %v11639_v15   ;;  %v11640_v15 = vld [vmem:[%s20779_s8 + $0x2d0] sm:$0xff] }
 0x3bd   : > { %10177 = vperm.xlu0 %14056, %v11638_v50   ;;  %v17251_v50 = vpop.permute.xlu0 %4069 }
 0x3be   : > { %21347 = vst [vmem:[#allocation367_spill] sm:$0xff] %v17251_v50  ;;  %v11643_v50 = vld [vmem:[%s20779_s8 + $0x2e8] sm:$0xff] }
 0x3c0   : > { %9967 = vperm.xlu1 %14057, %v11609_v54   ;;  %v11610_v54 = vld [vmem:[%s20778_s7 + $0x2e0] sm:$0xff] }
 0x3c1   : > { %9962 = vperm.xlu0 %14056, %v11608_v26   ;;  %v2153_v26 = vld [vmem:[%s20773_s2] sm:$0xff] }
 0x3c2   : > { %v17265_v22 = vpack.c.bf16 %v2154_v27, %v2153_v26  ;;  %v11613_v27 = vld [vmem:[%s20778_s7 + $0x2f8] sm:$0xff] }
 0x3c4   : > { %10192 = vperm.xlu1 %14057, %v11641_v39   ;;  %21348 = vst [vmem:[#allocation368_spill] sm:$0xff] %v17265_v22  ;;  %v17267_v39 = vpop.permute.xlu1 %8488  ;;  %13537 = vmatprep.subr.bf16.mxu1 %v17265_v22 }
 0x3c5   : > { %10187 = vperm.xlu0 %14056, %v11640_v15   ;;  %21349 = vst [vmem:[#allocation369_spill] sm:$0xff] %v17267_v39  ;;  %v17269_v15 = vpop.permute.xlu0 %4074  ;;  %v11645_v39 = vld [vmem:[%s20779_s8 + $0x2f8] sm:$0xff] }
 0x3c6   : > { %21350 = vst [vmem:[#allocation370_spill] sm:$0xff] %v17269_v15 }
 0x3c8   : > { %9977 = vperm.xlu1 %14057, %v11611_v58   ;;  %v17281_v58 = vpop.permute.xlu1 %8493 }
 0x3c9   : > { %9972 = vperm.xlu0 %14056, %v11610_v54   ;;  %21351 = vst [vmem:[#allocation371_spill] sm:$0xff] %v17281_v58  ;;  %v11612_v54 = vld [vmem:[%s20778_s7 + $0x2f0] sm:$0xff]  ;;  %v17286_v26 = vpop.permute.xlu0 %4079 }
 0x3ca   : > { %21352 = vst [vmem:[#allocation372_spill] sm:$0xff] %v17286_v26 }
 0x3cc   : > { %10202 = vperm.xlu1 %14057, %v11643_v50   ;;  %v17294_v50 = vpop.permute.xlu1 %8498 }
 0x3cd   : > { %10197 = vperm.xlu0 %14056, %v11642_v41   ;;  %v11644_v41 = vld [vmem:[%s20779_s8 + $0x2f0] sm:$0xff]  ;;  %21353 = vst [vmem:[#allocation373_spill] sm:$0xff] %v17294_v50  ;;  %v17296_v58 = vpop.permute.xlu0 %4084 }
 0x3ce   : > { %21354 = vst [vmem:[#allocation374_spill] sm:$0xff] %v17296_v58 }
 0x3d0   : > { %9987 = vperm.xlu1 %14057, %v11613_v27  }
 0x3d1   : > { %9982 = vperm.xlu0 %14056, %v11612_v54  }
 0x3d4   : > { %10212 = vperm.xlu1 %14057, %v11645_v39  }
 0x3d5   : > { %10207 = vperm.xlu0 %14056, %v11644_v41  }
 0x3f3   : > { %v12582_v15 = vpop.f32.mrb[36].mxu1 }
 0x3f4   : > { %v1223_v23 = vmul.f32 0.0625, %v12582_v15  ;;  %v1063_v42 = vpop.f32.mrb[37].mxu1 }
 0x3f5   : > { %v1222_v26 = vmul.f32 0.0625, %v1063_v42 }
 0x3f6   : > { %v1255_v27 = vadd.f32 1e-05, %v1223_v23 }
 0x3f7   : > { %v1254_v54 = vadd.f32 1e-05, %v1222_v26  ;;  %v12585_v46 = vpop.f32.mrb[38].mxu1 }
 0x3f8   : > { %14058 = vrsqrt.f32 %v1255_v27  ;;  %v1225_v6 = vmul.f32 0.0625, %v12585_v46  ;;  %v1073_v44 = vpop.f32.mrb[39].mxu1 }
 0x3f9   : > { %14060 = vrsqrt.f32 %v1254_v54  ;;  %v1224_v51 = vmul.f32 0.0625, %v1073_v44 }
 0x3fa   : > { %v1257_v52 = vadd.f32 1e-05, %v1225_v6 }
 0x3fb   : > { %v1256_v1 = vadd.f32 1e-05, %v1224_v51  ;;  %v12588_v22 = vpop.f32.mrb[40].mxu1 }
 0x3fc   : > { %14062 = vrsqrt.f32 %v1257_v52  ;;  %v1227_v39 = vmul.f32 0.0625, %v12588_v22  ;;  %v1083_v50 = vpop.f32.mrb[41].mxu1 }
 0x3fd   : > { %14064 = vrsqrt.f32 %v1256_v1  ;;  %v1226_v41 = vmul.f32 0.0625, %v1083_v50 }
 0x3fe   : > { %v1259_v58 = vadd.f32 1e-05, %v1227_v39 }
 0x3ff   : > { %v1258_v15 = vadd.f32 1e-05, %v1226_v41  ;;  %v12591_v48 = vpop.f32.mrb[42].mxu1 }
 0x400   : > { %14066 = vrsqrt.f32 %v1259_v58  ;;  %v1229_v42 = vmul.f32 0.0625, %v12591_v48  ;;  %v1093_v23 = vpop.f32.mrb[43].mxu1 }
 0x401   : > { %14068 = vrsqrt.f32 %v1258_v15  ;;  %v1228_v26 = vmul.f32 0.0625, %v1093_v23 }
 0x402   : > { %v14059_v46 = vpop.eup %14058  ;;  %v1261_v27 = vadd.f32 1e-05, %v1229_v42 }
 0x403   : > { %v14061_v54 = vpop.eup %14060  ;;  %v1319_v6 = vmul.f32 %v14059_v46, %v15916_v38  ;;  %v1260_v51 = vadd.f32 1e-05, %v1228_v26  ;;  %v12594_v44 = vpop.f32.mrb[44].mxu1 }
 0x404   : > { %14070 = vrsqrt.f32 %v1261_v27  ;;  %v1231_v22 = vmul.f32 0.0625, %v12594_v44  ;;  %v1103_v52 = vpop.f32.mrb[45].mxu1  ;;  %v1318_v1 = vmul.f32 %v14061_v54, %v15919_v19 }
 0x405   : > { %v1543_v50 = vmul.f32 %v14822_v60, %v1319_v6  ;;  %14072 = vrsqrt.f32 %v1260_v51  ;;  %v1230_v58 = vmul.f32 0.0625, %v1103_v52 }
 0x406   : > { %v14063_v48 = vpop.eup %14062  ;;  %v1263_v39 = vadd.f32 1e-05, %v1231_v22  ;;  %v1542_v41 = vmul.f32 %v14812_v56, %v1318_v1 }
 0x407   : > { %v14065_v15 = vpop.eup %14064  ;;  %v17303_v42 = vadd.f32 %v14820_v59, %v1543_v50  ;;  %v1262_v38 = vadd.f32 1e-05, %v1230_v58  ;;  %v12597_v23 = vpop.f32.mrb[46].mxu1  ;;  %v1321_v26 = vmul.f32 %v14063_v48, %v15940_v10 }
 0x408   : > { %14074 = vrsqrt.f32 %v1263_v39  ;;  %v1233_v46 = vmul.f32 0.0625, %v12597_v23  ;;  %v1113_v27 = vpop.f32.mrb[47].mxu1  ;;  %v17307_v19 = vadd.f32 %v14810_v55, %v1542_v41  ;;  %v1320_v60 = vmul.f32 %v14065_v15, %v15943_v2 }
 0x409   : > { %14076 = vrsqrt.f32 %v1262_v38  ;;  %v1232_v54 = vmul.f32 0.0625, %v1113_v27  ;;  %v1545_v56 = vmul.f32 %v14830_v63, %v1321_v26  ;;  %v1799_v10 = vmax.f32 %v17303_v42, 0.0 }
 0x40a   : > { %v14067_v6 = vpop.eup %14066  ;;  %v1265_v51 = vadd.f32 1e-05, %v1233_v46  ;;  %v1798_v59 = vmax.f32 %v17307_v19, 0.0  ;;  %v1544_v44 = vmul.f32 %v14832_v0, %v1320_v60 }
 0x40b   : > { %v14069_v22 = vpop.eup %14068  ;;  %v1264_v52 = vadd.f32 1e-05, %v1232_v54  ;;  %v12600_v1 = vpop.f32.mrb[48].mxu1  ;;  %v17315_v55 = vadd.f32 %v14844_v4, %v1545_v56  ;;  %v1323_v2 = vmul.f32 %v14067_v6, %v15975_v61 }
 0x40c   : > { %14078 = vrsqrt.f32 %v1265_v51  ;;  %v1235_v50 = vmul.f32 0.0625, %v12600_v1  ;;  %v1123_v58 = vpop.f32.mrb[49].mxu1  ;;  %12632 = vmatprep.mubr.msk.f32.mxu0 %vm504_vm0, %v1798_v59  ;;  %v17322_v63 = vadd.f32 %v14846_v5, %v1544_v44  ;;  %v1322_v0 = vmul.f32 %v14069_v22, %v15978_v34 }
 0x40d   : > { %14080 = vrsqrt.f32 %v1264_v52  ;;  %v1234_v48 = vmul.f32 0.0625, %v1123_v58  ;;  %12633 = vmatmul.mubr.msk.f32.vlgmr.msra.gmra.mrb[4].mxu0 %vm504_vm0, %v1799_v10  ;;  %v1547_v4 = vmul.f32 %v14854_v8, %v1323_v2  ;;  %v1801_v26 = vmax.f32 %v17315_v55, 0.0 }
 0x40e   : > { %v14071_v61 = vpop.eup %14070  ;;  %v1267_v39 = vadd.f32 1e-05, %v1235_v50  ;;  %v1800_v41 = vmax.f32 %v17322_v63, 0.0  ;;  %v1546_v15 = vmul.f32 %v14856_v9, %v1322_v0 }
 0x40f   : > { %v14073_v38 = vpop.eup %14072  ;;  %v1266_v23 = vadd.f32 1e-05, %v1234_v48  ;;  %v12603_v5 = vpop.f32.mrb[50].mxu1  ;;  %v17333_v34 = vadd.f32 %v14864_v12, %v1547_v4  ;;  %v1325_v46 = vmul.f32 %v14071_v61, %v16015_v11 }
 0x410   : > { %14082 = vrsqrt.f32 %v1267_v39  ;;  %v1237_v27 = vmul.f32 0.0625, %v12603_v5  ;;  %v1133_v60 = vpop.f32.mrb[51].mxu1  ;;  %12635 = vmatprep.mubr.msk.f32.mxu0 %vm504_vm0, %v1800_v41  ;;  %v17340_v8 = vadd.f32 %v14866_v13, %v1546_v15  ;;  %v1324_v9 = vmul.f32 %v14073_v38, %v16018_v3 }
 0x411   : > { %14084 = vrsqrt.f32 %v1266_v23  ;;  %v1236_v54 = vmul.f32 0.0625, %v1133_v60  ;;  %12636 = vmatmul.mubr.msk.f32.gmra.mrb[6].mxu0 %vm504_vm0, %v1801_v26  ;;  %v1549_v12 = vmul.f32 %v14874_v16, %v1325_v46  ;;  %v1803_v52 = vmax.f32 %v17333_v34, 0.0 }
 0x412   : > { %v14075_v11 = vpop.eup %14074  ;;  %v1269_v56 = vadd.f32 1e-05, %v1237_v27  ;;  %v1802_v6 = vmax.f32 %v17340_v8, 0.0  ;;  %v1548_v51 = vmul.f32 %v14876_v17, %v1324_v9  ;;  %v17642_v8 = vld [vmem:[%s20776_s5] sm:$0xff] }
 0x413   : > { %v14077_v44 = vpop.eup %14076  ;;  %v1268_v22 = vadd.f32 1e-05, %v1236_v54  ;;  %v12606_v13 = vpop.f32.mrb[52].mxu1  ;;  %v17351_v3 = vadd.f32 %v14884_v20, %v1549_v12  ;;  %v1327_v1 = vmul.f32 %v14075_v11, %v16026_v35 }
 0x414   : > { %14086 = vrsqrt.f32 %v1269_v56  ;;  %v1239_v2 = vmul.f32 0.0625, %v12606_v13  ;;  %v1143_v50 = vpop.f32.mrb[53].mxu1  ;;  %12638 = vmatprep.mubr.msk.f32.mxu0 %vm504_vm0, %v1802_v6  ;;  %v17358_v16 = vadd.f32 %v14886_v21, %v1548_v51  ;;  %v1326_v17 = vmul.f32 %v14077_v44, %v16029_v18 }
 0x415   : > { %14088 = vrsqrt.f32 %v1268_v22  ;;  %v1238_v58 = vmul.f32 0.0625, %v1143_v50  ;;  %12639 = vmatmul.mubr.msk.f32.gmra.mrb[8].mxu0 %vm504_vm0, %v1803_v52  ;;  %v1551_v20 = vmul.f32 %v14894_v24, %v1327_v1  ;;  %v1805_v15 = vmax.f32 %v17351_v3, 0.0 }
 0x416   : > { %v14079_v35 = vpop.eup %14078  ;;  %v1271_v0 = vadd.f32 1e-05, %v1239_v2  ;;  %v1804_v48 = vmax.f32 %v17358_v16, 0.0  ;;  %v1550_v4 = vmul.f32 %v14896_v25, %v1326_v17  ;;  %v21355_v2 = vld [vmem:[#allocation6_spill] sm:$0xff] }
 0x417   : > { %v14081_v61 = vpop.eup %14080  ;;  %v1270_v39 = vadd.f32 1e-05, %v1238_v58  ;;  %v12609_v21 = vpop.f32.mrb[54].mxu1  ;;  %v17369_v18 = vadd.f32 %v14904_v28, %v1551_v20  ;;  %v1329_v38 = vmul.f32 %v14079_v35, %v16070_v49 }
 0x418   : > { %14090 = vrsqrt.f32 %v1271_v0  ;;  %v1241_v23 = vmul.f32 0.0625, %v12609_v21  ;;  %v1153_v5 = vpop.f32.mrb[55].mxu1  ;;  %12641 = vmatprep.mubr.msk.f32.mxu0 %vm504_vm0, %v1804_v48  ;;  %v17376_v24 = vadd.f32 %v14906_v29, %v1550_v4  ;;  %v1328_v25 = vmul.f32 %v14081_v61, %v16073_v57 }
 0x419   : > { %14092 = vrsqrt.f32 %v1270_v39  ;;  %v1240_v46 = vmul.f32 0.0625, %v1153_v5  ;;  %12642 = vmatmul.mubr.msk.f32.gmra.mrb[10].mxu0 %vm504_vm0, %v1805_v15  ;;  %v1553_v28 = vmul.f32 %v14914_v32, %v1329_v38  ;;  %v1807_v11 = vmax.f32 %v17369_v18, 0.0 }
 0x41a   : > { %v14083_v49 = vpop.eup %14082  ;;  %v1273_v27 = vadd.f32 1e-05, %v1241_v23  ;;  %v1806_v60 = vmax.f32 %v17376_v24, 0.0  ;;  %v1552_v9 = vmul.f32 %v14916_v33, %v1328_v25  ;;  %v21358_v23 = vld [vmem:[#allocation9_spill] sm:$0xff] }
 0x41b   : > { %v14085_v54 = vpop.eup %14084  ;;  %v1272_v12 = vadd.f32 1e-05, %v1240_v46  ;;  %v12612_v29 = vpop.f32.mrb[56].mxu1  ;;  %v17387_v57 = vadd.f32 %v14924_v36, %v1553_v28  ;;  %v1331_v56 = vmul.f32 %v14083_v49, %v16106_v31  ;;  %v21359_v28 = vld [vmem:[#allocation10_spill] sm:$0xff] }
 0x41c   : > { %14094 = vrsqrt.f32 %v1273_v27  ;;  %v1243_v51 = vmul.f32 0.0625, %v12612_v29  ;;  %v1163_v44 = vpop.f32.mrb[57].mxu1  ;;  %12644 = vmatprep.mubr.msk.f32.mxu0 %vm504_vm0, %v1806_v60  ;;  %v17394_v32 = vadd.f32 %v14926_v37, %v1552_v9  ;;  %v1330_v33 = vmul.f32 %v14085_v54, %v16109_v43  ;;  %v21356_v43 = vld [vmem:[#allocation7_spill] sm:$0xff] }
 0x41d   : > { %14096 = vrsqrt.f32 %v1272_v12  ;;  %v1242_v22 = vmul.f32 0.0625, %v1163_v44  ;;  %12645 = vmatmul.mubr.msk.f32.gmra.mrb[12].mxu0 %vm504_vm0, %v1807_v11  ;;  %v1555_v36 = vmul.f32 %v14934_v40, %v1331_v56  ;;  %v1809_v20 = vmax.f32 %v17387_v57, 0.0  ;;  %v21357_v40 = vld [vmem:[#allocation8_spill] sm:$0xff]  ;;  %v21361_v56 = vld [vmem:[#allocation175_spill] sm:$0xff] }
 0x41e   : > { %v14087_v31 = vpop.eup %14086  ;;  %v1275_v13 = vadd.f32 1e-05, %v1243_v51  ;;  %v1808_v1 = vmax.f32 %v17394_v32, 0.0  ;;  %v1554_v50 = vmul.f32 %v21355_v2, %v1330_v33 }
 0x41f   : > { %v14089_v17 = vpop.eup %14088  ;;  %v1274_v58 = vadd.f32 1e-05, %v1242_v22  ;;  %v12615_v37 = vpop.f32.mrb[58].mxu1  ;;  %v17405_v35 = vadd.f32 %v21356_v43, %v1555_v36  ;;  %v1333_v0 = vmul.f32 %v14087_v31, %v16144_v47  ;;  %v21362_v22 = vld [vmem:[#allocation12_spill] sm:$0xff] }
 0x420   : > { %14098 = vrsqrt.f32 %v1275_v13  ;;  %v1245_v4 = vmul.f32 0.0625, %v12615_v37  ;;  %v1173_v61 = vpop.f32.mrb[59].mxu1  ;;  %12647 = vmatprep.mubr.msk.f32.mxu0 %vm504_vm0, %v1808_v1  ;;  %v17412_v39 = vadd.f32 %v21357_v40, %v1554_v50  ;;  %v1332_v21 = vmul.f32 %v14089_v17, %v16147_v45  ;;  %v21360_v45 = vld [vmem:[#allocation11_spill] sm:$0xff]  ;;  %v21363_v31 = vld [vmem:[#allocation176_spill] sm:$0xff]  ;;  %v21364_v50 = vld [vmem:[#allocation13_spill] sm:$0xff] }
 0x421   : > { %14100 = vrsqrt.f32 %v1274_v58  ;;  %v1244_v38 = vmul.f32 0.0625, %v1173_v61  ;;  %12648 = vmatmul.mubr.msk.f32.gmra.mrb[14].mxu0 %vm504_vm0, %v1809_v20  ;;  %v1557_v47 = vmul.f32 %v21358_v23, %v1333_v0  ;;  %v1811_v12 = vmax.f32 %v17405_v35, 0.0  ;;  %v21365_v0 = vld [vmem:[#allocation14_spill] sm:$0xff]  ;;  %v21366_v23 = vld [vmem:[#allocation15_spill] sm:$0xff] }
 0x422   : > { %v14091_v5 = vpop.eup %14090  ;;  %v1277_v25 = vadd.f32 1e-05, %v1245_v4  ;;  %v1810_v46 = vmax.f32 %v17412_v39, 0.0  ;;  %v1556_v49 = vmul.f32 %v21359_v28, %v1332_v21 }
 0x423   : > { %v14093_v27 = vpop.eup %14092  ;;  %v1276_v9 = vadd.f32 1e-05, %v1244_v38  ;;  %v12618_v54 = vpop.f32.mrb[60].mxu1  ;;  %v17423_v29 = vadd.f32 %v21360_v45, %v1557_v47  ;;  %v1335_v51 = vmul.f32 %v14091_v5, %v21361_v56  ;;  %v21367_v5 = vld [vmem:[#allocation179_spill] sm:$0xff] }
 0x424   : > { %14102 = vrsqrt.f32 %v1277_v25  ;;  %v1247_v44 = vmul.f32 0.0625, %v12618_v54  ;;  %v1183_v33 = vpop.f32.mrb[61].mxu1  ;;  %12650 = vmatprep.mubr.msk.f32.mxu0 %vm504_vm0, %v1810_v46  ;;  %v17430_v36 = vadd.f32 %v21362_v22, %v1556_v49  ;;  %v1334_v13 = vmul.f32 %v14093_v27, %v21363_v31  ;;  %v21368_v27 = vld [vmem:[#allocation16_spill] sm:$0xff] }
 0x425   : > { %14104 = vrsqrt.f32 %v1276_v9  ;;  %v1246_v2 = vmul.f32 0.0625, %v1183_v33  ;;  %12651 = vmatmul.mubr.msk.f32.gmra.mrb[16].mxu0 %vm504_vm0, %v1811_v12  ;;  %v1559_v17 = vmul.f32 %v21364_v50, %v1335_v51  ;;  %v20802_v38 = vmax.f32 %v17423_v29, 0.0  ;;  %v21369_v54 = vld [vmem:[#allocation180_spill] sm:$0xff]  ;;  %v21370_v51 = vld [vmem:[#allocation17_spill] sm:$0xff] }
 0x426   : > { %v14095_v58 = vpop.eup %14094  ;;  %v1279_v37 = vadd.f32 1e-05, %v1247_v44  ;;  %v1812_v43 = vmax.f32 %v17430_v36, 0.0  ;;  %v1558_v4 = vmul.f32 %v21365_v0, %v1334_v13  ;;  %v21371_v13 = vld [vmem:[#allocation18_spill] sm:$0xff]  ;;  %v21372_v0 = vld [vmem:[#allocation19_spill] sm:$0xff]  ;;  %v21406_v42 = vmax.f32 %v17423_v29, 0.0 }
 0x427   : > { %v14097_v61 = vpop.eup %14096  ;;  %v1278_v40 = vadd.f32 1e-05, %v1246_v2  ;;  %v12621_v21 = vpop.f32.mrb[62].mxu1  ;;  %v17441_v47 = vadd.f32 %v21366_v23, %v1559_v17  ;;  %v1337_v25 = vmul.f32 %v14095_v58, %v21367_v5  ;;  %v21374_v5 = vld [vmem:[#allocation20_spill] sm:$0xff] }
 0x428   : > { %14106 = vrsqrt.f32 %v1279_v37  ;;  %v1249_v28 = vmul.f32 0.0625, %v12621_v21  ;;  %v1193_v49 = vpop.f32.mrb[63].mxu1  ;;  %12653 = vmatprep.mubr.msk.f32.mxu0 %vm504_vm0, %v1812_v43  ;;  %v17448_v9 = vadd.f32 %v21368_v27, %v1558_v4  ;;  %v1336_v45 = vmul.f32 %v14097_v61, %v21369_v54  ;;  %v21373_v61 = vld [vmem:[#allocation183_spill] sm:$0xff]  ;;  %v21376_v54 = vld [vmem:[#allocation21_spill] sm:$0xff] }
 0x429   : > { %14108 = vrsqrt.f32 %v1278_v40  ;;  %v1248_v56 = vmul.f32 0.0625, %v1193_v49  ;;  %12654 = vmatmul.mubr.msk.f32.gmra.mrb[18].mxu0 %vm504_vm0, %v20802_v38  ;;  %v1561_v44 = vmul.f32 %v21370_v51, %v1337_v25  ;;  %v20795_v37 = vmax.f32 %v17441_v47, 0.0 }
 0x42a   : > { %v14099_v33 = vpop.eup %14098  ;;  %v1281_v22 = vadd.f32 1e-05, %v1249_v28  ;;  %v20801_v31 = vmax.f32 %v17448_v9, 0.0  ;;  %v1560_v2 = vmul.f32 %v21371_v13, %v1336_v45  ;;  %v21375_v28 = vld [vmem:[#allocation184_spill] sm:$0xff]  ;;  %v21407_v19 = vmax.f32 %v17448_v9, 0.0 }
 0x42b   : > { %v14101_v50 = vpop.eup %14100  ;;  %v1280_v17 = vadd.f32 1e-05, %v1248_v56  ;;  %v12624_v58 = vpop.f32.mrb[64].mxu1  ;;  %v17459_v4 = vadd.f32 %v21372_v0, %v1561_v44  ;;  %v1339_v40 = vmul.f32 %v14099_v33, %v21373_v61  ;;  %v21377_v33 = vld [vmem:[#allocation22_spill] sm:$0xff]  ;;  %v21379_v61 = vld [vmem:[#allocation187_spill] sm:$0xff] }
 0x42c   : > { %14110 = vrsqrt.f32 %v1281_v22  ;;  %v1251_v21 = vmul.f32 0.0625, %v12624_v58  ;;  %v1203_v23 = vpop.f32.mrb[65].mxu1  ;;  %12656 = vmatprep.mubr.msk.f32.mxu0 %vm504_vm0, %v20801_v31  ;;  %v17466_v25 = vadd.f32 %v21374_v5, %v1560_v2  ;;  %v1338_v49 = vmul.f32 %v14101_v50, %v21375_v28  ;;  %v21378_v50 = vld [vmem:[#allocation23_spill] sm:$0xff] }
 0x42d   : > { %14112 = vrsqrt.f32 %v1280_v17  ;;  %v1250_v27 = vmul.f32 0.0625, %v1203_v23  ;;  %12657 = vmatmul.mubr.msk.f32.gmra.mrb[20].mxu0 %vm504_vm0, %v20795_v37  ;;  %v1563_v45 = vmul.f32 %v21376_v54, %v1339_v40  ;;  %v20800_v0 = vmax.f32 %v17459_v4, 0.0  ;;  %v21380_v40 = vld [vmem:[#allocation24_spill] sm:$0xff] }
 0x42e   : > { %v14103_v56 = vpop.eup %14102  ;;  %v1283_v51 = vadd.f32 1e-05, %v1251_v21  ;;  %v20794_v44 = vmax.f32 %v17466_v25, 0.0  ;;  %v1562_v22 = vmul.f32 %v21377_v33, %v1338_v49  ;;  %v21381_v49 = vld [vmem:[#allocation188_spill] sm:$0xff]  ;;  %v21410_v55 = vmax.f32 %v17459_v4, 0.0 }
 0x42f   : > { %v14105_v13 = vpop.eup %14104  ;;  %v1282_v58 = vadd.f32 1e-05, %v1250_v27  ;;  %v12627_v2 = vpop.f32.mrb[66].mxu1  ;;  %v17477_v17 = vadd.f32 %v21378_v50, %v1563_v45  ;;  %v1341_v23 = vmul.f32 %v14103_v56, %v21379_v61  ;;  %v21382_v45 = vld [vmem:[#allocation25_spill] sm:$0xff]  ;;  %v21383_v50 = vld [vmem:[#allocation26_spill] sm:$0xff] }
 0x430   : > { %14114 = vrsqrt.f32 %v1283_v51  ;;  %v1253_v5 = vmul.f32 0.0625, %v12627_v2  ;;  %v1213_v28 = vpop.f32.mrb[67].mxu1  ;;  %12659 = vmatprep.mubr.msk.f32.mxu0 %vm504_vm0, %v20794_v44  ;;  %v17484_v21 = vadd.f32 %v21380_v40, %v1562_v22  ;;  %v1340_v27 = vmul.f32 %v14105_v13, %v21381_v49  ;;  %v21384_v40 = vld [vmem:[#allocation27_spill] sm:$0xff]  ;;  %v21386_v49 = vld [vmem:[#allocation29_spill] sm:$0xff] }
 0x431   : > { %14116 = vrsqrt.f32 %v1282_v58  ;;  %v1252_v54 = vmul.f32 0.0625, %v1213_v28  ;;  %12660 = vmatmul.mubr.msk.f32.gmra.mrb[22].mxu0 %vm504_vm0, %v20800_v0  ;;  %v1565_v56 = vmul.f32 %v21382_v45, %v1341_v23  ;;  %v20797_v22 = vmax.f32 %v17477_v17, 0.0  ;;  %v21385_v23 = vld [vmem:[#allocation28_spill] sm:$0xff]  ;;  %v21387_v45 = vld [vmem:[#allocation30_spill] sm:$0xff] }
 0x432   : > { %v14107_v51 = vpop.eup %14106  ;;  %v1285_v33 = vadd.f32 1e-05, %v1253_v5  ;;  %v20799_v2 = vmax.f32 %v17484_v21, 0.0  ;;  %v1564_v61 = vmul.f32 %v21383_v50, %v1340_v27  ;;  %v21388_v50 = vld [vmem:[#allocation31_spill] sm:$0xff]  ;;  %v21411_v63 = vmax.f32 %v17484_v21, 0.0 }
 0x433   : > { %v14109_v44 = vpop.eup %14108  ;;  %v1284_v37 = vadd.f32 1e-05, %v1252_v54  ;;  %v17495_v13 = vadd.f32 %v21384_v40, %v1565_v56  ;;  %v1343_v58 = vmul.f32 %v14107_v51, %v16076_v53 }
 0x434   : > { %14118 = vrsqrt.f32 %v1285_v33  ;;  %12662 = vmatprep.mubr.msk.f32.mxu0 %vm504_vm0, %v20799_v2  ;;  %v17502_v5 = vadd.f32 %v21385_v23, %v1564_v61  ;;  %v1342_v28 = vmul.f32 %v14109_v44, %v16081_v7 }
 0x435   : > { %14120 = vrsqrt.f32 %v1284_v37  ;;  %12663 = vmatmul.mubr.msk.f32.gmra.mrb[24].mxu0 %vm504_vm0, %v20797_v22  ;;  %v1567_v27 = vmul.f32 %v21386_v49, %v1343_v58  ;;  %v20798_v33 = vmax.f32 %v17495_v13, 0.0  ;;  %v21389_v37 = vld [vmem:[#allocation32_spill] sm:$0xff]  ;;  %v21390_v58 = vld [vmem:[#allocation33_spill] sm:$0xff]  ;;  %v21414_v34 = vmax.f32 %v17495_v13, 0.0 }
 0x436   : > { %v14111_v54 = vpop.eup %14110  ;;  %v20796_v53 = vmax.f32 %v17502_v5, 0.0  ;;  %v1566_v56 = vmul.f32 %v21387_v45, %v1342_v28  ;;  %v21395_v22 = vld [vmem:[#allocation196_spill] sm:$0xff] }
 0x437   : > { %v14113_v51 = vpop.eup %14112  ;;  %v17513_v61 = vadd.f32 %v21388_v50, %v1567_v27  ;;  %v1345_v7 = vmul.f32 %v14111_v54, %v16103_v30  ;;  %v21391_v27 = vld [vmem:[#allocation34_spill] sm:$0xff]  ;;  %v21392_v50 = vld [vmem:[#allocation35_spill] sm:$0xff] }
 0x438   : > { %12665 = vmatprep.mubr.msk.f32.mxu0 %vm504_vm0, %v20796_v53  ;;  %v17520_v44 = vadd.f32 %v21389_v37, %v1566_v56  ;;  %v1344_v40 = vmul.f32 %v14113_v51, %v16112_v14  ;;  %v21393_v56 = vld [vmem:[#allocation195_spill] sm:$0xff]  ;;  %v21394_v14 = vld [vmem:[#allocation36_spill] sm:$0xff] }
 0x439   : > { %12666 = vmatmul.mubr.msk.f32.gmra.mrb[26].mxu0 %vm504_vm0, %v20798_v33  ;;  %v1569_v23 = vmul.f32 %v21390_v58, %v1345_v7  ;;  %v1823_v45 = vmax.f32 %v17513_v61, 0.0  ;;  %v21396_v7 = vld [vmem:[#allocation37_spill] sm:$0xff] }
 0x43a   : > { %v14115_v28 = vpop.eup %14114  ;;  %v1822_v49 = vmax.f32 %v17520_v44, 0.0  ;;  %v1568_v30 = vmul.f32 %v21391_v27, %v1344_v40  ;;  %v21397_v40 = vld [vmem:[#allocation38_spill] sm:$0xff] }
 0x43b   : > { %v14117_v54 = vpop.eup %14116  ;;  %v1793_v53 = vadd.f32 %v21392_v50, %v1569_v23  ;;  %v1347_v37 = vmul.f32 %v14115_v28, %v21393_v56  ;;  %v21398_v50 = vld [vmem:[#allocation39_spill] sm:$0xff]  ;;  %v21399_v56 = vld [vmem:[#allocation40_spill] sm:$0xff] }
 0x43c   : > { %12668 = vmatprep.mubr.msk.f32.mxu0 %vm504_vm0, %v1822_v49  ;;  %v1792_v51 = vadd.f32 %v21394_v14, %v1568_v30  ;;  %v1346_v33 = vmul.f32 %v14117_v54, %v21395_v22  ;;  %v21400_v14 = vld [vmem:[#allocation199_spill] sm:$0xff]  ;;  %v21401_v54 = vld [vmem:[#allocation41_spill] sm:$0xff] }
 0x43d   : > { %12669 = vmatmul.mubr.msk.f32.gmra.mrb[28].mxu0 %vm504_vm0, %v1823_v45  ;;  %v1571_v58 = vmul.f32 %v21396_v7, %v1347_v37  ;;  %v1825_v23 = vmax.f32 %v1793_v53, 0.0 }
 0x43e   : > { %v14119_v44 = vpop.eup %14118  ;;  %v1824_v2 = vmax.f32 %v1792_v51, 0.0  ;;  %v1570_v27 = vmul.f32 %v21397_v40, %v1346_v33  ;;  %v21402_v51 = vld [vmem:[#allocation42_spill] sm:$0xff]  ;;  %v21403_v33 = vld [vmem:[#allocation43_spill] sm:$0xff] }
 0x43f   : > { %v14121_v0 = vpop.eup %14120  ;;  %v1349_v61 = vmul.f32 %v14119_v44, %v16161_v62  ;;  %v1795_v28 = vadd.f32 %v21398_v50, %v1571_v58  ;;  %v21404_v62 = vld [vmem:[#allocation44_spill] sm:$0xff] }
 0x440   : > { %12671 = vmatprep.mubr.msk.f32.mxu0 %vm504_vm0, %v1824_v2  ;;  %v1794_v30 = vadd.f32 %v21399_v56, %v1570_v27  ;;  %v1348_v22 = vmul.f32 %v14121_v0, %v21400_v14  ;;  %v17553_v0 = vld [vmem:[%s20777_s6 + $0x8] sm:$0xff] }
 0x441   : > { %v1573_v31 = vmul.f32 %v21401_v54, %v1349_v61  ;;  %12672 = vmatmul.mubr.msk.f32.gmra.mrb[30].mxu0 %vm504_vm0, %v1825_v23  ;;  %v1827_v38 = vmax.f32 %v1795_v28, 0.0 }
 0x442   : > { %v1826_v37 = vmax.f32 %v1794_v30, 0.0  ;;  %v1572_v7 = vmul.f32 %v21402_v51, %v1348_v22 }
 0x443   : > { %v1797_v40 = vadd.f32 %v21403_v33, %v1573_v31  ;;  %v21405_v31 = vld [vmem:[#allocation368_spill] sm:$0xff] }
 0x444   : > { %12674 = vmatprep.mubr.msk.f32.mxu0 %vm504_vm0, %v1826_v37  ;;  %v1796_v53 = vadd.f32 %v21404_v62, %v1572_v7  ;;  %v17745_v62 = vld [vmem:[%s20777_s6] sm:$0xff] }
 0x445   : > { %12675 = vmatmul.mubr.msk.f32.gmra.mrb[32].mxu0 %vm504_vm0, %v1827_v38  ;;  %v1829_v44 = vmax.f32 %v1797_v40, 0.0 }
 0x446   : > { %v1828_v58 = vmax.f32 %v1796_v53, 0.0  ;;  %2444 = vmatprep.mubr.f32.mxu0 %v17553_v0  ;;  %v17751_v53 = vld [vmem:[%s20777_s6 + $0x18] sm:$0xff] }
 0x448   : > { %12677 = vmatprep.mubr.msk.f32.mxu1 %vm504_vm0, %v1828_v58 }
 0x449   : > { %12678 = vmatmul.mubr.msk.f32.vlgmr.msra.gmra.mrb[68].mxu1 %vm504_vm0, %v1829_v44 }
 0x44a   : > { %13539 = vmatpush3.bf16.msra.mxu1 %v21405_v31  ;;  %12684 = vmatprep.mubr.msk.f32.mxu1 %vm504_vm0, %v1798_v59  ;;  %v21408_v59 = vmax.f32 %v17441_v47, 0.0 }
 0x44d   : > { %12685 = vmatmul.mubr.msk.f32.vlgmr.msra.gmra.mrb[70].mxu1 %vm504_vm0, %v1799_v10  ;;  %v21409_v10 = vmax.f32 %v17466_v25, 0.0 }
 0x44e   : > { %12687 = vmatprep.mubr.msk.f32.mxu1 %vm504_vm0, %v1800_v41  ;;  %v21412_v41 = vmax.f32 %v17477_v17, 0.0 }
 0x451   : > { %12688 = vmatmul.mubr.msk.f32.gmra.mrb[72].mxu1 %vm504_vm0, %v1801_v26  ;;  %v21413_v26 = vmax.f32 %v17502_v5, 0.0 }
 0x452   : > { %12690 = vmatprep.mubr.msk.f32.mxu1 %vm504_vm0, %v1802_v6 }
 0x455   : > { %12691 = vmatmul.mubr.msk.f32.gmra.mrb[74].mxu1 %vm504_vm0, %v1803_v52 }
 0x456   : > { %12693 = vmatprep.mubr.msk.f32.mxu1 %vm504_vm0, %v1804_v48 }
 0x459   : > { %12694 = vmatmul.mubr.msk.f32.gmra.mrb[76].mxu1 %vm504_vm0, %v1805_v15 }
 0x45a   : > { %12696 = vmatprep.mubr.msk.f32.mxu1 %vm504_vm0, %v1806_v60 }
 0x45d   : > { %12697 = vmatmul.mubr.msk.f32.gmra.mrb[78].mxu1 %vm504_vm0, %v1807_v11 }
 0x45e   : > { %12699 = vmatprep.mubr.msk.f32.mxu1 %vm504_vm0, %v1808_v1 }
 0x461   : > { %12700 = vmatmul.mubr.msk.f32.gmra.mrb[80].mxu1 %vm504_vm0, %v1809_v20 }
 0x462   : > { %12702 = vmatprep.mubr.msk.f32.mxu1 %vm504_vm0, %v1810_v46 }
 0x465   : > { %12703 = vmatmul.mubr.msk.f32.gmra.mrb[82].mxu1 %vm504_vm0, %v1811_v12 }
 0x466   : > { %12705 = vmatprep.mubr.msk.f32.mxu1 %vm504_vm0, %v1812_v43 }
 0x469   : > { %12706 = vmatmul.mubr.msk.f32.gmra.mrb[84].mxu1 %vm504_vm0, %v21406_v42 }
 0x46a   : > { %12708 = vmatprep.mubr.msk.f32.mxu1 %vm504_vm0, %v21407_v19 }
 0x46d   : > { %12709 = vmatmul.mubr.msk.f32.gmra.mrb[86].mxu1 %vm504_vm0, %v21408_v59 }
 0x46e   : > { %12711 = vmatprep.mubr.msk.f32.mxu1 %vm504_vm0, %v21409_v10 }
 0x471   : > { %12712 = vmatmul.mubr.msk.f32.gmra.mrb[88].mxu1 %vm504_vm0, %v21410_v55 }
 0x472   : > { %12714 = vmatprep.mubr.msk.f32.mxu1 %vm504_vm0, %v21411_v63  ;;  %v17763_v63 = vld [vmem:[%s20776_s5 + $0x8] sm:$0xff] }
 0x475   : > { %12715 = vmatmul.mubr.msk.f32.gmra.mrb[90].mxu1 %vm504_vm0, %v21412_v41  ;;  %v17770_v41 = vld [vmem:[%s20776_s5 + $0x10] sm:$0xff] }
 0x476   : > { %12717 = vmatprep.mubr.msk.f32.mxu1 %vm504_vm0, %v21413_v26  ;;  %v17777_v26 = vld [vmem:[%s20776_s5 + $0x18] sm:$0xff] }
 0x479   : > { %12718 = vmatmul.mubr.msk.f32.gmra.mrb[92].mxu1 %vm504_vm0, %v21414_v34  ;;  %v17784_v34 = vld [vmem:[%s20776_s5 + $0x20] sm:$0xff] }
 0x47a   : > { %12720 = vmatprep.mubr.msk.f32.mxu1 %vm504_vm0, %v1822_v49 }
 0x47d   : > { %12721 = vmatmul.mubr.msk.f32.gmra.mrb[94].mxu1 %vm504_vm0, %v1823_v45 }
 0x47e   : > { %12723 = vmatprep.mubr.msk.f32.mxu1 %vm504_vm0, %v1824_v2 }
 0x481   : > { %12724 = vmatmul.mubr.msk.f32.gmra.mrb[96].mxu1 %vm504_vm0, %v1825_v23 }
 0x482   : > { %12726 = vmatprep.mubr.msk.f32.mxu1 %vm504_vm0, %v1826_v37 }
 0x485   : > { %12727 = vmatmul.mubr.msk.f32.gmra.mrb[98].mxu1 %vm504_vm0, %v1827_v38 }
 0x486   : > { %12729 = vmatprep.mubr.msk.f32.mxu1 %vm504_vm0, %v1828_v58  ;;  %v17757_v58 = vld [vmem:[%s20777_s6 + $0x10] sm:$0xff] }
 0x489   : > { %12730 = vmatmul.mubr.msk.f32.gmra.mrb[100].mxu1 %vm504_vm0, %v1829_v44 }
 0x48a   : > { %12736 = vmatprep.mubr.msk.f32.mxu1 %vm504_vm0, %v17642_v8 }
 0x4e0   : > { %v17646_v6 = vpop.f32.mrb[4].mxu0 }
 0x4e1   : > { %v17648_v52 = vpop.f32.mrb[5].mxu0 }
 0x4e2   : > { %v13542_v3 = vpack.c.bf16 %v17646_v6, %v17648_v52 }
 0x4e4   : > { %v17652_v16 = vpop.f32.mrb[6].mxu0 }
 0x4e5   : > { %v17654_v48 = vpop.f32.mrb[7].mxu0 }
 0x4e6   : > { %v13546_v15 = vpack.c.bf16 %v17652_v16, %v17654_v48 }
 0x4e8   : > { %v17658_v18 = vpop.f32.mrb[8].mxu0 }
 0x4e9   : > { %v17660_v24 = vpop.f32.mrb[9].mxu0 }
 0x4ea   : > { %v13550_v60 = vpack.c.bf16 %v17658_v18, %v17660_v24 }
 0x4ec   : > { %v17664_v11 = vpop.f32.mrb[10].mxu0 }
 0x4ed   : > { %v17666_v57 = vpop.f32.mrb[11].mxu0 }
 0x4ee   : > { %v13554_v32 = vpack.c.bf16 %v17664_v11, %v17666_v57 }
 0x4f0   : > { %v17670_v1 = vpop.f32.mrb[12].mxu0 }
 0x4f1   : > { %v17672_v20 = vpop.f32.mrb[13].mxu0 }
 0x4f2   : > { %v13558_v35 = vpack.c.bf16 %v17670_v1, %v17672_v20 }
 0x4f4   : > { %v17676_v39 = vpop.f32.mrb[14].mxu0 }
 0x4f5   : > { %v17678_v46 = vpop.f32.mrb[15].mxu0 }
 0x4f6   : > { %v13562_v12 = vpack.c.bf16 %v17676_v39, %v17678_v46 }
 0x4f8   : > { %v17682_v29 = vpop.f32.mrb[16].mxu0 }
 0x4f9   : > { %v17684_v36 = vpop.f32.mrb[17].mxu0 }
 0x4fa   : > { %v13566_v43 = vpack.c.bf16 %v17682_v29, %v17684_v36 }
 0x4fc   : > { %v17688_v38 = vpop.f32.mrb[18].mxu0 }
 0x4fd   : > { %v17690_v47 = vpop.f32.mrb[19].mxu0 }
 0x4fe   : > { %v13570_v9 = vpack.c.bf16 %v17688_v38, %v17690_v47 }
 0x500   : > { %v17694_v4 = vpop.f32.mrb[20].mxu0 }
 0x501   : > { %v17696_v25 = vpop.f32.mrb[21].mxu0 }
 0x502   : > { %v13540_v17 = vpack.c.bf16 %v17694_v4, %v17696_v25 }
 0x504   : > { %v17700_v21 = vpop.f32.mrb[22].mxu0  ;;  %13541 = vmatprep.subr.bf16.mxu0 %v13540_v17  ;;  %v17847_v17 = vld [vmem:[%s20776_s5 + $0x68] sm:$0xff] }
 0x505   : > { %v17702_v2 = vpop.f32.mrb[23].mxu0  ;;  %13543 = vmatpush3.bf16.msra.mxu0 %v13542_v3  ;;  %v17791_v3 = vld [vmem:[%s20776_s5 + $0x28] sm:$0xff] }
 0x506   : > { %v13544_v13 = vpack.c.bf16 %v17700_v21, %v17702_v2 }
 0x508   : > { %v17706_v5 = vpop.f32.mrb[24].mxu0  ;;  %13545 = vmatprep.subr.bf16.mxu0 %v13544_v13  ;;  %v17854_v13 = vld [vmem:[%s20776_s5 + $0x70] sm:$0xff] }
 0x509   : > { %v17708_v49 = vpop.f32.mrb[25].mxu0  ;;  %13547 = vmatpush3.bf16.msra.mxu0 %v13546_v15  ;;  %v17798_v15 = vld [vmem:[%s20776_s5 + $0x30] sm:$0xff] }
 0x50a   : > { %v13548_v45 = vpack.c.bf16 %v17706_v5, %v17708_v49 }
 0x50c   : > { %v17712_v27 = vpop.f32.mrb[26].mxu0  ;;  %13549 = vmatprep.subr.bf16.mxu0 %v13548_v45  ;;  %v17861_v45 = vld [vmem:[%s20776_s5 + $0x78] sm:$0xff] }
 0x50d   : > { %v17714_v61 = vpop.f32.mrb[27].mxu0  ;;  %13551 = vmatpush3.bf16.msra.mxu0 %v13550_v60  ;;  %v17805_v60 = vld [vmem:[%s20776_s5 + $0x38] sm:$0xff]  ;;  %21415 = vst [vmem:[#allocation6_spill] sm:$0xff] %v17861_v45 }
 0x50e   : > { %v13552_v23 = vpack.c.bf16 %v17712_v27, %v17714_v61 }
 0x510   : > { %v17718_v50 = vpop.f32.mrb[28].mxu0  ;;  %13553 = vmatprep.subr.bf16.mxu0 %v13552_v23  ;;  %v17868_v23 = vld [vmem:[%s20776_s5 + $0x80] sm:$0xff] }
 0x511   : > { %v17720_v28 = vpop.f32.mrb[29].mxu0  ;;  %13555 = vmatpush3.bf16.msra.mxu0 %v13554_v32  ;;  %v17812_v32 = vld [vmem:[%s20776_s5 + $0x40] sm:$0xff]  ;;  %21416 = vst [vmem:[#allocation7_spill] sm:$0xff] %v17868_v23 }
 0x512   : > { %v13556_v56 = vpack.c.bf16 %v17718_v50, %v17720_v28 }
 0x514   : > { %v17724_v30 = vpop.f32.mrb[30].mxu0  ;;  %13557 = vmatprep.subr.bf16.mxu0 %v13556_v56  ;;  %v17875_v56 = vld [vmem:[%s20776_s5 + $0x88] sm:$0xff] }
 0x515   : > { %v17726_v14 = vpop.f32.mrb[31].mxu0  ;;  %13559 = vmatpush3.bf16.msra.mxu0 %v13558_v35  ;;  %v17819_v35 = vld [vmem:[%s20776_s5 + $0x48] sm:$0xff]  ;;  %21417 = vst [vmem:[#allocation8_spill] sm:$0xff] %v17875_v56 }
 0x516   : > { %v13560_v22 = vpack.c.bf16 %v17724_v30, %v17726_v14 }
 0x518   : > { %v17730_v54 = vpop.f32.mrb[32].mxu0  ;;  %13561 = vmatprep.subr.bf16.mxu0 %v13560_v22  ;;  %v17882_v22 = vld [vmem:[%s20776_s5 + $0x90] sm:$0xff] }
 0x519   : > { %v17732_v37 = vpop.f32.mrb[33].mxu0  ;;  %13563 = vmatpush3.bf16.msra.mxu0 %v13562_v12  ;;  %v17826_v12 = vld [vmem:[%s20776_s5 + $0x50] sm:$0xff]  ;;  %21418 = vst [vmem:[#allocation9_spill] sm:$0xff] %v17882_v22 }
 0x51a   : > { %v13564_v51 = vpack.c.bf16 %v17730_v54, %v17732_v37 }
 0x51c   : > { %v17736_v7 = vpop.f32.mrb[68].mxu1  ;;  %13565 = vmatprep.subr.bf16.mxu0 %v13564_v51  ;;  %v17889_v51 = vld [vmem:[%s20776_s5 + $0x98] sm:$0xff] }
 0x51d   : > { %v17738_v33 = vpop.f32.mrb[69].mxu1  ;;  %13567 = vmatpush3.bf16.msra.mxu0 %v13566_v43  ;;  %v17833_v43 = vld [vmem:[%s20776_s5 + $0x58] sm:$0xff]  ;;  %21419 = vst [vmem:[#allocation10_spill] sm:$0xff] %v17889_v51 }
 0x51e   : > { %v13568_v40 = vpack.c.bf16 %v17736_v7, %v17738_v33 }
 0x520   : > { %13569 = vmatprep.subr.bf16.mxu0 %v13568_v40  ;;  %v17896_v40 = vld [vmem:[%s20776_s5 + $0xa0] sm:$0xff] }
 0x521   : > { %13571 = vmatpush3.bf16.msra.mxu0 %v13570_v9  ;;  %v17840_v9 = vld [vmem:[%s20776_s5 + $0x60] sm:$0xff]  ;;  %21420 = vst [vmem:[#allocation11_spill] sm:$0xff] %v17896_v40 }
 0x524   : > { %2445 = vmatmul.mubr.f32.vlgmr.msra.gmra.mrb[34].mxu0 %v17745_v62 }
 0x525   : > { %2449 = vmatprep.mubr.f32.mxu0 %v17751_v53 }
 0x528   : > { %2450 = vmatmul.mubr.f32.gmra.mrb[36].mxu0 %v17757_v58 }
 0x5f7   : > { %v11928_v44 = vpop.f32.mrb[34].mxu0 }
 0x5f8   : > { %v11929_v31 = vpop.f32.mrb[35].mxu0 }
 0x5f9   : > { %v11930_v42 = vadd.f32 %v11929_v31, %v11928_v44  ;;  %v17903_v44 = vld [vmem:[%s20776_s5 + $0xa8] sm:$0xff]  ;;  %v17910_v31 = vld [vmem:[%s20776_s5 + $0xb0] sm:$0xff] }
 0x5fa   : > { %21421 = vst [vmem:[#allocation175_spill] sm:$0xff] %v17903_v44  ;;  %21422 = vst [vmem:[#allocation12_spill] sm:$0xff] %v17910_v31 }
 0x5fb   : > { %v11931_v19 = vpop.f32.mrb[36].mxu0 }
 0x5fc   : > { %v11932_v59 = vpop.f32.mrb[37].mxu0 }
 0x5fd   : > { %v11933_v10 = vadd.f32 %v11932_v59, %v11931_v19  ;;  %v17924_v19 = vld [vmem:[%s20776_s5 + $0xc0] sm:$0xff]  ;;  %v17931_v59 = vld [vmem:[%s20776_s5 + $0xc8] sm:$0xff] }
 0x5fe   : > { %21424 = vst [vmem:[#allocation13_spill] sm:$0xff] %v17924_v19  ;;  %21425 = vst [vmem:[#allocation14_spill] sm:$0xff] %v17931_v59 }
 0x5ff   : > { %v13572_v55 = vpack.c.bf16 %v11933_v10, %v11930_v42  ;;  %v17917_v42 = vld [vmem:[%s20776_s5 + $0xb8] sm:$0xff]  ;;  %v17938_v10 = vld [vmem:[%s20776_s5 + $0xd0] sm:$0xff] }
 0x600   : > { %21423 = vst [vmem:[#allocation176_spill] sm:$0xff] %v17917_v42  ;;  %21426 = vst [vmem:[#allocation15_spill] sm:$0xff] %v17938_v10 }
 0x601   : > { %13573 = vmatprep.subr.bf16.mxu1 %v13572_v55 }
 0x602   : > { %13575 = vmatpush3.bf16.msra.mxu1 %v13572_v55  ;;  %v17945_v55 = vld [vmem:[%s20776_s5 + $0xd8] sm:$0xff] }
 0x603   : > { %21427 = vst [vmem:[#allocation179_spill] sm:$0xff] %v17945_v55 }
 0x605   : > { %12737 = vmatmul.mubr.msk.f32.vlgmr.msra.gmra.mrb[102].mxu1 %vm504_vm0, %v17763_v63 }
 0x606   : > { %12739 = vmatprep.mubr.msk.f32.mxu1 %vm504_vm0, %v17770_v41 }
 0x609   : > { %12740 = vmatmul.mubr.msk.f32.gmra.mrb[104].mxu1 %vm504_vm0, %v17777_v26 }
 0x60a   : > { %12742 = vmatprep.mubr.msk.f32.mxu1 %vm504_vm0, %v17784_v34 }
 0x60d   : > { %12743 = vmatmul.mubr.msk.f32.gmra.mrb[106].mxu1 %vm504_vm0, %v17791_v3 }
 0x60e   : > { %12745 = vmatprep.mubr.msk.f32.mxu1 %vm504_vm0, %v17798_v15 }
 0x611   : > { %12746 = vmatmul.mubr.msk.f32.gmra.mrb[108].mxu1 %vm504_vm0, %v17805_v60 }
 0x612   : > { %12748 = vmatprep.mubr.msk.f32.mxu1 %vm504_vm0, %v17812_v32 }
 0x615   : > { %12749 = vmatmul.mubr.msk.f32.gmra.mrb[110].mxu1 %vm504_vm0, %v17819_v35 }
 0x616   : > { %12751 = vmatprep.mubr.msk.f32.mxu1 %vm504_vm0, %v17826_v12 }
 0x619   : > { %12752 = vmatmul.mubr.msk.f32.gmra.mrb[112].mxu1 %vm504_vm0, %v17833_v43 }
 0x61a   : > { %12754 = vmatprep.mubr.msk.f32.mxu1 %vm504_vm0, %v17840_v9 }
 0x61d   : > { %12755 = vmatmul.mubr.msk.f32.gmra.mrb[114].mxu1 %vm504_vm0, %v17847_v17 }
 0x61e   : > { %12757 = vmatprep.mubr.msk.f32.mxu1 %vm504_vm0, %v17854_v13 }
 0x621   : > { %12758 = vmatmul.mubr.msk.f32.gmra.mrb[116].mxu1 %vm504_vm0, %v17861_v45 }
 0x622   : > { %12760 = vmatprep.mubr.msk.f32.mxu1 %vm504_vm0, %v17868_v23 }
 0x625   : > { %12761 = vmatmul.mubr.msk.f32.gmra.mrb[118].mxu1 %vm504_vm0, %v17875_v56 }
 0x626   : > { %12763 = vmatprep.mubr.msk.f32.mxu1 %vm504_vm0, %v17882_v22 }
 0x629   : > { %12764 = vmatmul.mubr.msk.f32.gmra.mrb[120].mxu1 %vm504_vm0, %v17889_v51 }
 0x62a   : > { %12766 = vmatprep.mubr.msk.f32.mxu1 %vm504_vm0, %v17896_v40 }
 0x62d   : > { %12767 = vmatmul.mubr.msk.f32.gmra.mrb[122].mxu1 %vm504_vm0, %v17903_v44 }
 0x62e   : > { %12769 = vmatprep.mubr.msk.f32.mxu1 %vm504_vm0, %v17910_v31 }
 0x631   : > { %12770 = vmatmul.mubr.msk.f32.gmra.mrb[124].mxu1 %vm504_vm0, %v17917_v42 }
 0x632   : > { %12772 = vmatprep.mubr.msk.f32.mxu1 %vm504_vm0, %v17924_v19 }
 0x635   : > { %12773 = vmatmul.mubr.msk.f32.gmra.mrb[126].mxu1 %vm504_vm0, %v17931_v59  ;;  %v17952_v59 = vld [vmem:[%s20776_s5 + $0xe0] sm:$0xff] }
 0x636   : > { %12775 = vmatprep.mubr.msk.f32.mxu1 %vm504_vm0, %v17938_v10  ;;  %21428 = vst [vmem:[#allocation16_spill] sm:$0xff] %v17952_v59  ;;  %v17959_v10 = vld [vmem:[%s20776_s5 + $0xe8] sm:$0xff] }
 0x637   : > { %21429 = vst [vmem:[#allocation180_spill] sm:$0xff] %v17959_v10 }
 0x639   : > { %12776 = vmatmul.mubr.msk.f32.gmra.mrb[128].mxu1 %vm504_vm0, %v17945_v55  ;;  %v17966_v55 = vld [vmem:[%s20776_s5 + $0xf0] sm:$0xff] }
 0x63a   : > { %12778 = vmatprep.mubr.msk.f32.mxu1 %vm504_vm0, %v17952_v59  ;;  %21430 = vst [vmem:[#allocation17_spill] sm:$0xff] %v17966_v55  ;;  %v17973_v59 = vld [vmem:[%s20776_s5 + $0xf8] sm:$0xff] }
 0x63b   : > { %21431 = vst [vmem:[#allocation18_spill] sm:$0xff] %v17973_v59 }
 0x63d   : > { %12779 = vmatmul.mubr.msk.f32.gmra.mrb[130].mxu1 %vm504_vm0, %v17959_v10 }
 0x63e   : > { %12781 = vmatprep.mubr.msk.f32.mxu1 %vm504_vm0, %v17966_v55 }
 0x641   : > { %12782 = vmatmul.mubr.msk.f32.gmra.mrb[132].mxu1 %vm504_vm0, %v17973_v59 }
 0x642   : > { %2840 = vmatprep.mubr.f32.mxu1 %v17553_v0 }
 0x6d8   : > { %v12738_v19 = vpop.f32.mrb[102].mxu1 }
 0x6d9   : > { %v2681_v10 = vmul.f32 0.0625, %v12738_v19  ;;  %v2521_v42 = vpop.f32.mrb[103].mxu1 }
 0x6da   : > { %v2680_v31 = vmul.f32 0.0625, %v2521_v42 }
 0x6db   : > { %v17979_v44 = vsub.f32 %v17646_v6, %v2681_v10 }
 0x6dc   : > { %v17982_v40 = vsub.f32 %v17648_v52, %v2680_v31  ;;  %v12741_v55 = vpop.f32.mrb[104].mxu1 }
 0x6dd   : > { %v2683_v51 = vmul.f32 0.0625, %v12741_v55  ;;  %v2531_v22 = vpop.f32.mrb[105].mxu1 }
 0x6de   : > { %v2682_v56 = vmul.f32 0.0625, %v2531_v22 }
 0x6df   : > { %v17985_v23 = vsub.f32 %v17652_v16, %v2683_v51 }
 0x6e0   : > { %v17988_v59 = vsub.f32 %v17654_v48, %v2682_v56  ;;  %v12744_v0 = vpop.f32.mrb[106].mxu1 }
 0x6e1   : > { %21432 = vst [vmem:[#allocation19_spill] sm:$0xff] %v17985_v23  ;;  %v2685_v19 = vmul.f32 0.0625, %v12744_v0  ;;  %v2541_v45 = vpop.f32.mrb[107].mxu1 }
 0x6e2   : > { %21433 = vst [vmem:[#allocation183_spill] sm:$0xff] %v17988_v59  ;;  %v2684_v42 = vmul.f32 0.0625, %v2541_v45 }
 0x6e3   : > { %v17991_v6 = vsub.f32 %v17658_v18, %v2685_v19 }
 0x6e4   : > { %v17994_v52 = vsub.f32 %v17660_v24, %v2684_v42  ;;  %v12747_v31 = vpop.f32.mrb[108].mxu1 }
 0x6e5   : > { %v2687_v10 = vmul.f32 0.0625, %v12747_v31  ;;  %v2551_v55 = vpop.f32.mrb[109].mxu1 }
 0x6e6   : > { %v2686_v22 = vmul.f32 0.0625, %v2551_v55 }
 0x6e7   : > { %v17997_v16 = vsub.f32 %v17664_v11, %v2687_v10 }
 0x6e8   : > { %v18000_v48 = vsub.f32 %v17666_v57, %v2686_v22  ;;  %v12750_v56 = vpop.f32.mrb[110].mxu1 }
 0x6e9   : > { %v2689_v51 = vmul.f32 0.0625, %v12750_v56  ;;  %v2561_v0 = vpop.f32.mrb[111].mxu1 }
 0x6ea   : > { %v2688_v45 = vmul.f32 0.0625, %v2561_v0 }
 0x6eb   : > { %v18003_v18 = vsub.f32 %v17670_v1, %v2689_v51 }
 0x6ec   : > { %v18006_v24 = vsub.f32 %v17672_v20, %v2688_v45  ;;  %v12753_v19 = vpop.f32.mrb[112].mxu1 }
 0x6ed   : > { %v2691_v42 = vmul.f32 0.0625, %v12753_v19  ;;  %v2571_v31 = vpop.f32.mrb[113].mxu1 }
 0x6ee   : > { %v2690_v55 = vmul.f32 0.0625, %v2571_v31 }
 0x6ef   : > { %v18009_v11 = vsub.f32 %v17676_v39, %v2691_v42 }
 0x6f0   : > { %v18012_v57 = vsub.f32 %v17678_v46, %v2690_v55  ;;  %v12756_v10 = vpop.f32.mrb[114].mxu1 }
 0x6f1   : > { %v2693_v22 = vmul.f32 0.0625, %v12756_v10  ;;  %v2581_v56 = vpop.f32.mrb[115].mxu1 }
 0x6f2   : > { %v2692_v0 = vmul.f32 0.0625, %v2581_v56 }
 0x6f3   : > { %v18015_v1 = vsub.f32 %v17682_v29, %v2693_v22 }
 0x6f4   : > { %v18018_v20 = vsub.f32 %v17684_v36, %v2692_v0  ;;  %v12759_v51 = vpop.f32.mrb[116].mxu1  ;;  %v2745_v0 = vmul.f32 %v17979_v44, %v17979_v44 }
 0x6f5   : > { %v2695_v45 = vmul.f32 0.0625, %v12759_v51  ;;  %v2591_v19 = vpop.f32.mrb[117].mxu1 }
 0x6f6   : > { %v2694_v31 = vmul.f32 0.0625, %v2591_v19 }
 0x6f7   : > { %v18021_v39 = vsub.f32 %v17688_v38, %v2695_v45  ;;  %v2744_v38 = vmul.f32 %v17982_v40, %v17982_v40 }
 0x6f8   : > { %v18024_v46 = vsub.f32 %v17690_v47, %v2694_v31  ;;  %v12762_v42 = vpop.f32.mrb[118].mxu1 }
 0x6f9   : > { %v2697_v55 = vmul.f32 0.0625, %v12762_v42  ;;  %v2601_v10 = vpop.f32.mrb[119].mxu1  ;;  %v2746_v42 = vmul.f32 %v17988_v59, %v17988_v59 }
 0x6fa   : > { %v2696_v56 = vmul.f32 0.0625, %v2601_v10 }
 0x6fb   : > { %v18027_v29 = vsub.f32 %v17694_v4, %v2697_v55 }
 0x6fc   : > { %v18030_v36 = vsub.f32 %v17696_v25, %v2696_v56  ;;  %v12765_v22 = vpop.f32.mrb[120].mxu1  ;;  %v2747_v25 = vmul.f32 %v17985_v23, %v17985_v23 }
 0x6fd   : > { %21434 = vst [vmem:[#allocation20_spill] sm:$0xff] %v18027_v29  ;;  %v2761_v47 = vmul.f32 %v18027_v29, %v18027_v29  ;;  %v2699_v51 = vmul.f32 0.0625, %v12765_v22  ;;  %v2611_v45 = vpop.f32.mrb[121].mxu1  ;;  %v13578_v22 = vpack.c.bf16 %v2745_v0, %v2744_v38  ;;  %v2749_v38 = vmul.f32 %v17991_v6, %v17991_v6 }
 0x6fe   : > { %21435 = vst [vmem:[#allocation184_spill] sm:$0xff] %v18030_v36  ;;  %v2760_v19 = vmul.f32 %v18030_v36, %v18030_v36  ;;  %v2698_v4 = vmul.f32 0.0625, %v2611_v45  ;;  %v13582_v59 = vpack.c.bf16 %v2747_v25, %v2746_v42  ;;  %v2750_v25 = vmul.f32 %v18000_v48, %v18000_v48 }
 0x6ff   : > { %v18041_v31 = vsub.f32 %v17700_v21, %v2699_v51 }
 0x700   : > { %v18048_v55 = vsub.f32 %v17702_v2, %v2698_v4  ;;  %v12768_v10 = vpop.f32.mrb[122].mxu1  ;;  %v13576_v56 = vpack.c.bf16 %v2761_v47, %v2760_v19  ;;  %v2748_v19 = vmul.f32 %v17994_v52, %v17994_v52 }
 0x701   : > { %v2763_v29 = vmul.f32 %v18041_v31, %v18041_v31  ;;  %v2701_v36 = vmul.f32 0.0625, %v12768_v10  ;;  %v2621_v45 = vpop.f32.mrb[123].mxu1 }
 0x702   : > { %v2762_v21 = vmul.f32 %v18048_v55, %v18048_v55  ;;  %v2700_v51 = vmul.f32 0.0625, %v2621_v45  ;;  %13577 = vmatprep.subr.bf16.mxu1 %v13576_v56 }
 0x703   : > { %v18055_v23 = vsub.f32 %v17706_v5, %v2701_v36  ;;  %13579 = vmatpush3.bf16.msra.mxu1 %v13578_v22 }
 0x704   : > { %v18058_v2 = vsub.f32 %v17708_v49, %v2700_v51  ;;  %v12771_v47 = vpop.f32.mrb[124].mxu1  ;;  %v13580_v0 = vpack.c.bf16 %v2763_v29, %v2762_v21  ;;  %v2751_v29 = vmul.f32 %v17997_v16, %v17997_v16  ;;  %v13586_v21 = vpack.c.bf16 %v2749_v38, %v2748_v19 }
 0x705   : > { %v2765_v4 = vmul.f32 %v18055_v23, %v18055_v23  ;;  %v2703_v10 = vmul.f32 0.0625, %v12771_v47  ;;  %v2631_v56 = vpop.f32.mrb[125].mxu1  ;;  %v2753_v19 = vmul.f32 %v18003_v18, %v18003_v18 }
 0x706   : > { %v2764_v5 = vmul.f32 %v18058_v2, %v18058_v2  ;;  %v2702_v36 = vmul.f32 0.0625, %v2631_v56  ;;  %13581 = vmatprep.subr.bf16.mxu1 %v13580_v0  ;;  %v13590_v56 = vpack.c.bf16 %v2751_v29, %v2750_v25  ;;  %v2755_v25 = vmul.f32 %v18009_v11, %v18009_v11 }
 0x707   : > { %v18069_v49 = vsub.f32 %v17712_v27, %v2703_v10  ;;  %13583 = vmatpush3.bf16.msra.mxu1 %v13582_v59 }
 0x708   : > { %v18076_v42 = vsub.f32 %v17714_v61, %v2702_v36  ;;  %v12774_v22 = vpop.f32.mrb[126].mxu1  ;;  %v13584_v45 = vpack.c.bf16 %v2765_v4, %v2764_v5  ;;  %v2752_v5 = vmul.f32 %v18006_v24, %v18006_v24 }
 0x709   : > { %21436 = vst [vmem:[#allocation21_spill] sm:$0xff] %v18069_v49  ;;  %v2767_v51 = vmul.f32 %v18069_v49, %v18069_v49  ;;  %v2705_v47 = vmul.f32 0.0625, %v12774_v22  ;;  %v2641_v0 = vpop.f32.mrb[127].mxu1 }
 0x70a   : > { %v2766_v27 = vmul.f32 %v18076_v42, %v18076_v42  ;;  %v2704_v59 = vmul.f32 0.0625, %v2641_v0  ;;  %13585 = vmatprep.subr.bf16.mxu1 %v13584_v45 }
 0x70b   : > { %v18083_v10 = vsub.f32 %v17718_v50, %v2705_v47  ;;  %13587 = vmatpush3.bf16.msra.mxu1 %v13586_v21  ;;  %v2754_v21 = vmul.f32 %v18012_v57, %v18012_v57 }
 0x70c   : > { %v18086_v61 = vsub.f32 %v17720_v28, %v2704_v59  ;;  %v12777_v4 = vpop.f32.mrb[128].mxu1  ;;  %v13588_v38 = vpack.c.bf16 %v2767_v51, %v2766_v27  ;;  %v13594_v27 = vpack.c.bf16 %v2753_v19, %v2752_v5  ;;  %v2757_v5 = vmul.f32 %v18015_v1, %v18015_v1 }
 0x70d   : > { %21437 = vst [vmem:[#allocation22_spill] sm:$0xff] %v18083_v10  ;;  %v2769_v36 = vmul.f32 %v18083_v10, %v18083_v10  ;;  %v2707_v22 = vmul.f32 0.0625, %v12777_v4  ;;  %v2651_v45 = vpop.f32.mrb[129].mxu1 }
 0x70e   : > { %21438 = vst [vmem:[#allocation23_spill] sm:$0xff] %v18086_v61  ;;  %v2768_v50 = vmul.f32 %v18086_v61, %v18086_v61  ;;  %v2706_v29 = vmul.f32 0.0625, %v2651_v45  ;;  %13589 = vmatprep.subr.bf16.mxu1 %v13588_v38  ;;  %v13598_v45 = vpack.c.bf16 %v2755_v25, %v2754_v21 }
 0x70f   : > { %v18097_v28 = vsub.f32 %v17724_v30, %v2707_v22  ;;  %13591 = vmatpush3.bf16.msra.mxu1 %v13590_v56 }
 0x710   : > { %v18104_v51 = vsub.f32 %v17726_v14, %v2706_v29  ;;  %v12780_v47 = vpop.f32.mrb[130].mxu1  ;;  %v13592_v0 = vpack.c.bf16 %v2769_v36, %v2768_v50  ;;  %v2756_v50 = vmul.f32 %v18018_v20, %v18018_v20 }
 0x711   : > { %21439 = vst [vmem:[#allocation187_spill] sm:$0xff] %v18097_v28  ;;  %v2771_v59 = vmul.f32 %v18097_v28, %v18097_v28  ;;  %v2709_v4 = vmul.f32 0.0625, %v12780_v47  ;;  %v2661_v38 = vpop.f32.mrb[131].mxu1 }
 0x712   : > { %21440 = vst [vmem:[#allocation24_spill] sm:$0xff] %v18104_v51  ;;  %v2770_v30 = vmul.f32 %v18104_v51, %v18104_v51  ;;  %v2708_v56 = vmul.f32 0.0625, %v2661_v38  ;;  %13593 = vmatprep.subr.bf16.mxu1 %v13592_v0  ;;  %v2758_v38 = vmul.f32 %v18024_v46, %v18024_v46  ;;  %v21464_v51 = vld [vmem:[#allocation183_spill] sm:$0xff] }
 0x713   : > { %v18111_v22 = vsub.f32 %v17730_v54, %v2709_v4  ;;  %13595 = vmatpush3.bf16.msra.mxu1 %v13594_v27  ;;  %v2759_v4 = vmul.f32 %v18021_v39, %v18021_v39 }
 0x714   : > { %v18114_v14 = vsub.f32 %v17732_v37, %v2708_v56  ;;  %v12783_v36 = vpop.f32.mrb[132].mxu1  ;;  %v13596_v19 = vpack.c.bf16 %v2771_v59, %v2770_v30  ;;  %v13602_v59 = vpack.c.bf16 %v2757_v5, %v2756_v50 }
 0x715   : > { %v2773_v29 = vmul.f32 %v18111_v22, %v18111_v22  ;;  %v2711_v47 = vmul.f32 0.0625, %v12783_v36  ;;  %v2671_v0 = vpop.f32.mrb[133].mxu1 }
 0x716   : > { %21441 = vst [vmem:[#allocation188_spill] sm:$0xff] %v18114_v14  ;;  %v2772_v54 = vmul.f32 %v18114_v14, %v18114_v14  ;;  %v2710_v25 = vmul.f32 0.0625, %v2671_v0  ;;  %13597 = vmatprep.subr.bf16.mxu1 %v13596_v19  ;;  %v4205_v0 = vld [vmem:[%s20774_s3 + $0x18] sm:$0xff] }
 0x717   : > { %v18125_v37 = vsub.f32 %v17736_v7, %v2711_v47  ;;  %13599 = vmatpush3.bf16.msra.mxu1 %v13598_v45  ;;  %v13606_v45 = vpack.c.bf16 %v2759_v4, %v2758_v38 }
 0x718   : > { %v18128_v21 = vsub.f32 %v17738_v33, %v2710_v25  ;;  %v13600_v27 = vpack.c.bf16 %v2773_v29, %v2772_v54  ;;  %v3977_v25 = vld [vmem:[%s20774_s3] sm:$0xff] }
 0x719   : > { %v2775_v30 = vmul.f32 %v18125_v37, %v18125_v37 }
 0x71a   : > { %v2774_v56 = vmul.f32 %v18128_v21, %v18128_v21  ;;  %13601 = vmatprep.subr.bf16.mxu1 %v13600_v27  ;;  %v3978_v27 = vld [vmem:[%s20774_s3 + $0x8] sm:$0xff] }
 0x71b   : > { %13603 = vmatpush3.bf16.msra.mxu1 %v13602_v59  ;;  %v13616_v59 = vpack.c.bf16 %v3978_v27, %v3977_v25 }
 0x71c   : > { %v13604_v7 = vpack.c.bf16 %v2775_v30, %v2774_v56 }
 0x71d   : > { %13617 = vmatprep.subr.bf16.mxu0 %v13616_v59 }
 0x71e   : > { %13605 = vmatprep.subr.bf16.mxu1 %v13604_v7  ;;  %13619 = vmatpush3.bf16.msra.mxu0 %v13616_v59 }
 0x71f   : > { %13607 = vmatpush3.bf16.msra.mxu1 %v13606_v45 }
 0x722   : > { %2841 = vmatmul.mubr.f32.vlgmr.msra.gmra.mrb[134].mxu1 %v17745_v62  ;;  %v21443_v62 = vld [vmem:[#allocation7_spill] sm:$0xff] }
 0x723   : > { %2845 = vmatprep.mubr.f32.mxu1 %v17751_v53  ;;  %v21444_v53 = vld [vmem:[#allocation8_spill] sm:$0xff] }
 0x726   : > { %2846 = vmatmul.mubr.f32.gmra.mrb[136].mxu1 %v17757_v58  ;;  %v21445_v58 = vld [vmem:[#allocation9_spill] sm:$0xff] }
 0x727   : > { %12788 = vmatprep.mubr.msk.f32.mxu1 %vm504_vm0, %v17642_v8  ;;  %v21442_v8 = vld [vmem:[#allocation6_spill] sm:$0xff] }
 0x7f5   : > { %v12000_v33 = vpop.f32.mrb[134].mxu1 }
 0x7f6   : > { %v12001_v36 = vpop.f32.mrb[135].mxu1 }
 0x7f7   : > { %v12002_v19 = vadd.f32 %v12001_v36, %v12000_v33 }
 0x7f9   : > { %v12003_v5 = vpop.f32.mrb[136].mxu1 }
 0x7fa   : > { %v12004_v50 = vpop.f32.mrb[137].mxu1 }
 0x7fb   : > { %v12005_v29 = vadd.f32 %v12004_v50, %v12003_v5 }
 0x7fd   : > { %v13608_v47 = vpack.c.bf16 %v12005_v29, %v12002_v19 }
 0x7ff   : > { %13609 = vmatprep.subr.bf16.mxu1 %v13608_v47 }
 0x800   : > { %13611 = vmatpush3.bf16.msra.mxu1 %v13608_v47 }
 0x803   : > { %12789 = vmatmul.mubr.msk.f32.vlgmr.msra.gmra.mrb[138].mxu1 %vm504_vm0, %v17763_v63  ;;  %v21446_v63 = vld [vmem:[#allocation10_spill] sm:$0xff] }
 0x804   : > { %12791 = vmatprep.mubr.msk.f32.mxu1 %vm504_vm0, %v17770_v41  ;;  %v21447_v41 = vld [vmem:[#allocation11_spill] sm:$0xff] }
 0x807   : > { %12792 = vmatmul.mubr.msk.f32.gmra.mrb[140].mxu1 %vm504_vm0, %v17777_v26  ;;  %v21448_v26 = vld [vmem:[#allocation175_spill] sm:$0xff] }
 0x808   : > { %12794 = vmatprep.mubr.msk.f32.mxu1 %vm504_vm0, %v17784_v34  ;;  %v21449_v34 = vld [vmem:[#allocation12_spill] sm:$0xff] }
 0x80b   : > { %12795 = vmatmul.mubr.msk.f32.gmra.mrb[142].mxu1 %vm504_vm0, %v17791_v3  ;;  %v21450_v3 = vld [vmem:[#allocation176_spill] sm:$0xff] }
 0x80c   : > { %12797 = vmatprep.mubr.msk.f32.mxu1 %vm504_vm0, %v17798_v15  ;;  %v21451_v15 = vld [vmem:[#allocation13_spill] sm:$0xff] }
 0x80f   : > { %12798 = vmatmul.mubr.msk.f32.gmra.mrb[144].mxu1 %vm504_vm0, %v17805_v60  ;;  %v21452_v60 = vld [vmem:[#allocation14_spill] sm:$0xff] }
 0x810   : > { %12800 = vmatprep.mubr.msk.f32.mxu1 %vm504_vm0, %v17812_v32  ;;  %v21453_v32 = vld [vmem:[#allocation15_spill] sm:$0xff] }
 0x813   : > { %12801 = vmatmul.mubr.msk.f32.gmra.mrb[146].mxu1 %vm504_vm0, %v17819_v35  ;;  %v21454_v35 = vld [vmem:[#allocation179_spill] sm:$0xff] }
 0x814   : > { %12803 = vmatprep.mubr.msk.f32.mxu1 %vm504_vm0, %v17826_v12  ;;  %v21455_v12 = vld [vmem:[#allocation16_spill] sm:$0xff] }
 0x817   : > { %12804 = vmatmul.mubr.msk.f32.gmra.mrb[148].mxu1 %vm504_vm0, %v17833_v43  ;;  %v21456_v43 = vld [vmem:[#allocation180_spill] sm:$0xff] }
 0x818   : > { %12806 = vmatprep.mubr.msk.f32.mxu1 %vm504_vm0, %v17840_v9  ;;  %v21457_v9 = vld [vmem:[#allocation17_spill] sm:$0xff] }
 0x81b   : > { %12807 = vmatmul.mubr.msk.f32.gmra.mrb[150].mxu1 %vm504_vm0, %v17847_v17  ;;  %v21458_v17 = vld [vmem:[#allocation18_spill] sm:$0xff] }
 0x81c   : > { %12809 = vmatprep.mubr.msk.f32.mxu1 %vm504_vm0, %v17854_v13  ;;  %v4204_v13 = vld [vmem:[%s20774_s3 + $0x10] sm:$0xff] }
 0x81d   : > { %v13612_v54 = vpack.c.bf16 %v4205_v0, %v4204_v13 }
 0x81f   : > { %12810 = vmatmul.mubr.msk.f32.gmra.mrb[152].mxu1 %vm504_vm0, %v21442_v8  ;;  %13613 = vmatprep.subr.bf16.mxu1 %v13612_v54 }
 0x820   : > { %12812 = vmatprep.mubr.msk.f32.mxu1 %vm504_vm0, %v21443_v62  ;;  %13615 = vmatpush3.bf16.msra.mxu1 %v13612_v54 }
 0x823   : > { %12813 = vmatmul.mubr.msk.f32.gmra.mrb[154].mxu1 %vm504_vm0, %v21444_v53 }
 0x824   : > { %12815 = vmatprep.mubr.msk.f32.mxu1 %vm504_vm0, %v21445_v58 }
 0x827   : > { %12816 = vmatmul.mubr.msk.f32.gmra.mrb[156].mxu1 %vm504_vm0, %v21446_v63 }
 0x828   : > { %12818 = vmatprep.mubr.msk.f32.mxu1 %vm504_vm0, %v21447_v41 }
 0x82b   : > { %12819 = vmatmul.mubr.msk.f32.gmra.mrb[158].mxu1 %vm504_vm0, %v21448_v26 }
 0x82c   : > { %12821 = vmatprep.mubr.msk.f32.mxu1 %vm504_vm0, %v21449_v34 }
 0x82f   : > { %12822 = vmatmul.mubr.msk.f32.gmra.mrb[160].mxu1 %vm504_vm0, %v21450_v3 }
 0x830   : > { %12824 = vmatprep.mubr.msk.f32.mxu1 %vm504_vm0, %v21451_v15 }
 0x833   : > { %12825 = vmatmul.mubr.msk.f32.gmra.mrb[162].mxu1 %vm504_vm0, %v21452_v60 }
 0x834   : > { %12827 = vmatprep.mubr.msk.f32.mxu1 %vm504_vm0, %v21453_v32 }
 0x837   : > { %12828 = vmatmul.mubr.msk.f32.gmra.mrb[164].mxu1 %vm504_vm0, %v21454_v35 }
 0x838   : > { %12830 = vmatprep.mubr.msk.f32.mxu1 %vm504_vm0, %v21455_v12 }
 0x83b   : > { %12831 = vmatmul.mubr.msk.f32.gmra.mrb[166].mxu1 %vm504_vm0, %v21456_v43 }
 0x83c   : > { %12833 = vmatprep.mubr.msk.f32.mxu1 %vm504_vm0, %v21457_v9 }
 0x83f   : > { %12834 = vmatmul.mubr.msk.f32.gmra.mrb[168].mxu1 %vm504_vm0, %v21458_v17 }
 0x8d6   : > { %v12790_v4 = vpop.f32.mrb[138].mxu1 }
 0x8d7   : > { %v2917_v38 = vpop.f32.mrb[139].mxu1  ;;  %v3077_v53 = vmul.f32 0.0625, %v12790_v4 }
 0x8d8   : > { %v3076_v63 = vmul.f32 0.0625, %v2917_v38 }
 0x8d9   : > { %v3109_v26 = vadd.f32 1e-05, %v3077_v53 }
 0x8da   : > { %v12793_v30 = vpop.f32.mrb[140].mxu1  ;;  %v3108_v3 = vadd.f32 1e-05, %v3076_v63 }
 0x8db   : > { %v2927_v56 = vpop.f32.mrb[141].mxu1  ;;  %v3079_v15 = vmul.f32 0.0625, %v12793_v30  ;;  %14122 = vrsqrt.f32 %v3109_v26  ;;  %v18241_v26 = vpop.permute.xlu0 %4089 }
 0x8dc   : > { %v3078_v32 = vmul.f32 0.0625, %v2927_v56  ;;  %14124 = vrsqrt.f32 %v3108_v3  ;;  %21459 = vst [vmem:[#allocation25_spill] sm:$0xff] %v18241_v26 }
 0x8dd   : > { %v3111_v12 = vadd.f32 1e-05, %v3079_v15 }
 0x8de   : > { %v12796_v7 = vpop.f32.mrb[142].mxu1  ;;  %v3110_v13 = vadd.f32 1e-05, %v3078_v32 }
 0x8df   : > { %v2937_v45 = vpop.f32.mrb[143].mxu1  ;;  %v3081_v43 = vmul.f32 0.0625, %v12796_v7  ;;  %14126 = vrsqrt.f32 %v3111_v12 }
 0x8e0   : > { %v3080_v9 = vmul.f32 0.0625, %v2937_v45  ;;  %14128 = vrsqrt.f32 %v3110_v13 }
 0x8e1   : > { %v3113_v27 = vadd.f32 1e-05, %v3081_v43 }
 0x8e2   : > { %v12799_v33 = vpop.f32.mrb[144].mxu1  ;;  %v3112_v59 = vadd.f32 1e-05, %v3080_v9 }
 0x8e3   : > { %v2947_v36 = vpop.f32.mrb[145].mxu1  ;;  %v3083_v0 = vmul.f32 0.0625, %v12799_v33  ;;  %14130 = vrsqrt.f32 %v3113_v27  ;;  %v21461_v27 = vld [vmem:[#allocation51_spill] sm:$0xff] }
 0x8e4   : > { %v3082_v25 = vmul.f32 0.0625, %v2947_v36  ;;  %14132 = vrsqrt.f32 %v3112_v59 }
 0x8e5   : > { %v3115_v38 = vadd.f32 1e-05, %v3083_v0  ;;  %v14123_v53 = vpop.eup %14122 }
 0x8e6   : > { %v12802_v19 = vpop.f32.mrb[146].mxu1  ;;  %v3114_v56 = vadd.f32 1e-05, %v3082_v25  ;;  %v14125_v45 = vpop.eup %14124  ;;  %v3173_v3 = vmul.f32 %v14123_v53, %v17979_v44  ;;  %v3718_v44 = vlaneseq  ;;  %v21463_v53 = vld [vmem:[#allocation19_spill] sm:$0xff] }
 0x8e7   : > { %v2957_v5 = vpop.f32.mrb[147].mxu1  ;;  %v3085_v7 = vmul.f32 0.0625, %v12802_v19  ;;  %14134 = vrsqrt.f32 %v3115_v38  ;;  %v3172_v15 = vmul.f32 %v14125_v45, %v17982_v40  ;;  %v18251_v25 = vpop.permute.xlu0 %4094  ;;  %v21462_v38 = vld [vmem:[#allocation52_spill] sm:$0xff] }
 0x8e8   : > { %v3084_v63 = vmul.f32 0.0625, %v2957_v5  ;;  %14136 = vrsqrt.f32 %v3114_v56  ;;  %21460 = vst [vmem:[#allocation26_spill] sm:$0xff] %v18251_v25  ;;  %v3398_v59 = vmul.f32 %v21461_v27, %v3173_v3  ;;  %v21465_v3 = vld [vmem:[#allocation53_spill] sm:$0xff] }
 0x8e9   : > { %v3117_v32 = vadd.f32 1e-05, %v3085_v7  ;;  %v14127_v19 = vpop.eup %14126  ;;  %v3397_v56 = vmul.f32 %v21462_v38, %v3172_v15  ;;  %v18261_v38 = vshrl.u32 %v3718_v44, 7 }
 0x8ea   : > { %v12805_v50 = vpop.f32.mrb[148].mxu1  ;;  %v3116_v12 = vadd.f32 1e-05, %v3084_v63  ;;  %v14129_v0 = vpop.eup %14128  ;;  %v3175_v40 = vmul.f32 %v14127_v19, %v21463_v53  ;;  %v3623_v27 = vadd.f32 %v21465_v3, %v3398_v59  ;;  %v21467_v19 = vld [vmem:[#allocation55_spill] sm:$0xff] }
 0x8eb   : > { %v2967_v29 = vpop.f32.mrb[149].mxu1  ;;  %v3087_v43 = vmul.f32 0.0625, %v12805_v50  ;;  %14138 = vrsqrt.f32 %v3117_v32  ;;  %v3174_v10 = vmul.f32 %v14129_v0, %v21464_v51  ;;  %v18265_v49 = vpop.permute.xlu0 %4099  ;;  %vm3720_vm1 = vcmp.lt.s32.totalorder %v18261_v38, 1 }
 0x8ec   : > { %v3086_v5 = vmul.f32 0.0625, %v2967_v29  ;;  %14140 = vrsqrt.f32 %v3116_v12  ;;  %v3400_v53 = vmul.f32 %v21467_v19, %v3175_v40  ;;  %vm4880_vm2 = vcmp.lt.s32.totalorder %v18261_v38, 7  ;;  %v6879_v38 = vld [vmem:[%s20774_s3 + $0x58] sm:$0xff] }
 0x8ed   : > { %v3119_v7 = vadd.f32 1e-05, %v3087_v43  ;;  %v14131_v63 = vpop.eup %14130  ;;  %v21466_v43 = vld [vmem:[#allocation54_spill] sm:$0xff] }
 0x8ee   : > { %v12808_v47 = vpop.f32.mrb[150].mxu1  ;;  %v14133_v29 = vpop.eup %14132  ;;  %v3118_v25 = vadd.f32 1e-05, %v3086_v5  ;;  %v3177_v51 = vmul.f32 %v14131_v63, %v17991_v6  ;;  %v21470_v63 = vld [vmem:[#allocation59_spill] sm:$0xff] }
 0x8ef   : > { %v18217_v8 = vpop.f32.mrb[151].mxu1  ;;  %v3089_v50 = vmul.f32 0.0625, %v12808_v47  ;;  %v3622_v47 = vadd.f32 %v21466_v43, %v3397_v56  ;;  %14142 = vrsqrt.f32 %v3119_v7  ;;  %v3176_v5 = vmul.f32 %v14133_v29, %v17994_v52  ;;  %v18283_v19 = vpop.permute.xlu0 %4104 }
 0x8f0   : > { %v3088_v15 = vmul.f32 0.0625, %v18217_v8  ;;  %v18273_v43 = vmax.f32 %v3623_v27, 0.0  ;;  %v3625_v29 = vadd.f32 %v21470_v63, %v3400_v53 }
 0x8f1   : > { %v14135_v26 = vpop.eup %14134 }
 0x8f2   : > { %v18219_v62 = vpop.f32.mrb[152].mxu1  ;;  %v14137_v12 = vpop.eup %14136  ;;  %v3179_v44 = vmul.f32 %v14135_v26, %v17997_v16  ;;  %v3120_v7 = vadd.f32 1e-05, %v3088_v15  ;;  %21469 = vst [vmem:[#allocation27_spill] sm:$0xff] %v18273_v43  ;;  %v21472_v16 = vld [vmem:[#allocation62_spill] sm:$0xff]  ;;  %v21474_v15 = vld [vmem:[#allocation57_spill] sm:$0xff] }
 0x8f3   : > { %v18221_v58 = vpop.f32.mrb[153].mxu1  ;;  %v3178_v40 = vmul.f32 %v14137_v12, %v18000_v48  ;;  %v3401_v26 = vmul.f32 %v21472_v16, %v3176_v5  ;;  %v18279_v48 = vmax.f32 %v3622_v47, 0.0  ;;  %v21475_v12 = vld [vmem:[#allocation67_spill] sm:$0xff]  ;;  %v20830_v16 = vrot.slane %v18273_v43, 7 }
 0x8f4   : > { %v3090_v6 = vmul.f32 0.0625, %v18221_v58  ;;  %v3404_v27 = vmul.f32 %v21475_v12, %v3179_v44  ;;  %v21476_v58 = vld [vmem:[#allocation68_spill] sm:$0xff]  ;;  %v21477_v5 = vld [vmem:[#allocation351_spill] sm:$0xff]  ;;  %v18311_v12 = vpop.permute.xlu0 %4109 }
 0x8f5   : > { %21473 = vst [vmem:[#allocation28_spill] sm:$0xff] %v18279_v48  ;;  %v18290_v47 = vmul.f32 %v21477_v5, %v18273_v43  ;;  %v21480_v44 = vld [vmem:[#allocation63_spill] sm:$0xff]  ;;  %21486 = vst [vmem:[#allocation31_spill] sm:$0xff] %v18311_v12  ;;  %v21496_v12 = vld [vmem:[#allocation66_spill] sm:$0xff] }
 0x8f6   : > { %v18223_v41 = vpop.f32.mrb[154].mxu1 }
 0x8f7   : > { %v18225_v34 = vpop.f32.mrb[155].mxu1 }
 0x8fa   : > { %v18227_v60 = vpop.f32.mrb[156].mxu1 }
 0x8fb   : > { %v18229_v35 = vpop.f32.mrb[157].mxu1 }
 0x8fe   : > { %v18231_v17 = vpop.f32.mrb[158].mxu1 }
 0x8ff   : > { %v18233_v54 = vpop.f32.mrb[159].mxu1 }
 0x902   : > { %v18235_v4 = vpop.f32.mrb[160].mxu1 }
 0x903   : > { %v18237_v30 = vpop.f32.mrb[161].mxu1 }
 0x906   : > { %v18239_v33 = vpop.f32.mrb[162].mxu1 }
 0x907   : > { %v18243_v36 = vpop.f32.mrb[163].mxu1 }
 0x90a   : > { %v18247_v9 = vpop.f32.mrb[164].mxu1 }
 0x90b   : > { %v18249_v13 = vpop.f32.mrb[165].mxu1 }
 0x90e   : > { %v12832_v45 = vpop.f32.mrb[166].mxu1 }
 0x90f   : > { %v3105_v14 = vmul.f32 0.0625, %v12832_v45  ;;  %v18256_v28 = vpop.f32.mrb[167].mxu1  ;;  %v3121_v45 = vadd.f32 1e-05, %v3089_v50  ;;  %v3091_v50 = vmul.f32 0.0625, %v18219_v62 }
 0x911   : > { %v3137_v32 = vadd.f32 1e-05, %v3105_v14  ;;  %v21468_v14 = vld [vmem:[#allocation56_spill] sm:$0xff] }
 0x912   : > { %v12835_v61 = vpop.f32.mrb[168].mxu1  ;;  %v3399_v59 = vmul.f32 %v21468_v14, %v3174_v10  ;;  %v21471_v10 = vld [vmem:[#allocation61_spill] sm:$0xff] }
 0x913   : > { %14144 = vrsqrt.f32 %v3137_v32  ;;  %v3107_v0 = vmul.f32 0.0625, %v12835_v61  ;;  %v3067_v8 = vpop.f32.mrb[169].mxu1  ;;  %v14139_v61 = vpop.eup %14138  ;;  %v3402_v32 = vmul.f32 %v21471_v10, %v3177_v51  ;;  %v3122_v51 = vadd.f32 1e-05, %v3090_v6  ;;  %v21479_v14 = vld [vmem:[#allocation65_spill] sm:$0xff] }
 0x914   : > { %14146 = vrsqrt.f32 %v3118_v25  ;;  %v3106_v56 = vmul.f32 0.0625, %v3067_v8  ;;  %v14141_v25 = vpop.eup %14140  ;;  %v3624_v62 = vadd.f32 %v21474_v15, %v3399_v59  ;;  %v3181_v53 = vmul.f32 %v14139_v61, %v18003_v18  ;;  %v21483_v6 = vld [vmem:[#allocation349_spill] sm:$0xff] }
 0x915   : > { %v3139_v3 = vadd.f32 1e-05, %v3107_v0  ;;  %14148 = vrsqrt.f32 %v3121_v45  ;;  %v3403_v45 = vmul.f32 %v21476_v58, %v3178_v40  ;;  %v3123_v0 = vadd.f32 1e-05, %v3091_v50  ;;  %v14143_v40 = vpop.eup %14142  ;;  %v21482_v50 = vld [vmem:[#allocation71_spill] sm:$0xff] }
 0x916   : > { %v3138_v52 = vadd.f32 1e-05, %v3106_v56  ;;  %v18292_v8 = vmax.f32 %v3625_v29, 0.0  ;;  %v3627_v59 = vadd.f32 %v21479_v14, %v3402_v32  ;;  %v3626_v56 = vadd.f32 %v21480_v44, %v3401_v26  ;;  %v21484_v29 = vld [vmem:[#allocation69_spill] sm:$0xff] }
 0x917   : > { %14150 = vrsqrt.f32 %v3139_v3  ;;  %v3180_v3 = vmul.f32 %v14141_v25, %v18006_v24  ;;  %v3629_v18 = vadd.f32 %v21482_v50, %v3404_v27  ;;  %v20831_v61 = vrot.slane %v18279_v48, 7  ;;  %v21485_v26 = vld [vmem:[#allocation73_spill] sm:$0xff] }
 0x918   : > { %14152 = vrsqrt.f32 %v3138_v52  ;;  %21478 = vst [vmem:[#allocation29_spill] sm:$0xff] %v18292_v8  ;;  %v18302_v52 = vmul.f32 %v21483_v6, %v18279_v48  ;;  %v3628_v10 = vadd.f32 %v21484_v29, %v3403_v45  ;;  %v3093_v32 = vmul.f32 0.0625, %v18223_v41  ;;  %v21487_v45 = vld [vmem:[#allocation74_spill] sm:$0xff] }
 0x919   : > { %14154 = vrsqrt.f32 %v3120_v7  ;;  %v18297_v7 = vmax.f32 %v3624_v62, 0.0  ;;  %v3406_v25 = vmul.f32 %v21485_v26, %v3181_v53  ;;  %v3092_v15 = vmul.f32 0.0625, %v18225_v34  ;;  %v21489_v34 = vld [vmem:[#allocation353_spill] sm:$0xff] }
 0x91a   : > { %14156 = vrsqrt.f32 %v3123_v0  ;;  %v18313_v27 = vmax.f32 %v3627_v59, 0.0  ;;  %v18315_v58 = vmax.f32 %v3626_v56, 0.0  ;;  %v3405_v0 = vmul.f32 %v21487_v45, %v3180_v3 }
 0x91b   : > { %21481 = vst [vmem:[#allocation30_spill] sm:$0xff] %v18297_v7  ;;  %14158 = vrsqrt.f32 %v3122_v51  ;;  %v3183_v41 = vmul.f32 %v14143_v40, %v18009_v11  ;;  %v18319_v14 = vmax.f32 %v3629_v18, 0.0  ;;  %v3095_v53 = vmul.f32 0.0625, %v18227_v60  ;;  %v21488_v51 = vld [vmem:[#allocation46_spill] sm:$0xff]  ;;  %v21491_v40 = vld [vmem:[#allocation77_spill] sm:$0xff] }
 0x91c   : > { %v3125_v56 = vadd.f32 1e-05, %v3093_v32  ;;  %v3094_v6 = vmul.f32 0.0625, %v18229_v35  ;;  %v18335_v11 = vsel %vm3720_vm1, %v20831_v61, %v20830_v16  ;;  %v18337_v3 = vmax.f32 %v3628_v10, 0.0  ;;  %v21492_v32 = vld [vmem:[#allocation75_spill] sm:$0xff]  ;;  %v21495_v61 = vld [vmem:[#allocation48_spill] sm:$0xff] }
 0x91d   : > { %v14145_v63 = vpop.eup %14144  ;;  %21490 = vst [vmem:[#allocation32_spill] sm:$0xff] %v18335_v11  ;;  %v3631_v18 = vadd.f32 %v21491_v40, %v3406_v25  ;;  %v21493_v35 = vld [vmem:[#allocation79_spill] sm:$0xff]  ;;  %v3127_v16 = vadd.f32 1e-05, %v3095_v53  ;;  %v18349_v25 = vmul.f32 %v21496_v12, %v18335_v11 }
 0x91e   : > { %v14147_v24 = vpop.eup %14146  ;;  %v3201_v62 = vmul.f32 %v14145_v63, %v18111_v22  ;;  %v18325_v22 = vmul.f32 %v21489_v34, %v18297_v7  ;;  %v3124_v63 = vadd.f32 1e-05, %v3092_v15  ;;  %v3408_v26 = vmul.f32 %v21493_v35, %v3183_v41  ;;  %v18351_v15 = vpop.permute.xlu0 %4114  ;;  %v21498_v41 = vld [vmem:[#allocation45_spill] sm:$0xff]  ;;  %v21500_v12 = vld [vmem:[#allocation83_spill] sm:$0xff] }
 0x91f   : > { %v14149_v5 = vpop.eup %14148  ;;  %v3182_v59 = vmul.f32 %v14147_v24, %v18012_v57  ;;  %v3630_v24 = vadd.f32 %v21492_v32, %v3405_v0  ;;  %14160 = vrsqrt.f32 %v3125_v56  ;;  %v3126_v0 = vadd.f32 1e-05, %v3094_v6  ;;  %v21501_v32 = vld [vmem:[#allocation50_spill] sm:$0xff]  ;;  %v21502_v6 = vld [vmem:[#allocation85_spill] sm:$0xff] }
 0x920   : > { %v3426_v44 = vmul.f32 %v21488_v51, %v3201_v62  ;;  %v21494_v62 = vld [vmem:[#allocation47_spill] sm:$0xff]  ;;  %v3185_v34 = vmul.f32 %v14149_v5, %v18015_v1  ;;  %14162 = vrsqrt.f32 %v3124_v63  ;;  %v21499_v1 = vld [vmem:[#allocation49_spill] sm:$0xff] }
 0x921   : > { %v14151_v50 = vpop.eup %14150  ;;  %v18359_v53 = vmax.f32 %v3630_v24, 0.0  ;;  %14164 = vrsqrt.f32 %v3127_v16  ;;  %v21505_v24 = vld [vmem:[#allocation355_spill] sm:$0xff] }
 0x922   : > { %v14153_v60 = vpop.eup %14152  ;;  %v3203_v29 = vmul.f32 %v14151_v50, %v18125_v37  ;;  %v3651_v45 = vadd.f32 %v21494_v62, %v3426_v44  ;;  %v21497_v37 = vld [vmem:[#allocation80_spill] sm:$0xff]  ;;  %v18355_v44 = vmax.f32 %v3631_v18, 0.0  ;;  %v3410_v35 = vmul.f32 %v21502_v6, %v3185_v34  ;;  %v21514_v6 = vld [vmem:[#allocation91_spill] sm:$0xff] }
 0x923   : > { %v14155_v57 = vpop.eup %14154  ;;  %v3202_v51 = vmul.f32 %v14153_v60, %v18128_v21  ;;  %v3407_v50 = vmul.f32 %v21497_v37, %v3182_v59  ;;  %v3633_v60 = vadd.f32 %v21500_v12, %v3408_v26  ;;  %v3097_v18 = vmul.f32 0.0625, %v18231_v17  ;;  %v18380_v17 = vpop.permute.xlu0 %4119 }
 0x924   : > { %v3428_v10 = vmul.f32 %v21495_v61, %v3203_v29  ;;  %v3184_v21 = vmul.f32 %v14155_v57, %v18018_v20  ;;  %v14157_v61 = vpop.eup %14156  ;;  %v18362_v29 = vmax.f32 %v3651_v45, 0.0  ;;  %v21504_v20 = vld [vmem:[#allocation81_spill] sm:$0xff]  ;;  %14166 = vrsqrt.f32 %v3126_v0  ;;  %v21506_v45 = vld [vmem:[#allocation86_spill] sm:$0xff] }
 0x925   : > { %v3427_v40 = vmul.f32 %v21498_v41, %v3202_v51  ;;  %v14159_v56 = vpop.eup %14158  ;;  %v3632_v63 = vadd.f32 %v21504_v20, %v3407_v50  ;;  %v18374_v26 = vmul.f32 %v21505_v24, %v18292_v8  ;;  %v3096_v34 = vmul.f32 0.0625, %v18233_v54  ;;  %v21507_v50 = vld [vmem:[#allocation345_spill] sm:$0xff]  ;;  %v21516_v24 = vld [vmem:[#allocation60_spill] sm:$0xff] }
 0x926   : > { %v3653_v5 = vadd.f32 %v21499_v1, %v3428_v10  ;;  %v3409_v51 = vmul.f32 %v21506_v45, %v3184_v21  ;;  %v3187_v10 = vmul.f32 %v14157_v61, %v18021_v39  ;;  %v3186_v37 = vmul.f32 %v14159_v56, %v18024_v46  ;;  %v21508_v1 = vld [vmem:[#allocation89_spill] sm:$0xff]  ;;  %v21509_v39 = vld [vmem:[#allocation347_spill] sm:$0xff] }
 0x927   : > { %v3652_v59 = vadd.f32 %v21501_v32, %v3427_v40  ;;  %v20832_v41 = vrot.slane %v18362_v29, 7  ;;  %v3129_v21 = vadd.f32 1e-05, %v3097_v18  ;;  %v3688_v54 = vrot.slane %v18297_v7, 7  ;;  %v21515_v18 = vld [vmem:[#allocation58_spill] sm:$0xff] }
 0x928   : > { %v18367_v62 = vmax.f32 %v3653_v5, 0.0  ;;  %v3635_v5 = vadd.f32 %v21508_v1, %v3410_v35  ;;  %v3098_v12 = vmul.f32 0.0625, %v18237_v30  ;;  %v3412_v30 = vmul.f32 %v21514_v6, %v3187_v10  ;;  %v21517_v1 = vld [vmem:[#allocation92_spill] sm:$0xff]  ;;  %v21518_v10 = vld [vmem:[#allocation87_spill] sm:$0xff] }
 0x929   : > { %v18370_v57 = vmax.f32 %v3652_v59, 0.0  ;;  %v21512_v59 = vrot.slane %v18279_v48, 7  ;;  %v3099_v35 = vmul.f32 0.0625, %v18235_v4  ;;  %14168 = vrsqrt.f32 %v3129_v21 }
 0x92a   : > { %21503 = vst [vmem:[#allocation33_spill] sm:$0xff] %v18367_v62  ;;  %v3717_v16 = vrot.slane %v18367_v62, 7  ;;  %v4173_v61 = vmul.f32 %v21509_v39, %v18367_v62  ;;  %v3128_v39 = vadd.f32 1e-05, %v3096_v34  ;;  %v3130_v34 = vadd.f32 1e-05, %v3098_v12 }
 0x92b   : > { %v4172_v0 = vmul.f32 %v21507_v50, %v18370_v57  ;;  %v3716_v40 = vrot.slane %v18370_v57, 7  ;;  %v14161_v50 = vpop.eup %14160  ;;  %v3100_v21 = vmul.f32 0.0625, %v18243_v36  ;;  %v21527_v36 = vld [vmem:[#allocation70_spill] sm:$0xff] }
 0x92c   : > { %v18407_v56 = vsel %vm3720_vm1, %v3717_v16, %v21512_v59  ;;  %v14163_v4 = vpop.eup %14162  ;;  %v21519_v59 = vld [vmem:[#allocation64_spill] sm:$0xff]  ;;  %14170 = vrsqrt.f32 %v3128_v39  ;;  %v21530_v39 = vld [vmem:[#allocation97_spill] sm:$0xff] }
 0x92d   : > { %12840 = vmatprep.mubr.msk.f32.mxu1 %vm504_vm0, %v4172_v0  ;;  %v18395_v46 = vsel %vm3720_vm1, %v3716_v40, %v3717_v16  ;;  %v18401_v32 = vsel %vm3720_vm1, %v20832_v41, %v3716_v40  ;;  %21513 = vst [vmem:[#allocation195_spill] sm:$0xff] %v18407_v56  ;;  %v18416_v0 = vmax.f32 %v3633_v60, 0.0  ;;  %v18418_v40 = vmax.f32 %v3632_v63, 0.0  ;;  %v21525_v41 = vld [vmem:[#allocation20_spill] sm:$0xff] }
 0x92e   : > { %21510 = vst [vmem:[#allocation34_spill] sm:$0xff] %v18395_v46  ;;  %21511 = vst [vmem:[#allocation35_spill] sm:$0xff] %v18401_v32  ;;  %12841 = vmatmul.mubr.msk.f32.vlgmr.msra.gmra.mrb[170].mxu1 %vm504_vm0, %v4173_v61  ;;  %v3945_v20 = vmul.f32 %v21515_v18, %v18401_v32  ;;  %v3946_v45 = vmul.f32 %v21516_v24, %v18395_v46  ;;  %v3411_v16 = vmul.f32 %v21517_v1, %v3186_v37  ;;  %v21520_v18 = vld [vmem:[#allocation357_spill] sm:$0xff]  ;;  %v18430_v24 = vpop.permute.xlu0 %4124  ;;  %v21526_v32 = vld [vmem:[#allocation184_spill] sm:$0xff] }
 0x92f   : > { %12843 = vmatprep.mubr.msk.f32.mxu1 %vm504_vm0, %v18302_v52  ;;  %v3634_v61 = vadd.f32 %v21518_v10, %v3409_v51  ;;  %v3947_v6 = vmul.f32 %v21519_v59, %v18407_v56  ;;  %v4178_v60 = vmul.f32 %v21520_v18, %v18315_v58  ;;  %v3689_v63 = vrot.slane %v18292_v8, 7  ;;  %v21523_v10 = vld [vmem:[#allocation95_spill] sm:$0xff] }
 0x930   : > { %12892 = vmatprep.mubr.msk.f32.mxu0 %vm504_vm0, %v3945_v20  ;;  %v21521_v52 = vrot.slane %v18273_v43, 7  ;;  %v3690_v37 = vrot.slane %v18315_v58, 7  ;;  %v18440_v20 = vpop.eup %14164  ;;  %v18442_v1 = vmax.f32 %v3635_v5, 0.0  ;;  %v3637_v59 = vadd.f32 %v21523_v10, %v3412_v30  ;;  %v21533_v10 = vld [vmem:[#allocation359_spill] sm:$0xff] }
 0x931   : > { %12893 = vmatmul.mubr.msk.f32.vlgmr.msra.gmra.mrb[38].mxu0 %vm504_vm0, %v3946_v45  ;;  %v3131_v18 = vadd.f32 1e-05, %v3099_v35  ;;  %v14167_v12 = vpop.eup %14166  ;;  %v21524_v45 = vld [vmem:[#allocation93_spill] sm:$0xff]  ;;  %v3189_v46 = vmul.f32 %v14161_v50, %v21525_v41  ;;  %v3188_v11 = vmul.f32 %v14163_v4, %v21526_v32  ;;  %v18454_v5 = vmax.f32 %v3634_v61, 0.0  ;;  %v21531_v61 = vld [vmem:[#allocation98_spill] sm:$0xff] }
 0x932   : > { %v18437_v51 = vsel %vm3720_vm1, %v21521_v52, %v3688_v54  ;;  %12844 = vmatmul.mubr.msk.f32.gmra.mrb[172].mxu1 %vm504_vm0, %v18290_v47  ;;  %12895 = vmatprep.mubr.msk.f32.mxu0 %vm504_vm0, %v3947_v6  ;;  %v3636_v52 = vadd.f32 %v21524_v45, %v3411_v16  ;;  %v18460_v47 = vsel %vm3720_vm1, %v3688_v54, %v3689_v63  ;;  %v3691_v35 = vrot.slane %v18313_v27, 7  ;;  %v21536_v45 = vld [vmem:[#allocation361_spill] sm:$0xff] }
 0x933   : > { %21522 = vst [vmem:[#allocation36_spill] sm:$0xff] %v18437_v51  ;;  %12846 = vmatprep.mubr.msk.f32.mxu1 %vm504_vm0, %v18325_v22  ;;  %v3949_v30 = vmul.f32 %v21527_v36, %v18437_v51  ;;  %21528 = vst [vmem:[#allocation196_spill] sm:$0xff] %v18460_v47  ;;  %14172 = vrsqrt.f32 %v3130_v34  ;;  %v3101_v41 = vmul.f32 0.0625, %v18239_v33  ;;  %v18468_v22 = vsel %vm3720_vm1, %v3689_v63, %v3690_v37  ;;  %v18477_v33 = vpop.permute.xlu0 %4129  ;;  %v21532_v63 = vld [vmem:[#allocation72_spill] sm:$0xff] }
 0x934   : > { %21529 = vst [vmem:[#allocation37_spill] sm:$0xff] %v18468_v22  ;;  %v3692_v32 = vrot.slane %v18337_v3, 7  ;;  %v18471_v50 = vmax.f32 %v3637_v59, 0.0  ;;  %14174 = vrsqrt.f32 %v3131_v18  ;;  %v3132_v16 = vadd.f32 1e-05, %v3100_v21 }
 0x935   : > { %12896 = vmatmul.mubr.msk.f32.gmra.mrb[40].mxu0 %vm504_vm0, %v18349_v25  ;;  %v3102_v54 = vmul.f32 0.0625, %v18249_v13  ;;  %v18479_v25 = vmax.f32 %v3636_v52, 0.0  ;;  %v3414_v4 = vmul.f32 %v21530_v39, %v3189_v46  ;;  %v3413_v6 = vmul.f32 %v21531_v61, %v3188_v11  ;;  %v5138_v13 = vld [vmem:[%s20774_s3 + $0x20] sm:$0xff]  ;;  %v21534_v46 = vld [vmem:[#allocation76_spill] sm:$0xff] }
 0x936   : > { %12847 = vmatmul.mubr.msk.f32.gmra.mrb[174].mxu1 %vm504_vm0, %v18374_v26  ;;  %12898 = vmatprep.mubr.msk.f32.mxu0 %vm504_vm0, %v3949_v30  ;;  %v3950_v34 = vmul.f32 %v21532_v63, %v18460_v47  ;;  %v5139_v26 = vld [vmem:[%s20774_s3 + $0x28] sm:$0xff]  ;;  %v4179_v59 = vmul.f32 %v21533_v10, %v18313_v27  ;;  %v3951_v18 = vmul.f32 %v21534_v46, %v18468_v22  ;;  %v3133_v21 = vadd.f32 1e-05, %v3101_v41  ;;  %v14169_v41 = vpop.eup %14168  ;;  %v21538_v63 = vld [vmem:[#allocation101_spill] sm:$0xff] }
 0x937   : > { %12849 = vmatprep.mubr.msk.f32.mxu1 %vm504_vm0, %v4178_v60  ;;  %v18498_v11 = vsel %vm3720_vm1, %v3690_v37, %v3691_v35  ;;  %v3693_v60 = vrot.slane %v18319_v14, 7  ;;  %v4180_v52 = vmul.f32 %v21536_v45, %v18337_v3  ;;  %v18506_v36 = vsel %vm3720_vm1, %v3691_v35, %v3692_v32  ;;  %v21539_v35 = vld [vmem:[#allocation78_spill] sm:$0xff] }
 0x938   : > { %21535 = vst [vmem:[#allocation38_spill] sm:$0xff] %v18498_v11  ;;  %21537 = vst [vmem:[#allocation39_spill] sm:$0xff] %v18506_v36  ;;  %v3694_v30 = vrot.slane %v18359_v53, 7  ;;  %14176 = vrsqrt.f32 %v3132_v16  ;;  %v3103_v39 = vmul.f32 0.0625, %v18247_v9  ;;  %v3134_v61 = vadd.f32 1e-05, %v3102_v54 }
 0x939   : > { %12899 = vmatmul.mubr.msk.f32.gmra.mrb[42].mxu0 %vm504_vm0, %v3950_v34  ;;  %v13620_v37 = vpack.c.bf16 %v5139_v26, %v5138_v13  ;;  %v3639_v34 = vadd.f32 %v21538_v63, %v3414_v4  ;;  %v3190_v10 = vmul.f32 %v14167_v12, %v18048_v55  ;;  %v3104_v46 = vmul.f32 0.0625, %v18256_v28  ;;  %v21540_v9 = vld [vmem:[#allocation363_spill] sm:$0xff]  ;;  %v14171_v55 = vpop.eup %14170  ;;  %v18527_v28 = vpop.permute.xlu0 %4134  ;;  %v21543_v12 = vld [vmem:[#allocation365_spill] sm:$0xff] }
 0x93a   : > { %12850 = vmatmul.mubr.msk.f32.gmra.mrb[176].mxu1 %vm504_vm0, %v4179_v59  ;;  %12901 = vmatprep.mubr.msk.f32.mxu0 %vm504_vm0, %v3951_v18  ;;  %v3952_v16 = vmul.f32 %v21539_v35, %v18498_v11  ;;  %v4181_v54 = vmul.f32 %v21540_v9, %v18319_v14  ;;  %v21541_v59 = vld [vmem:[#allocation82_spill] sm:$0xff]  ;;  %v18524_v13 = vsel %vm3720_vm1, %v3692_v32, %v3693_v60  ;;  %v3695_v4 = vrot.slane %v18355_v44, 7  ;;  %v21545_v32 = vld [vmem:[#allocation99_spill] sm:$0xff] }
 0x93b   : > { %12852 = vmatprep.mubr.msk.f32.mxu1 %vm504_vm0, %v4180_v52  ;;  %v3953_v45 = vmul.f32 %v21541_v59, %v18506_v36  ;;  %21542 = vst [vmem:[#allocation40_spill] sm:$0xff] %v18524_v13  ;;  %13621 = vmatprep.subr.bf16.mxu0 %v13620_v37  ;;  %14178 = vrsqrt.f32 %v3133_v21  ;;  %v4182_v26 = vmul.f32 %v21543_v12, %v18359_v53  ;;  %v3696_v52 = vrot.slane %v18418_v40, 7  ;;  %v21547_v36 = vld [vmem:[#allocation84_spill] sm:$0xff] }
 0x93c   : > { %v18534_v18 = vsel %vm3720_vm1, %v3693_v60, %v3694_v30  ;;  %v3638_v63 = vadd.f32 %v21545_v32, %v3413_v6  ;;  %v3191_v35 = vmul.f32 %v18440_v20, %v18041_v31  ;;  %v3135_v9 = vadd.f32 1e-05, %v3103_v39  ;;  %13623 = vmatpush3.bf16.msra.mxu0 %v13620_v37  ;;  %v21548_v31 = vld [vmem:[#allocation367_spill] sm:$0xff]  ;;  %v21549_v39 = vld [vmem:[#allocation88_spill] sm:$0xff] }
 0x93d   : > { %12902 = vmatmul.mubr.msk.f32.gmra.mrb[44].mxu0 %vm504_vm0, %v3952_v16  ;;  %21544 = vst [vmem:[#allocation199_spill] sm:$0xff] %v18534_v18  ;;  %14180 = vrsqrt.f32 %v3134_v61  ;;  %v14173_v21 = vpop.eup %14172  ;;  %v21546_v16 = vld [vmem:[#allocation104_spill] sm:$0xff]  ;;  %v3193_v12 = vmul.f32 %v14169_v41, %v18055_v23  ;;  %v3136_v60 = vadd.f32 1e-05, %v3104_v46  ;;  %v3954_v6 = vmul.f32 %v21547_v36, %v18524_v13  ;;  %v21551_v36 = vld [vmem:[#allocation370_spill] sm:$0xff] }
 0x93e   : > { %12853 = vmatmul.mubr.msk.f32.gmra.mrb[178].mxu1 %vm504_vm0, %v4181_v54  ;;  %12904 = vmatprep.mubr.msk.f32.mxu0 %vm504_vm0, %v3953_v45  ;;  %v3415_v59 = vmul.f32 %v21546_v16, %v3190_v10  ;;  %v14175_v32 = vpop.eup %14174  ;;  %v4183_v20 = vmul.f32 %v21548_v31, %v18355_v44  ;;  %v3955_v61 = vmul.f32 %v21549_v39, %v18534_v18  ;;  %v3697_v23 = vrot.slane %v18416_v0, 7  ;;  %v21555_v31 = vld [vmem:[#allocation109_spill] sm:$0xff] }
 0x93f   : > { %12855 = vmatprep.mubr.msk.f32.mxu1 %vm504_vm0, %v4182_v26  ;;  %v18553_v54 = vsel %vm3720_vm1, %v3694_v30, %v3695_v4  ;;  %v3192_v41 = vmul.f32 %v14171_v55, %v18058_v2  ;;  %v4184_v37 = vmul.f32 %v21551_v36, %v18418_v40  ;;  %v18562_v10 = vsel %vm3720_vm1, %v3695_v4, %v3696_v52  ;;  %v21553_v26 = vld [vmem:[#allocation103_spill] sm:$0xff]  ;;  %v18571_v2 = vpop.permute.xlu0 %4139  ;;  %v21554_v55 = vld [vmem:[#allocation105_spill] sm:$0xff]  ;;  %v21561_v36 = vld [vmem:[#allocation374_spill] sm:$0xff] }
 0x940   : > { %21550 = vst [vmem:[#allocation41_spill] sm:$0xff] %v18553_v54  ;;  %21552 = vst [vmem:[#allocation42_spill] sm:$0xff] %v18562_v10  ;;  %v3698_v46 = vrot.slane %v18454_v5, 7  ;;  %v18565_v45 = vmax.f32 %v3638_v63, 0.0  ;;  %v3416_v30 = vmul.f32 %v21553_v26, %v3191_v35  ;;  %v3194_v16 = vmul.f32 %v14173_v21, %v18076_v42  ;;  %v21556_v63 = vld [vmem:[#allocation90_spill] sm:$0xff]  ;;  %v21557_v42 = vld [vmem:[#allocation372_spill] sm:$0xff] }
 0x941   : > { %12905 = vmatmul.mubr.msk.f32.gmra.mrb[46].mxu0 %vm504_vm0, %v3954_v6  ;;  %14182 = vrsqrt.f32 %v3135_v9  ;;  %v3640_v6 = vadd.f32 %v21554_v55, %v3415_v59  ;;  %v3418_v4 = vmul.f32 %v21555_v31, %v3193_v12  ;;  %v3956_v39 = vmul.f32 %v21556_v63, %v18553_v54  ;;  %v21558_v21 = vld [vmem:[#allocation94_spill] sm:$0xff]  ;;  %v21563_v63 = vld [vmem:[#allocation107_spill] sm:$0xff] }
 0x942   : > { %12856 = vmatmul.mubr.msk.f32.gmra.mrb[180].mxu1 %vm504_vm0, %v4183_v20  ;;  %12907 = vmatprep.mubr.msk.f32.mxu0 %vm504_vm0, %v3955_v61  ;;  %14184 = vrsqrt.f32 %v3136_v60  ;;  %v14177_v35 = vpop.eup %14176  ;;  %v4185_v9 = vmul.f32 %v21557_v42, %v18416_v0  ;;  %v3957_v20 = vmul.f32 %v21558_v21, %v18562_v10  ;;  %v18584_v61 = vsel %vm3720_vm1, %v3696_v52, %v3697_v23  ;;  %v21560_v12 = vld [vmem:[#allocation110_spill] sm:$0xff]  ;;  %v21564_v42 = vld [vmem:[#allocation21_spill] sm:$0xff]  ;;  %v21565_v10 = vld [vmem:[#allocation116_spill] sm:$0xff] }
 0x943   : > { %12858 = vmatprep.mubr.msk.f32.mxu1 %vm504_vm0, %v4184_v37  ;;  %21559 = vst [vmem:[#allocation43_spill] sm:$0xff] %v18584_v61  ;;  %v3699_v59 = vrot.slane %v18442_v1, 7  ;;  %v3417_v60 = vmul.f32 %v21560_v12, %v3192_v41  ;;  %v4186_v37 = vmul.f32 %v21561_v36, %v18454_v5  ;;  %v18593_v26 = vsel %vm3720_vm1, %v3697_v23, %v3698_v46  ;;  %v21566_v12 = vld [vmem:[#allocation113_spill] sm:$0xff]  ;;  %v21567_v36 = vld [vmem:[#allocation23_spill] sm:$0xff] }
 0x944   : > { %21562 = vst [vmem:[#allocation44_spill] sm:$0xff] %v18593_v26  ;;  %v3700_v55 = vrot.slane %v18479_v25, 7  ;;  %v18596_v31 = vmax.f32 %v3639_v34, 0.0  ;;  %v3641_v52 = vadd.f32 %v21563_v63, %v3416_v30  ;;  %v3195_v21 = vmul.f32 %v14175_v32, %v21564_v42  ;;  %v21568_v34 = vld [vmem:[#allocation96_spill] sm:$0xff]  ;;  %v21569_v32 = vld [vmem:[#allocation25_spill] sm:$0xff]  ;;  %v21573_v42 = vld [vmem:[#allocation26_spill] sm:$0xff] }
 0x945   : > { %12908 = vmatmul.mubr.msk.f32.gmra.mrb[48].mxu0 %vm504_vm0, %v3956_v39  ;;  %v3419_v54 = vmul.f32 %v21565_v10, %v3194_v16  ;;  %v14179_v41 = vpop.eup %14178  ;;  %v18603_v39 = vmax.f32 %v3640_v6, 0.0  ;;  %v3643_v23 = vadd.f32 %v21566_v12, %v3418_v4  ;;  %v3196_v18 = vmul.f32 %v14177_v35, %v21567_v36  ;;  %v21570_v16 = vld [vmem:[#allocation100_spill] sm:$0xff]  ;;  %v21572_v35 = vld [vmem:[#allocation111_spill] sm:$0xff] }
 0x946   : > { %12859 = vmatmul.mubr.msk.f32.gmra.mrb[182].mxu1 %vm504_vm0, %v4185_v9  ;;  %12910 = vmatprep.mubr.msk.f32.mxu0 %vm504_vm0, %v3957_v20  ;;  %v3958_v30 = vmul.f32 %v21568_v34, %v18584_v61  ;;  %v4187_v10 = vmul.f32 %v21569_v32, %v18442_v1  ;;  %v3959_v9 = vmul.f32 %v21570_v16, %v18593_v26  ;;  %v3701_v4 = vrot.slane %v18471_v50, 7  ;;  %v18619_v20 = vpop.permute.xlu0 %4144  ;;  %v21575_v32 = vld [vmem:[#allocation115_spill] sm:$0xff]  ;;  %v21576_v16 = vld [vmem:[#allocation117_spill] sm:$0xff]  ;;  %v21577_v61 = vld [vmem:[#allocation22_spill] sm:$0xff] }
 0x947   : > { %12861 = vmatprep.mubr.msk.f32.mxu1 %vm504_vm0, %v4186_v37  ;;  %v14181_v63 = vpop.eup %14180  ;;  %v18616_v6 = vsel %vm3720_vm1, %v3698_v46, %v3699_v59  ;;  %v3642_v37 = vadd.f32 %v21572_v35, %v3417_v60  ;;  %v4188_v12 = vmul.f32 %v21573_v42, %v18479_v25  ;;  %v18627_v36 = vsel %vm3720_vm1, %v3699_v59, %v3700_v55  ;;  %v21579_v42 = vld [vmem:[#allocation24_spill] sm:$0xff]  ;;  %v21580_v59 = vld [vmem:[#allocation102_spill] sm:$0xff] }
 0x948   : > { %21571 = vst [vmem:[#allocation368_spill] sm:$0xff] %v18616_v6  ;;  %21574 = vst [vmem:[#allocation6_spill] sm:$0xff] %v18627_v36  ;;  %v3702_v34 = vrot.slane %v18565_v45, 7  ;;  %v3420_v46 = vmul.f32 %v21575_v32, %v3195_v21  ;;  %v3644_v26 = vadd.f32 %v21576_v16, %v3419_v54  ;;  %v3197_v13 = vmul.f32 %v14179_v41, %v21577_v61  ;;  %v21581_v61 = vld [vmem:[#allocation106_spill] sm:$0xff] }
 0x949   : > { %12911 = vmatmul.mubr.msk.f32.gmra.mrb[50].mxu0 %vm504_vm0, %v3958_v30  ;;  %v18635_v60 = vmax.f32 %v3641_v52, 0.0  ;;  %v21578_v30 = vld [vmem:[#allocation122_spill] sm:$0xff]  ;;  %v3198_v11 = vmul.f32 %v14181_v63, %v21579_v42  ;;  %v3960_v22 = vmul.f32 %v21580_v59, %v18616_v6  ;;  %v4189_v54 = vmul.f32 %v18265_v49, %v18471_v50  ;;  %v21584_v42 = vld [vmem:[#allocation121_spill] sm:$0xff] }
 0x94a   : > { %12862 = vmatmul.mubr.msk.f32.gmra.mrb[184].mxu1 %vm504_vm0, %v4187_v10  ;;  %12913 = vmatprep.mubr.msk.f32.mxu0 %vm504_vm0, %v3959_v9  ;;  %v3421_v35 = vmul.f32 %v21578_v30, %v3196_v18  ;;  %v3961_v41 = vmul.f32 %v21581_v61, %v18627_v36  ;;  %v18648_v52 = vsel %vm3720_vm1, %v3700_v55, %v3701_v4  ;;  %v3703_v18 = vrot.slane %v18596_v31, 7  ;;  %v21583_v55 = vld [vmem:[#allocation119_spill] sm:$0xff]  ;;  %v21587_v36 = vld [vmem:[#allocation128_spill] sm:$0xff] }
 0x94b   : > { %12864 = vmatprep.mubr.msk.f32.mxu1 %vm504_vm0, %v4188_v12  ;;  %v14183_v21 = vpop.eup %14182  ;;  %v18651_v63 = vmax.f32 %v3642_v37, 0.0  ;;  %v4190_v9 = vmul.f32 %v18283_v19, %v18565_v45  ;;  %v18658_v49 = vsel %vm3720_vm1, %v3701_v4, %v3702_v34  ;;  %v3704_v12 = vrot.slane %v18603_v39, 7  ;;  %v21585_v19 = vld [vmem:[#allocation123_spill] sm:$0xff] }
 0x94c   : > { %v14185_v10 = vpop.eup %14184  ;;  %21582 = vst [vmem:[#allocation7_spill] sm:$0xff] %v18658_v49  ;;  %v18661_v32 = vmax.f32 %v3643_v23, 0.0  ;;  %v3645_v16 = vadd.f32 %v21583_v55, %v3420_v46  ;;  %v18664_v30 = vmax.f32 %v3644_v26, 0.0  ;;  %v3422_v37 = vmul.f32 %v21584_v42, %v3197_v13  ;;  %v21586_v4 = vld [vmem:[#allocation187_spill] sm:$0xff]  ;;  %v21588_v23 = vld [vmem:[#allocation108_spill] sm:$0xff]  ;;  %v5719_v46 = vld [vmem:[%s20774_s3 + $0x38] sm:$0xff] }
 0x94d   : > { %12914 = vmatmul.mubr.msk.f32.gmra.mrb[52].mxu0 %vm504_vm0, %v3960_v22  ;;  %v18669_v22 = vpop.permute.xlu0 %4149  ;;  %v3646_v59 = vadd.f32 %v21585_v19, %v3421_v35  ;;  %v3199_v61 = vmul.f32 %v14183_v21, %v21586_v4  ;;  %v3423_v6 = vmul.f32 %v21587_v36, %v3198_v11  ;;  %v3962_v26 = vmul.f32 %v21588_v23, %v18648_v52  ;;  %v5718_v13 = vld [vmem:[%s20774_s3 + $0x30] sm:$0xff] }
 0x94e   : > { %12865 = vmatmul.mubr.msk.f32.gmra.mrb[186].mxu1 %vm504_vm0, %v4189_v54  ;;  %12916 = vmatprep.mubr.msk.f32.mxu0 %vm504_vm0, %v3961_v41  ;;  %v21589_v54 = vld [vmem:[#allocation31_spill] sm:$0xff]  ;;  %v21590_v21 = vld [vmem:[#allocation112_spill] sm:$0xff]  ;;  %v18689_v11 = vsel %vm3720_vm1, %v3702_v34, %v3703_v18  ;;  %v3705_v36 = vrot.slane %v18635_v60, 7  ;;  %v4192_v42 = vmul.f32 %v18351_v15, %v18603_v39  ;;  %v18698_v19 = vsel %vm3720_vm1, %v3703_v18, %v3704_v12  ;;  %v21595_v18 = vld [vmem:[#allocation114_spill] sm:$0xff] }
 0x94f   : > { %12867 = vmatprep.mubr.msk.f32.mxu1 %vm504_vm0, %v4190_v9  ;;  %v4191_v35 = vmul.f32 %v21589_v54, %v18596_v31  ;;  %v3963_v41 = vmul.f32 %v21590_v21, %v18658_v49  ;;  %v21591_v9 = vld [vmem:[#allocation188_spill] sm:$0xff]  ;;  %v3706_v4 = vrot.slane %v18651_v63, 7  ;;  %v18701_v23 = vmax.f32 %v3645_v16, 0.0  ;;  %v21592_v54 = vld [vmem:[#allocation125_spill] sm:$0xff]  ;;  %v21593_v21 = vld [vmem:[#allocation127_spill] sm:$0xff] }
 0x950   : > { %v3200_v55 = vmul.f32 %v14185_v10, %v21591_v9  ;;  %v3647_v34 = vadd.f32 %v21592_v54, %v3422_v37  ;;  %v18706_v10 = vpack.c.bf16 %v5719_v46, %v5718_v13  ;;  %v3424_v15 = vmul.f32 %v21593_v21, %v3199_v61  ;;  %v21594_v9 = vld [vmem:[#allocation129_spill] sm:$0xff]  ;;  %v21597_v61 = vld [vmem:[#allocation134_spill] sm:$0xff]  ;;  %v21598_v21 = vld [vmem:[#allocation131_spill] sm:$0xff] }
 0x951   : > { %12917 = vmatmul.mubr.msk.f32.gmra.mrb[54].mxu0 %vm504_vm0, %v3962_v26  ;;  %v18708_v26 = vmax.f32 %v3646_v59, 0.0  ;;  %v3648_v49 = vadd.f32 %v21594_v9, %v3423_v6  ;;  %v3964_v16 = vmul.f32 %v21595_v18, %v18689_v11  ;;  %v4193_v37 = vmul.f32 %v18380_v17, %v18635_v60  ;;  %v4155_v6 = vpop.permute.xlu0 %4154 }
 0x952   : > { %12868 = vmatmul.mubr.msk.f32.gmra.mrb[188].mxu1 %vm504_vm0, %v4191_v35  ;;  %12919 = vmatprep.mubr.msk.f32.mxu0 %vm504_vm0, %v3963_v41  ;;  %v21596_v35 = vld [vmem:[#allocation118_spill] sm:$0xff]  ;;  %v18721_v13 = vsel %vm3720_vm1, %v3704_v12, %v3705_v36  ;;  %v3707_v59 = vrot.slane %v18661_v32, 7  ;;  %v3425_v46 = vmul.f32 %v21597_v61, %v3200_v55  ;;  %v4194_v41 = vmul.f32 %v18430_v24, %v18651_v63  ;;  %v21599_v24 = vld [vmem:[#allocation120_spill] sm:$0xff] }
 0x953   : > { %12870 = vmatprep.mubr.msk.f32.mxu1 %vm504_vm0, %v4192_v42  ;;  %v3965_v54 = vmul.f32 %v21596_v35, %v18698_v19  ;;  %13625 = vmatprep.subr.bf16.mxu0 %v18706_v10  ;;  %v18731_v17 = vsel %vm3720_vm1, %v3705_v36, %v3706_v4  ;;  %v3708_v42 = vrot.slane %v18664_v30, 7  ;;  %v18736_v12 = vmax.f32 %v3647_v34, 0.0 }
 0x954   : > { %v3649_v9 = vadd.f32 %v21598_v21, %v3424_v15  ;;  %v18739_v55 = vmax.f32 %v3648_v49, 0.0  ;;  %v3966_v18 = vmul.f32 %v21599_v24, %v18721_v13  ;;  %v4195_v36 = vmul.f32 %v18477_v33, %v18661_v32  ;;  %v21601_v15 = vld [vmem:[#allocation136_spill] sm:$0xff] }
 0x955   : > { %12920 = vmatmul.mubr.msk.f32.gmra.mrb[56].mxu0 %vm504_vm0, %v3964_v16  ;;  %v21600_v16 = vld [vmem:[#allocation124_spill] sm:$0xff]  ;;  %v3709_v34 = vrot.slane %v18701_v23, 7  ;;  %v3650_v49 = vadd.f32 %v21601_v15, %v3425_v46  ;;  %v18759_v61 = vsel %vm3720_vm1, %v3707_v59, %v3708_v42  ;;  %v3710_v33 = vrot.slane %v18708_v26, 7  ;;  %v21602_v46 = vld [vmem:[#allocation126_spill] sm:$0xff] }
 0x956   : > { %12871 = vmatmul.mubr.msk.f32.gmra.mrb[190].mxu1 %vm504_vm0, %v4193_v37  ;;  %12922 = vmatprep.mubr.msk.f32.mxu0 %vm504_vm0, %v3965_v54  ;;  %v3967_v35 = vmul.f32 %v21600_v16, %v18731_v17  ;;  %v18750_v37 = vsel %vm3720_vm1, %v3706_v4, %v3707_v59  ;;  %v4196_v54 = vmul.f32 %v18527_v28, %v18664_v30  ;;  %v4160_v4 = vpop.permute.xlu0 %4159  ;;  %v21603_v59 = vld [vmem:[#allocation130_spill] sm:$0xff] }
 0x957   : > { %12873 = vmatprep.mubr.msk.f32.mxu1 %vm504_vm0, %v4194_v41  ;;  %v18764_v41 = vmax.f32 %v3649_v9, 0.0  ;;  %v3968_v21 = vmul.f32 %v21602_v46, %v18750_v37  ;;  %v4197_v28 = vmul.f32 %v18571_v2, %v18701_v23  ;;  %v3969_v24 = vmul.f32 %v21603_v59, %v18759_v61 }
 0x958   : > { %v18778_v16 = vmax.f32 %v3650_v49, 0.0  ;;  %v4198_v9 = vmul.f32 %v18619_v20, %v18708_v26  ;;  %v3712_v2 = vrot.slane %v18739_v55, 7  ;;  %v4199_v49 = vmul.f32 %v18669_v22, %v18736_v12  ;;  %v21605_v20 = vld [vmem:[#allocation133_spill] sm:$0xff] }
 0x959   : > { %12923 = vmatmul.mubr.msk.f32.gmra.mrb[58].mxu0 %vm504_vm0, %v3966_v18  ;;  %v18775_v18 = vsel %vm3720_vm1, %v3708_v42, %v3709_v34  ;;  %v21604_v42 = vld [vmem:[#allocation132_spill] sm:$0xff]  ;;  %v3713_v46 = vrot.slane %v18764_v41, 7 }
 0x95a   : > { %12874 = vmatmul.mubr.msk.f32.gmra.mrb[192].mxu1 %vm504_vm0, %v4195_v36  ;;  %12925 = vmatprep.mubr.msk.f32.mxu0 %vm504_vm0, %v3967_v35  ;;  %v3711_v36 = vrot.slane %v18736_v12, 7  ;;  %v18785_v35 = vsel %vm3720_vm1, %v3709_v34, %v3710_v33  ;;  %v3970_v15 = vmul.f32 %v21604_v42, %v18775_v18  ;;  %v3714_v22 = vrot.slane %v18778_v16, 7  ;;  %v21608_v42 = vld [vmem:[#allocation138_spill] sm:$0xff] }
 0x95b   : > { %12876 = vmatprep.mubr.msk.f32.mxu1 %vm504_vm0, %v4196_v54  ;;  %v3971_v54 = vmul.f32 %v21605_v20, %v18785_v35  ;;  %v20863_v20 = vrot.slane %v18370_v57, 1 }
 0x95c   : > { %v18799_v34 = vsel %vm3720_vm1, %v3710_v33, %v3711_v36  ;;  %v18806_v59 = vsel %vm3720_vm1, %v3711_v36, %v3712_v2  ;;  %v21607_v33 = vld [vmem:[#allocation135_spill] sm:$0xff]  ;;  %v18819_v36 = vsel %vm3720_vm1, %v3712_v2, %v3713_v46  ;;  %v21610_v2 = vld [vmem:[#allocation137_spill] sm:$0xff] }
 0x95d   : > { %12926 = vmatmul.mubr.msk.f32.gmra.mrb[60].mxu0 %vm504_vm0, %v3968_v21  ;;  %21606 = vst [vmem:[#allocation8_spill] sm:$0xff] %v18799_v34  ;;  %v4165_v21 = vpop.permute.xlu0 %4164  ;;  %21609 = vst [vmem:[#allocation9_spill] sm:$0xff] %v18819_v36 }
 0x95e   : > { %12877 = vmatmul.mubr.msk.f32.gmra.mrb[194].mxu1 %vm504_vm0, %v4197_v28  ;;  %12928 = vmatprep.mubr.msk.f32.mxu0 %vm504_vm0, %v3969_v24  ;;  %v4200_v28 = vmul.f32 %v4155_v6, %v18739_v55  ;;  %v3972_v24 = vmul.f32 %v21607_v33, %v18799_v34  ;;  %v3973_v6 = vmul.f32 %v21608_v42, %v18806_v59  ;;  %v21611_v33 = vld [vmem:[#allocation140_spill] sm:$0xff] }
 0x95f   : > { %12879 = vmatprep.mubr.msk.f32.mxu1 %vm504_vm0, %v4198_v9  ;;  %v4201_v9 = vmul.f32 %v4160_v4, %v18764_v41 }
 0x961   : > { %12929 = vmatmul.mubr.msk.f32.gmra.mrb[62].mxu0 %vm504_vm0, %v3970_v15  ;;  %v4202_v15 = vmul.f32 %v4165_v21, %v18778_v16  ;;  %v4170_v4 = vpop.permute.xlu0 %4169 }
 0x962   : > { %12880 = vmatmul.mubr.msk.f32.gmra.mrb[196].mxu1 %vm504_vm0, %v4199_v49  ;;  %12931 = vmatprep.mubr.msk.f32.mxu0 %vm504_vm0, %v3971_v54  ;;  %v18825_v49 = vsel %vm3720_vm1, %v3713_v46, %v3714_v22  ;;  %v4879_v54 = vrot.slane %v18367_v62, 1  ;;  %v4203_v21 = vmul.f32 %v4170_v4, %v18362_v29 }
 0x963   : > { %12882 = vmatprep.mubr.msk.f32.mxu1 %vm504_vm0, %v4200_v28  ;;  %v3974_v28 = vmul.f32 %v21610_v2, %v18819_v36  ;;  %v3975_v46 = vmul.f32 %v21611_v33, %v18825_v49  ;;  %v14354_v2 = vld [vmem:[%s20777_s6 + $0x8] sm:$0xff]  ;;  %v21616_v33 = vld [vmem:[#allocation142_spill] sm:$0xff] }
 0x965   : > { %12932 = vmatmul.mubr.msk.f32.gmra.mrb[64].mxu0 %vm504_vm0, %v3972_v24  ;;  %v21612_v24 = vrot.slane %v18362_v29, 7 }
 0x966   : > { %12883 = vmatmul.mubr.msk.f32.gmra.mrb[198].mxu1 %vm504_vm0, %v4201_v9  ;;  %12934 = vmatprep.mubr.msk.f32.mxu0 %vm504_vm0, %v3973_v6  ;;  %v4848_v9 = vrot.slane %v18279_v48, 1  ;;  %v18850_v6 = vsel %vm4880_vm2, %v20863_v20, %v4879_v54  ;;  %v4850_v20 = vrot.slane %v18297_v7, 1 }
 0x967   : > { %12885 = vmatprep.mubr.msk.f32.mxu1 %vm504_vm0, %v4202_v15  ;;  %v18841_v42 = vsel %vm3720_vm1, %v3714_v22, %v21612_v24  ;;  %21613 = vst [vmem:[#allocation10_spill] sm:$0xff] %v18850_v6  ;;  %v4849_v15 = vrot.slane %v18273_v43, 1  ;;  %v21614_v22 = vld [vmem:[#allocation139_spill] sm:$0xff]  ;;  %v5106_v24 = vmul.f32 %v21616_v33, %v18850_v6 }
 0x968   : > { %v3976_v4 = vmul.f32 %v21614_v22, %v18841_v42  ;;  %v6298_v22 = vld [vmem:[%s20774_s3 + $0x40] sm:$0xff] }
 0x969   : > { %12935 = vmatmul.mubr.msk.f32.gmra.mrb[66].mxu0 %vm504_vm0, %v3974_v28  ;;  %v18862_v28 = vsel %vm4880_vm2, %v4879_v54, %v4848_v9  ;;  %v6299_v54 = vld [vmem:[%s20774_s3 + $0x48] sm:$0xff]  ;;  %v18888_v62 = vsel %vm4880_vm2, %v4849_v15, %v4850_v20 }
 0x96a   : > { %12886 = vmatmul.mubr.msk.f32.gmra.mrb[200].mxu1 %vm504_vm0, %v4203_v21  ;;  %12937 = vmatprep.mubr.msk.f32.mxu0 %vm504_vm0, %v3975_v46  ;;  %21615 = vst [vmem:[#allocation11_spill] sm:$0xff] %v18862_v28  ;;  %v18870_v21 = vsel %vm4880_vm2, %v4848_v9, %v4849_v15  ;;  %v4851_v46 = vrot.slane %v18292_v8, 1  ;;  %v21619_v9 = vld [vmem:[#allocation144_spill] sm:$0xff]  ;;  %21620 = vst [vmem:[#allocation12_spill] sm:$0xff] %v18888_v62  ;;  %v4852_v8 = vrot.slane %v18315_v58, 1  ;;  %v21623_v15 = vld [vmem:[#allocation146_spill] sm:$0xff] }
 0x96b   : > { %9037 = vmatprep.mubr.f32.mxu1 %v14354_v2  ;;  %21617 = vst [vmem:[#allocation175_spill] sm:$0xff] %v18870_v21  ;;  %v21618_v2 = vld [vmem:[#allocation141_spill] sm:$0xff]  ;;  %v5108_v6 = vmul.f32 %v21619_v9, %v18870_v21 }
 0x96c   : > { %v5107_v33 = vmul.f32 %v21618_v2, %v18862_v28  ;;  %v18894_v7 = vsel %vm4880_vm2, %v4850_v20, %v4851_v46  ;;  %v4854_v20 = vrot.slane %v18337_v3, 1  ;;  %v21626_v9 = vld [vmem:[#allocation145_spill] sm:$0xff] }
 0x96d   : > { %12938 = vmatmul.mubr.msk.f32.gmra.mrb[68].mxu0 %vm504_vm0, %v3976_v4  ;;  %v18882_v4 = vpack.c.bf16 %v6299_v54, %v6298_v22  ;;  %21621 = vst [vmem:[#allocation176_spill] sm:$0xff] %v18894_v7  ;;  %v21622_v22 = vld [vmem:[#allocation143_spill] sm:$0xff]  ;;  %v5110_v2 = vmul.f32 %v21623_v15, %v18894_v7  ;;  %v21627_v15 = vld [vmem:[#allocation148_spill] sm:$0xff] }
 0x96e   : > { %12944 = vmatprep.mubr.msk.f32.mxu0 %vm504_vm0, %v5106_v24  ;;  %v4853_v24 = vrot.slane %v18313_v27, 1  ;;  %v5109_v54 = vmul.f32 %v21622_v22, %v18888_v62 }
 0x971   : > { %12945 = vmatmul.mubr.msk.f32.vlgmr.msra.gmra.mrb[38].mxu0 %vm504_vm0, %v5107_v33  ;;  %v18906_v33 = vsel %vm4880_vm2, %v4851_v46, %v4852_v8  ;;  %v18922_v46 = vsel %vm4880_vm2, %v4853_v24, %v4854_v20 }
 0x972   : > { %12947 = vmatprep.mubr.msk.f32.mxu0 %vm504_vm0, %v5108_v6  ;;  %13627 = vmatpush3.bf16.msra.mxu0 %v18706_v10  ;;  %21624 = vst [vmem:[#allocation13_spill] sm:$0xff] %v18906_v33  ;;  %v18912_v6 = vsel %vm4880_vm2, %v4852_v8, %v4853_v24  ;;  %v4855_v10 = vrot.slane %v18319_v14, 1  ;;  %v5111_v22 = vmul.f32 %v21626_v9, %v18906_v33  ;;  %21628 = vst [vmem:[#allocation15_spill] sm:$0xff] %v18922_v46  ;;  %v21630_v9 = vld [vmem:[#allocation147_spill] sm:$0xff] }
 0x973   : > { %13629 = vmatprep.subr.bf16.mxu0 %v18882_v4  ;;  %21625 = vst [vmem:[#allocation14_spill] sm:$0xff] %v18912_v6  ;;  %v5112_v28 = vmul.f32 %v21627_v15, %v18912_v6  ;;  %v5113_v33 = vmul.f32 %v21630_v9, %v18922_v46  ;;  %v21631_v15 = vld [vmem:[#allocation150_spill] sm:$0xff]  ;;  %v21634_v9 = vld [vmem:[#allocation149_spill] sm:$0xff] }
 0x974   : > { %v18928_v8 = vsel %vm4880_vm2, %v4854_v20, %v4855_v10 }
 0x975   : > { %12948 = vmatmul.mubr.msk.f32.gmra.mrb[40].mxu0 %vm504_vm0, %v5109_v54  ;;  %v4856_v54 = vrot.slane %v18359_v53, 1  ;;  %21629 = vst [vmem:[#allocation179_spill] sm:$0xff] %v18928_v8  ;;  %v5114_v6 = vmul.f32 %v21631_v15, %v18928_v8  ;;  %v21635_v15 = vld [vmem:[#allocation152_spill] sm:$0xff] }
 0x976   : > { %12950 = vmatprep.mubr.msk.f32.mxu0 %vm504_vm0, %v5110_v2  ;;  %v4857_v2 = vrot.slane %v18355_v44, 1 }
 0x977   : > { %v18938_v24 = vsel %vm4880_vm2, %v4855_v10, %v4856_v54 }
 0x978   : > { %21632 = vst [vmem:[#allocation16_spill] sm:$0xff] %v18938_v24  ;;  %v18944_v20 = vsel %vm4880_vm2, %v4856_v54, %v4857_v2  ;;  %v5115_v46 = vmul.f32 %v21634_v9, %v18938_v24  ;;  %v21638_v9 = vld [vmem:[#allocation151_spill] sm:$0xff] }
 0x979   : > { %12951 = vmatmul.mubr.msk.f32.gmra.mrb[42].mxu0 %vm504_vm0, %v5111_v22  ;;  %v4858_v22 = vrot.slane %v18418_v40, 1  ;;  %21633 = vst [vmem:[#allocation180_spill] sm:$0xff] %v18944_v20  ;;  %v5116_v8 = vmul.f32 %v21635_v15, %v18944_v20  ;;  %v21639_v15 = vld [vmem:[#allocation154_spill] sm:$0xff] }
 0x97a   : > { %12953 = vmatprep.mubr.msk.f32.mxu0 %vm504_vm0, %v5112_v28  ;;  %v4859_v28 = vrot.slane %v18416_v0, 1 }
 0x97b   : > { %v18954_v10 = vsel %vm4880_vm2, %v4857_v2, %v4858_v22 }
 0x97c   : > { %21636 = vst [vmem:[#allocation17_spill] sm:$0xff] %v18954_v10  ;;  %v18960_v54 = vsel %vm4880_vm2, %v4858_v22, %v4859_v28  ;;  %v5117_v24 = vmul.f32 %v21638_v9, %v18954_v10  ;;  %v21642_v9 = vld [vmem:[#allocation153_spill] sm:$0xff] }
 0x97d   : > { %12954 = vmatmul.mubr.msk.f32.gmra.mrb[44].mxu0 %vm504_vm0, %v5113_v33  ;;  %v4860_v33 = vrot.slane %v18454_v5, 1  ;;  %21637 = vst [vmem:[#allocation18_spill] sm:$0xff] %v18960_v54  ;;  %v5118_v20 = vmul.f32 %v21639_v15, %v18960_v54  ;;  %v21643_v15 = vld [vmem:[#allocation156_spill] sm:$0xff] }
 0x97e   : > { %12956 = vmatprep.mubr.msk.f32.mxu0 %vm504_vm0, %v5114_v6  ;;  %v4861_v6 = vrot.slane %v18442_v1, 1 }
 0x97f   : > { %v18970_v2 = vsel %vm4880_vm2, %v4859_v28, %v4860_v33 }
 0x980   : > { %21640 = vst [vmem:[#allocation51_spill] sm:$0xff] %v18970_v2  ;;  %v18976_v22 = vsel %vm4880_vm2, %v4860_v33, %v4861_v6  ;;  %v5119_v10 = vmul.f32 %v21642_v9, %v18970_v2  ;;  %v21646_v9 = vld [vmem:[#allocation155_spill] sm:$0xff] }
 0x981   : > { %12957 = vmatmul.mubr.msk.f32.gmra.mrb[46].mxu0 %vm504_vm0, %v5115_v46  ;;  %v4862_v46 = vrot.slane %v18479_v25, 1  ;;  %21641 = vst [vmem:[#allocation52_spill] sm:$0xff] %v18976_v22  ;;  %v5120_v54 = vmul.f32 %v21643_v15, %v18976_v22  ;;  %v21647_v15 = vld [vmem:[#allocation158_spill] sm:$0xff] }
 0x982   : > { %12959 = vmatprep.mubr.msk.f32.mxu0 %vm504_vm0, %v5116_v8  ;;  %v4863_v8 = vrot.slane %v18471_v50, 1 }
 0x983   : > { %v18986_v28 = vsel %vm4880_vm2, %v4861_v6, %v4862_v46 }
 0x984   : > { %21644 = vst [vmem:[#allocation19_spill] sm:$0xff] %v18986_v28  ;;  %v18992_v33 = vsel %vm4880_vm2, %v4862_v46, %v4863_v8  ;;  %v5121_v2 = vmul.f32 %v21646_v9, %v18986_v28  ;;  %v21650_v9 = vld [vmem:[#allocation157_spill] sm:$0xff] }
 0x985   : > { %12960 = vmatmul.mubr.msk.f32.gmra.mrb[48].mxu0 %vm504_vm0, %v5117_v24  ;;  %v4864_v24 = vrot.slane %v18565_v45, 1  ;;  %21645 = vst [vmem:[#allocation183_spill] sm:$0xff] %v18992_v33  ;;  %v5122_v22 = vmul.f32 %v21647_v15, %v18992_v33  ;;  %v21651_v15 = vld [vmem:[#allocation160_spill] sm:$0xff] }
 0x986   : > { %12962 = vmatprep.mubr.msk.f32.mxu0 %vm504_vm0, %v5118_v20  ;;  %v4865_v20 = vrot.slane %v18596_v31, 1 }
 0x987   : > { %v19002_v6 = vsel %vm4880_vm2, %v4863_v8, %v4864_v24 }
 0x988   : > { %21648 = vst [vmem:[#allocation53_spill] sm:$0xff] %v19002_v6  ;;  %v19008_v46 = vsel %vm4880_vm2, %v4864_v24, %v4865_v20  ;;  %v5123_v28 = vmul.f32 %v21650_v9, %v19002_v6  ;;  %v21654_v9 = vld [vmem:[#allocation159_spill] sm:$0xff] }
 0x989   : > { %12963 = vmatmul.mubr.msk.f32.gmra.mrb[50].mxu0 %vm504_vm0, %v5119_v10  ;;  %v4866_v10 = vrot.slane %v18603_v39, 1  ;;  %21649 = vst [vmem:[#allocation54_spill] sm:$0xff] %v19008_v46  ;;  %v5124_v33 = vmul.f32 %v21651_v15, %v19008_v46  ;;  %v21655_v15 = vld [vmem:[#allocation162_spill] sm:$0xff] }
 0x98a   : > { %12965 = vmatprep.mubr.msk.f32.mxu0 %vm504_vm0, %v5120_v54  ;;  %v4867_v54 = vrot.slane %v18635_v60, 1 }
 0x98b   : > { %v19018_v8 = vsel %vm4880_vm2, %v4865_v20, %v4866_v10 }
 0x98c   : > { %21652 = vst [vmem:[#allocation55_spill] sm:$0xff] %v19018_v8  ;;  %v19024_v24 = vsel %vm4880_vm2, %v4866_v10, %v4867_v54  ;;  %v5125_v6 = vmul.f32 %v21654_v9, %v19018_v8  ;;  %v21658_v9 = vld [vmem:[#allocation161_spill] sm:$0xff] }
 0x98d   : > { %12966 = vmatmul.mubr.msk.f32.gmra.mrb[52].mxu0 %vm504_vm0, %v5121_v2  ;;  %v4868_v2 = vrot.slane %v18651_v63, 1  ;;  %21653 = vst [vmem:[#allocation56_spill] sm:$0xff] %v19024_v24  ;;  %v5126_v46 = vmul.f32 %v21655_v15, %v19024_v24  ;;  %v21659_v15 = vld [vmem:[#allocation164_spill] sm:$0xff] }
 0x98e   : > { %12968 = vmatprep.mubr.msk.f32.mxu0 %vm504_vm0, %v5122_v22  ;;  %v4869_v22 = vrot.slane %v18661_v32, 1 }
 0x98f   : > { %v19034_v20 = vsel %vm4880_vm2, %v4867_v54, %v4868_v2 }
 0x990   : > { %21656 = vst [vmem:[#allocation59_spill] sm:$0xff] %v19034_v20  ;;  %v19040_v10 = vsel %vm4880_vm2, %v4868_v2, %v4869_v22  ;;  %v5127_v8 = vmul.f32 %v21658_v9, %v19034_v20  ;;  %v21662_v9 = vld [vmem:[#allocation163_spill] sm:$0xff] }
 0x991   : > { %12969 = vmatmul.mubr.msk.f32.gmra.mrb[54].mxu0 %vm504_vm0, %v5123_v28  ;;  %v4870_v28 = vrot.slane %v18664_v30, 1  ;;  %21657 = vst [vmem:[#allocation61_spill] sm:$0xff] %v19040_v10  ;;  %v5128_v24 = vmul.f32 %v21659_v15, %v19040_v10  ;;  %v21663_v15 = vld [vmem:[#allocation166_spill] sm:$0xff] }
 0x992   : > { %12971 = vmatprep.mubr.msk.f32.mxu0 %vm504_vm0, %v5124_v33  ;;  %v4871_v33 = vrot.slane %v18701_v23, 1 }
 0x993   : > { %v19050_v54 = vsel %vm4880_vm2, %v4869_v22, %v4870_v28 }
 0x994   : > { %21660 = vst [vmem:[#allocation62_spill] sm:$0xff] %v19050_v54  ;;  %v19056_v2 = vsel %vm4880_vm2, %v4870_v28, %v4871_v33  ;;  %v5129_v20 = vmul.f32 %v21662_v9, %v19050_v54  ;;  %v21666_v9 = vld [vmem:[#allocation165_spill] sm:$0xff] }
 0x995   : > { %12972 = vmatmul.mubr.msk.f32.gmra.mrb[56].mxu0 %vm504_vm0, %v5125_v6  ;;  %v4872_v6 = vrot.slane %v18708_v26, 1  ;;  %21661 = vst [vmem:[#allocation57_spill] sm:$0xff] %v19056_v2  ;;  %v5130_v10 = vmul.f32 %v21663_v15, %v19056_v2  ;;  %v21667_v15 = vld [vmem:[#allocation168_spill] sm:$0xff] }
 0x996   : > { %12974 = vmatprep.mubr.msk.f32.mxu0 %vm504_vm0, %v5126_v46  ;;  %v4873_v46 = vrot.slane %v18736_v12, 1 }
 0x997   : > { %v19066_v22 = vsel %vm4880_vm2, %v4871_v33, %v4872_v6 }
 0x998   : > { %21664 = vst [vmem:[#allocation67_spill] sm:$0xff] %v19066_v22  ;;  %v19072_v28 = vsel %vm4880_vm2, %v4872_v6, %v4873_v46  ;;  %v5131_v54 = vmul.f32 %v21666_v9, %v19066_v22  ;;  %v21670_v9 = vld [vmem:[#allocation167_spill] sm:$0xff] }
 0x999   : > { %12975 = vmatmul.mubr.msk.f32.gmra.mrb[58].mxu0 %vm504_vm0, %v5127_v8  ;;  %v4874_v8 = vrot.slane %v18739_v55, 1  ;;  %21665 = vst [vmem:[#allocation68_spill] sm:$0xff] %v19072_v28  ;;  %v5132_v2 = vmul.f32 %v21667_v15, %v19072_v28  ;;  %v21671_v15 = vld [vmem:[#allocation170_spill] sm:$0xff] }
 0x99a   : > { %12977 = vmatprep.mubr.msk.f32.mxu0 %vm504_vm0, %v5128_v24  ;;  %v4875_v24 = vrot.slane %v18764_v41, 1 }
 0x99b   : > { %v19082_v33 = vsel %vm4880_vm2, %v4873_v46, %v4874_v8 }
 0x99c   : > { %21668 = vst [vmem:[#allocation351_spill] sm:$0xff] %v19082_v33  ;;  %v19088_v6 = vsel %vm4880_vm2, %v4874_v8, %v4875_v24  ;;  %v5133_v22 = vmul.f32 %v21670_v9, %v19082_v33  ;;  %v21675_v9 = vld [vmem:[#allocation172_spill] sm:$0xff] }
 0x99d   : > { %12978 = vmatmul.mubr.msk.f32.gmra.mrb[60].mxu0 %vm504_vm0, %v5129_v20  ;;  %v4876_v20 = vrot.slane %v18778_v16, 1  ;;  %21669 = vst [vmem:[#allocation65_spill] sm:$0xff] %v19088_v6  ;;  %v5134_v28 = vmul.f32 %v21671_v15, %v19088_v6  ;;  %v21676_v15 = vrot.slane %v18370_v57, 1 }
 0x99e   : > { %12980 = vmatprep.mubr.msk.f32.mxu0 %vm504_vm0, %v5130_v10  ;;  %v4877_v10 = vrot.slane %v18362_v29, 1 }
 0x99f   : > { %v19098_v46 = vsel %vm4880_vm2, %v4875_v24, %v4876_v20 }
 0x9a0   : > { %21672 = vst [vmem:[#allocation63_spill] sm:$0xff] %v19098_v46  ;;  %v19114_v24 = vsel %vm4880_vm2, %v4877_v10, %v21676_v15  ;;  %v21682_v15 = vld [vmem:[#allocation178_spill] sm:$0xff] }
 0x9a1   : > { %12981 = vmatmul.mubr.msk.f32.gmra.mrb[62].mxu0 %vm504_vm0, %v5131_v54  ;;  %v19103_v54 = vsel %vm4880_vm2, %v4876_v20, %v4877_v10  ;;  %21677 = vst [vmem:[#allocation349_spill] sm:$0xff] %v19114_v24  ;;  %v21680_v10 = vld [vmem:[#allocation32_spill] sm:$0xff] }
 0x9a2   : > { %12983 = vmatprep.mubr.msk.f32.mxu0 %vm504_vm0, %v5132_v2  ;;  %21673 = vst [vmem:[#allocation71_spill] sm:$0xff] %v19103_v54  ;;  %v21674_v2 = vld [vmem:[#allocation169_spill] sm:$0xff]  ;;  %v5136_v33 = vmul.f32 %v21675_v9, %v19103_v54 }
 0x9a3   : > { %v5135_v8 = vmul.f32 %v21674_v2, %v19098_v46  ;;  %v6878_v2 = vld [vmem:[%s20774_s3 + $0x50] sm:$0xff] }
 0x9a4   : > { %v19132_v9 = vpack.c.bf16 %v6879_v38, %v6878_v2  ;;  %v21686_v2 = vld [vmem:[#allocation38_spill] sm:$0xff]  ;;  %v21687_v38 = vld [vmem:[#allocation181_spill] sm:$0xff] }
 0x9a5   : > { %12984 = vmatmul.mubr.msk.f32.gmra.mrb[64].mxu0 %vm504_vm0, %v5133_v22  ;;  %v21678_v22 = vld [vmem:[#allocation171_spill] sm:$0xff] }
 0x9a6   : > { %12986 = vmatprep.mubr.msk.f32.mxu0 %vm504_vm0, %v5134_v28  ;;  %v5137_v20 = vmul.f32 %v21678_v22, %v19114_v24  ;;  %v21679_v28 = vld [vmem:[#allocation174_spill] sm:$0xff]  ;;  %v5688_v22 = vmul.f32 %v21682_v15, %v18437_v51 }
 0x9a7   : > { %v5686_v6 = vmul.f32 %v21679_v28, %v18407_v56  ;;  %v21685_v56 = vld [vmem:[#allocation182_spill] sm:$0xff] }
 0x9a8   : > { %v21689_v15 = vld [vmem:[#allocation186_spill] sm:$0xff] }
 0x9a9   : > { %12987 = vmatmul.mubr.msk.f32.gmra.mrb[66].mxu0 %vm504_vm0, %v5135_v8  ;;  %v21693_v51 = vld [vmem:[#allocation190_spill] sm:$0xff] }
 0x9aa   : > { %12989 = vmatprep.mubr.msk.f32.mxu0 %vm504_vm0, %v5136_v33  ;;  %v21681_v33 = vld [vmem:[#allocation173_spill] sm:$0xff] }
 0x9ab   : > { %v5687_v8 = vmul.f32 %v21681_v33, %v21680_v10  ;;  %v5691_v33 = vmul.f32 %v21687_v38, %v21686_v2  ;;  %v21696_v2 = vld [vmem:[#allocation42_spill] sm:$0xff] }
 0x9ad   : > { %12990 = vmatmul.mubr.msk.f32.gmra.mrb[68].mxu0 %vm504_vm0, %v5137_v20  ;;  %v21683_v20 = vld [vmem:[#allocation177_spill] sm:$0xff] }
 0x9ae   : > { %12996 = vmatprep.mubr.msk.f32.mxu0 %vm504_vm0, %v5686_v6  ;;  %v5689_v28 = vmul.f32 %v21683_v20, %v18460_v47  ;;  %v21684_v6 = vld [vmem:[#allocation37_spill] sm:$0xff]  ;;  %v21692_v47 = vld [vmem:[#allocation199_spill] sm:$0xff] }
 0x9af   : > { %v5690_v24 = vmul.f32 %v21685_v56, %v21684_v6  ;;  %v21691_v20 = vld [vmem:[#allocation185_spill] sm:$0xff]  ;;  %v5694_v56 = vmul.f32 %v21693_v51, %v21692_v47  ;;  %v21697_v6 = vld [vmem:[#allocation192_spill] sm:$0xff]  ;;  %v21705_v47 = vld [vmem:[#allocation198_spill] sm:$0xff] }
 0x9b1   : > { %12997 = vmatmul.mubr.msk.f32.vlgmr.msra.gmra.mrb[38].mxu0 %vm504_vm0, %v5687_v8  ;;  %v21688_v8 = vld [vmem:[#allocation39_spill] sm:$0xff] }
 0x9b2   : > { %12999 = vmatprep.mubr.msk.f32.mxu0 %vm504_vm0, %v5688_v22  ;;  %13631 = vmatpush3.bf16.msra.mxu0 %v18882_v4  ;;  %v5692_v22 = vmul.f32 %v21689_v15, %v21688_v8  ;;  %v21690_v4 = vld [vmem:[#allocation40_spill] sm:$0xff]  ;;  %v5696_v15 = vmul.f32 %v21697_v6, %v21696_v2  ;;  %v21701_v8 = vld [vmem:[#allocation194_spill] sm:$0xff] }
 0x9b3   : > { %13633 = vmatprep.subr.bf16.mxu0 %v19132_v9  ;;  %v5693_v10 = vmul.f32 %v21691_v20, %v21690_v4  ;;  %v21700_v4 = vld [vmem:[#allocation44_spill] sm:$0xff] }
 0x9b4   : > { %v5698_v51 = vmul.f32 %v21701_v8, %v21700_v4 }
 0x9b5   : > { %13000 = vmatmul.mubr.msk.f32.gmra.mrb[40].mxu0 %vm504_vm0, %v5689_v28  ;;  %v21695_v28 = vld [vmem:[#allocation189_spill] sm:$0xff] }
 0x9b6   : > { %13002 = vmatprep.mubr.msk.f32.mxu0 %vm504_vm0, %v5690_v24  ;;  %v21694_v24 = vld [vmem:[#allocation41_spill] sm:$0xff] }
 0x9b7   : > { %v5695_v38 = vmul.f32 %v21695_v28, %v21694_v24  ;;  %v21704_v24 = vld [vmem:[#allocation6_spill] sm:$0xff] }
 0x9b8   : > { %v5700_v6 = vmul.f32 %v21705_v47, %v21704_v24 }
 0x9b9   : > { %13003 = vmatmul.mubr.msk.f32.gmra.mrb[42].mxu0 %vm504_vm0, %v5691_v33  ;;  %v21698_v33 = vld [vmem:[#allocation43_spill] sm:$0xff] }
 0x9ba   : > { %13005 = vmatprep.mubr.msk.f32.mxu0 %vm504_vm0, %v5692_v22  ;;  %v21699_v22 = vld [vmem:[#allocation191_spill] sm:$0xff] }
 0x9bb   : > { %v5697_v20 = vmul.f32 %v21699_v22, %v21698_v33  ;;  %v21707_v22 = vld [vmem:[#allocation7_spill] sm:$0xff]  ;;  %v21708_v33 = vld [vmem:[#allocation201_spill] sm:$0xff] }
 0x9bc   : > { %v5702_v8 = vmul.f32 %v21708_v33, %v21707_v22 }
 0x9bd   : > { %13006 = vmatmul.mubr.msk.f32.gmra.mrb[44].mxu0 %vm504_vm0, %v5693_v10  ;;  %v21702_v10 = vld [vmem:[#allocation368_spill] sm:$0xff] }
 0x9be   : > { %13008 = vmatprep.mubr.msk.f32.mxu0 %vm504_vm0, %v5694_v56  ;;  %v21703_v56 = vld [vmem:[#allocation193_spill] sm:$0xff] }
 0x9bf   : > { %v5699_v28 = vmul.f32 %v21703_v56, %v21702_v10  ;;  %v21710_v56 = vld [vmem:[#allocation203_spill] sm:$0xff] }
 0x9c0   : > { %v5704_v47 = vmul.f32 %v21710_v56, %v18698_v19 }
 0x9c1   : > { %13009 = vmatmul.mubr.msk.f32.gmra.mrb[46].mxu0 %vm504_vm0, %v5695_v38  ;;  %v21706_v38 = vld [vmem:[#allocation197_spill] sm:$0xff] }
 0x9c2   : > { %13011 = vmatprep.mubr.msk.f32.mxu0 %vm504_vm0, %v5696_v15  ;;  %v5701_v15 = vmul.f32 %v21706_v38, %v18648_v52  ;;  %v21712_v38 = vld [vmem:[#allocation205_spill] sm:$0xff] }
 0x9c3   : > { %v5706_v33 = vmul.f32 %v21712_v38, %v18731_v17 }
 0x9c5   : > { %13012 = vmatmul.mubr.msk.f32.gmra.mrb[48].mxu0 %vm504_vm0, %v5697_v20  ;;  %v21709_v20 = vld [vmem:[#allocation200_spill] sm:$0xff] }
 0x9c6   : > { %13014 = vmatprep.mubr.msk.f32.mxu0 %vm504_vm0, %v5698_v51  ;;  %v5703_v51 = vmul.f32 %v21709_v20, %v18689_v11  ;;  %v21714_v20 = vld [vmem:[#allocation207_spill] sm:$0xff] }
 0x9c7   : > { %v5708_v56 = vmul.f32 %v21714_v20, %v18759_v61 }
 0x9c9   : > { %13015 = vmatmul.mubr.msk.f32.gmra.mrb[50].mxu0 %vm504_vm0, %v5699_v28  ;;  %v21711_v28 = vld [vmem:[#allocation202_spill] sm:$0xff] }
 0x9ca   : > { %13017 = vmatprep.mubr.msk.f32.mxu0 %vm504_vm0, %v5700_v6  ;;  %v5705_v6 = vmul.f32 %v21711_v28, %v18721_v13  ;;  %v21716_v28 = vld [vmem:[#allocation209_spill] sm:$0xff] }
 0x9cb   : > { %v5710_v38 = vmul.f32 %v21716_v28, %v18785_v35 }
 0x9cd   : > { %13018 = vmatmul.mubr.msk.f32.gmra.mrb[52].mxu0 %vm504_vm0, %v5701_v15  ;;  %v21713_v15 = vld [vmem:[#allocation204_spill] sm:$0xff] }
 0x9ce   : > { %13020 = vmatprep.mubr.msk.f32.mxu0 %vm504_vm0, %v5702_v8  ;;  %v5707_v8 = vmul.f32 %v21713_v15, %v18750_v37  ;;  %v21718_v15 = vld [vmem:[#allocation211_spill] sm:$0xff] }
 0x9cf   : > { %v5712_v20 = vmul.f32 %v21718_v15, %v18806_v59 }
 0x9d1   : > { %13021 = vmatmul.mubr.msk.f32.gmra.mrb[54].mxu0 %vm504_vm0, %v5703_v51  ;;  %v21715_v51 = vld [vmem:[#allocation206_spill] sm:$0xff] }
 0x9d2   : > { %13023 = vmatprep.mubr.msk.f32.mxu0 %vm504_vm0, %v5704_v47  ;;  %v5709_v47 = vmul.f32 %v21715_v51, %v18775_v18  ;;  %v21720_v51 = vld [vmem:[#allocation213_spill] sm:$0xff] }
 0x9d3   : > { %v5714_v28 = vmul.f32 %v21720_v51, %v18825_v49 }
 0x9d5   : > { %13024 = vmatmul.mubr.msk.f32.gmra.mrb[56].mxu0 %vm504_vm0, %v5705_v6  ;;  %v21717_v6 = vld [vmem:[#allocation208_spill] sm:$0xff] }
 0x9d6   : > { %13026 = vmatprep.mubr.msk.f32.mxu0 %vm504_vm0, %v5706_v33  ;;  %v5711_v33 = vmul.f32 %v21717_v6, %v18799_v34  ;;  %v21722_v6 = vld [vmem:[#allocation35_spill] sm:$0xff] }
 0x9d7   : > { %v21723_v34 = vld [vmem:[#allocation215_spill] sm:$0xff] }
 0x9d8   : > { %v5716_v15 = vmul.f32 %v21723_v34, %v21722_v6  ;;  %v7459_v34 = vld [vmem:[%s20774_s3 + $0x68] sm:$0xff] }
 0x9d9   : > { %13027 = vmatmul.mubr.msk.f32.gmra.mrb[58].mxu0 %vm504_vm0, %v5707_v8  ;;  %v21719_v8 = vld [vmem:[#allocation210_spill] sm:$0xff] }
 0x9da   : > { %13029 = vmatprep.mubr.msk.f32.mxu0 %vm504_vm0, %v5708_v56  ;;  %v5713_v56 = vmul.f32 %v21719_v8, %v18819_v36  ;;  %v21726_v36 = vld [vmem:[#allocation217_spill] sm:$0xff] }
 0x9db   : > { %v6266_v51 = vmul.f32 %v21726_v36, %v18279_v48  ;;  %v21731_v48 = vld [vmem:[#allocation218_spill] sm:$0xff] }
 0x9dd   : > { %13030 = vmatmul.mubr.msk.f32.gmra.mrb[60].mxu0 %vm504_vm0, %v5709_v47  ;;  %v21721_v47 = vld [vmem:[#allocation212_spill] sm:$0xff] }
 0x9de   : > { %13032 = vmatprep.mubr.msk.f32.mxu0 %vm504_vm0, %v5710_v38  ;;  %v5715_v38 = vmul.f32 %v21721_v47, %v18841_v42 }
 0x9e1   : > { %13033 = vmatmul.mubr.msk.f32.gmra.mrb[62].mxu0 %vm504_vm0, %v5711_v33  ;;  %v21724_v33 = vld [vmem:[#allocation34_spill] sm:$0xff] }
 0x9e2   : > { %13035 = vmatprep.mubr.msk.f32.mxu0 %vm504_vm0, %v5712_v20  ;;  %v21725_v20 = vld [vmem:[#allocation214_spill] sm:$0xff] }
 0x9e3   : > { %v5717_v8 = vmul.f32 %v21725_v20, %v21724_v33  ;;  %v21729_v20 = vld [vmem:[#allocation219_spill] sm:$0xff] }
 0x9e5   : > { %13036 = vmatmul.mubr.msk.f32.gmra.mrb[64].mxu0 %vm504_vm0, %v5713_v56  ;;  %v7458_v56 = vld [vmem:[%s20774_s3 + $0x60] sm:$0xff] }
 0x9e6   : > { %13038 = vmatprep.mubr.msk.f32.mxu0 %vm504_vm0, %v5714_v28  ;;  %v21727_v28 = vld [vmem:[#allocation216_spill] sm:$0xff] }
 0x9e7   : > { %v6267_v47 = vmul.f32 %v21727_v28, %v18273_v43  ;;  %v21734_v28 = vld [vmem:[#allocation223_spill] sm:$0xff] }
 0x9e9   : > { %13039 = vmatmul.mubr.msk.f32.gmra.mrb[66].mxu0 %vm504_vm0, %v5715_v38  ;;  %v19238_v38 = vpack.c.bf16 %v7459_v34, %v7458_v56  ;;  %v21733_v56 = vld [vmem:[#allocation220_spill] sm:$0xff] }
 0x9ea   : > { %13041 = vmatprep.mubr.msk.f32.mxu0 %vm504_vm0, %v5716_v15  ;;  %v21728_v15 = vld [vmem:[#allocation30_spill] sm:$0xff]  ;;  %v6271_v34 = vmul.f32 %v21733_v56, %v18313_v27 }
 0x9eb   : > { %v6268_v36 = vmul.f32 %v21729_v20, %v21728_v15  ;;  %v21736_v20 = vld [vmem:[#allocation225_spill] sm:$0xff] }
 0x9ed   : > { %13042 = vmatmul.mubr.msk.f32.gmra.mrb[68].mxu0 %vm504_vm0, %v5717_v8  ;;  %v21730_v8 = vld [vmem:[#allocation29_spill] sm:$0xff] }
 0x9ee   : > { %13048 = vmatprep.mubr.msk.f32.mxu0 %vm504_vm0, %v6266_v51  ;;  %v6269_v33 = vmul.f32 %v21731_v48, %v21730_v8  ;;  %v21732_v51 = vld [vmem:[#allocation221_spill] sm:$0xff]  ;;  %v21735_v48 = vld [vmem:[#allocation222_spill] sm:$0xff] }
 0x9ef   : > { %v6270_v6 = vmul.f32 %v21732_v51, %v18315_v58  ;;  %v21738_v51 = vld [vmem:[#allocation227_spill] sm:$0xff] }
 0x9f0   : > { %v6276_v56 = vmul.f32 %v21738_v51, %v18418_v40 }
 0x9f1   : > { %13049 = vmatmul.mubr.msk.f32.vlgmr.msra.gmra.mrb[38].mxu0 %vm504_vm0, %v6267_v47  ;;  %v6272_v47 = vmul.f32 %v21734_v28, %v18337_v3 }
 0x9f2   : > { %13051 = vmatprep.mubr.msk.f32.mxu0 %vm504_vm0, %v6268_v36  ;;  %13635 = vmatpush3.bf16.msra.mxu0 %v19132_v9  ;;  %v6273_v9 = vmul.f32 %v21735_v48, %v18319_v14  ;;  %v6274_v36 = vmul.f32 %v21736_v20, %v18359_v53 }
 0x9f3   : > { %13637 = vmatprep.subr.bf16.mxu0 %v19238_v38 }
 0x9f5   : > { %13052 = vmatmul.mubr.msk.f32.gmra.mrb[40].mxu0 %vm504_vm0, %v6269_v33 }
 0x9f6   : > { %13054 = vmatprep.mubr.msk.f32.mxu0 %vm504_vm0, %v6270_v6  ;;  %v21737_v6 = vld [vmem:[#allocation224_spill] sm:$0xff] }
 0x9f7   : > { %v6275_v33 = vmul.f32 %v21737_v6, %v18355_v44 }
 0x9f9   : > { %13055 = vmatmul.mubr.msk.f32.gmra.mrb[42].mxu0 %vm504_vm0, %v6271_v34 }
 0x9fa   : > { %13057 = vmatprep.mubr.msk.f32.mxu0 %vm504_vm0, %v6272_v47  ;;  %v21741_v47 = vld [vmem:[#allocation226_spill] sm:$0xff] }
 0x9fb   : > { %v6277_v48 = vmul.f32 %v21741_v47, %v18416_v0 }
 0x9fd   : > { %13058 = vmatmul.mubr.msk.f32.gmra.mrb[44].mxu0 %vm504_vm0, %v6273_v9  ;;  %v21742_v9 = vld [vmem:[#allocation229_spill] sm:$0xff] }
 0x9fe   : > { %13060 = vmatprep.mubr.msk.f32.mxu0 %vm504_vm0, %v6274_v36  ;;  %v6278_v20 = vmul.f32 %v21742_v9, %v18454_v5 }
 0xa01   : > { %v19268_v28 = vpop.f32.mrb[170].mxu1  ;;  %13061 = vmatmul.mubr.msk.f32.gmra.mrb[46].mxu0 %vm504_vm0, %v6275_v33  ;;  %v21745_v33 = vld [vmem:[#allocation228_spill] sm:$0xff] }
 0xa02   : > { %21739 = vst [vmem:[#allocation69_spill] sm:$0xff] %v19268_v28  ;;  %v19271_v34 = vpop.f32.mrb[171].mxu1  ;;  %13063 = vmatprep.mubr.msk.f32.mxu0 %vm504_vm0, %v6276_v56  ;;  %v6279_v51 = vmul.f32 %v21745_v33, %v18442_v1 }
 0xa03   : > { %21740 = vst [vmem:[#allocation73_spill] sm:$0xff] %v19271_v34  ;;  %v21746_v34 = vld [vmem:[#allocation231_spill] sm:$0xff] }
 0xa04   : > { %v6280_v56 = vmul.f32 %v21746_v34, %v18479_v25  ;;  %v21753_v34 = vld [vmem:[#allocation232_spill] sm:$0xff] }
 0xa05   : > { %v19278_v36 = vpop.f32.mrb[172].mxu1  ;;  %13064 = vmatmul.mubr.msk.f32.gmra.mrb[48].mxu0 %vm504_vm0, %v6277_v48  ;;  %v21749_v48 = vld [vmem:[#allocation230_spill] sm:$0xff] }
 0xa06   : > { %21743 = vst [vmem:[#allocation74_spill] sm:$0xff] %v19278_v36  ;;  %v19281_v6 = vpop.f32.mrb[173].mxu1  ;;  %13066 = vmatprep.mubr.msk.f32.mxu0 %vm504_vm0, %v6278_v20  ;;  %v6281_v9 = vmul.f32 %v21749_v48, %v18471_v50 }
 0xa07   : > { %21744 = vst [vmem:[#allocation46_spill] sm:$0xff] %v19281_v6  ;;  %v21750_v6 = vld [vmem:[#allocation233_spill] sm:$0xff] }
 0xa08   : > { %v6282_v20 = vmul.f32 %v21750_v6, %v18565_v45  ;;  %v21757_v6 = vld [vmem:[#allocation234_spill] sm:$0xff] }
 0xa09   : > { %v19288_v28 = vpop.f32.mrb[174].mxu1  ;;  %13067 = vmatmul.mubr.msk.f32.gmra.mrb[50].mxu0 %vm504_vm0, %v6279_v51  ;;  %v6283_v51 = vmul.f32 %v21753_v34, %v18596_v31 }
 0xa0a   : > { %21747 = vst [vmem:[#allocation353_spill] sm:$0xff] %v19288_v28  ;;  %v19291_v47 = vpop.f32.mrb[175].mxu1  ;;  %13069 = vmatprep.mubr.msk.f32.mxu0 %vm504_vm0, %v6280_v56 }
 0xa0b   : > { %21748 = vst [vmem:[#allocation77_spill] sm:$0xff] %v19291_v47  ;;  %v21754_v47 = vld [vmem:[#allocation235_spill] sm:$0xff] }
 0xa0c   : > { %v6284_v56 = vmul.f32 %v21754_v47, %v18603_v39  ;;  %v21761_v47 = vld [vmem:[#allocation236_spill] sm:$0xff] }
 0xa0d   : > { %v19298_v36 = vpop.f32.mrb[176].mxu1  ;;  %13070 = vmatmul.mubr.msk.f32.gmra.mrb[52].mxu0 %vm504_vm0, %v6281_v9  ;;  %v6285_v9 = vmul.f32 %v21757_v6, %v18635_v60 }
 0xa0e   : > { %21751 = vst [vmem:[#allocation75_spill] sm:$0xff] %v19298_v36  ;;  %v19301_v33 = vpop.f32.mrb[177].mxu1  ;;  %13072 = vmatprep.mubr.msk.f32.mxu0 %vm504_vm0, %v6282_v20 }
 0xa0f   : > { %21752 = vst [vmem:[#allocation79_spill] sm:$0xff] %v19301_v33  ;;  %v21758_v33 = vld [vmem:[#allocation237_spill] sm:$0xff] }
 0xa10   : > { %v6286_v20 = vmul.f32 %v21758_v33, %v18651_v63  ;;  %v21765_v33 = vld [vmem:[#allocation238_spill] sm:$0xff] }
 0xa11   : > { %v19308_v28 = vpop.f32.mrb[178].mxu1  ;;  %13073 = vmatmul.mubr.msk.f32.gmra.mrb[54].mxu0 %vm504_vm0, %v6283_v51  ;;  %v6287_v51 = vmul.f32 %v21761_v47, %v18661_v32 }
 0xa12   : > { %21755 = vst [vmem:[#allocation47_spill] sm:$0xff] %v19308_v28  ;;  %v19311_v48 = vpop.f32.mrb[179].mxu1  ;;  %13075 = vmatprep.mubr.msk.f32.mxu0 %vm504_vm0, %v6284_v56 }
 0xa13   : > { %21756 = vst [vmem:[#allocation48_spill] sm:$0xff] %v19311_v48  ;;  %v21762_v48 = vld [vmem:[#allocation239_spill] sm:$0xff] }
 0xa14   : > { %v6288_v56 = vmul.f32 %v21762_v48, %v18664_v30  ;;  %v21769_v48 = vld [vmem:[#allocation240_spill] sm:$0xff] }
 0xa15   : > { %v19318_v36 = vpop.f32.mrb[180].mxu1  ;;  %13076 = vmatmul.mubr.msk.f32.gmra.mrb[56].mxu0 %vm504_vm0, %v6285_v9  ;;  %v6289_v9 = vmul.f32 %v21765_v33, %v18701_v23 }
 0xa16   : > { %21759 = vst [vmem:[#allocation66_spill] sm:$0xff] %v19318_v36  ;;  %v19321_v34 = vpop.f32.mrb[181].mxu1  ;;  %13078 = vmatprep.mubr.msk.f32.mxu0 %vm504_vm0, %v6286_v20 }
 0xa17   : > { %21760 = vst [vmem:[#allocation80_spill] sm:$0xff] %v19321_v34  ;;  %v21766_v34 = vld [vmem:[#allocation241_spill] sm:$0xff] }
 0xa18   : > { %v6290_v20 = vmul.f32 %v21766_v34, %v18708_v26  ;;  %v21773_v34 = vld [vmem:[#allocation242_spill] sm:$0xff] }
 0xa19   : > { %v19328_v28 = vpop.f32.mrb[182].mxu1  ;;  %13079 = vmatmul.mubr.msk.f32.gmra.mrb[58].mxu0 %vm504_vm0, %v6287_v51  ;;  %v6291_v51 = vmul.f32 %v21769_v48, %v18736_v12 }
 0xa1a   : > { %21763 = vst [vmem:[#allocation45_spill] sm:$0xff] %v19328_v28  ;;  %v19331_v6 = vpop.f32.mrb[183].mxu1  ;;  %13081 = vmatprep.mubr.msk.f32.mxu0 %vm504_vm0, %v6288_v56 }
 0xa1b   : > { %21764 = vst [vmem:[#allocation49_spill] sm:$0xff] %v19331_v6  ;;  %v21770_v6 = vld [vmem:[#allocation243_spill] sm:$0xff] }
 0xa1c   : > { %v6292_v56 = vmul.f32 %v21770_v6, %v18739_v55  ;;  %v21777_v6 = vld [vmem:[#allocation244_spill] sm:$0xff] }
 0xa1d   : > { %v19338_v36 = vpop.f32.mrb[184].mxu1  ;;  %13082 = vmatmul.mubr.msk.f32.gmra.mrb[60].mxu0 %vm504_vm0, %v6289_v9  ;;  %v6293_v9 = vmul.f32 %v21773_v34, %v18764_v41 }
 0xa1e   : > { %21767 = vst [vmem:[#allocation83_spill] sm:$0xff] %v19338_v36  ;;  %v19341_v47 = vpop.f32.mrb[185].mxu1  ;;  %13084 = vmatprep.mubr.msk.f32.mxu0 %vm504_vm0, %v6290_v20 }
 0xa1f   : > { %21768 = vst [vmem:[#allocation50_spill] sm:$0xff] %v19341_v47  ;;  %v21774_v47 = vld [vmem:[#allocation245_spill] sm:$0xff] }
 0xa20   : > { %v6294_v20 = vmul.f32 %v21774_v47, %v18778_v16  ;;  %v21781_v47 = vld [vmem:[#allocation33_spill] sm:$0xff] }
 0xa21   : > { %v19348_v28 = vpop.f32.mrb[186].mxu1  ;;  %13085 = vmatmul.mubr.msk.f32.gmra.mrb[62].mxu0 %vm504_vm0, %v6291_v51  ;;  %v6295_v51 = vmul.f32 %v21777_v6, %v18362_v29  ;;  %v8039_v6 = vld [vmem:[%s20774_s3 + $0x78] sm:$0xff] }
 0xa22   : > { %21771 = vst [vmem:[#allocation85_spill] sm:$0xff] %v19348_v28  ;;  %v19351_v33 = vpop.f32.mrb[187].mxu1  ;;  %13087 = vmatprep.mubr.msk.f32.mxu0 %vm504_vm0, %v6292_v56 }
 0xa23   : > { %21772 = vst [vmem:[#allocation81_spill] sm:$0xff] %v19351_v33  ;;  %v21778_v33 = vld [vmem:[#allocation247_spill] sm:$0xff] }
 0xa24   : > { %v6296_v56 = vmul.f32 %v21778_v33, %v18370_v57  ;;  %v8038_v33 = vld [vmem:[%s20774_s3 + $0x70] sm:$0xff] }
 0xa25   : > { %v19358_v36 = vpop.f32.mrb[188].mxu1  ;;  %13088 = vmatmul.mubr.msk.f32.gmra.mrb[64].mxu0 %vm504_vm0, %v6293_v9  ;;  %v21782_v9 = vld [vmem:[#allocation246_spill] sm:$0xff] }
 0xa26   : > { %21775 = vst [vmem:[#allocation355_spill] sm:$0xff] %v19358_v36  ;;  %v19361_v48 = vpop.f32.mrb[189].mxu1  ;;  %13090 = vmatprep.mubr.msk.f32.mxu0 %vm504_vm0, %v6294_v20  ;;  %v6297_v36 = vmul.f32 %v21782_v9, %v21781_v47 }
 0xa27   : > { %21776 = vst [vmem:[#allocation86_spill] sm:$0xff] %v19361_v48  ;;  %v21783_v48 = vld [vmem:[#allocation249_spill] sm:$0xff] }
 0xa28   : > { %v6846_v20 = vmul.f32 %v21783_v48, %v18870_v21  ;;  %v19392_v48 = vpack.c.bf16 %v8039_v6, %v8038_v33  ;;  %v21792_v33 = vld [vmem:[#allocation14_spill] sm:$0xff]  ;;  %v21793_v6 = vld [vmem:[#allocation253_spill] sm:$0xff] }
 0xa29   : > { %v19368_v28 = vpop.f32.mrb[190].mxu1  ;;  %13091 = vmatmul.mubr.msk.f32.gmra.mrb[66].mxu0 %vm504_vm0, %v6295_v51 }
 0xa2a   : > { %21779 = vst [vmem:[#allocation345_spill] sm:$0xff] %v19368_v28  ;;  %v19371_v34 = vpop.f32.mrb[191].mxu1  ;;  %13093 = vmatprep.mubr.msk.f32.mxu0 %vm504_vm0, %v6296_v56  ;;  %v21786_v56 = vld [vmem:[#allocation248_spill] sm:$0xff] }
 0xa2b   : > { %21780 = vst [vmem:[#allocation89_spill] sm:$0xff] %v19371_v34  ;;  %v6847_v9 = vmul.f32 %v21786_v56, %v18888_v62  ;;  %v6850_v56 = vmul.f32 %v21793_v6, %v21792_v33  ;;  %v21802_v6 = vld [vmem:[#allocation16_spill] sm:$0xff]  ;;  %v21805_v33 = vld [vmem:[#allocation257_spill] sm:$0xff] }
 0xa2d   : > { %v19378_v43 = vpop.f32.mrb[192].mxu1  ;;  %13094 = vmatmul.mubr.msk.f32.gmra.mrb[68].mxu0 %vm504_vm0, %v6297_v36 }
 0xa2e   : > { %21784 = vst [vmem:[#allocation347_spill] sm:$0xff] %v19378_v43  ;;  %v19387_v51 = vpop.f32.mrb[193].mxu1  ;;  %13100 = vmatprep.mubr.msk.f32.mxu0 %vm504_vm0, %v6846_v20  ;;  %v21787_v43 = vld [vmem:[#allocation251_spill] sm:$0xff]  ;;  %v21791_v20 = vld [vmem:[#allocation250_spill] sm:$0xff] }
 0xa2f   : > { %21785 = vst [vmem:[#allocation91_spill] sm:$0xff] %v19387_v51  ;;  %v6848_v36 = vmul.f32 %v21787_v43, %v18894_v7  ;;  %v21790_v51 = vld [vmem:[#allocation13_spill] sm:$0xff] }
 0xa30   : > { %v6849_v21 = vmul.f32 %v21791_v20, %v21790_v51 }
 0xa31   : > { %v19396_v34 = vpop.f32.mrb[194].mxu1  ;;  %13101 = vmatmul.mubr.msk.f32.vlgmr.msra.gmra.mrb[38].mxu0 %vm504_vm0, %v6847_v9  ;;  %v21796_v9 = vld [vmem:[#allocation15_spill] sm:$0xff] }
 0xa32   : > { %21788 = vst [vmem:[#allocation58_spill] sm:$0xff] %v19396_v34  ;;  %v19399_v28 = vpop.f32.mrb[195].mxu1  ;;  %13103 = vmatprep.mubr.msk.f32.mxu0 %vm504_vm0, %v6848_v36  ;;  %13639 = vmatpush3.bf16.msra.mxu0 %v19238_v38  ;;  %v21797_v36 = vld [vmem:[#allocation252_spill] sm:$0xff]  ;;  %v21798_v38 = vld [vmem:[#allocation179_spill] sm:$0xff] }
 0xa33   : > { %21789 = vst [vmem:[#allocation60_spill] sm:$0xff] %v19399_v28  ;;  %13641 = vmatprep.subr.bf16.mxu0 %v19392_v48  ;;  %v6851_v28 = vmul.f32 %v21797_v36, %v21796_v9  ;;  %v21799_v34 = vld [vmem:[#allocation255_spill] sm:$0xff] }
 0xa34   : > { %v6852_v7 = vmul.f32 %v21799_v34, %v21798_v38  ;;  %v21808_v34 = vld [vmem:[#allocation17_spill] sm:$0xff]  ;;  %v21811_v38 = vld [vmem:[#allocation259_spill] sm:$0xff] }
 0xa35   : > { %v19408_v62 = vpop.f32.mrb[196].mxu1  ;;  %13104 = vmatmul.mubr.msk.f32.gmra.mrb[40].mxu0 %vm504_vm0, %v6849_v21  ;;  %v21803_v21 = vld [vmem:[#allocation254_spill] sm:$0xff]  ;;  %v21819_v9 = vld [vmem:[#allocation263_spill] sm:$0xff] }
 0xa36   : > { %21794 = vst [vmem:[#allocation92_spill] sm:$0xff] %v19408_v62  ;;  %v19411_v43 = vpop.f32.mrb[197].mxu1  ;;  %13106 = vmatprep.mubr.msk.f32.mxu0 %vm504_vm0, %v6850_v56  ;;  %v6853_v62 = vmul.f32 %v21803_v21, %v21802_v6  ;;  %v21812_v21 = vld [vmem:[#allocation51_spill] sm:$0xff]  ;;  %v21815_v6 = vld [vmem:[#allocation261_spill] sm:$0xff] }
 0xa37   : > { %21795 = vst [vmem:[#allocation87_spill] sm:$0xff] %v19411_v43  ;;  %v21804_v43 = vld [vmem:[#allocation180_spill] sm:$0xff] }
 0xa38   : > { %v6854_v56 = vmul.f32 %v21805_v33, %v21804_v43  ;;  %v21813_v33 = vld [vmem:[#allocation258_spill] sm:$0xff] }
 0xa39   : > { %v19418_v20 = vpop.f32.mrb[198].mxu1  ;;  %13107 = vmatmul.mubr.msk.f32.gmra.mrb[42].mxu0 %vm504_vm0, %v6851_v28  ;;  %v21809_v28 = vld [vmem:[#allocation256_spill] sm:$0xff]  ;;  %v6857_v43 = vmul.f32 %v21813_v33, %v21812_v21  ;;  %v21822_v21 = vld [vmem:[#allocation54_spill] sm:$0xff] }
 0xa3a   : > { %21800 = vst [vmem:[#allocation64_spill] sm:$0xff] %v19418_v20  ;;  %v19421_v51 = vpop.f32.mrb[199].mxu1  ;;  %13109 = vmatprep.mubr.msk.f32.mxu0 %vm504_vm0, %v6852_v7  ;;  %v6855_v20 = vmul.f32 %v21809_v28, %v21808_v34  ;;  %v21818_v34 = vld [vmem:[#allocation183_spill] sm:$0xff] }
 0xa3b   : > { %21801 = vst [vmem:[#allocation357_spill] sm:$0xff] %v19421_v51  ;;  %v21810_v51 = vld [vmem:[#allocation18_spill] sm:$0xff] }
 0xa3c   : > { %v6856_v7 = vmul.f32 %v21811_v38, %v21810_v51  ;;  %v6860_v38 = vmul.f32 %v21819_v9, %v21818_v34  ;;  %v21823_v51 = vld [vmem:[#allocation265_spill] sm:$0xff] }
 0xa3d   : > { %v19428_v47 = vpop.f32.mrb[200].mxu1  ;;  %13110 = vmatmul.mubr.msk.f32.gmra.mrb[44].mxu0 %vm504_vm0, %v6853_v62  ;;  %v21831_v34 = vld [vmem:[#allocation269_spill] sm:$0xff] }
 0xa3e   : > { %21806 = vst [vmem:[#allocation95_spill] sm:$0xff] %v19428_v47  ;;  %v19431_v36 = vpop.f32.mrb[201].mxu1  ;;  %13112 = vmatprep.mubr.msk.f32.mxu0 %vm504_vm0, %v6854_v56  ;;  %v21814_v47 = vld [vmem:[#allocation52_spill] sm:$0xff]  ;;  %v21816_v56 = vld [vmem:[#allocation19_spill] sm:$0xff] }
 0xa3f   : > { %21807 = vst [vmem:[#allocation93_spill] sm:$0xff] %v19431_v36  ;;  %v6858_v62 = vmul.f32 %v21815_v6, %v21814_v47  ;;  %v21817_v36 = vld [vmem:[#allocation260_spill] sm:$0xff]  ;;  %v6862_v6 = vmul.f32 %v21823_v51, %v21822_v21  ;;  %v21827_v47 = vld [vmem:[#allocation267_spill] sm:$0xff] }
 0xa40   : > { %v6859_v28 = vmul.f32 %v21817_v36, %v21816_v56  ;;  %v21826_v56 = vld [vmem:[#allocation56_spill] sm:$0xff]  ;;  %v21835_v21 = vld [vmem:[#allocation271_spill] sm:$0xff] }
 0xa41   : > { %13113 = vmatmul.mubr.msk.f32.gmra.mrb[46].mxu0 %vm504_vm0, %v6855_v20  ;;  %v21820_v20 = vld [vmem:[#allocation53_spill] sm:$0xff]  ;;  %v6864_v9 = vmul.f32 %v21827_v47, %v21826_v56 }
 0xa42   : > { %13115 = vmatprep.mubr.msk.f32.mxu0 %vm504_vm0, %v6856_v7  ;;  %v21821_v7 = vld [vmem:[#allocation262_spill] sm:$0xff]  ;;  %v21839_v56 = vld [vmem:[#allocation273_spill] sm:$0xff] }
 0xa43   : > { %v6861_v33 = vmul.f32 %v21821_v7, %v21820_v20  ;;  %v21830_v20 = vld [vmem:[#allocation61_spill] sm:$0xff] }
 0xa44   : > { %v6866_v51 = vmul.f32 %v21831_v34, %v21830_v20  ;;  %v21843_v20 = vld [vmem:[#allocation275_spill] sm:$0xff] }
 0xa45   : > { %13116 = vmatmul.mubr.msk.f32.gmra.mrb[48].mxu0 %vm504_vm0, %v6857_v43  ;;  %v21824_v43 = vld [vmem:[#allocation55_spill] sm:$0xff] }
 0xa46   : > { %13118 = vmatprep.mubr.msk.f32.mxu0 %vm504_vm0, %v6858_v62  ;;  %v21825_v62 = vld [vmem:[#allocation264_spill] sm:$0xff] }
 0xa47   : > { %v6863_v36 = vmul.f32 %v21825_v62, %v21824_v43  ;;  %v21834_v43 = vld [vmem:[#allocation57_spill] sm:$0xff] }
 0xa48   : > { %v6868_v47 = vmul.f32 %v21835_v21, %v21834_v43 }
 0xa49   : > { %13119 = vmatmul.mubr.msk.f32.gmra.mrb[50].mxu0 %vm504_vm0, %v6859_v28  ;;  %v21828_v28 = vld [vmem:[#allocation59_spill] sm:$0xff] }
 0xa4a   : > { %13121 = vmatprep.mubr.msk.f32.mxu0 %vm504_vm0, %v6860_v38  ;;  %v21829_v38 = vld [vmem:[#allocation266_spill] sm:$0xff] }
 0xa4b   : > { %v6865_v7 = vmul.f32 %v21829_v38, %v21828_v28  ;;  %v21838_v28 = vld [vmem:[#allocation68_spill] sm:$0xff] }
 0xa4c   : > { %v6870_v34 = vmul.f32 %v21839_v56, %v21838_v28  ;;  %v21849_v28 = vld [vmem:[#allocation279_spill] sm:$0xff] }
 0xa4d   : > { %13122 = vmatmul.mubr.msk.f32.gmra.mrb[52].mxu0 %vm504_vm0, %v6861_v33  ;;  %v21832_v33 = vld [vmem:[#allocation62_spill] sm:$0xff] }
 0xa4e   : > { %13124 = vmatprep.mubr.msk.f32.mxu0 %vm504_vm0, %v6862_v6  ;;  %v21833_v6 = vld [vmem:[#allocation268_spill] sm:$0xff] }
 0xa4f   : > { %v6867_v62 = vmul.f32 %v21833_v6, %v21832_v33  ;;  %v21842_v33 = vld [vmem:[#allocation65_spill] sm:$0xff] }
 0xa50   : > { %v6872_v21 = vmul.f32 %v21843_v20, %v21842_v33  ;;  %v21853_v33 = vld [vmem:[#allocation281_spill] sm:$0xff] }
 0xa51   : > { %13125 = vmatmul.mubr.msk.f32.gmra.mrb[54].mxu0 %vm504_vm0, %v6863_v36  ;;  %v21836_v36 = vld [vmem:[#allocation67_spill] sm:$0xff] }
 0xa52   : > { %13127 = vmatprep.mubr.msk.f32.mxu0 %vm504_vm0, %v6864_v9  ;;  %v21837_v9 = vld [vmem:[#allocation270_spill] sm:$0xff] }
 0xa53   : > { %v6869_v38 = vmul.f32 %v21837_v9, %v21836_v36  ;;  %v21845_v9 = vld [vmem:[#allocation277_spill] sm:$0xff] }
 0xa54   : > { %v6874_v56 = vmul.f32 %v21845_v9, %v19103_v54 }
 0xa55   : > { %13128 = vmatmul.mubr.msk.f32.gmra.mrb[56].mxu0 %vm504_vm0, %v6865_v7  ;;  %v21840_v7 = vld [vmem:[#allocation351_spill] sm:$0xff] }
 0xa56   : > { %13130 = vmatprep.mubr.msk.f32.mxu0 %vm504_vm0, %v6866_v51  ;;  %v21841_v51 = vld [vmem:[#allocation272_spill] sm:$0xff] }
 0xa57   : > { %v6871_v6 = vmul.f32 %v21841_v51, %v21840_v7  ;;  %v21848_v7 = vld [vmem:[#allocation10_spill] sm:$0xff] }
 0xa58   : > { %v6876_v20 = vmul.f32 %v21849_v28, %v21848_v7  ;;  %v8619_v28 = vld [vmem:[%s20774_s3 + $0x88] sm:$0xff] }
 0xa59   : > { %13131 = vmatmul.mubr.msk.f32.gmra.mrb[58].mxu0 %vm504_vm0, %v6867_v62  ;;  %v21844_v62 = vld [vmem:[#allocation274_spill] sm:$0xff] }
 0xa5a   : > { %13133 = vmatprep.mubr.msk.f32.mxu0 %vm504_vm0, %v6868_v47  ;;  %v6873_v47 = vmul.f32 %v21844_v62, %v19098_v46  ;;  %v21852_v46 = vld [vmem:[#allocation36_spill] sm:$0xff] }
 0xa5b   : > { %v7426_v9 = vmul.f32 %v21853_v33, %v21852_v46  ;;  %v21858_v33 = vld [vmem:[#allocation38_spill] sm:$0xff] }
 0xa5d   : > { %13134 = vmatmul.mubr.msk.f32.gmra.mrb[60].mxu0 %vm504_vm0, %v6869_v38  ;;  %v21846_v38 = vld [vmem:[#allocation349_spill] sm:$0xff] }
 0xa5e   : > { %13136 = vmatprep.mubr.msk.f32.mxu0 %vm504_vm0, %v6870_v34  ;;  %v21847_v34 = vld [vmem:[#allocation276_spill] sm:$0xff] }
 0xa5f   : > { %v6875_v51 = vmul.f32 %v21847_v34, %v21846_v38  ;;  %v21855_v34 = vld [vmem:[#allocation280_spill] sm:$0xff]  ;;  %v21861_v38 = vld [vmem:[#allocation285_spill] sm:$0xff] }
 0xa61   : > { %13137 = vmatmul.mubr.msk.f32.gmra.mrb[62].mxu0 %vm504_vm0, %v6871_v6  ;;  %v21850_v6 = vld [vmem:[#allocation11_spill] sm:$0xff] }
 0xa62   : > { %13139 = vmatprep.mubr.msk.f32.mxu0 %vm504_vm0, %v6872_v21  ;;  %v21851_v21 = vld [vmem:[#allocation278_spill] sm:$0xff] }
 0xa63   : > { %v6877_v62 = vmul.f32 %v21851_v21, %v21850_v6  ;;  %v21856_v21 = vld [vmem:[#allocation37_spill] sm:$0xff]  ;;  %v21857_v6 = vld [vmem:[#allocation283_spill] sm:$0xff] }
 0xa64   : > { %v7428_v46 = vmul.f32 %v21857_v6, %v21856_v21  ;;  %v21863_v6 = vld [vmem:[#allocation284_spill] sm:$0xff]  ;;  %v21867_v21 = vld [vmem:[#allocation286_spill] sm:$0xff] }
 0xa65   : > { %13140 = vmatmul.mubr.msk.f32.gmra.mrb[64].mxu0 %vm504_vm0, %v6873_v47  ;;  %v8618_v47 = vld [vmem:[%s20774_s3 + $0x80] sm:$0xff] }
 0xa66   : > { %13142 = vmatprep.mubr.msk.f32.mxu0 %vm504_vm0, %v6874_v56  ;;  %v21854_v56 = vld [vmem:[#allocation196_spill] sm:$0xff] }
 0xa69   : > { %13143 = vmatmul.mubr.msk.f32.gmra.mrb[66].mxu0 %vm504_vm0, %v6875_v51  ;;  %v7427_v51 = vmul.f32 %v21855_v34, %v21854_v56  ;;  %v21864_v56 = vld [vmem:[#allocation199_spill] sm:$0xff] }
 0xa6a   : > { %13145 = vmatprep.mubr.msk.f32.mxu0 %vm504_vm0, %v6876_v20  ;;  %v19514_v20 = vpack.c.bf16 %v8619_v28, %v8618_v47  ;;  %v21862_v47 = vld [vmem:[#allocation40_spill] sm:$0xff]  ;;  %v21865_v34 = vld [vmem:[#allocation287_spill] sm:$0xff] }
 0xa6b   : > { %v7431_v28 = vmul.f32 %v21863_v6, %v21862_v47  ;;  %v21872_v6 = vld [vmem:[#allocation290_spill] sm:$0xff] }
 0xa6d   : > { %13146 = vmatmul.mubr.msk.f32.gmra.mrb[68].mxu0 %vm504_vm0, %v6877_v62  ;;  %v21859_v62 = vld [vmem:[#allocation282_spill] sm:$0xff] }
 0xa6e   : > { %13152 = vmatprep.mubr.msk.f32.mxu0 %vm504_vm0, %v7426_v9  ;;  %v7429_v7 = vmul.f32 %v21859_v62, %v21858_v33  ;;  %v21860_v9 = vld [vmem:[#allocation39_spill] sm:$0xff]  ;;  %v21868_v33 = vld [vmem:[#allocation289_spill] sm:$0xff] }
 0xa6f   : > { %v7430_v54 = vmul.f32 %v21861_v38, %v21860_v9  ;;  %v7434_v38 = vmul.f32 %v21868_v33, %v21696_v2  ;;  %v21871_v9 = vld [vmem:[#allocation291_spill] sm:$0xff]  ;;  %v21878_v33 = vld [vmem:[#allocation296_spill] sm:$0xff] }
 0xa70   : > { %v7436_v47 = vmul.f32 %v21871_v9, %v21700_v4  ;;  %v21883_v9 = vld [vmem:[#allocation303_spill] sm:$0xff] }
 0xa71   : > { %13153 = vmatmul.mubr.msk.f32.vlgmr.msra.gmra.mrb[38].mxu0 %vm504_vm0, %v7427_v51  ;;  %v7432_v51 = vmul.f32 %v21865_v34, %v21864_v56  ;;  %v21873_v56 = vld [vmem:[#allocation293_spill] sm:$0xff]  ;;  %v21874_v34 = vld [vmem:[#allocation292_spill] sm:$0xff] }
 0xa72   : > { %13155 = vmatprep.mubr.msk.f32.mxu0 %vm504_vm0, %v7428_v46  ;;  %13643 = vmatpush3.bf16.msra.mxu0 %v19392_v48  ;;  %v21866_v48 = vld [vmem:[#allocation41_spill] sm:$0xff]  ;;  %v7438_v2 = vmul.f32 %v21873_v56, %v21704_v24 }
 0xa73   : > { %13645 = vmatprep.subr.bf16.mxu0 %v19514_v20  ;;  %v7433_v46 = vmul.f32 %v21867_v21, %v21866_v48  ;;  %v21875_v48 = vld [vmem:[#allocation295_spill] sm:$0xff]  ;;  %v21876_v21 = vld [vmem:[#allocation294_spill] sm:$0xff]  ;;  %v21887_v56 = vld [vmem:[#allocation9_spill] sm:$0xff] }
 0xa74   : > { %v7440_v4 = vmul.f32 %v21875_v48, %v21707_v22 }
 0xa75   : > { %13156 = vmatmul.mubr.msk.f32.gmra.mrb[40].mxu0 %vm504_vm0, %v7429_v7  ;;  %v21870_v7 = vld [vmem:[#allocation288_spill] sm:$0xff] }
 0xa76   : > { %13158 = vmatprep.mubr.msk.f32.mxu0 %vm504_vm0, %v7430_v54  ;;  %v21869_v54 = vld [vmem:[#allocation43_spill] sm:$0xff] }
 0xa77   : > { %v7435_v62 = vmul.f32 %v21870_v7, %v21869_v54  ;;  %v21880_v54 = vld [vmem:[#allocation298_spill] sm:$0xff]  ;;  %v21881_v7 = vld [vmem:[#allocation301_spill] sm:$0xff] }
 0xa79   : > { %13159 = vmatmul.mubr.msk.f32.gmra.mrb[42].mxu0 %vm504_vm0, %v7431_v28  ;;  %v7437_v28 = vmul.f32 %v21872_v6, %v21702_v10  ;;  %v7441_v10 = vmul.f32 %v21876_v21, %v18689_v11  ;;  %v7445_v11 = vmul.f32 %v21880_v54, %v18750_v37  ;;  %v21885_v6 = vld [vmem:[#allocation302_spill] sm:$0xff]  ;;  %v21892_v21 = vld [vmem:[#allocation309_spill] sm:$0xff] }
 0xa7a   : > { %13161 = vmatprep.mubr.msk.f32.mxu0 %vm504_vm0, %v7432_v51  ;;  %v7439_v51 = vmul.f32 %v21874_v34, %v18648_v52  ;;  %v7443_v52 = vmul.f32 %v21878_v33, %v18721_v13  ;;  %v21889_v34 = vld [vmem:[#allocation307_spill] sm:$0xff]  ;;  %v21899_v54 = vld [vmem:[#allocation313_spill] sm:$0xff] }
 0xa7b   : > { %v21895_v33 = vld [vmem:[#allocation195_spill] sm:$0xff] }
 0xa7d   : > { %13162 = vmatmul.mubr.msk.f32.gmra.mrb[44].mxu0 %vm504_vm0, %v7433_v46  ;;  %v21877_v46 = vld [vmem:[#allocation297_spill] sm:$0xff] }
 0xa7e   : > { %13164 = vmatprep.mubr.msk.f32.mxu0 %vm504_vm0, %v7434_v38  ;;  %v7442_v24 = vmul.f32 %v21877_v46, %v18698_v19  ;;  %v21879_v38 = vld [vmem:[#allocation299_spill] sm:$0xff]  ;;  %v7446_v19 = vmul.f32 %v21881_v7, %v18759_v61  ;;  %v21894_v46 = vld [vmem:[#allocation308_spill] sm:$0xff] }
 0xa7f   : > { %v7444_v22 = vmul.f32 %v21879_v38, %v18731_v17  ;;  %v7448_v17 = vmul.f32 %v21883_v9, %v18785_v35  ;;  %v7452_v35 = vmul.f32 %v21889_v34, %v18825_v49  ;;  %v21897_v38 = vld [vmem:[#allocation32_spill] sm:$0xff]  ;;  %v21902_v9 = vld [vmem:[#allocation314_spill] sm:$0xff] }
 0xa80   : > { %v21900_v7 = vld [vmem:[#allocation312_spill] sm:$0xff] }
 0xa81   : > { %13165 = vmatmul.mubr.msk.f32.gmra.mrb[46].mxu0 %vm504_vm0, %v7435_v62  ;;  %v21882_v62 = vld [vmem:[#allocation300_spill] sm:$0xff] }
 0xa82   : > { %13167 = vmatprep.mubr.msk.f32.mxu0 %vm504_vm0, %v7436_v47  ;;  %v7447_v13 = vmul.f32 %v21882_v62, %v18775_v18  ;;  %v21884_v47 = vld [vmem:[#allocation8_spill] sm:$0xff]  ;;  %v21901_v62 = vld [vmem:[#allocation315_spill] sm:$0xff] }
 0xa83   : > { %v7449_v37 = vmul.f32 %v21885_v6, %v21884_v47  ;;  %v21912_v34 = vld [vmem:[#allocation324_spill] sm:$0xff] }
 0xa85   : > { %13168 = vmatmul.mubr.msk.f32.gmra.mrb[48].mxu0 %vm504_vm0, %v7437_v28  ;;  %v21886_v28 = vld [vmem:[#allocation305_spill] sm:$0xff] }
 0xa86   : > { %13170 = vmatprep.mubr.msk.f32.mxu0 %vm504_vm0, %v7438_v2  ;;  %v7450_v61 = vmul.f32 %v21886_v28, %v18806_v59  ;;  %v21888_v2 = vld [vmem:[#allocation304_spill] sm:$0xff]  ;;  %v21907_v28 = vld [vmem:[#allocation321_spill] sm:$0xff] }
 0xa87   : > { %v7451_v18 = vmul.f32 %v21888_v2, %v21887_v56  ;;  %v21909_v56 = vld [vmem:[#allocation323_spill] sm:$0xff]  ;;  %v21910_v2 = vld [vmem:[#allocation322_spill] sm:$0xff] }
 0xa89   : > { %13171 = vmatmul.mubr.msk.f32.gmra.mrb[50].mxu0 %vm504_vm0, %v7439_v51  ;;  %v21890_v51 = vld [vmem:[#allocation306_spill] sm:$0xff] }
 0xa8a   : > { %13173 = vmatprep.mubr.msk.f32.mxu0 %vm504_vm0, %v7440_v4  ;;  %v7453_v48 = vmul.f32 %v21890_v51, %v18841_v42  ;;  %v21891_v4 = vld [vmem:[#allocation35_spill] sm:$0xff]  ;;  %v19654_v51 = vpop.permute.xlu1 %8503 }
 0xa8b   : > { %v7454_v59 = vmul.f32 %v21892_v21, %v21891_v4 }
 0xa8d   : > { %13174 = vmatmul.mubr.msk.f32.gmra.mrb[52].mxu0 %vm504_vm0, %v7441_v10  ;;  %v21893_v10 = vld [vmem:[#allocation34_spill] sm:$0xff] }
 0xa8e   : > { %13176 = vmatprep.mubr.msk.f32.mxu0 %vm504_vm0, %v7442_v24  ;;  %v7455_v24 = vmul.f32 %v21894_v46, %v21893_v10 }
 0xa91   : > { %13177 = vmatmul.mubr.msk.f32.gmra.mrb[54].mxu0 %vm504_vm0, %v7443_v52  ;;  %v21896_v52 = vld [vmem:[#allocation311_spill] sm:$0xff] }
 0xa92   : > { %13179 = vmatprep.mubr.msk.f32.mxu0 %vm504_vm0, %v7444_v22  ;;  %v7456_v49 = vmul.f32 %v21896_v52, %v21895_v33  ;;  %v21898_v22 = vld [vmem:[#allocation310_spill] sm:$0xff] }
 0xa93   : > { %v7457_v42 = vmul.f32 %v21898_v22, %v21897_v38  ;;  %v21923_v22 = vld [vmem:[#allocation337_spill] sm:$0xff] }
 0xa95   : > { %13180 = vmatmul.mubr.msk.f32.gmra.mrb[56].mxu0 %vm504_vm0, %v7445_v11  ;;  %v8006_v11 = vmul.f32 %v21899_v54, %v21728_v15  ;;  %v21903_v15 = vld [vmem:[#allocation317_spill] sm:$0xff] }
 0xa96   : > { %13182 = vmatprep.mubr.msk.f32.mxu0 %vm504_vm0, %v7446_v19  ;;  %v8007_v19 = vmul.f32 %v21900_v7, %v21730_v8  ;;  %v8010_v47 = vmul.f32 %v21903_v15, %v18337_v3  ;;  %v21904_v8 = vld [vmem:[#allocation316_spill] sm:$0xff]  ;;  %v8014_v3 = vmul.f32 %v21907_v28, %v18418_v40  ;;  %v21931_v15 = vld [vmem:[#allocation343_spill] sm:$0xff]  ;;  %v21937_v28 = vld [vmem:[#allocation346_spill] sm:$0xff] }
 0xa97   : > { %v8011_v6 = vmul.f32 %v21904_v8, %v18319_v14  ;;  %v21932_v8 = vld [vmem:[#allocation27_spill] sm:$0xff] }
 0xa99   : > { %13183 = vmatmul.mubr.msk.f32.gmra.mrb[58].mxu0 %vm504_vm0, %v7447_v13  ;;  %v8008_v13 = vmul.f32 %v21901_v62, %v18315_v58  ;;  %v21905_v58 = vld [vmem:[#allocation319_spill] sm:$0xff] }
 0xa9a   : > { %13185 = vmatprep.mubr.msk.f32.mxu0 %vm504_vm0, %v7448_v17  ;;  %v8009_v17 = vmul.f32 %v21902_v9, %v18313_v27 }
 0xa9d   : > { %13186 = vmatmul.mubr.msk.f32.gmra.mrb[60].mxu0 %vm504_vm0, %v7449_v37  ;;  %v8012_v37 = vmul.f32 %v21905_v58, %v18359_v53  ;;  %v8016_v53 = vmul.f32 %v21909_v56, %v18454_v5  ;;  %v21934_v58 = vld [vmem:[#allocation176_spill] sm:$0xff] }
 0xa9e   : > { %13188 = vmatprep.mubr.msk.f32.mxu0 %vm504_vm0, %v7450_v61  ;;  %v21908_v61 = vld [vmem:[#allocation320_spill] sm:$0xff] }
 0xa9f   : > { %v8015_v14 = vmul.f32 %v21908_v61, %v18416_v0  ;;  %v8019_v0 = vmul.f32 %v21912_v34, %v18471_v50  ;;  %v21916_v50 = vld [vmem:[#allocation328_spill] sm:$0xff]  ;;  %v21938_v61 = vld [vmem:[#allocation14_spill] sm:$0xff] }
 0xaa0   : > { %v8023_v21 = vmul.f32 %v21916_v50, %v18635_v60  ;;  %v21920_v60 = vld [vmem:[#allocation332_spill] sm:$0xff] }
 0xaa1   : > { %13189 = vmatmul.mubr.msk.f32.gmra.mrb[62].mxu0 %vm504_vm0, %v7451_v18  ;;  %v21911_v18 = vld [vmem:[#allocation325_spill] sm:$0xff]  ;;  %v8027_v52 = vmul.f32 %v21920_v60, %v18701_v23  ;;  %v21924_v23 = vld [vmem:[#allocation336_spill] sm:$0xff]  ;;  %v21953_v60 = vld [vmem:[#allocation362_spill] sm:$0xff] }
 0xaa2   : > { %13191 = vmatprep.mubr.msk.f32.mxu0 %vm504_vm0, %v7452_v35  ;;  %v8018_v40 = vmul.f32 %v21911_v18, %v18479_v25  ;;  %v21913_v35 = vld [vmem:[#allocation327_spill] sm:$0xff]  ;;  %v21915_v25 = vld [vmem:[#allocation329_spill] sm:$0xff]  ;;  %v8031_v54 = vmul.f32 %v21924_v23, %v18764_v41  ;;  %v21929_v41 = vld [vmem:[#allocation340_spill] sm:$0xff] }
 0xaa3   : > { %v8020_v5 = vmul.f32 %v21913_v35, %v18565_v45  ;;  %v8022_v4 = vmul.f32 %v21915_v25, %v18603_v39  ;;  %v19665_v45 = vpop.permute.xlu1 %8508  ;;  %v21919_v39 = vld [vmem:[#allocation333_spill] sm:$0xff]  ;;  %v21943_v34 = vld [vmem:[#allocation352_spill] sm:$0xff] }
 0xaa4   : > { %v21944_v35 = vld [vmem:[#allocation16_spill] sm:$0xff] }
 0xaa5   : > { %13192 = vmatmul.mubr.msk.f32.gmra.mrb[64].mxu0 %vm504_vm0, %v7453_v48  ;;  %v21947_v25 = vld [vmem:[#allocation356_spill] sm:$0xff] }
 0xaa6   : > { %13194 = vmatprep.mubr.msk.f32.mxu0 %vm504_vm0, %v7454_v59  ;;  %v21917_v59 = vld [vmem:[#allocation331_spill] sm:$0xff] }
 0xaa7   : > { %v8024_v10 = vmul.f32 %v21917_v59, %v18651_v63  ;;  %v19676_v33 = vpop.permute.xlu1 %8513  ;;  %v21921_v63 = vld [vmem:[#allocation335_spill] sm:$0xff]  ;;  %v21949_v59 = vld [vmem:[#allocation358_spill] sm:$0xff] }
 0xaa9   : > { %13195 = vmatmul.mubr.msk.f32.gmra.mrb[66].mxu0 %vm504_vm0, %v7455_v24  ;;  %v8026_v24 = vmul.f32 %v21919_v39, %v18664_v30 }
 0xaaa   : > { %13197 = vmatprep.mubr.msk.f32.mxu0 %vm504_vm0, %v7456_v49  ;;  %v8028_v49 = vmul.f32 %v21921_v63, %v18708_v26  ;;  %v21925_v26 = vld [vmem:[#allocation339_spill] sm:$0xff] }
 0xaab   : > { %v8519_v30 = vpop.permute.xlu1 %8518 }
 0xaad   : > { %13198 = vmatmul.mubr.msk.f32.gmra.mrb[68].mxu0 %vm504_vm0, %v7457_v42  ;;  %v8030_v42 = vmul.f32 %v21923_v22, %v18739_v55  ;;  %v21927_v55 = vld [vmem:[#allocation341_spill] sm:$0xff]  ;;  %v21956_v22 = vld [vmem:[#allocation19_spill] sm:$0xff] }
 0xaae   : > { %13204 = vmatprep.mubr.msk.f32.mxu0 %vm504_vm0, %v8006_v11  ;;  %v8032_v11 = vmul.f32 %v21925_v26, %v18778_v16  ;;  %v8034_v62 = vmul.f32 %v21927_v55, %v18370_v57  ;;  %v21930_v16 = vld [vmem:[#allocation28_spill] sm:$0xff]  ;;  %v21959_v26 = vld [vmem:[#allocation369_spill] sm:$0xff]  ;;  %v21961_v55 = vld [vmem:[#allocation371_spill] sm:$0xff] }
 0xaaf   : > { %v8524_v7 = vpop.permute.xlu1 %8523  ;;  %v21935_v57 = vld [vmem:[#allocation344_spill] sm:$0xff] }
 0xab1   : > { %13205 = vmatmul.mubr.msk.f32.vlgmr.msra.gmra.mrb[38].mxu0 %vm504_vm0, %v8007_v19 }
 0xab2   : > { %13207 = vmatprep.mubr.msk.f32.mxu0 %vm504_vm0, %v8008_v13  ;;  %13647 = vmatpush3.bf16.msra.mxu0 %v19514_v20  ;;  %v21906_v20 = vld [vmem:[#allocation318_spill] sm:$0xff]  ;;  %v21928_v13 = vld [vmem:[#allocation33_spill] sm:$0xff] }
 0xab3   : > { %v8013_v27 = vmul.f32 %v21906_v20, %v18355_v44  ;;  %v8017_v44 = vmul.f32 %v21910_v2, %v18442_v1  ;;  %v21914_v1 = vld [vmem:[#allocation326_spill] sm:$0xff]  ;;  %v8035_v9 = vmul.f32 %v21929_v41, %v21928_v13  ;;  %v21963_v41 = vld [vmem:[#allocation373_spill] sm:$0xff] }
 0xab4   : > { %v8021_v48 = vmul.f32 %v21914_v1, %v18596_v31  ;;  %v21918_v31 = vld [vmem:[#allocation330_spill] sm:$0xff] }
 0xab5   : > { %13208 = vmatmul.mubr.msk.f32.gmra.mrb[40].mxu0 %vm504_vm0, %v8009_v17  ;;  %v8025_v46 = vmul.f32 %v21918_v31, %v18661_v32  ;;  %v21922_v32 = vld [vmem:[#allocation334_spill] sm:$0xff]  ;;  %v8529_v17 = vpop.permute.xlu1 %8528 }
 0xab6   : > { %13210 = vmatprep.mubr.msk.f32.mxu0 %vm504_vm0, %v8010_v47  ;;  %v8029_v38 = vmul.f32 %v21922_v32, %v18736_v12  ;;  %v21926_v12 = vld [vmem:[#allocation338_spill] sm:$0xff]  ;;  %v8036_v47 = vmul.f32 %v21931_v15, %v21930_v16  ;;  %v21955_v32 = vld [vmem:[#allocation364_spill] sm:$0xff]  ;;  %v21964_v16 = vld [vmem:[#allocation55_spill] sm:$0xff] }
 0xab7   : > { %v8033_v19 = vmul.f32 %v21926_v12, %v18362_v29  ;;  %v21933_v29 = vld [vmem:[#allocation342_spill] sm:$0xff]  ;;  %v8601_v15 = vmul.f32 %v19654_v51, %v21964_v16 }
 0xab8   : > { %v21941_v2 = vld [vmem:[#allocation350_spill] sm:$0xff] }
 0xab9   : > { %13211 = vmatmul.mubr.msk.f32.gmra.mrb[42].mxu0 %vm504_vm0, %v8011_v6  ;;  %v8037_v6 = vmul.f32 %v21933_v29, %v21932_v8  ;;  %v8534_v20 = vpop.permute.xlu1 %8533  ;;  %v21950_v31 = vld [vmem:[#allocation18_spill] sm:$0xff]  ;;  %v21965_v8 = vld [vmem:[#allocation56_spill] sm:$0xff] }
 0xaba   : > { %13213 = vmatprep.mubr.msk.f32.mxu0 %vm504_vm0, %v8012_v37  ;;  %v8586_v37 = vmul.f32 %v21935_v57, %v21934_v58  ;;  %v21962_v13 = vld [vmem:[#allocation54_spill] sm:$0xff]  ;;  %v8602_v29 = vmul.f32 %v19665_v45, %v21965_v8  ;;  %v21967_v57 = vld [vmem:[#allocation61_spill] sm:$0xff]  ;;  %v8607_v45 = vmul.f32 %v8534_v20, %v21836_v36 }
 0xabb   : > { %v21974_v20 = vld [vmem:[#allocation349_spill] sm:$0xff] }
 0xabd   : > { %13214 = vmatmul.mubr.msk.f32.gmra.mrb[44].mxu0 %vm504_vm0, %v8013_v27  ;;  %v21936_v27 = vld [vmem:[#allocation13_spill] sm:$0xff]  ;;  %v8539_v18 = vpop.permute.xlu1 %8538 }
 0xabe   : > { %13216 = vmatprep.mubr.msk.f32.mxu0 %vm504_vm0, %v8014_v3  ;;  %v8587_v3 = vmul.f32 %v21937_v28, %v21936_v27  ;;  %v21968_v28 = vld [vmem:[#allocation62_spill] sm:$0xff] }
 0xabf   : > { %v8605_v51 = vmul.f32 %v8524_v7, %v21968_v28  ;;  %v21972_v7 = vld [vmem:[#allocation63_spill] sm:$0xff] }
 0xac1   : > { %13217 = vmatmul.mubr.msk.f32.gmra.mrb[46].mxu0 %vm504_vm0, %v8015_v14  ;;  %v21939_v14 = vld [vmem:[#allocation348_spill] sm:$0xff]  ;;  %v8544_v50 = vpop.permute.xlu1 %8543 }
 0xac2   : > { %13219 = vmatprep.mubr.msk.f32.mxu0 %vm504_vm0, %v8016_v53  ;;  %v8588_v56 = vmul.f32 %v21939_v14, %v21938_v61  ;;  %v21940_v53 = vld [vmem:[#allocation15_spill] sm:$0xff]  ;;  %v21969_v14 = vld [vmem:[#allocation68_spill] sm:$0xff] }
 0xac5   : > { %13220 = vmatmul.mubr.msk.f32.gmra.mrb[48].mxu0 %vm504_vm0, %v8017_v44  ;;  %v8589_v44 = vmul.f32 %v21941_v2, %v21940_v53  ;;  %v8549_v63 = vpop.permute.xlu1 %8548  ;;  %v21971_v53 = vld [vmem:[#allocation65_spill] sm:$0xff] }
 0xac6   : > { %13222 = vmatprep.mubr.msk.f32.mxu0 %vm504_vm0, %v8018_v40  ;;  %v21942_v40 = vld [vmem:[#allocation179_spill] sm:$0xff]  ;;  %v8610_v2 = vmul.f32 %v8549_v63, %v21971_v53 }
 0xac9   : > { %13223 = vmatmul.mubr.msk.f32.gmra.mrb[50].mxu0 %vm504_vm0, %v8019_v0  ;;  %v8590_v0 = vmul.f32 %v21943_v34, %v21942_v40  ;;  %v8554_v12 = vpop.permute.xlu1 %8553  ;;  %v21975_v34 = vld [vmem:[#allocation10_spill] sm:$0xff] }
 0xaca   : > { %13225 = vmatprep.mubr.msk.f32.mxu0 %vm504_vm0, %v8020_v5  ;;  %v21945_v5 = vld [vmem:[#allocation354_spill] sm:$0xff] }
 0xacb   : > { %v8591_v1 = vmul.f32 %v21945_v5, %v21944_v35  ;;  %v21976_v35 = vld [vmem:[#allocation11_spill] sm:$0xff] }
 0xacd   : > { %13226 = vmatmul.mubr.msk.f32.gmra.mrb[52].mxu0 %vm504_vm0, %v8021_v48  ;;  %v21946_v48 = vld [vmem:[#allocation180_spill] sm:$0xff] }
 0xace   : > { %13228 = vmatprep.mubr.msk.f32.mxu0 %vm504_vm0, %v8022_v4  ;;  %v8592_v4 = vmul.f32 %v21947_v25, %v21946_v48 }
 0xad1   : > { %13229 = vmatmul.mubr.msk.f32.gmra.mrb[54].mxu0 %vm504_vm0, %v8023_v21  ;;  %v21948_v21 = vld [vmem:[#allocation17_spill] sm:$0xff] }
 0xad2   : > { %13231 = vmatprep.mubr.msk.f32.mxu0 %vm504_vm0, %v8024_v10  ;;  %v8593_v10 = vmul.f32 %v21949_v59, %v21948_v21  ;;  %v21979_v59 = vld [vmem:[#allocation69_spill] sm:$0xff] }
 0xad5   : > { %13232 = vmatmul.mubr.msk.f32.gmra.mrb[56].mxu0 %vm504_vm0, %v8025_v46  ;;  %v21951_v46 = vld [vmem:[#allocation360_spill] sm:$0xff] }
 0xad6   : > { %13234 = vmatprep.mubr.msk.f32.mxu0 %vm504_vm0, %v8026_v24  ;;  %v8594_v39 = vmul.f32 %v21951_v46, %v21950_v31  ;;  %v21952_v24 = vld [vmem:[#allocation51_spill] sm:$0xff]  ;;  %v21980_v46 = vld [vmem:[#allocation73_spill] sm:$0xff] }
 0xad9   : > { %13235 = vmatmul.mubr.msk.f32.gmra.mrb[58].mxu0 %vm504_vm0, %v8027_v52  ;;  %v8595_v52 = vmul.f32 %v21953_v60, %v21952_v24  ;;  %v21981_v60 = vld [vmem:[#allocation74_spill] sm:$0xff] }
 0xada   : > { %13237 = vmatprep.mubr.msk.f32.mxu0 %vm504_vm0, %v8028_v49  ;;  %v21954_v49 = vld [vmem:[#allocation52_spill] sm:$0xff] }
 0xadd   : > { %13238 = vmatmul.mubr.msk.f32.gmra.mrb[60].mxu0 %vm504_vm0, %v8029_v38  ;;  %v8596_v38 = vmul.f32 %v21955_v32, %v21954_v49  ;;  %v21982_v49 = vld [vmem:[#allocation46_spill] sm:$0xff] }
 0xade   : > { %13240 = vmatprep.mubr.msk.f32.mxu0 %vm504_vm0, %v8030_v42  ;;  %v21957_v42 = vld [vmem:[#allocation366_spill] sm:$0xff] }
 0xadf   : > { %v8597_v23 = vmul.f32 %v21957_v42, %v21956_v22  ;;  %v21983_v22 = vld [vmem:[#allocation353_spill] sm:$0xff] }
 0xae1   : > { %13241 = vmatmul.mubr.msk.f32.gmra.mrb[62].mxu0 %vm504_vm0, %v8031_v54  ;;  %v21958_v54 = vld [vmem:[#allocation183_spill] sm:$0xff] }
 0xae2   : > { %13243 = vmatprep.mubr.msk.f32.mxu0 %vm504_vm0, %v8032_v11  ;;  %v8598_v11 = vmul.f32 %v21959_v26, %v21958_v54  ;;  %v21984_v54 = vld [vmem:[#allocation77_spill] sm:$0xff] }
 0xae5   : > { %13244 = vmatmul.mubr.msk.f32.gmra.mrb[64].mxu0 %vm504_vm0, %v8033_v19  ;;  %v21960_v19 = vld [vmem:[#allocation53_spill] sm:$0xff] }
 0xae6   : > { %13246 = vmatprep.mubr.msk.f32.mxu0 %vm504_vm0, %v8034_v62  ;;  %v8599_v62 = vmul.f32 %v21961_v55, %v21960_v19 }
 0xae9   : > { %13247 = vmatmul.mubr.msk.f32.gmra.mrb[66].mxu0 %vm504_vm0, %v8035_v9  ;;  %v8600_v9 = vmul.f32 %v21963_v41, %v21962_v13 }
 0xaea   : > { %13249 = vmatprep.mubr.msk.f32.mxu0 %vm504_vm0, %v8036_v47  ;;  %v8559_v47 = vpop.permute.xlu1 %8558 }
 0xaed   : > { %13250 = vmatmul.mubr.msk.f32.gmra.mrb[68].mxu0 %vm504_vm0, %v8037_v6  ;;  %v21966_v6 = vld [vmem:[#allocation59_spill] sm:$0xff] }
 0xaee   : > { %13256 = vmatprep.mubr.msk.f32.mxu0 %vm504_vm0, %v8586_v37  ;;  %v8603_v58 = vmul.f32 %v19676_v33, %v21966_v6  ;;  %v8604_v37 = vmul.f32 %v8519_v30, %v21967_v57  ;;  %v8564_v27 = vpop.permute.xlu1 %8563  ;;  %v8608_v33 = vmul.f32 %v8539_v18, %v21969_v14  ;;  %v21970_v30 = vld [vmem:[#allocation351_spill] sm:$0xff]  ;;  %v21989_v6 = vld [vmem:[#allocation66_spill] sm:$0xff] }
 0xaef   : > { %v8613_v18 = vmul.f32 %v8564_v27, %v21974_v20  ;;  %v21996_v20 = vld [vmem:[#allocation81_spill] sm:$0xff] }
 0xaf1   : > { %13257 = vmatmul.mubr.msk.f32.vlgmr.msra.gmra.mrb[38].mxu0 %vm504_vm0, %v8587_v3  ;;  %v8606_v3 = vmul.f32 %v8529_v17, %v21834_v43  ;;  %v8611_v17 = vmul.f32 %v8554_v12, %v21972_v7  ;;  %v21985_v12 = vld [vmem:[#allocation75_spill] sm:$0xff] }
 0xaf2   : > { %13259 = vmatprep.mubr.msk.f32.mxu0 %vm504_vm0, %v8588_v56  ;;  %v8569_v61 = vpop.permute.xlu1 %8568  ;;  %v8609_v56 = vmul.f32 %v8544_v50, %v21970_v30  ;;  %v21993_v30 = vld [vmem:[#allocation83_spill] sm:$0xff] }
 0xaf5   : > { %13260 = vmatmul.mubr.msk.f32.gmra.mrb[40].mxu0 %vm504_vm0, %v8589_v44  ;;  %v21973_v44 = vld [vmem:[#allocation71_spill] sm:$0xff] }
 0xaf6   : > { %13262 = vmatprep.mubr.msk.f32.mxu0 %vm504_vm0, %v8590_v0  ;;  %v8574_v43 = vpop.permute.xlu1 %8573  ;;  %v8612_v36 = vmul.f32 %v8559_v47, %v21973_v44  ;;  %v8614_v0 = vmul.f32 %v8569_v61, %v21975_v34  ;;  %v21988_v47 = vld [vmem:[#allocation48_spill] sm:$0xff]  ;;  %v21992_v61 = vld [vmem:[#allocation49_spill] sm:$0xff] }
 0xaf7   : > { %v8615_v5 = vmul.f32 %v8574_v43, %v21976_v35  ;;  %v21997_v35 = vld [vmem:[#allocation355_spill] sm:$0xff] }
 0xaf9   : > { %13263 = vmatmul.mubr.msk.f32.gmra.mrb[42].mxu0 %vm504_vm0, %v8591_v1  ;;  %v21977_v1 = vld [vmem:[#allocation175_spill] sm:$0xff] }
 0xafa   : > { %13265 = vmatprep.mubr.msk.f32.mxu0 %vm504_vm0, %v8592_v4  ;;  %v8579_v40 = vpop.permute.xlu1 %8578  ;;  %v21978_v4 = vld [vmem:[#allocation12_spill] sm:$0xff] }
 0xafb   : > { %v8616_v48 = vmul.f32 %v8579_v40, %v21977_v1 }
 0xafd   : > { %13266 = vmatmul.mubr.msk.f32.gmra.mrb[44].mxu0 %vm504_vm0, %v8593_v10 }
 0xafe   : > { %13268 = vmatprep.mubr.msk.f32.mxu0 %vm504_vm0, %v8594_v39  ;;  %v8584_v25 = vpop.permute.xlu1 %8583 }
 0xaff   : > { %v8617_v50 = vmul.f32 %v8584_v25, %v21978_v4 }
 0xb01   : > { %13269 = vmatmul.mubr.msk.f32.gmra.mrb[46].mxu0 %vm504_vm0, %v8595_v52 }
 0xb02   : > { %13271 = vmatprep.mubr.msk.f32.mxu0 %vm504_vm0, %v8596_v38 }
 0xb05   : > { %13272 = vmatmul.mubr.msk.f32.gmra.mrb[48].mxu0 %vm504_vm0, %v8597_v23 }
 0xb06   : > { %13274 = vmatprep.mubr.msk.f32.mxu0 %vm504_vm0, %v8598_v11 }
 0xb09   : > { %13275 = vmatmul.mubr.msk.f32.gmra.mrb[50].mxu0 %vm504_vm0, %v8599_v62  ;;  %v21986_v62 = vld [vmem:[#allocation79_spill] sm:$0xff] }
 0xb0a   : > { %13277 = vmatprep.mubr.msk.f32.mxu0 %vm504_vm0, %v8600_v9  ;;  %v21987_v9 = vld [vmem:[#allocation47_spill] sm:$0xff] }
 0xb0d   : > { %13278 = vmatmul.mubr.msk.f32.gmra.mrb[52].mxu0 %vm504_vm0, %v8601_v15 }
 0xb0e   : > { %13280 = vmatprep.mubr.msk.f32.mxu0 %vm504_vm0, %v8602_v29 }
 0xb11   : > { %13281 = vmatmul.mubr.msk.f32.gmra.mrb[54].mxu0 %vm504_vm0, %v8603_v58 }
 0xb12   : > { %13283 = vmatprep.mubr.msk.f32.mxu0 %vm504_vm0, %v8604_v37  ;;  %v21990_v37 = vld [vmem:[#allocation80_spill] sm:$0xff] }
 0xb15   : > { %13284 = vmatmul.mubr.msk.f32.gmra.mrb[56].mxu0 %vm504_vm0, %v8605_v51  ;;  %v21991_v51 = vld [vmem:[#allocation45_spill] sm:$0xff] }
 0xb16   : > { %13286 = vmatprep.mubr.msk.f32.mxu0 %vm504_vm0, %v8606_v3 }
 0xb19   : > { %13287 = vmatmul.mubr.msk.f32.gmra.mrb[58].mxu0 %vm504_vm0, %v8607_v45 }
 0xb1a   : > { %13289 = vmatprep.mubr.msk.f32.mxu0 %vm504_vm0, %v8608_v33 }
 0xb1d   : > { %13290 = vmatmul.mubr.msk.f32.gmra.mrb[60].mxu0 %vm504_vm0, %v8609_v56 }
 0xb1e   : > { %13292 = vmatprep.mubr.msk.f32.mxu0 %vm504_vm0, %v8610_v2  ;;  %v21994_v2 = vld [vmem:[#allocation50_spill] sm:$0xff] }
 0xb21   : > { %13293 = vmatmul.mubr.msk.f32.gmra.mrb[62].mxu0 %vm504_vm0, %v8611_v17  ;;  %v21995_v17 = vld [vmem:[#allocation85_spill] sm:$0xff] }
 0xb22   : > { %13295 = vmatprep.mubr.msk.f32.mxu0 %vm504_vm0, %v8612_v36 }
 0xb25   : > { %13296 = vmatmul.mubr.msk.f32.gmra.mrb[64].mxu0 %vm504_vm0, %v8613_v18 }
 0xb26   : > { %13298 = vmatprep.mubr.msk.f32.mxu0 %vm504_vm0, %v8614_v0 }
 0xb29   : > { %13299 = vmatmul.mubr.msk.f32.gmra.mrb[66].mxu0 %vm504_vm0, %v8615_v5 }
 0xb2a   : > { %13301 = vmatprep.mubr.msk.f32.mxu0 %vm504_vm0, %v8616_v48  ;;  %v21998_v48 = vld [vmem:[#allocation86_spill] sm:$0xff] }
 0xb2d   : > { %13302 = vmatmul.mubr.msk.f32.gmra.mrb[68].mxu0 %vm504_vm0, %v8617_v50 }
 0xbc4   : > { %v13258_v21 = vpop.f32.mrb[38].mxu0 }
 0xbc5   : > { %v19795_v10 = vadd.f32 %v13258_v21, %v21979_v59  ;;  %v8782_v31 = vpop.f32.mrb[39].mxu0  ;;  %v21999_v59 = vld [vmem:[#allocation345_spill] sm:$0xff] }
 0xbc6   : > { %v19798_v39 = vadd.f32 %v8782_v31, %v21980_v46 }
 0xbc8   : > { %v13261_v24 = vpop.f32.mrb[40].mxu0  ;;  %v13650_v0 = vpack.c.bf16 %v19795_v10, %v19798_v39 }
 0xbc9   : > { %v19801_v52 = vadd.f32 %v13261_v24, %v21981_v60  ;;  %v8792_v63 = vpop.f32.mrb[41].mxu0  ;;  %v22000_v24 = vld [vmem:[#allocation89_spill] sm:$0xff] }
 0xbca   : > { %v19804_v32 = vadd.f32 %v8792_v63, %v21982_v49 }
 0xbcc   : > { %v13264_v38 = vpop.f32.mrb[42].mxu0  ;;  %v13654_v21 = vpack.c.bf16 %v19801_v52, %v19804_v32 }
 0xbcd   : > { %v19807_v42 = vadd.f32 %v13264_v38, %v21983_v22  ;;  %v8802_v23 = vpop.f32.mrb[43].mxu0  ;;  %v22001_v22 = vld [vmem:[#allocation347_spill] sm:$0xff] }
 0xbce   : > { %v19810_v26 = vadd.f32 %v8802_v23, %v21984_v54 }
 0xbd0   : > { %v13267_v11 = vpop.f32.mrb[44].mxu0  ;;  %v13658_v38 = vpack.c.bf16 %v19807_v42, %v19810_v26 }
 0xbd1   : > { %v19813_v19 = vadd.f32 %v13267_v11, %v21985_v12  ;;  %v8812_v55 = vpop.f32.mrb[45].mxu0  ;;  %v22002_v11 = vld [vmem:[#allocation91_spill] sm:$0xff] }
 0xbd2   : > { %v19816_v13 = vadd.f32 %v8812_v55, %v21986_v62 }
 0xbd4   : > { %v13270_v41 = vpop.f32.mrb[46].mxu0 }
 0xbd5   : > { %v19819_v16 = vadd.f32 %v13270_v41, %v21987_v9  ;;  %v8822_v15 = vpop.f32.mrb[47].mxu0  ;;  %v13662_v41 = vpack.c.bf16 %v19813_v19, %v19816_v13  ;;  %v22003_v9 = vld [vmem:[#allocation58_spill] sm:$0xff] }
 0xbd6   : > { %v19822_v8 = vadd.f32 %v8822_v15, %v21988_v47 }
 0xbd8   : > { %v13273_v29 = vpop.f32.mrb[48].mxu0 }
 0xbd9   : > { %v19825_v58 = vadd.f32 %v13273_v29, %v21989_v6  ;;  %v8832_v57 = vpop.f32.mrb[49].mxu0  ;;  %v22004_v29 = vld [vmem:[#allocation60_spill] sm:$0xff] }
 0xbda   : > { %v19828_v27 = vadd.f32 %v8832_v57, %v21990_v37 }
 0xbdc   : > { %v13276_v28 = vpop.f32.mrb[50].mxu0 }
 0xbdd   : > { %v19831_v3 = vadd.f32 %v13276_v28, %v21991_v51  ;;  %v8842_v45 = vpop.f32.mrb[51].mxu0  ;;  %v13666_v28 = vpack.c.bf16 %v19819_v16, %v19822_v8  ;;  %v22005_v51 = vld [vmem:[#allocation92_spill] sm:$0xff] }
 0xbde   : > { %v19834_v14 = vadd.f32 %v8842_v45, %v21992_v61 }
 0xbe0   : > { %v13279_v33 = vpop.f32.mrb[52].mxu0 }
 0xbe1   : > { %v19837_v56 = vadd.f32 %v13279_v33, %v21993_v30  ;;  %v8852_v53 = vpop.f32.mrb[53].mxu0  ;;  %v22006_v33 = vld [vmem:[#allocation87_spill] sm:$0xff] }
 0xbe2   : > { %v19840_v43 = vadd.f32 %v8852_v53, %v21994_v2 }
 0xbe4   : > { %v13282_v7 = vpop.f32.mrb[54].mxu0 }
 0xbe5   : > { %v19843_v44 = vadd.f32 %v13282_v7, %v21995_v17  ;;  %v8862_v36 = vpop.f32.mrb[55].mxu0  ;;  %v13670_v7 = vpack.c.bf16 %v19825_v58, %v19828_v27  ;;  %v22007_v17 = vld [vmem:[#allocation64_spill] sm:$0xff] }
 0xbe6   : > { %v19846_v18 = vadd.f32 %v8862_v36, %v21996_v20 }
 0xbe8   : > { %v13648_v40 = vpack.c.bf16 %v19843_v44, %v19846_v18  ;;  %v13285_v34 = vpop.f32.mrb[56].mxu0 }
 0xbe9   : > { %v19853_v5 = vadd.f32 %v13285_v34, %v21997_v35  ;;  %v8872_v1 = vpop.f32.mrb[57].mxu0 }
 0xbea   : > { %v19856_v25 = vadd.f32 %v8872_v1, %v21998_v48  ;;  %13649 = vmatprep.subr.bf16.mxu1 %v13648_v40  ;;  %v22008_v40 = vld [vmem:[#allocation357_spill] sm:$0xff]  ;;  %v13674_v1 = vpack.c.bf16 %v19831_v3, %v19834_v14  ;;  %v22009_v48 = vld [vmem:[#allocation95_spill] sm:$0xff] }
 0xbeb   : > { %13651 = vmatpush3.bf16.msra.mxu1 %v13650_v0 }
 0xbec   : > { %v13652_v4 = vpack.c.bf16 %v19853_v5, %v19856_v25  ;;  %v13288_v50 = vpop.f32.mrb[58].mxu0 }
 0xbed   : > { %v19863_v31 = vadd.f32 %v13288_v50, %v21999_v59  ;;  %v8882_v46 = vpop.f32.mrb[59].mxu0 }
 0xbee   : > { %v19866_v60 = vadd.f32 %v8882_v46, %v22000_v24  ;;  %13653 = vmatprep.subr.bf16.mxu1 %v13652_v4  ;;  %v13678_v24 = vpack.c.bf16 %v19837_v56, %v19840_v43 }
 0xbef   : > { %13655 = vmatpush3.bf16.msra.mxu1 %v13654_v21  ;;  %v22010_v21 = vld [vmem:[#allocation93_spill] sm:$0xff] }
 0xbf0   : > { %v13656_v63 = vpack.c.bf16 %v19863_v31, %v19866_v60  ;;  %v13291_v49 = vpop.f32.mrb[60].mxu0 }
 0xbf1   : > { %v19873_v23 = vadd.f32 %v13291_v49, %v22001_v22  ;;  %v8892_v54 = vpop.f32.mrb[61].mxu0  ;;  %v19931_v49 = vld [vmem:[%s20777_s6 + $0x18] sm:$0xff]  ;;  %v19943_v22 = vld [vmem:[%s20776_s5] sm:$0xff] }
 0xbf2   : > { %v19876_v12 = vadd.f32 %v8892_v54, %v22002_v11  ;;  %13657 = vmatprep.subr.bf16.mxu1 %v13656_v63  ;;  %v19925_v63 = vld [vmem:[%s20777_s6] sm:$0xff] }
 0xbf3   : > { %13659 = vmatpush3.bf16.msra.mxu1 %v13658_v38  ;;  %v19937_v38 = vld [vmem:[%s20777_s6 + $0x10] sm:$0xff] }
 0xbf4   : > { %v13660_v55 = vpack.c.bf16 %v19873_v23, %v19876_v12  ;;  %v13294_v62 = vpop.f32.mrb[62].mxu0 }
 0xbf5   : > { %v19883_v15 = vadd.f32 %v13294_v62, %v22003_v9  ;;  %v8902_v47 = vpop.f32.mrb[63].mxu0 }
 0xbf6   : > { %v19886_v6 = vadd.f32 %v8902_v47, %v22004_v29  ;;  %13661 = vmatprep.subr.bf16.mxu1 %v13660_v55  ;;  %v19950_v29 = vld [vmem:[%s20776_s5 + $0x8] sm:$0xff] }
 0xbf7   : > { %13663 = vmatpush3.bf16.msra.mxu1 %v13662_v41 }
 0xbf8   : > { %v13664_v57 = vpack.c.bf16 %v19883_v15, %v19886_v6  ;;  %v13297_v37 = vpop.f32.mrb[64].mxu0 }
 0xbf9   : > { %v19893_v45 = vadd.f32 %v13297_v37, %v22005_v51  ;;  %v8912_v61 = vpop.f32.mrb[65].mxu0  ;;  %v19964_v37 = vld [vmem:[%s20776_s5 + $0x18] sm:$0xff]  ;;  %v19978_v51 = vld [vmem:[%s20776_s5 + $0x28] sm:$0xff] }
 0xbfa   : > { %v19896_v30 = vadd.f32 %v8912_v61, %v22006_v33  ;;  %13665 = vmatprep.subr.bf16.mxu1 %v13664_v57  ;;  %v19957_v57 = vld [vmem:[%s20776_s5 + $0x10] sm:$0xff]  ;;  %22012 = vst [vmem:[#allocation184_spill] sm:$0xff] %v19964_v37  ;;  %22014 = vst [vmem:[#allocation97_spill] sm:$0xff] %v19978_v51  ;;  %v19992_v33 = vld [vmem:[%s20776_s5 + $0x38] sm:$0xff] }
 0xbfb   : > { %13667 = vmatpush3.bf16.msra.mxu1 %v13666_v28  ;;  %22011 = vst [vmem:[#allocation20_spill] sm:$0xff] %v19957_v57  ;;  %v19971_v28 = vld [vmem:[%s20776_s5 + $0x20] sm:$0xff]  ;;  %v19985_v61 = vld [vmem:[%s20776_s5 + $0x30] sm:$0xff]  ;;  %22016 = vst [vmem:[#allocation72_spill] sm:$0xff] %v19992_v33 }
 0xbfc   : > { %v13668_v53 = vpack.c.bf16 %v19893_v45, %v19896_v30  ;;  %v13300_v2 = vpop.f32.mrb[66].mxu0  ;;  %22013 = vst [vmem:[#allocation70_spill] sm:$0xff] %v19971_v28  ;;  %22015 = vst [vmem:[#allocation98_spill] sm:$0xff] %v19985_v61 }
 0xbfd   : > { %v19903_v36 = vadd.f32 %v13300_v2, %v22007_v17  ;;  %v8922_v20 = vpop.f32.mrb[67].mxu0  ;;  %v20006_v2 = vld [vmem:[%s20776_s5 + $0x48] sm:$0xff]  ;;  %v20020_v17 = vld [vmem:[%s20776_s5 + $0x58] sm:$0xff] }
 0xbfe   : > { %v19906_v34 = vadd.f32 %v8922_v20, %v22008_v40  ;;  %13669 = vmatprep.subr.bf16.mxu1 %v13668_v53  ;;  %v19999_v53 = vld [vmem:[%s20776_s5 + $0x40] sm:$0xff]  ;;  %22018 = vst [vmem:[#allocation76_spill] sm:$0xff] %v20006_v2  ;;  %22020 = vst [vmem:[#allocation101_spill] sm:$0xff] %v20020_v17  ;;  %v20034_v40 = vld [vmem:[%s20776_s5 + $0x68] sm:$0xff] }
 0xbff   : > { %13671 = vmatpush3.bf16.msra.mxu1 %v13670_v7  ;;  %22017 = vst [vmem:[#allocation359_spill] sm:$0xff] %v19999_v53  ;;  %v20013_v7 = vld [vmem:[%s20776_s5 + $0x50] sm:$0xff]  ;;  %v20027_v20 = vld [vmem:[%s20776_s5 + $0x60] sm:$0xff]  ;;  %22022 = vst [vmem:[#allocation363_spill] sm:$0xff] %v20034_v40 }
 0xc00   : > { %v13672_v0 = vpack.c.bf16 %v19903_v36, %v19906_v34  ;;  %v13303_v35 = vpop.f32.mrb[68].mxu0  ;;  %22019 = vst [vmem:[#allocation361_spill] sm:$0xff] %v20013_v7  ;;  %22021 = vst [vmem:[#allocation78_spill] sm:$0xff] %v20027_v20 }
 0xc01   : > { %v19913_v4 = vadd.f32 %v13303_v35, %v22009_v48  ;;  %v8932_v50 = vpop.f32.mrb[69].mxu0  ;;  %v20048_v35 = vld [vmem:[%s20776_s5 + $0x78] sm:$0xff]  ;;  %v20062_v48 = vld [vmem:[%s20776_s5 + $0x88] sm:$0xff] }
 0xc02   : > { %v19916_v59 = vadd.f32 %v8932_v50, %v22010_v21  ;;  %13673 = vmatprep.subr.bf16.mxu1 %v13672_v0  ;;  %v20041_v0 = vld [vmem:[%s20776_s5 + $0x70] sm:$0xff]  ;;  %22024 = vst [vmem:[#allocation365_spill] sm:$0xff] %v20048_v35  ;;  %22026 = vst [vmem:[#allocation104_spill] sm:$0xff] %v20062_v48  ;;  %v20076_v21 = vld [vmem:[%s20776_s5 + $0x98] sm:$0xff] }
 0xc03   : > { %13675 = vmatpush3.bf16.msra.mxu1 %v13674_v1  ;;  %22023 = vst [vmem:[#allocation82_spill] sm:$0xff] %v20041_v0  ;;  %v20055_v1 = vld [vmem:[%s20776_s5 + $0x80] sm:$0xff]  ;;  %v20069_v50 = vld [vmem:[%s20776_s5 + $0x90] sm:$0xff]  ;;  %22028 = vst [vmem:[#allocation367_spill] sm:$0xff] %v20076_v21 }
 0xc04   : > { %v13676_v46 = vpack.c.bf16 %v19913_v4, %v19916_v59  ;;  %22025 = vst [vmem:[#allocation99_spill] sm:$0xff] %v20055_v1  ;;  %22027 = vst [vmem:[#allocation84_spill] sm:$0xff] %v20069_v50 }
 0xc06   : > { %13677 = vmatprep.subr.bf16.mxu1 %v13676_v46  ;;  %v20083_v46 = vld [vmem:[%s20776_s5 + $0xa0] sm:$0xff] }
 0xc07   : > { %13679 = vmatpush3.bf16.msra.mxu1 %v13678_v24  ;;  %22029 = vst [vmem:[#allocation88_spill] sm:$0xff] %v20083_v46  ;;  %v20090_v24 = vld [vmem:[%s20776_s5 + $0xa8] sm:$0xff] }
 0xc08   : > { %22030 = vst [vmem:[#allocation370_spill] sm:$0xff] %v20090_v24 }
 0xc0a   : > { %9038 = vmatmul.mubr.f32.vlgmr.msra.gmra.mrb[202].mxu1 %v19925_v63 }
 0xc0b   : > { %9042 = vmatprep.mubr.f32.mxu1 %v19931_v49 }
 0xc0e   : > { %9043 = vmatmul.mubr.f32.gmra.mrb[204].mxu1 %v19937_v38 }
 0xc0f   : > { %13308 = vmatprep.mubr.msk.f32.mxu1 %vm504_vm0, %v19943_v22 }
 0xcdd   : > { %v12378_v54 = vpop.f32.mrb[202].mxu1 }
 0xcde   : > { %v12379_v11 = vpop.f32.mrb[203].mxu1 }
 0xcdf   : > { %v12380_v55 = vadd.f32 %v12379_v11, %v12378_v54  ;;  %v20097_v54 = vld [vmem:[%s20776_s5 + $0xb0] sm:$0xff]  ;;  %v20104_v11 = vld [vmem:[%s20776_s5 + $0xb8] sm:$0xff] }
 0xce0   : > { %22031 = vst [vmem:[#allocation103_spill] sm:$0xff] %v20097_v54  ;;  %22032 = vst [vmem:[#allocation105_spill] sm:$0xff] %v20104_v11 }
 0xce1   : > { %v12381_v62 = vpop.f32.mrb[204].mxu1 }
 0xce2   : > { %v12382_v41 = vpop.f32.mrb[205].mxu1 }
 0xce3   : > { %v12383_v9 = vadd.f32 %v12382_v41, %v12381_v62  ;;  %v20118_v62 = vld [vmem:[%s20776_s5 + $0xc8] sm:$0xff]  ;;  %v20125_v41 = vld [vmem:[%s20776_s5 + $0xd0] sm:$0xff] }
 0xce4   : > { %22034 = vst [vmem:[#allocation90_spill] sm:$0xff] %v20118_v62  ;;  %22035 = vst [vmem:[#allocation372_spill] sm:$0xff] %v20125_v41 }
 0xce5   : > { %v13680_v47 = vpack.c.bf16 %v12383_v9, %v12380_v55  ;;  %v20111_v55 = vld [vmem:[%s20776_s5 + $0xc0] sm:$0xff]  ;;  %v20132_v9 = vld [vmem:[%s20776_s5 + $0xd8] sm:$0xff] }
 0xce6   : > { %22033 = vst [vmem:[#allocation109_spill] sm:$0xff] %v20111_v55  ;;  %22036 = vst [vmem:[#allocation94_spill] sm:$0xff] %v20132_v9 }
 0xce7   : > { %13681 = vmatprep.subr.bf16.mxu1 %v13680_v47 }
 0xce8   : > { %13683 = vmatpush3.bf16.msra.mxu1 %v13680_v47  ;;  %v20139_v47 = vld [vmem:[%s20776_s5 + $0xe0] sm:$0xff] }
 0xce9   : > { %22037 = vst [vmem:[#allocation110_spill] sm:$0xff] %v20139_v47 }
 0xceb   : > { %13309 = vmatmul.mubr.msk.f32.vlgmr.msra.gmra.mrb[206].mxu1 %vm504_vm0, %v19950_v29 }
 0xcec   : > { %13311 = vmatprep.mubr.msk.f32.mxu1 %vm504_vm0, %v19957_v57 }
 0xcef   : > { %13312 = vmatmul.mubr.msk.f32.gmra.mrb[208].mxu1 %vm504_vm0, %v19964_v37 }
 0xcf0   : > { %13314 = vmatprep.mubr.msk.f32.mxu1 %vm504_vm0, %v19971_v28 }
 0xcf3   : > { %13315 = vmatmul.mubr.msk.f32.gmra.mrb[210].mxu1 %vm504_vm0, %v19978_v51 }
 0xcf4   : > { %13317 = vmatprep.mubr.msk.f32.mxu1 %vm504_vm0, %v19985_v61 }
 0xcf7   : > { %13318 = vmatmul.mubr.msk.f32.gmra.mrb[212].mxu1 %vm504_vm0, %v19992_v33 }
 0xcf8   : > { %13320 = vmatprep.mubr.msk.f32.mxu1 %vm504_vm0, %v19999_v53 }
 0xcfb   : > { %13321 = vmatmul.mubr.msk.f32.gmra.mrb[214].mxu1 %vm504_vm0, %v20006_v2 }
 0xcfc   : > { %13323 = vmatprep.mubr.msk.f32.mxu1 %vm504_vm0, %v20013_v7 }
 0xcff   : > { %13324 = vmatmul.mubr.msk.f32.gmra.mrb[216].mxu1 %vm504_vm0, %v20020_v17 }
 0xd00   : > { %13326 = vmatprep.mubr.msk.f32.mxu1 %vm504_vm0, %v20027_v20 }
 0xd03   : > { %13327 = vmatmul.mubr.msk.f32.gmra.mrb[218].mxu1 %vm504_vm0, %v20034_v40 }
 0xd04   : > { %13329 = vmatprep.mubr.msk.f32.mxu1 %vm504_vm0, %v20041_v0 }
 0xd07   : > { %13330 = vmatmul.mubr.msk.f32.gmra.mrb[220].mxu1 %vm504_vm0, %v20048_v35 }
 0xd08   : > { %13332 = vmatprep.mubr.msk.f32.mxu1 %vm504_vm0, %v20055_v1 }
 0xd0b   : > { %13333 = vmatmul.mubr.msk.f32.gmra.mrb[222].mxu1 %vm504_vm0, %v20062_v48 }
 0xd0c   : > { %13335 = vmatprep.mubr.msk.f32.mxu1 %vm504_vm0, %v20069_v50 }
 0xd0f   : > { %13336 = vmatmul.mubr.msk.f32.gmra.mrb[224].mxu1 %vm504_vm0, %v20076_v21 }
 0xd10   : > { %13338 = vmatprep.mubr.msk.f32.mxu1 %vm504_vm0, %v20083_v46 }
 0xd13   : > { %13339 = vmatmul.mubr.msk.f32.gmra.mrb[226].mxu1 %vm504_vm0, %v20090_v24 }
 0xd14   : > { %13341 = vmatprep.mubr.msk.f32.mxu1 %vm504_vm0, %v20097_v54 }
 0xd17   : > { %13342 = vmatmul.mubr.msk.f32.gmra.mrb[228].mxu1 %vm504_vm0, %v20104_v11 }
 0xd18   : > { %13344 = vmatprep.mubr.msk.f32.mxu1 %vm504_vm0, %v20111_v55 }
 0xd1b   : > { %13345 = vmatmul.mubr.msk.f32.gmra.mrb[230].mxu1 %vm504_vm0, %v20118_v62 }
 0xd1c   : > { %13347 = vmatprep.mubr.msk.f32.mxu1 %vm504_vm0, %v20125_v41  ;;  %v20146_v41 = vld [vmem:[%s20776_s5 + $0xe8] sm:$0xff] }
 0xd1d   : > { %22038 = vst [vmem:[#allocation374_spill] sm:$0xff] %v20146_v41 }
 0xd1f   : > { %13348 = vmatmul.mubr.msk.f32.gmra.mrb[232].mxu1 %vm504_vm0, %v20132_v9  ;;  %v20153_v9 = vld [vmem:[%s20776_s5 + $0xf0] sm:$0xff] }
 0xd20   : > { %13350 = vmatprep.mubr.msk.f32.mxu1 %vm504_vm0, %v20139_v47  ;;  %22039 = vst [vmem:[#allocation107_spill] sm:$0xff] %v20153_v9  ;;  %v20160_v47 = vld [vmem:[%s20776_s5 + $0xf8] sm:$0xff] }
 0xd21   : > { %22040 = vst [vmem:[#allocation21_spill] sm:$0xff] %v20160_v47 }
 0xd23   : > { %13351 = vmatmul.mubr.msk.f32.gmra.mrb[234].mxu1 %vm504_vm0, %v20146_v41  ;;  %v14390_v41 = vld [vmem:[%s20777_s6 + $0x8] sm:$0xff] }
 0xd24   : > { %13353 = vmatprep.mubr.msk.f32.mxu1 %vm504_vm0, %v20153_v9 }
 0xd27   : > { %13354 = vmatmul.mubr.msk.f32.gmra.mrb[236].mxu1 %vm504_vm0, %v20160_v47 }
 0xd28   : > { %9433 = vmatprep.mubr.f32.mxu1 %v14390_v41 }
 0xdbe   : > { %v13310_v62 = vpop.f32.mrb[206].mxu1 }
 0xdbf   : > { %v9114_v55 = vpop.f32.mrb[207].mxu1  ;;  %v9274_v40 = vmul.f32 0.0625, %v13310_v62 }
 0xdc0   : > { %v9273_v41 = vmul.f32 0.0625, %v9114_v55 }
 0xdc1   : > { %v20180_v7 = vsub.f32 %v19795_v10, %v9274_v40 }
 0xdc2   : > { %v13313_v11 = vpop.f32.mrb[208].mxu1  ;;  %v20183_v2 = vsub.f32 %v19798_v39, %v9273_v41 }
 0xdc3   : > { %v9124_v54 = vpop.f32.mrb[209].mxu1  ;;  %v9276_v53 = vmul.f32 0.0625, %v13313_v11  ;;  %v9338_v37 = vmul.f32 %v20180_v7, %v20180_v7 }
 0xdc4   : > { %22041 = vst [vmem:[#allocation116_spill] sm:$0xff] %v20183_v2  ;;  %v9275_v33 = vmul.f32 0.0625, %v9124_v54  ;;  %v9337_v55 = vmul.f32 %v20183_v2, %v20183_v2 }
 0xdc5   : > { %v20190_v57 = vsub.f32 %v19801_v52, %v9276_v53 }
 0xdc6   : > { %v13316_v24 = vpop.f32.mrb[210].mxu1  ;;  %v20193_v10 = vsub.f32 %v19804_v32, %v9275_v33  ;;  %v13686_v32 = vpack.c.bf16 %v9338_v37, %v9337_v55 }
 0xdc7   : > { %v9134_v46 = vpop.f32.mrb[211].mxu1  ;;  %v9278_v40 = vmul.f32 0.0625, %v13316_v24 }
 0xdc8   : > { %v9277_v54 = vmul.f32 0.0625, %v9134_v46 }
 0xdc9   : > { %v20213_v33 = vsub.f32 %v19807_v42, %v9278_v40 }
 0xdca   : > { %v13319_v9 = vpop.f32.mrb[212].mxu1  ;;  %v20216_v46 = vsub.f32 %v19810_v26, %v9277_v54 }
 0xdcb   : > { %v9144_v21 = vpop.f32.mrb[213].mxu1 }
 0xdcc   : > { %v9279_v55 = vmul.f32 0.0625, %v9144_v21  ;;  %v9342_v21 = vmul.f32 %v20213_v33, %v20213_v33 }
 0xdce   : > { %v13322_v50 = vpop.f32.mrb[214].mxu1 }
 0xdcf   : > { %v9154_v48 = vpop.f32.mrb[215].mxu1 }
 0xdd0   : > { %v9281_v54 = vmul.f32 0.0625, %v9154_v48  ;;  %v20239_v48 = vsub.f32 %v19816_v13, %v9279_v55 }
 0xdd2   : > { %v20167_v1 = vpop.f32.mrb[216].mxu1 }
 0xdd3   : > { %v20169_v35 = vpop.f32.mrb[217].mxu1 }
 0xdd4   : > { %v9283_v13 = vmul.f32 0.0625, %v20169_v35 }
 0xdd6   : > { %v20171_v47 = vpop.f32.mrb[218].mxu1 }
 0xdd7   : > { %v20173_v0 = vpop.f32.mrb[219].mxu1 }
 0xdda   : > { %v20175_v20 = vpop.f32.mrb[220].mxu1 }
 0xddb   : > { %v20177_v17 = vpop.f32.mrb[221].mxu1 }
 0xdde   : > { %v13334_v61 = vpop.f32.mrb[222].mxu1 }
 0xddf   : > { %v9290_v51 = vmul.f32 0.0625, %v13334_v61  ;;  %v9194_v28 = vpop.f32.mrb[223].mxu1 }
 0xde0   : > { %v9289_v62 = vmul.f32 0.0625, %v9194_v28 }
 0xde1   : > { %v20196_v39 = vsub.f32 %v19843_v44, %v9290_v51  ;;  %v9340_v44 = vmul.f32 %v20190_v57, %v20190_v57  ;;  %v9339_v51 = vmul.f32 %v20193_v10, %v20193_v10 }
 0xde2   : > { %v20199_v61 = vsub.f32 %v19846_v18, %v9289_v62  ;;  %v13337_v11 = vpop.f32.mrb[224].mxu1  ;;  %v9280_v62 = vmul.f32 0.0625, %v13319_v9  ;;  %v9341_v9 = vmul.f32 %v20216_v46, %v20216_v46 }
 0xde3   : > { %22042 = vst [vmem:[#allocation113_spill] sm:$0xff] %v20196_v39  ;;  %v9354_v28 = vmul.f32 %v20196_v39, %v20196_v39  ;;  %v9292_v41 = vmul.f32 0.0625, %v13337_v11  ;;  %v9204_v2 = vpop.f32.mrb[225].mxu1  ;;  %v13690_v26 = vpack.c.bf16 %v9340_v44, %v9339_v51  ;;  %v20249_v44 = vsub.f32 %v19822_v8, %v9281_v54 }
 0xde4   : > { %22043 = vst [vmem:[#allocation23_spill] sm:$0xff] %v20199_v61  ;;  %v9353_v52 = vmul.f32 %v20199_v61, %v20199_v61  ;;  %v9291_v53 = vmul.f32 0.0625, %v9204_v2  ;;  %v9343_v8 = vmul.f32 %v20239_v48, %v20239_v48 }
 0xde5   : > { %v20210_v18 = vsub.f32 %v19853_v5, %v9292_v41  ;;  %v9282_v5 = vmul.f32 0.0625, %v13322_v50 }
 0xde6   : > { %v20219_v24 = vsub.f32 %v19856_v25, %v9291_v53  ;;  %v13340_v2 = vpop.f32.mrb[226].mxu1  ;;  %v13684_v37 = vpack.c.bf16 %v9354_v28, %v9353_v52 }
 0xde7   : > { %22044 = vst [vmem:[#allocation96_spill] sm:$0xff] %v20210_v18  ;;  %v9356_v11 = vmul.f32 %v20210_v18, %v20210_v18  ;;  %v9294_v61 = vmul.f32 0.0625, %v13340_v2  ;;  %v9214_v39 = vpop.f32.mrb[227].mxu1  ;;  %v20244_v53 = vsub.f32 %v19819_v16, %v9282_v5  ;;  %v13694_v2 = vpack.c.bf16 %v9342_v21, %v9341_v9 }
 0xde8   : > { %22045 = vst [vmem:[#allocation25_spill] sm:$0xff] %v20219_v24  ;;  %v9355_v42 = vmul.f32 %v20219_v24, %v20219_v24  ;;  %v9293_v40 = vmul.f32 0.0625, %v9214_v39  ;;  %13685 = vmatprep.subr.bf16.mxu1 %v13684_v37  ;;  %v20236_v39 = vsub.f32 %v19813_v19, %v9280_v62  ;;  %v9284_v19 = vmul.f32 0.0625, %v20167_v1 }
 0xde9   : > { %v20226_v25 = vsub.f32 %v19863_v31, %v9294_v61  ;;  %13687 = vmatpush3.bf16.msra.mxu1 %v13686_v32  ;;  %v9286_v21 = vmul.f32 0.0625, %v20171_v47  ;;  %v9285_v9 = vmul.f32 0.0625, %v20173_v0 }
 0xdea   : > { %v20233_v28 = vsub.f32 %v19866_v60, %v9293_v40  ;;  %v13343_v50 = vpop.f32.mrb[228].mxu1  ;;  %v13688_v41 = vpack.c.bf16 %v9356_v11, %v9355_v42  ;;  %v9344_v55 = vmul.f32 %v20236_v39, %v20236_v39  ;;  %v9345_v42 = vmul.f32 %v20249_v44, %v20249_v44 }
 0xdeb   : > { %22046 = vst [vmem:[#allocation100_spill] sm:$0xff] %v20226_v25  ;;  %v9358_v31 = vmul.f32 %v20226_v25, %v20226_v25  ;;  %v9296_v61 = vmul.f32 0.0625, %v13343_v50  ;;  %v9224_v52 = vpop.f32.mrb[229].mxu1  ;;  %v20272_v40 = vsub.f32 %v19825_v58, %v9284_v19  ;;  %v20297_v19 = vsub.f32 %v19831_v3, %v9286_v21 }
 0xdec   : > { %22047 = vst [vmem:[#allocation111_spill] sm:$0xff] %v20233_v28  ;;  %v9357_v60 = vmul.f32 %v20233_v28, %v20233_v28  ;;  %v9295_v32 = vmul.f32 0.0625, %v9224_v52  ;;  %13689 = vmatprep.subr.bf16.mxu1 %v13688_v41 }
 0xded   : > { %v20254_v51 = vsub.f32 %v19873_v23, %v9296_v61  ;;  %13691 = vmatpush3.bf16.msra.mxu1 %v13690_v26  ;;  %v9346_v23 = vmul.f32 %v20244_v53, %v20244_v53  ;;  %v20275_v26 = vsub.f32 %v19828_v27, %v9283_v13  ;;  %v13698_v61 = vpack.c.bf16 %v9344_v55, %v9343_v8 }
 0xdee   : > { %v20257_v16 = vsub.f32 %v19876_v12, %v9295_v32  ;;  %v13346_v37 = vpop.f32.mrb[230].mxu1  ;;  %v13692_v62 = vpack.c.bf16 %v9358_v31, %v9357_v60  ;;  %v9348_v0 = vmul.f32 %v20272_v40, %v20272_v40  ;;  %v20300_v13 = vsub.f32 %v19834_v14, %v9285_v9 }
 0xdef   : > { %22048 = vst [vmem:[#allocation26_spill] sm:$0xff] %v20254_v51  ;;  %v9360_v1 = vmul.f32 %v20254_v51, %v20254_v51  ;;  %v9298_v35 = vmul.f32 0.0625, %v13346_v37  ;;  %v9234_v11 = vpop.f32.mrb[231].mxu1  ;;  %v13702_v32 = vpack.c.bf16 %v9346_v23, %v9345_v42  ;;  %v9288_v55 = vmul.f32 0.0625, %v20175_v20 }
 0xdf0   : > { %22049 = vst [vmem:[#allocation115_spill] sm:$0xff] %v20257_v16  ;;  %v9359_v12 = vmul.f32 %v20257_v16, %v20257_v16  ;;  %v9297_v5 = vmul.f32 0.0625, %v9234_v11  ;;  %13693 = vmatprep.subr.bf16.mxu1 %v13692_v62  ;;  %v9287_v8 = vmul.f32 0.0625, %v20177_v17  ;;  %v9350_v20 = vmul.f32 %v20297_v19, %v20297_v19 }
 0xdf1   : > { %v20278_v54 = vsub.f32 %v19883_v15, %v9298_v35  ;;  %13695 = vmatpush3.bf16.msra.mxu1 %v13694_v2  ;;  %v9349_v17 = vmul.f32 %v20300_v13, %v20300_v13  ;;  %v20322_v42 = vsub.f32 %v19837_v56, %v9288_v55 }
 0xdf2   : > { %v20283_v50 = vsub.f32 %v19886_v6, %v9297_v5  ;;  %v13349_v41 = vpop.f32.mrb[232].mxu1  ;;  %v13696_v31 = vpack.c.bf16 %v9360_v1, %v9359_v12  ;;  %v9347_v6 = vmul.f32 %v20275_v26, %v20275_v26  ;;  %v20325_v21 = vsub.f32 %v19840_v43, %v9287_v8 }
 0xdf3   : > { %22050 = vst [vmem:[#allocation117_spill] sm:$0xff] %v20278_v54  ;;  %v9362_v58 = vmul.f32 %v20278_v54, %v20278_v54  ;;  %v9300_v52 = vmul.f32 0.0625, %v13349_v41  ;;  %v9244_v27 = vpop.f32.mrb[233].mxu1  ;;  %v13710_v43 = vpack.c.bf16 %v9350_v20, %v9349_v17  ;;  %v22069_v20 = vld [vmem:[#allocation363_spill] sm:$0xff]  ;;  %v22070_v17 = vld [vmem:[#allocation82_spill] sm:$0xff] }
 0xdf4   : > { %22051 = vst [vmem:[#allocation22_spill] sm:$0xff] %v20283_v50  ;;  %v9361_v15 = vmul.f32 %v20283_v50, %v20283_v50  ;;  %v9299_v60 = vmul.f32 0.0625, %v9244_v27  ;;  %13697 = vmatprep.subr.bf16.mxu1 %v13696_v31  ;;  %v13706_v14 = vpack.c.bf16 %v9348_v0, %v9347_v6  ;;  %v9351_v27 = vmul.f32 %v20325_v21, %v20325_v21 }
 0xdf5   : > { %v20294_v47 = vsub.f32 %v19893_v45, %v9300_v52  ;;  %13699 = vmatpush3.bf16.msra.mxu1 %v13698_v61  ;;  %v9352_v52 = vmul.f32 %v20322_v42, %v20322_v42 }
 0xdf6   : > { %v20303_v2 = vsub.f32 %v19896_v30, %v9299_v60  ;;  %v13352_v37 = vpop.f32.mrb[234].mxu1  ;;  %v13700_v62 = vpack.c.bf16 %v9362_v58, %v9361_v15 }
 0xdf7   : > { %22052 = vst [vmem:[#allocation122_spill] sm:$0xff] %v20294_v47  ;;  %v9364_v45 = vmul.f32 %v20294_v47, %v20294_v47  ;;  %v9302_v1 = vmul.f32 0.0625, %v13352_v37  ;;  %v9254_v35 = vpop.f32.mrb[235].mxu1 }
 0xdf8   : > { %22053 = vst [vmem:[#allocation24_spill] sm:$0xff] %v20303_v2  ;;  %v9363_v3 = vmul.f32 %v20303_v2, %v20303_v2  ;;  %v9301_v11 = vmul.f32 0.0625, %v9254_v35  ;;  %13701 = vmatprep.subr.bf16.mxu1 %v13700_v62  ;;  %v22064_v35 = vld [vmem:[#allocation359_spill] sm:$0xff] }
 0xdf9   : > { %v20312_v30 = vsub.f32 %v19903_v36, %v9302_v1  ;;  %13703 = vmatpush3.bf16.msra.mxu1 %v13702_v32  ;;  %v13714_v32 = vpack.c.bf16 %v9352_v52, %v9351_v27  ;;  %v22063_v1 = vld [vmem:[#allocation72_spill] sm:$0xff]  ;;  %v22080_v52 = vld [vmem:[#allocation109_spill] sm:$0xff]  ;;  %v22081_v27 = vld [vmem:[#allocation90_spill] sm:$0xff] }
 0xdfa   : > { %v20319_v23 = vsub.f32 %v19906_v34, %v9301_v11  ;;  %v13355_v12 = vpop.f32.mrb[236].mxu1  ;;  %v13704_v5 = vpack.c.bf16 %v9364_v45, %v9363_v3  ;;  %v22062_v45 = vld [vmem:[#allocation98_spill] sm:$0xff]  ;;  %v22066_v3 = vld [vmem:[#allocation361_spill] sm:$0xff] }
 0xdfb   : > { %22054 = vst [vmem:[#allocation102_spill] sm:$0xff] %v20312_v30  ;;  %v9366_v36 = vmul.f32 %v20312_v30, %v20312_v30  ;;  %v9304_v9 = vmul.f32 0.0625, %v13355_v12  ;;  %v9264_v41 = vpop.f32.mrb[237].mxu1  ;;  %v22067_v11 = vld [vmem:[#allocation101_spill] sm:$0xff] }
 0xdfc   : > { %22055 = vst [vmem:[#allocation106_spill] sm:$0xff] %v20319_v23  ;;  %v9365_v31 = vmul.f32 %v20319_v23, %v20319_v23  ;;  %v9303_v61 = vmul.f32 0.0625, %v9264_v41  ;;  %13705 = vmatprep.subr.bf16.mxu1 %v13704_v5  ;;  %v22071_v12 = vld [vmem:[#allocation365_spill] sm:$0xff]  ;;  %v22072_v5 = vld [vmem:[#allocation99_spill] sm:$0xff] }
 0xdfd   : > { %v20332_v34 = vsub.f32 %v19913_v4, %v9304_v9  ;;  %13707 = vmatpush3.bf16.msra.mxu1 %v13706_v14  ;;  %v22068_v14 = vld [vmem:[#allocation78_spill] sm:$0xff]  ;;  %v22074_v9 = vld [vmem:[#allocation84_spill] sm:$0xff]  ;;  %v22075_v41 = vld [vmem:[#allocation367_spill] sm:$0xff] }
 0xdfe   : > { %v20335_v56 = vsub.f32 %v19916_v59, %v9303_v61  ;;  %v13708_v58 = vpack.c.bf16 %v9366_v36, %v9365_v31  ;;  %v22073_v36 = vld [vmem:[#allocation104_spill] sm:$0xff]  ;;  %v22077_v61 = vld [vmem:[#allocation370_spill] sm:$0xff] }
 0xdff   : > { %22056 = vst [vmem:[#allocation119_spill] sm:$0xff] %v20332_v34  ;;  %v9368_v15 = vmul.f32 %v20332_v34, %v20332_v34  ;;  %v22076_v31 = vld [vmem:[#allocation88_spill] sm:$0xff] }
 0xe00   : > { %22057 = vst [vmem:[#allocation121_spill] sm:$0xff] %v20335_v56  ;;  %v9367_v60 = vmul.f32 %v20335_v56, %v20335_v56  ;;  %13709 = vmatprep.subr.bf16.mxu1 %v13708_v58  ;;  %v22078_v58 = vld [vmem:[#allocation103_spill] sm:$0xff] }
 0xe01   : > { %13711 = vmatpush3.bf16.msra.mxu1 %v13710_v43  ;;  %v22079_v43 = vld [vmem:[#allocation105_spill] sm:$0xff] }
 0xe02   : > { %v13712_v4 = vpack.c.bf16 %v9368_v15, %v9367_v60  ;;  %v22082_v15 = vld [vmem:[#allocation372_spill] sm:$0xff]  ;;  %v22083_v60 = vld [vmem:[#allocation94_spill] sm:$0xff] }
 0xe04   : > { %13713 = vmatprep.subr.bf16.mxu1 %v13712_v4  ;;  %v22084_v4 = vld [vmem:[#allocation110_spill] sm:$0xff] }
 0xe05   : > { %13715 = vmatpush3.bf16.msra.mxu1 %v13714_v32  ;;  %v22085_v32 = vld [vmem:[#allocation374_spill] sm:$0xff] }
 0xe08   : > { %9434 = vmatmul.mubr.f32.vlgmr.msra.gmra.mrb[238].mxu1 %v19925_v63  ;;  %v22058_v63 = vld [vmem:[#allocation20_spill] sm:$0xff] }
 0xe09   : > { %9438 = vmatprep.mubr.f32.mxu1 %v19931_v49  ;;  %v22059_v49 = vld [vmem:[#allocation184_spill] sm:$0xff] }
 0xe0c   : > { %9439 = vmatmul.mubr.f32.gmra.mrb[240].mxu1 %v19937_v38  ;;  %v22060_v38 = vld [vmem:[#allocation70_spill] sm:$0xff] }
 0xe0d   : > { %13360 = vmatprep.mubr.msk.f32.mxu1 %vm504_vm0, %v19943_v22  ;;  %v22061_v22 = vld [vmem:[#allocation97_spill] sm:$0xff] }
 0xedb   : > { %v12450_v59 = vpop.f32.mrb[238].mxu1 }
 0xedc   : > { %v12451_v0 = vpop.f32.mrb[239].mxu1 }
 0xedd   : > { %v12452_v6 = vadd.f32 %v12451_v0, %v12450_v59  ;;  %v22086_v59 = vld [vmem:[#allocation107_spill] sm:$0xff]  ;;  %v22087_v0 = vld [vmem:[#allocation21_spill] sm:$0xff] }
 0xedf   : > { %v12453_v37 = vpop.f32.mrb[240].mxu1 }
 0xee0   : > { %v12454_v62 = vpop.f32.mrb[241].mxu1 }
 0xee1   : > { %v12455_v55 = vadd.f32 %v12454_v62, %v12453_v37  ;;  %v20414_v37 = vpop.permute.xlu0 %9832  ;;  %v10279_v62 = vld [vmem:[%s20775_s4] sm:$0xff] }
 0xee3   : > { %v13716_v8 = vpack.c.bf16 %v12455_v55, %v12452_v6  ;;  %v20412_v6 = vpop.permute.xlu1 %9837  ;;  %v10280_v55 = vld [vmem:[%s20775_s4 + $0x8] sm:$0xff] }
 0xee5   : > { %13717 = vmatprep.subr.bf16.mxu1 %v13716_v8 }
 0xee6   : > { %13719 = vmatpush3.bf16.msra.mxu1 %v13716_v8 }
 0xee7   : > { %v20422_v8 = vpop.permute.xlu1 %10062 }
 0xee9   : > { %13361 = vmatmul.mubr.msk.f32.vlgmr.msra.gmra.mrb[242].mxu1 %vm504_vm0, %v19950_v29  ;;  %v22065_v29 = vld [vmem:[#allocation76_spill] sm:$0xff] }
 0xeea   : > { %13363 = vmatprep.mubr.msk.f32.mxu1 %vm504_vm0, %v22058_v63  ;;  %v13720_v63 = vpack.c.bf16 %v10280_v55, %v10279_v62 }
 0xeec   : > { %13721 = vmatprep.subr.bf16.mxu1 %v13720_v63 }
 0xeed   : > { %13364 = vmatmul.mubr.msk.f32.gmra.mrb[244].mxu1 %vm504_vm0, %v22059_v49  ;;  %v20424_v49 = vpop.permute.xlu0 %10057 }
 0xeee   : > { %13366 = vmatprep.mubr.msk.f32.mxu1 %vm504_vm0, %v22060_v38  ;;  %13723 = vmatpush3.bf16.msra.mxu1 %v13720_v63  ;;  %v20426_v38 = vpop.permute.xlu1 %9847 }
 0xef1   : > { %13367 = vmatmul.mubr.msk.f32.gmra.mrb[246].mxu1 %vm504_vm0, %v22061_v22  ;;  %v20428_v22 = vpop.permute.xlu0 %9842 }
 0xef2   : > { %13369 = vmatprep.mubr.msk.f32.mxu1 %vm504_vm0, %v22062_v45  ;;  %v20430_v45 = vpop.permute.xlu1 %10072 }
 0xef5   : > { %13370 = vmatmul.mubr.msk.f32.gmra.mrb[248].mxu1 %vm504_vm0, %v22063_v1  ;;  %v20432_v1 = vpop.permute.xlu0 %10067 }
 0xef6   : > { %13372 = vmatprep.mubr.msk.f32.mxu1 %vm504_vm0, %v22064_v35  ;;  %v20434_v35 = vpop.permute.xlu1 %9857 }
 0xef9   : > { %13373 = vmatmul.mubr.msk.f32.gmra.mrb[250].mxu1 %vm504_vm0, %v22065_v29  ;;  %v20436_v29 = vpop.permute.xlu0 %9852 }
 0xefa   : > { %13375 = vmatprep.mubr.msk.f32.mxu1 %vm504_vm0, %v22066_v3  ;;  %v20438_v3 = vpop.permute.xlu1 %10082 }
 0xefd   : > { %13376 = vmatmul.mubr.msk.f32.gmra.mrb[252].mxu1 %vm504_vm0, %v22067_v11  ;;  %v20440_v11 = vpop.permute.xlu0 %10077 }
 0xefe   : > { %13378 = vmatprep.mubr.msk.f32.mxu1 %vm504_vm0, %v22068_v14  ;;  %v20442_v14 = vpop.permute.xlu1 %9867 }
 0xf01   : > { %13379 = vmatmul.mubr.msk.f32.gmra.mrb[254].mxu1 %vm504_vm0, %v22069_v20  ;;  %v20444_v20 = vpop.permute.xlu0 %9862 }
 0xf02   : > { %13381 = vmatprep.mubr.msk.f32.mxu1 %vm504_vm0, %v22070_v17  ;;  %v20446_v17 = vpop.permute.xlu1 %10092 }
 0xf05   : > { %13382 = vmatmul.mubr.msk.f32.gmra.mrb[0].mxu1 %vm504_vm0, %v22071_v12  ;;  %v20448_v12 = vpop.permute.xlu0 %10087 }
 0xf06   : > { %13384 = vmatprep.mubr.msk.f32.mxu1 %vm504_vm0, %v22072_v5  ;;  %v20450_v5 = vpop.permute.xlu1 %9877 }
 0xf09   : > { %13385 = vmatmul.mubr.msk.f32.gmra.mrb[2].mxu1 %vm504_vm0, %v22073_v36  ;;  %v20452_v36 = vpop.permute.xlu0 %9872 }
 0xf0a   : > { %13387 = vmatprep.mubr.msk.f32.mxu1 %vm504_vm0, %v22074_v9  ;;  %v20454_v9 = vpop.permute.xlu1 %10102 }
 0xf0d   : > { %13388 = vmatmul.mubr.msk.f32.gmra.mrb[4].mxu1 %vm504_vm0, %v22075_v41  ;;  %v20456_v41 = vpop.permute.xlu0 %10097 }
 0xf0e   : > { %13390 = vmatprep.mubr.msk.f32.mxu1 %vm504_vm0, %v22076_v31  ;;  %v20458_v31 = vpop.permute.xlu1 %9887 }
 0xf11   : > { %13391 = vmatmul.mubr.msk.f32.gmra.mrb[6].mxu1 %vm504_vm0, %v22077_v61  ;;  %v20460_v61 = vpop.permute.xlu0 %9882 }
 0xf12   : > { %13393 = vmatprep.mubr.msk.f32.mxu1 %vm504_vm0, %v22078_v58  ;;  %v20462_v58 = vpop.permute.xlu1 %10112 }
 0xf15   : > { %13394 = vmatmul.mubr.msk.f32.gmra.mrb[8].mxu1 %vm504_vm0, %v22079_v43  ;;  %v20464_v43 = vpop.permute.xlu0 %10107 }
 0xf16   : > { %13396 = vmatprep.mubr.msk.f32.mxu1 %vm504_vm0, %v22080_v52  ;;  %v20466_v52 = vpop.permute.xlu1 %9897 }
 0xf19   : > { %13397 = vmatmul.mubr.msk.f32.gmra.mrb[10].mxu1 %vm504_vm0, %v22081_v27  ;;  %v20468_v27 = vpop.permute.xlu0 %9892 }
 0xf1a   : > { %13399 = vmatprep.mubr.msk.f32.mxu1 %vm504_vm0, %v22082_v15  ;;  %v20470_v15 = vpop.permute.xlu1 %10122 }
 0xf1d   : > { %13400 = vmatmul.mubr.msk.f32.gmra.mrb[12].mxu1 %vm504_vm0, %v22083_v60  ;;  %v20472_v60 = vpop.permute.xlu0 %10117 }
 0xf1e   : > { %13402 = vmatprep.mubr.msk.f32.mxu1 %vm504_vm0, %v22084_v4  ;;  %v20474_v4 = vpop.permute.xlu1 %9907 }
 0xf21   : > { %13403 = vmatmul.mubr.msk.f32.gmra.mrb[14].mxu1 %vm504_vm0, %v22085_v32  ;;  %v20476_v32 = vpop.permute.xlu0 %9902 }
 0xf22   : > { %13405 = vmatprep.mubr.msk.f32.mxu1 %vm504_vm0, %v22086_v59  ;;  %v20478_v59 = vpop.permute.xlu1 %10132 }
 0xf23   : > { %22088 = vst [vmem:[#allocation123_spill] sm:$0xff] %v20478_v59 }
 0xf25   : > { %13406 = vmatmul.mubr.msk.f32.gmra.mrb[16].mxu1 %vm504_vm0, %v22087_v0  ;;  %v20480_v0 = vpop.permute.xlu0 %10127 }
 0xf26   : > { %22089 = vst [vmem:[#allocation187_spill] sm:$0xff] %v20480_v0  ;;  %v20482_v62 = vpop.permute.xlu1 %9917 }
 0xf27   : > { %22090 = vst [vmem:[#allocation128_spill] sm:$0xff] %v20482_v62 }
 0xf29   : > { %v20484_v55 = vpop.permute.xlu0 %9912 }
 0xf2a   : > { %22091 = vst [vmem:[#allocation108_spill] sm:$0xff] %v20484_v55  ;;  %v20486_v63 = vpop.permute.xlu1 %10142 }
 0xf2b   : > { %22092 = vst [vmem:[#allocation31_spill] sm:$0xff] %v20486_v63 }
 0xf2d   : > { %v20488_v56 = vpop.permute.xlu0 %10137 }
 0xf2e   : > { %22093 = vst [vmem:[#allocation112_spill] sm:$0xff] %v20488_v56  ;;  %v20490_v23 = vpop.permute.xlu1 %9927 }
 0xf2f   : > { %22094 = vst [vmem:[#allocation188_spill] sm:$0xff] %v20490_v23 }
 0xf31   : > { %v20492_v47 = vpop.permute.xlu0 %9922 }
 0xf32   : > { %22095 = vst [vmem:[#allocation125_spill] sm:$0xff] %v20492_v47  ;;  %v20494_v18 = vpop.permute.xlu1 %10152 }
 0xf33   : > { %22096 = vst [vmem:[#allocation127_spill] sm:$0xff] %v20494_v18 }
 0xf35   : > { %v20496_v56 = vpop.permute.xlu0 %10147 }
 0xf36   : > { %22097 = vst [vmem:[#allocation129_spill] sm:$0xff] %v20496_v56 }
 0xfbc   : > { %v13362_v34 = vpop.f32.mrb[242].mxu1 }
 0xfbd   : > { %v9670_v30 = vmul.f32 0.0625, %v13362_v34  ;;  %v9510_v2 = vpop.f32.mrb[243].mxu1 }
 0xfbe   : > { %v9669_v50 = vmul.f32 0.0625, %v9510_v2 }
 0xfbf   : > { %v9702_v54 = vadd.f32 1e-05, %v9670_v30 }
 0xfc0   : > { %v9701_v16 = vadd.f32 1e-05, %v9669_v50  ;;  %v13365_v51 = vpop.f32.mrb[244].mxu1 }
 0xfc1   : > { %14186 = vrsqrt.f32 %v9702_v54  ;;  %v9672_v28 = vmul.f32 0.0625, %v13365_v51  ;;  %v9520_v25 = vpop.f32.mrb[245].mxu1  ;;  %v20498_v54 = vpop.permute.xlu1 %9937 }
 0xfc2   : > { %14188 = vrsqrt.f32 %v9701_v16  ;;  %v9671_v24 = vmul.f32 0.0625, %v9520_v25  ;;  %22098 = vst [vmem:[#allocation114_spill] sm:$0xff] %v20498_v54  ;;  %v20500_v16 = vpop.permute.xlu0 %9932 }
 0xfc3   : > { %v9704_v63 = vadd.f32 1e-05, %v9672_v28  ;;  %22099 = vst [vmem:[#allocation118_spill] sm:$0xff] %v20500_v16 }
 0xfc4   : > { %v9703_v55 = vadd.f32 1e-05, %v9671_v24  ;;  %v13368_v23 = vpop.f32.mrb[246].mxu1 }
 0xfc5   : > { %14190 = vrsqrt.f32 %v9704_v63  ;;  %v9674_v34 = vmul.f32 0.0625, %v13368_v23  ;;  %v9530_v62 = vpop.f32.mrb[247].mxu1  ;;  %v20505_v16 = vpop.permute.xlu1 %10162 }
 0xfc6   : > { %14192 = vrsqrt.f32 %v9703_v55  ;;  %v9673_v2 = vmul.f32 0.0625, %v9530_v62  ;;  %v20508_v59 = vpop.permute.xlu0 %10157 }
 0xfc7   : > { %v9706_v30 = vadd.f32 1e-05, %v9674_v34 }
 0xfc8   : > { %v9705_v50 = vadd.f32 1e-05, %v9673_v2  ;;  %v13371_v47 = vpop.f32.mrb[248].mxu1  ;;  %v22100_v2 = vld [vmem:[#allocation116_spill] sm:$0xff] }
 0xfc9   : > { %14194 = vrsqrt.f32 %v9706_v30  ;;  %v9676_v51 = vmul.f32 0.0625, %v13371_v47  ;;  %v9540_v25 = vpop.f32.mrb[249].mxu1 }
 0xfca   : > { %14196 = vrsqrt.f32 %v9705_v50  ;;  %v9675_v28 = vmul.f32 0.0625, %v9540_v25 }
 0xfcb   : > { %v14187_v56 = vpop.eup %14186  ;;  %v9708_v24 = vadd.f32 1e-05, %v9676_v51 }
 0xfcc   : > { %v14189_v18 = vpop.eup %14188  ;;  %v9766_v23 = vmul.f32 %v14187_v56, %v20180_v7  ;;  %v9707_v63 = vadd.f32 1e-05, %v9675_v28  ;;  %v13374_v55 = vpop.f32.mrb[250].mxu1 }
 0xfcd   : > { %14198 = vrsqrt.f32 %v9708_v24  ;;  %v9678_v62 = vmul.f32 0.0625, %v13374_v55  ;;  %v9550_v34 = vpop.f32.mrb[251].mxu1  ;;  %v9765_v0 = vmul.f32 %v14189_v18, %v22100_v2 }
 0xfce   : > { %v9991_v30 = vmul.f32 %v20412_v6, %v9766_v23  ;;  %14200 = vrsqrt.f32 %v9707_v63  ;;  %v9677_v47 = vmul.f32 0.0625, %v9550_v34 }
 0xfcf   : > { %v14191_v54 = vpop.eup %14190  ;;  %v9710_v50 = vadd.f32 1e-05, %v9678_v62  ;;  %v9990_v51 = vmul.f32 %v20414_v37, %v9765_v0 }
 0xfd0   : > { %v14193_v25 = vpop.eup %14192  ;;  %v10216_v7 = vadd.f32 %v20422_v8, %v9991_v30  ;;  %v9709_v56 = vadd.f32 1e-05, %v9677_v47  ;;  %v13377_v28 = vpop.f32.mrb[252].mxu1  ;;  %v9768_v24 = vmul.f32 %v14191_v54, %v20190_v57 }
 0xfd1   : > { %14202 = vrsqrt.f32 %v9710_v50  ;;  %v9680_v18 = vmul.f32 0.0625, %v13377_v28  ;;  %v9560_v6 = vpop.f32.mrb[253].mxu1  ;;  %v10215_v23 = vadd.f32 %v20424_v49, %v9990_v51  ;;  %v9767_v63 = vmul.f32 %v14193_v25, %v20193_v10  ;;  %v20518_v49 = vpop.permute.xlu1 %9947 }
 0xfd2   : > { %14204 = vrsqrt.f32 %v9709_v56  ;;  %v9679_v55 = vmul.f32 0.0625, %v9560_v6  ;;  %v9993_v37 = vmul.f32 %v20426_v38, %v9768_v24  ;;  %v10248_v30 = vmax.f32 %v10216_v7, 0.0 }
 0xfd3   : > { %v14195_v0 = vpop.eup %14194  ;;  %v9712_v62 = vadd.f32 1e-05, %v9680_v18  ;;  %v10247_v34 = vmax.f32 %v10215_v23, 0.0  ;;  %v9992_v8 = vmul.f32 %v20428_v22, %v9767_v63  ;;  %v20523_v22 = vpop.permute.xlu0 %9942 }
 0xfd4   : > { %v14197_v2 = vpop.eup %14196  ;;  %v9711_v47 = vadd.f32 1e-05, %v9679_v55  ;;  %v13380_v57 = vpop.f32.mrb[254].mxu1  ;;  %v10218_v54 = vadd.f32 %v20430_v45, %v9993_v37  ;;  %v9770_v50 = vmul.f32 %v14195_v0, %v20213_v33 }
 0xfd5   : > { %14206 = vrsqrt.f32 %v9712_v62  ;;  %v9682_v10 = vmul.f32 0.0625, %v13380_v57  ;;  %v9570_v51 = vpop.f32.mrb[255].mxu1  ;;  %13412 = vmatprep.mubr.msk.f32.mxu1 %vm504_vm0, %v10247_v34  ;;  %v10217_v38 = vadd.f32 %v20432_v1, %v9992_v8  ;;  %v9769_v25 = vmul.f32 %v14197_v2, %v20216_v46  ;;  %v20535_v8 = vpop.permute.xlu1 %10172 }
 0xfd6   : > { %14208 = vrsqrt.f32 %v9711_v47  ;;  %v9681_v7 = vmul.f32 0.0625, %v9570_v51  ;;  %13413 = vmatmul.mubr.msk.f32.vlgmr.msra.gmra.mrb[70].mxu1 %vm504_vm0, %v10248_v30  ;;  %v9995_v45 = vmul.f32 %v20434_v35, %v9770_v50  ;;  %v10250_v63 = vmax.f32 %v10218_v54, 0.0 }
 0xfd7   : > { %v14199_v33 = vpop.eup %14198  ;;  %v9714_v56 = vadd.f32 1e-05, %v9682_v10  ;;  %v10249_v28 = vmax.f32 %v10217_v38, 0.0  ;;  %v9994_v24 = vmul.f32 %v20436_v29, %v9769_v25  ;;  %v20538_v47 = vpop.permute.xlu0 %10167 }
 0xfd8   : > { %v14201_v18 = vpop.eup %14200  ;;  %v9713_v6 = vadd.f32 1e-05, %v9681_v7  ;;  %v13383_v23 = vpop.f32.mrb[0].mxu1  ;;  %v10220_v1 = vadd.f32 %v20438_v3, %v9995_v45  ;;  %v9772_v46 = vmul.f32 %v14199_v33, %v20236_v39 }
 0xfd9   : > { %14210 = vrsqrt.f32 %v9714_v56  ;;  %v9684_v55 = vmul.f32 0.0625, %v13383_v23  ;;  %v9580_v37 = vpop.f32.mrb[1].mxu1  ;;  %13415 = vmatprep.mubr.msk.f32.mxu1 %vm504_vm0, %v10249_v28  ;;  %v10219_v35 = vadd.f32 %v20440_v11, %v9994_v24  ;;  %v9771_v0 = vmul.f32 %v14201_v18, %v20239_v48 }
 0xfda   : > { %14212 = vrsqrt.f32 %v9713_v6  ;;  %v9683_v62 = vmul.f32 0.0625, %v9580_v37  ;;  %13416 = vmatmul.mubr.msk.f32.gmra.mrb[72].mxu1 %vm504_vm0, %v10250_v63  ;;  %v9997_v29 = vmul.f32 %v20442_v14, %v9772_v46  ;;  %v10252_v54 = vmax.f32 %v10220_v1, 0.0 }
 0xfdb   : > { %v14203_v34 = vpop.eup %14202  ;;  %v9716_v3 = vadd.f32 1e-05, %v9684_v55  ;;  %v10251_v39 = vmax.f32 %v10219_v35, 0.0  ;;  %v9996_v2 = vmul.f32 %v20444_v20, %v9771_v0 }
 0xfdc   : > { %v14205_v30 = vpop.eup %14204  ;;  %v9715_v57 = vadd.f32 1e-05, %v9683_v62  ;;  %v13386_v11 = vpop.f32.mrb[2].mxu1  ;;  %v10222_v48 = vadd.f32 %v20446_v17, %v9997_v29  ;;  %v9774_v50 = vmul.f32 %v14203_v34, %v20244_v53 }
 0xfdd   : > { %14214 = vrsqrt.f32 %v9716_v3  ;;  %v9686_v10 = vmul.f32 0.0625, %v13386_v11  ;;  %v9590_v14 = vpop.f32.mrb[3].mxu1  ;;  %13418 = vmatprep.mubr.msk.f32.mxu1 %vm504_vm0, %v10251_v39  ;;  %v10221_v51 = vadd.f32 %v20448_v12, %v9996_v2  ;;  %v9773_v38 = vmul.f32 %v14205_v30, %v20249_v44  ;;  %v20550_v44 = vpop.permute.xlu1 %9957 }
 0xfde   : > { %14216 = vrsqrt.f32 %v9715_v57  ;;  %v9685_v20 = vmul.f32 0.0625, %v9590_v14  ;;  %13419 = vmatmul.mubr.msk.f32.gmra.mrb[74].mxu1 %vm504_vm0, %v10252_v54  ;;  %v9999_v25 = vmul.f32 %v20450_v5, %v9774_v50  ;;  %v10254_v24 = vmax.f32 %v10222_v48, 0.0 }
 0xfdf   : > { %v14207_v7 = vpop.eup %14206  ;;  %v9718_v45 = vadd.f32 1e-05, %v9686_v10  ;;  %v10253_v17 = vmax.f32 %v10221_v51, 0.0  ;;  %v9998_v53 = vmul.f32 %v20452_v36, %v9773_v38  ;;  %v20555_v36 = vpop.permute.xlu0 %9952 }
 0xfe0   : > { %v14209_v33 = vpop.eup %14208  ;;  %v9717_v56 = vadd.f32 1e-05, %v9685_v20  ;;  %v13389_v28 = vpop.f32.mrb[4].mxu1  ;;  %v10224_v18 = vadd.f32 %v20454_v9, %v9999_v25  ;;  %v9776_v12 = vmul.f32 %v14207_v7, %v20272_v40 }
 0xfe1   : > { %14218 = vrsqrt.f32 %v9718_v45  ;;  %v9688_v6 = vmul.f32 0.0625, %v13389_v28  ;;  %v9600_v23 = vpop.f32.mrb[5].mxu1  ;;  %13421 = vmatprep.mubr.msk.f32.mxu1 %vm504_vm0, %v10253_v17  ;;  %v10223_v5 = vadd.f32 %v20456_v41, %v9998_v53  ;;  %v9775_v63 = vmul.f32 %v14209_v33, %v20275_v26  ;;  %v20567_v57 = vpop.permute.xlu1 %10182  ;;  %v22101_v28 = vld [vmem:[#allocation123_spill] sm:$0xff] }
 0xfe2   : > { %14220 = vrsqrt.f32 %v9717_v56  ;;  %v9687_v1 = vmul.f32 0.0625, %v9600_v23  ;;  %13422 = vmatmul.mubr.msk.f32.gmra.mrb[76].mxu1 %vm504_vm0, %v10254_v24  ;;  %v10001_v9 = vmul.f32 %v20458_v31, %v9776_v12  ;;  %v10256_v29 = vmax.f32 %v10224_v18, 0.0 }
 0xfe3   : > { %v14211_v40 = vpop.eup %14210  ;;  %v9720_v46 = vadd.f32 1e-05, %v9688_v6  ;;  %v10255_v55 = vmax.f32 %v10223_v5, 0.0  ;;  %v10000_v37 = vmul.f32 %v20460_v61, %v9775_v63  ;;  %v20570_v48 = vpop.permute.xlu0 %10177  ;;  %v22104_v5 = vld [vmem:[#allocation23_spill] sm:$0xff] }
 0xfe4   : > { %v14213_v35 = vpop.eup %14212  ;;  %v9719_v0 = vadd.f32 1e-05, %v9687_v1  ;;  %v13392_v62 = vpop.f32.mrb[6].mxu1  ;;  %v10226_v41 = vadd.f32 %v20462_v58, %v10001_v9  ;;  %v9778_v26 = vmul.f32 %v14211_v40, %v20297_v19  ;;  %v22105_v9 = vld [vmem:[#allocation128_spill] sm:$0xff] }
 0xfe5   : > { %14222 = vrsqrt.f32 %v9720_v46  ;;  %v9690_v34 = vmul.f32 0.0625, %v13392_v62  ;;  %v9610_v3 = vpop.f32.mrb[7].mxu1  ;;  %13424 = vmatprep.mubr.msk.f32.mxu1 %vm504_vm0, %v10255_v55  ;;  %v10225_v31 = vadd.f32 %v20464_v43, %v10000_v37  ;;  %v9777_v39 = vmul.f32 %v14213_v35, %v20300_v13  ;;  %v22106_v35 = vld [vmem:[#allocation108_spill] sm:$0xff] }
 0xfe6   : > { %14224 = vrsqrt.f32 %v9719_v0  ;;  %v9689_v2 = vmul.f32 0.0625, %v9610_v3  ;;  %13425 = vmatmul.mubr.msk.f32.gmra.mrb[78].mxu1 %vm504_vm0, %v10256_v29  ;;  %v10003_v61 = vmul.f32 %v20466_v52, %v9778_v26  ;;  %v10258_v10 = vmax.f32 %v10226_v41, 0.0 }
 0xfe7   : > { %v14215_v30 = vpop.eup %14214  ;;  %v9722_v58 = vadd.f32 1e-05, %v9690_v34  ;;  %v10257_v19 = vmax.f32 %v10225_v31, 0.0  ;;  %v10002_v11 = vmul.f32 %v20468_v27, %v9777_v39  ;;  %v22107_v34 = vld [vmem:[#allocation31_spill] sm:$0xff]  ;;  %v22108_v31 = vld [vmem:[#allocation96_spill] sm:$0xff] }
 0xfe8   : > { %v14217_v54 = vpop.eup %14216  ;;  %v9721_v50 = vadd.f32 1e-05, %v9689_v2  ;;  %v13395_v43 = vpop.f32.mrb[8].mxu1  ;;  %v10228_v13 = vadd.f32 %v20470_v15, %v10003_v61  ;;  %v9780_v14 = vmul.f32 %v14215_v30, %v20322_v42  ;;  %v22109_v30 = vld [vmem:[#allocation112_spill] sm:$0xff] }
 0xfe9   : > { %14226 = vrsqrt.f32 %v9722_v58  ;;  %v9692_v51 = vmul.f32 0.0625, %v13395_v43  ;;  %v9620_v52 = vpop.f32.mrb[9].mxu1  ;;  %13427 = vmatprep.mubr.msk.f32.mxu1 %vm504_vm0, %v10257_v19  ;;  %v10227_v38 = vadd.f32 %v20472_v60, %v10002_v11  ;;  %v9779_v20 = vmul.f32 %v14217_v54, %v20325_v21  ;;  %v22102_v60 = vld [vmem:[#allocation113_spill] sm:$0xff]  ;;  %v20582_v21 = vpop.permute.xlu1 %9967 }
 0xfea   : > { %14228 = vrsqrt.f32 %v9721_v50  ;;  %v9691_v27 = vmul.f32 0.0625, %v9620_v52  ;;  %13428 = vmatmul.mubr.msk.f32.gmra.mrb[80].mxu1 %vm504_vm0, %v10258_v10  ;;  %v10005_v25 = vmul.f32 %v20474_v4, %v9780_v14  ;;  %v10260_v56 = vmax.f32 %v10228_v13, 0.0  ;;  %v22103_v4 = vld [vmem:[#allocation187_spill] sm:$0xff]  ;;  %v22110_v19 = vld [vmem:[#allocation25_spill] sm:$0xff]  ;;  %v22111_v50 = vld [vmem:[#allocation188_spill] sm:$0xff] }
 0xfeb   : > { %v14219_v7 = vpop.eup %14218  ;;  %v9724_v45 = vadd.f32 1e-05, %v9692_v51  ;;  %v10259_v15 = vmax.f32 %v10227_v38, 0.0  ;;  %v10004_v42 = vmul.f32 %v20476_v32, %v9779_v20  ;;  %v20587_v32 = vpop.permute.xlu0 %9962  ;;  %v22112_v52 = vld [vmem:[#allocation125_spill] sm:$0xff] }
 0xfec   : > { %v14221_v17 = vpop.eup %14220  ;;  %v9723_v53 = vadd.f32 1e-05, %v9691_v27  ;;  %v13398_v33 = vpop.f32.mrb[10].mxu1  ;;  %v10230_v24 = vadd.f32 %v22101_v28, %v10005_v25  ;;  %v9782_v18 = vmul.f32 %v14219_v7, %v22102_v60  ;;  %v22115_v28 = vld [vmem:[#allocation129_spill] sm:$0xff]  ;;  %v22116_v60 = vld [vmem:[#allocation111_spill] sm:$0xff] }
 0xfed   : > { %14230 = vrsqrt.f32 %v9724_v45  ;;  %v9694_v12 = vmul.f32 0.0625, %v13398_v33  ;;  %v9630_v6 = vpop.f32.mrb[11].mxu1  ;;  %13430 = vmatprep.mubr.msk.f32.mxu1 %vm504_vm0, %v10259_v15  ;;  %v10229_v23 = vadd.f32 %v22103_v4, %v10004_v42  ;;  %v9781_v63 = vmul.f32 %v14221_v17, %v22104_v5  ;;  %v20599_v13 = vpop.permute.xlu1 %10192  ;;  %v22113_v15 = vld [vmem:[#allocation127_spill] sm:$0xff]  ;;  %v22114_v17 = vld [vmem:[#allocation100_spill] sm:$0xff] }
 0xfee   : > { %14232 = vrsqrt.f32 %v9723_v53  ;;  %v9693_v1 = vmul.f32 0.0625, %v9630_v6  ;;  %13431 = vmatmul.mubr.msk.f32.gmra.mrb[82].mxu1 %vm504_vm0, %v10260_v56  ;;  %v10007_v40 = vmul.f32 %v22105_v9, %v9782_v18  ;;  %v10262_v26 = vmax.f32 %v10230_v24, 0.0  ;;  %v22117_v6 = vld [vmem:[#allocation114_spill] sm:$0xff] }
 0xfef   : > { %v14223_v46 = vpop.eup %14222  ;;  %v9726_v55 = vadd.f32 1e-05, %v9694_v12  ;;  %v10261_v37 = vmax.f32 %v10229_v23, 0.0  ;;  %v10006_v0 = vmul.f32 %v22106_v35, %v9781_v63  ;;  %v20602_v27 = vpop.permute.xlu0 %10187 }
 0xff0   : > { %v14225_v62 = vpop.eup %14224  ;;  %v9725_v29 = vadd.f32 1e-05, %v9693_v1  ;;  %v13401_v41 = vpop.f32.mrb[12].mxu1  ;;  %v10232_v3 = vadd.f32 %v22107_v34, %v10007_v40  ;;  %v9784_v39 = vmul.f32 %v14223_v46, %v22108_v31  ;;  %v22118_v1 = vld [vmem:[#allocation118_spill] sm:$0xff] }
 0xff1   : > { %14234 = vrsqrt.f32 %v9726_v55  ;;  %v9696_v2 = vmul.f32 0.0625, %v13401_v41  ;;  %v9640_v61 = vpop.f32.mrb[13].mxu1  ;;  %13433 = vmatprep.mubr.msk.f32.mxu1 %vm504_vm0, %v10261_v37  ;;  %v10231_v58 = vadd.f32 %v22109_v30, %v10006_v0  ;;  %v9783_v11 = vmul.f32 %v14225_v62, %v22110_v19  ;;  %v22119_v0 = vld [vmem:[#allocation26_spill] sm:$0xff] }
 0xff2   : > { %14236 = vrsqrt.f32 %v9725_v29  ;;  %v9695_v54 = vmul.f32 0.0625, %v9640_v61  ;;  %13434 = vmatmul.mubr.msk.f32.gmra.mrb[84].mxu1 %vm504_vm0, %v10262_v26  ;;  %v10009_v43 = vmul.f32 %v22111_v50, %v9784_v39  ;;  %v10264_v45 = vmax.f32 %v10232_v3, 0.0  ;;  %v9978_v29 = vpop.permute.xlu1 %9977  ;;  %v22120_v3 = vld [vmem:[#allocation115_spill] sm:$0xff] }
 0xff3   : > { %v14227_v10 = vpop.eup %14226  ;;  %v9728_v14 = vadd.f32 1e-05, %v9696_v2  ;;  %v10263_v51 = vmax.f32 %v10231_v58, 0.0  ;;  %v10008_v38 = vmul.f32 %v22112_v52, %v9783_v11  ;;  %v9973_v39 = vpop.permute.xlu0 %9972 }
 0xff4   : > { %v14229_v20 = vpop.eup %14228  ;;  %v9727_v25 = vadd.f32 1e-05, %v9695_v54  ;;  %v13404_v7 = vpop.f32.mrb[14].mxu1  ;;  %v10234_v42 = vadd.f32 %v22113_v15, %v10009_v43  ;;  %v9786_v53 = vmul.f32 %v14227_v10, %v22114_v17 }
 0xff5   : > { %14238 = vrsqrt.f32 %v9728_v14  ;;  %v9698_v33 = vmul.f32 0.0625, %v13404_v7  ;;  %v9650_v56 = vpop.f32.mrb[15].mxu1  ;;  %13436 = vmatprep.mubr.msk.f32.mxu1 %vm504_vm0, %v10263_v51  ;;  %v10233_v24 = vadd.f32 %v22115_v28, %v10008_v38  ;;  %v9785_v18 = vmul.f32 %v14229_v20, %v22116_v60  ;;  %v22122_v51 = vld [vmem:[#allocation22_spill] sm:$0xff] }
 0xff6   : > { %14240 = vrsqrt.f32 %v9727_v25  ;;  %v9697_v12 = vmul.f32 0.0625, %v9650_v56  ;;  %13437 = vmatmul.mubr.msk.f32.gmra.mrb[86].mxu1 %vm504_vm0, %v10264_v45  ;;  %v10011_v4 = vmul.f32 %v22117_v6, %v9786_v53  ;;  %v10266_v37 = vmax.f32 %v10234_v42, 0.0  ;;  %v10203_v38 = vpop.permute.xlu1 %10202  ;;  %v22123_v42 = vld [vmem:[#allocation122_spill] sm:$0xff]  ;;  %v22124_v53 = vld [vmem:[#allocation24_spill] sm:$0xff] }
 0xff7   : > { %v14231_v23 = vpop.eup %14230  ;;  %v9730_v5 = vadd.f32 1e-05, %v9698_v33  ;;  %v10265_v63 = vmax.f32 %v10233_v24, 0.0  ;;  %v10010_v9 = vmul.f32 %v22118_v1, %v9785_v18  ;;  %v10198_v7 = vpop.permute.xlu0 %10197  ;;  %v22125_v18 = vld [vmem:[#allocation102_spill] sm:$0xff] }
 0xff8   : > { %v14233_v40 = vpop.eup %14232  ;;  %v9729_v46 = vadd.f32 1e-05, %v9697_v12  ;;  %v13407_v55 = vpop.f32.mrb[16].mxu1  ;;  %v10236_v35 = vadd.f32 %v20505_v16, %v10011_v4  ;;  %v9788_v62 = vmul.f32 %v14231_v23, %v22119_v0  ;;  %v22126_v4 = vld [vmem:[#allocation106_spill] sm:$0xff] }
 0xff9   : > { %14242 = vrsqrt.f32 %v9730_v5  ;;  %v9700_v41 = vmul.f32 0.0625, %v13407_v55  ;;  %v9660_v26 = vpop.f32.mrb[17].mxu1  ;;  %13439 = vmatprep.mubr.msk.f32.mxu1 %vm504_vm0, %v10265_v63  ;;  %v10235_v34 = vadd.f32 %v20508_v59, %v10010_v9  ;;  %v9787_v31 = vmul.f32 %v14233_v40, %v22120_v3  ;;  %v22121_v59 = vld [vmem:[#allocation117_spill] sm:$0xff] }
 0xffa   : > { %14244 = vrsqrt.f32 %v9729_v46  ;;  %v9699_v2 = vmul.f32 0.0625, %v9660_v26  ;;  %13440 = vmatmul.mubr.msk.f32.gmra.mrb[88].mxu1 %vm504_vm0, %v10266_v37  ;;  %v10013_v61 = vmul.f32 %v20518_v49, %v9788_v62  ;;  %v10268_v50 = vmax.f32 %v10236_v35, 0.0  ;;  %v9988_v6 = vpop.permute.xlu1 %9987  ;;  %v22128_v35 = vld [vmem:[#allocation121_spill] sm:$0xff] }
 0xffb   : > { %v14235_v16 = vpop.eup %14234  ;;  %v9732_v30 = vadd.f32 1e-05, %v9700_v41  ;;  %v10267_v58 = vmax.f32 %v10235_v34, 0.0  ;;  %v10012_v19 = vmul.f32 %v20523_v22, %v9787_v31  ;;  %v9983_v5 = vpop.permute.xlu0 %9982 }
 0xffc   : > { %v14237_v11 = vpop.eup %14236  ;;  %v9731_v54 = vadd.f32 1e-05, %v9699_v2  ;;  %v10238_v43 = vadd.f32 %v20535_v8, %v10013_v61  ;;  %v9790_v10 = vmul.f32 %v14235_v16, %v22121_v59 }
 0xffd   : > { %14246 = vrsqrt.f32 %v9732_v30  ;;  %13442 = vmatprep.mubr.msk.f32.mxu1 %vm504_vm0, %v10267_v58  ;;  %v10237_v14 = vadd.f32 %v20538_v47, %v10012_v19  ;;  %v9789_v52 = vmul.f32 %v14237_v11, %v22122_v51 }
 0xffe   : > { %14248 = vrsqrt.f32 %v9731_v54  ;;  %13443 = vmatmul.mubr.msk.f32.gmra.mrb[90].mxu1 %vm504_vm0, %v10268_v50  ;;  %v10015_v49 = vmul.f32 %v20550_v44, %v9790_v10  ;;  %v10270_v45 = vmax.f32 %v10238_v43, 0.0  ;;  %v10213_v62 = vpop.permute.xlu1 %10212 }
 0xfff   : > { %v14239_v22 = vpop.eup %14238  ;;  %v10269_v20 = vmax.f32 %v10237_v14, 0.0  ;;  %v10014_v25 = vmul.f32 %v20555_v36, %v9789_v52  ;;  %v10208_v26 = vpop.permute.xlu0 %10207 }
0x1000   : > { %v14241_v8 = vpop.eup %14240  ;;  %v10240_v15 = vadd.f32 %v20567_v57, %v10015_v49  ;;  %v9792_v17 = vmul.f32 %v14239_v22, %v22123_v42 }
0x1001   : > { %13445 = vmatprep.mubr.msk.f32.mxu1 %vm504_vm0, %v10269_v20  ;;  %v10239_v47 = vadd.f32 %v20570_v48, %v10014_v25  ;;  %v9791_v33 = vmul.f32 %v14241_v8, %v22124_v53 }
0x1002   : > { %13446 = vmatmul.mubr.msk.f32.gmra.mrb[92].mxu1 %vm504_vm0, %v10270_v45  ;;  %v10017_v44 = vmul.f32 %v20582_v21, %v9792_v17  ;;  %v10272_v60 = vmax.f32 %v10240_v15, 0.0 }
0x1003   : > { %v14243_v56 = vpop.eup %14242  ;;  %v10271_v28 = vmax.f32 %v10239_v47, 0.0  ;;  %v10016_v36 = vmul.f32 %v20587_v32, %v9791_v33 }
0x1004   : > { %v14245_v24 = vpop.eup %14244  ;;  %v10242_v57 = vadd.f32 %v20599_v13, %v10017_v44  ;;  %v9794_v12 = vmul.f32 %v14243_v56, %v22125_v18  ;;  %v22127_v13 = vld [vmem:[#allocation119_spill] sm:$0xff] }
0x1005   : > { %13448 = vmatprep.mubr.msk.f32.mxu1 %vm504_vm0, %v10271_v28  ;;  %v10241_v48 = vadd.f32 %v20602_v27, %v10016_v36  ;;  %v9793_v23 = vmul.f32 %v14245_v24, %v22126_v4 }
0x1006   : > { %13449 = vmatmul.mubr.msk.f32.gmra.mrb[94].mxu1 %vm504_vm0, %v10272_v60  ;;  %v10019_v21 = vmul.f32 %v9978_v29, %v9794_v12  ;;  %v10274_v40 = vmax.f32 %v10242_v57, 0.0 }
0x1007   : > { %v14247_v63 = vpop.eup %14246  ;;  %v10273_v1 = vmax.f32 %v10241_v48, 0.0  ;;  %v10018_v32 = vmul.f32 %v9973_v39, %v9793_v23 }
0x1008   : > { %v14249_v9 = vpop.eup %14248  ;;  %v10244_v46 = vadd.f32 %v10203_v38, %v10019_v21  ;;  %v9796_v55 = vmul.f32 %v14247_v63, %v22127_v13 }
0x1009   : > { %13451 = vmatprep.mubr.msk.f32.mxu1 %vm504_vm0, %v10273_v1  ;;  %v10243_v37 = vadd.f32 %v10198_v7, %v10018_v32  ;;  %v9795_v0 = vmul.f32 %v14249_v9, %v22128_v35 }
0x100a   : > { %13452 = vmatmul.mubr.msk.f32.gmra.mrb[96].mxu1 %vm504_vm0, %v10274_v40  ;;  %v10021_v27 = vmul.f32 %v9988_v6, %v9796_v55  ;;  %v10276_v34 = vmax.f32 %v10244_v46, 0.0 }
0x100b   : > { %v10275_v29 = vmax.f32 %v10243_v37, 0.0  ;;  %v10020_v41 = vmul.f32 %v9983_v5, %v9795_v0 }
0x100c   : > { %v10246_v3 = vadd.f32 %v10213_v62, %v10021_v27 }
0x100d   : > { %13454 = vmatprep.mubr.msk.f32.mxu1 %vm504_vm0, %v10275_v29  ;;  %v10245_v31 = vadd.f32 %v10208_v26, %v10020_v41 }
0x100e   : > { %13455 = vmatmul.mubr.msk.f32.gmra.mrb[98].mxu1 %vm504_vm0, %v10276_v34  ;;  %v10278_v2 = vmax.f32 %v10246_v3, 0.0 }
0x100f   : > { %v10277_v39 = vmax.f32 %v10245_v31, 0.0 }
0x1011   : > { %13457 = vmatprep.mubr.msk.f32.mxu1 %vm504_vm0, %v10277_v39 }
0x1012   : > { %13458 = vmatmul.mubr.msk.f32.gmra.mrb[100].mxu1 %vm504_vm0, %v10278_v2 }
0x10a9   : > { %v13414_v61 = vpop.f32.mrb[70].mxu1 }
0x10aa   : > { %10604 = vst.msk [vmem:[%s20653_s28 + $0x8] sm:$0xff] %vm10602_vm3, %v13414_v61  ;;  %v10443_v16 = vpop.f32.mrb[71].mxu1 }
0x10ab   : > { %10603 = vst.msk [vmem:[%s20653_s28] sm:$0xff] %vm10602_vm3, %v10443_v16 }
0x10ad   : > { %v13417_v30 = vpop.f32.mrb[72].mxu1 }
0x10ae   : > { %10606 = vst.msk [vmem:[%s20653_s28 + $0x18] sm:$0xff] %vm10602_vm3, %v13417_v30  ;;  %v10453_v58 = vpop.f32.mrb[73].mxu1 }
0x10af   : > { %10605 = vst.msk [vmem:[%s20653_s28 + $0x10] sm:$0xff] %vm10602_vm3, %v10453_v58 }
0x10b1   : > { %v13420_v19 = vpop.f32.mrb[74].mxu1 }
0x10b2   : > { %10608 = vst.msk [vmem:[%s20653_s28 + $0x28] sm:$0xff] %vm10602_vm3, %v13420_v19  ;;  %v10463_v11 = vpop.f32.mrb[75].mxu1 }
0x10b3   : > { %10607 = vst.msk [vmem:[%s20653_s28 + $0x20] sm:$0xff] %vm10602_vm3, %v10463_v11 }
0x10b5   : > { %v13423_v54 = vpop.f32.mrb[76].mxu1 }
0x10b6   : > { %10610 = vst.msk [vmem:[%s20653_s28 + $0x38] sm:$0xff] %vm10602_vm3, %v13423_v54  ;;  %v10473_v50 = vpop.f32.mrb[77].mxu1 }
0x10b7   : > { %10609 = vst.msk [vmem:[%s20653_s28 + $0x30] sm:$0xff] %vm10602_vm3, %v10473_v50 }
0x10b9   : > { %v13426_v43 = vpop.f32.mrb[78].mxu1 }
0x10ba   : > { %10612 = vst.msk [vmem:[%s20653_s28 + $0x48] sm:$0xff] %vm10602_vm3, %v13426_v43  ;;  %v10483_v59 = vpop.f32.mrb[79].mxu1 }
0x10bb   : > { %10611 = vst.msk [vmem:[%s20653_s28 + $0x40] sm:$0xff] %vm10602_vm3, %v10483_v59 }
0x10bd   : > { %v13429_v10 = vpop.f32.mrb[80].mxu1 }
0x10be   : > { %10614 = vst.msk [vmem:[%s20653_s28 + $0x58] sm:$0xff] %vm10602_vm3, %v13429_v10  ;;  %v10493_v14 = vpop.f32.mrb[81].mxu1 }
0x10bf   : > { %10613 = vst.msk [vmem:[%s20653_s28 + $0x50] sm:$0xff] %vm10602_vm3, %v10493_v14 }
0x10c1   : > { %v13432_v51 = vpop.f32.mrb[82].mxu1 }
0x10c2   : > { %10616 = vst.msk [vmem:[%s20653_s28 + $0x68] sm:$0xff] %vm10602_vm3, %v13432_v51  ;;  %v10503_v52 = vpop.f32.mrb[83].mxu1 }
0x10c3   : > { %10615 = vst.msk [vmem:[%s20653_s28 + $0x60] sm:$0xff] %vm10602_vm3, %v10503_v52 }
0x10c5   : > { %v13435_v49 = vpop.f32.mrb[84].mxu1 }
0x10c6   : > { %10618 = vst.msk [vmem:[%s20653_s28 + $0x78] sm:$0xff] %vm10602_vm3, %v13435_v49  ;;  %v10513_v22 = vpop.f32.mrb[85].mxu1 }
0x10c7   : > { %10617 = vst.msk [vmem:[%s20653_s28 + $0x70] sm:$0xff] %vm10602_vm3, %v10513_v22 }
0x10c9   : > { %v13438_v38 = vpop.f32.mrb[86].mxu1 }
0x10ca   : > { %10620 = vst.msk [vmem:[%s20653_s28 + $0x88] sm:$0xff] %vm10602_vm3, %v13438_v38  ;;  %v10523_v20 = vpop.f32.mrb[87].mxu1 }
0x10cb   : > { %10619 = vst.msk [vmem:[%s20653_s28 + $0x80] sm:$0xff] %vm10602_vm3, %v10523_v20 }
0x10cd   : > { %v13441_v25 = vpop.f32.mrb[88].mxu1 }
0x10ce   : > { %10622 = vst.msk [vmem:[%s20653_s28 + $0x98] sm:$0xff] %vm10602_vm3, %v13441_v25  ;;  %v10533_v8 = vpop.f32.mrb[89].mxu1 }
0x10cf   : > { %10621 = vst.msk [vmem:[%s20653_s28 + $0x90] sm:$0xff] %vm10602_vm3, %v10533_v8 }
0x10d1   : > { %v13444_v7 = vpop.f32.mrb[90].mxu1 }
0x10d2   : > { %10624 = vst.msk [vmem:[%s20653_s28 + $0xa8] sm:$0xff] %vm10602_vm3, %v13444_v7  ;;  %v10543_v45 = vpop.f32.mrb[91].mxu1 }
0x10d3   : > { %10623 = vst.msk [vmem:[%s20653_s28 + $0xa0] sm:$0xff] %vm10602_vm3, %v10543_v45 }
0x10d5   : > { %v13447_v15 = vpop.f32.mrb[92].mxu1 }
0x10d6   : > { %10626 = vst.msk [vmem:[%s20653_s28 + $0xb8] sm:$0xff] %vm10602_vm3, %v13447_v15  ;;  %v10553_v42 = vpop.f32.mrb[93].mxu1 }
0x10d7   : > { %10625 = vst.msk [vmem:[%s20653_s28 + $0xb0] sm:$0xff] %vm10602_vm3, %v10553_v42 }
0x10d9   : > { %v13450_v17 = vpop.f32.mrb[94].mxu1 }
0x10da   : > { %10628 = vst.msk [vmem:[%s20653_s28 + $0xc8] sm:$0xff] %vm10602_vm3, %v13450_v17  ;;  %v10563_v47 = vpop.f32.mrb[95].mxu1 }
0x10db   : > { %10627 = vst.msk [vmem:[%s20653_s28 + $0xc0] sm:$0xff] %vm10602_vm3, %v10563_v47 }
0x10dd   : > { %v13453_v53 = vpop.f32.mrb[96].mxu1 }
0x10de   : > { %10630 = vst.msk [vmem:[%s20653_s28 + $0xd8] sm:$0xff] %vm10602_vm3, %v13453_v53  ;;  %v10573_v33 = vpop.f32.mrb[97].mxu1 }
0x10df   : > { %10629 = vst.msk [vmem:[%s20653_s28 + $0xd0] sm:$0xff] %vm10602_vm3, %v10573_v33 }
0x10e1   : > { %v13456_v44 = vpop.f32.mrb[98].mxu1 }
0x10e2   : > { %10632 = vst.msk [vmem:[%s20653_s28 + $0xe8] sm:$0xff] %vm10602_vm3, %v13456_v44  ;;  %v10583_v56 = vpop.f32.mrb[99].mxu1 }
0x10e3   : > { %10631 = vst.msk [vmem:[%s20653_s28 + $0xe0] sm:$0xff] %vm10602_vm3, %v10583_v56 }
0x10e5   : > { %v13459_v28 = vpop.f32.mrb[100].mxu1 }
0x10e6   : > { %10634 = vst.msk [vmem:[%s20653_s28 + $0xf8] sm:$0xff] %vm10602_vm3, %v13459_v28  ;;  %v10593_v36 = vpop.f32.mrb[101].mxu1 }
0x10e7   : > { %10633 = vst.msk [vmem:[%s20653_s28 + $0xf0] sm:$0xff] %vm10602_vm3, %v10593_v36 }
0x10e8   : > { %14404 = shalt.err (!%p14401_p3)
}
0x10e9   : > { %s14405_s26 = scalar_lea.hbm %s20720_s30, 4096  ;;  %s14409_s11 = scalar_lea.hbm %s20781_s10, 8192 }
0x10ea   : > { %p14406_p4 = scmp.ne.s32.totalorder %s20720_s30, %s14405_s26  ;;  %p14410_p9 = scmp.lt.u32.totalorder %s20720_s30, %s20781_s10 }
0x10eb   : > { %p14411_p10 = scmp.lt.u32.totalorder %s14409_s11, %s14405_s26  ;;  %p14413_p12 = scmp.lt.u32.totalorder %s14405_s26, %s20720_s30 }
0x10ec   : > { %p14407_p7 = pnand %p14406_p4, %p14552_p5 }
0x10ed   : > { %p14412_p11 = por %p14411_p10, %p14410_p9 }
0x10ee   : > { %p14408_p8 = pneg %p14407_p7 }
0x10ef   : > { %p14414_p13 = por %p14413_p12, %p14412_p11 }
0x10f1   : > { %p14415_p0 = pnand %p14414_p13, %p14408_p8 }
0x10f3   : > { %14418 = shalt.err (!%p14415_p0)
}
0x10f4   : > { %s14457_s18 = smov 128   ;;  %s14458_s20 = smov 8  }
0x10f5   : > { %14014 = dma.vmem_to_hbm [thread:$0]  (%p14552_p5), %s20722_s12, 4096, %s20720_s30, %s20730_s17, %s14457_s18, %s14457_s18, %s14458_s20  }
0x10f6 PF: > { %p14020_p1 = scmp.ge.s32.totalorder %s14453_s16, 2  ;;  %s10664_s21 = sand.u32 1, %s14441_s13  }
0x10f7   : > { %s10665_s25 = scalar_lea.sflag [#allocation3], %s10664_s21 }
0x10f8   : > { %p14017_p2 = pnand %p14020_p1, %p14556_p6 }
0x10fa   : > { %14436 = dma.done.wait (!%p14017_p2), %s10665_s25, 4096  }
0x10fb   : > { %14438 = vsyncadd (!%p14017_p2), %s10665_s25, 4294963200  ;;  %s22129_s26 = sld [smem:[#allocation5_spill]]  ;;  %p20_p3 = scmp.ge.s32.totalorder %s14539_s19, 4  }
0x10fc   : > { %s22130_s13 = smov %s14445_s14  ;;  %s22131_s14 = smov %s14449_s15 }
0x10fd   : > { %s22133_s16 = smov %s14539_s19  ;;  %22 = sbr.rel (!%p20_p3) target bundleno = 3 (0x3), region = 107 }
0x1101   : > { %s22132_s15 = smov %s22129_s26 }
0x1104   :  { %10670 = vsyncpa [#allocation3], 1 }
0x1105   :  { %10672 = vsyncpa [#allocation3 + $0x1], 1 }

</bundles_post_ra>
